<compile_context>
chip_gen: v5e
topology: v5e:2x2
jax: 0.10.0
libtpu: 0.0.40
codegen_flags: <defaults>
</compile_context>

<pallas_src>
import functools

import jax
import jax.numpy as jnp
from jax import lax
from jax.experimental import pallas as pl
from jax.experimental.pallas import tpu as pltpu


_LANE = 128      # TPU lane width: channel dims on lanes are padded to this
_LEFT = 8        # sublane-aligned left padding inside the haloed scratches


def _round_up(x, m):
    return (x + m - 1) // m * m


# ----------------------------------------------------------------------------
# Fused DoubleConv kernel: (conv3x3 + bias + ReLU) x 2, B images per grid step
# ----------------------------------------------------------------------------
def _double_conv_kernel(x_ref, w1_ref, b1_ref, w2_ref, b2_ref, o_ref,
                        xp1_ref, xp2_ref, col_ref, *,
                        B, H, W, Cin, Cmid_p, Cout_p):
    # x_ref  : (B, H, W, Cin)          bf16  input block
    # w1_ref : (9*Cin, Cmid_p)         bf16  im2col conv1 weights (cols padded)
    # b1_ref : (1, Cmid_p)             f32   (padded entries are 0)
    # w2_ref : (9*Cmid_p, Cout_p)      bf16  im2col conv2 weights (rows+cols padded)
    # b2_ref : (1, Cout_p)             f32
    # o_ref  : (B, H, W, Cout_p)       f32   lane-dense output block
    # xp1_ref: (B*(H+2), LEFT+W+1, Cin)    bf16 haloed input scratch
    # xp2_ref: (B*(H+2), LEFT+W+1, Cmid_p) bf16 haloed intermediate scratch
    # col_ref: (B*H*W, 9*Cmid_p)       bf16  shared im2col slab
    HW = H * W
    Hp = H + 2                       # haloed rows per image
    Wp = _LEFT + W + 1               # 8 aligned left-pad cols + W + 1 right halo

    def zero_halo(xp_ref, b, C):
        base = b * Hp
        zrow = jnp.zeros((1, Wp, C), xp_ref.dtype)
        zcol = jnp.zeros((Hp, 1, C), xp_ref.dtype)
        xp_ref[base:base + 1, :, :] = zrow                          # top row
        xp_ref[base + H + 1:base + H + 2, :, :] = zrow              # bottom row
        xp_ref[base:base + Hp, _LEFT - 1:_LEFT, :] = zcol           # left col
        xp_ref[base:base + Hp, _LEFT + W:_LEFT + W + 1, :] = zcol   # right col

    def build_col(xp_ref, b, C):
        # 9 static-slice stores of one image's taps into the shared col slab.
        base = b * Hp
        for ky in range(3):
            for kx in range(3):
                k = ky * 3 + kx
                tap = xp_ref[base + ky:base + ky + H,
                             _LEFT - 1 + kx:_LEFT - 1 + kx + W, :]
                col_ref[b * HW:(b + 1) * HW, k * C:(k + 1) * C] = (
                    tap.reshape(HW, C))

    # ---- stage input (halo-only zeroing, sublane-aligned interior store) ---
    for b in range(B):
        zero_halo(xp1_ref, b, Cin)
        xp1_ref[b * Hp + 1:b * Hp + 1 + H, _LEFT:_LEFT + W, :] = (
            x_ref[b].astype(xp1_ref.dtype))

    # ---- conv1 + bias + ReLU: one K = 9*Cin MXU matmul ----------------------
    for b in range(B):
        build_col(xp1_ref, b, Cin)
    h = jnp.dot(col_ref[:, :9 * Cin], w1_ref[...],
                preferred_element_type=jnp.float32)
    h = jnp.maximum(h + b1_ref[...], 0.0)               # (B*HW, Cmid_p) f32

    # ---- stage intermediate (padded channels are exact zeros, lane-dense) --
    for b in range(B):
        zero_halo(xp2_ref, b, Cmid_p)
        xp2_ref[b * Hp + 1:b * Hp + 1 + H, _LEFT:_LEFT + W, :] = (
            h[b * HW:(b + 1) * HW].reshape(H, W, Cmid_p).astype(xp2_ref.dtype))

    # ---- conv2 + bias + ReLU: one K = 9*Cmid_p MXU matmul -------------------
    for b in range(B):
        build_col(xp2_ref, b, Cmid_p)
    y = jnp.dot(col_ref[...], w2_ref[...],
                preferred_element_type=jnp.float32)
    y = jnp.maximum(y + b2_ref[...], 0.0)               # (B*HW, Cout_p) f32

    o_ref[...] = y.reshape(B, H, W, Cout_p).astype(o_ref.dtype)


# ----------------------------------------------------------------------------
# Wrapper
# ----------------------------------------------------------------------------
def _pick_batch_tile(n):
    # Stack several images along the matmul M dim per grid step, but keep the
    # grid length >= 2 so the parallel batch axis still feeds both v7x cores.
    for bt in (8, 4, 2):
        if n % bt == 0 and n // bt >= 2:
            return bt
    return 1


def double_conv(x_nchw, w1, b1, w2, b2):
    """DoubleConv forward.

    x_nchw: (N, Cin, H, W) f32
    w1    : (3, 3, Cin, Cmid)  HWIO f32 ; b1: (Cmid,)
    w2    : (3, 3, Cmid, Cout) HWIO f32 ; b2: (Cout,)
    returns (N, Cout, H, W) f32
    """
    N, Cin, H, W = x_nchw.shape
    Cmid = w1.shape[-1]
    Cout = w2.shape[-1]
    Cmid_p = _round_up(Cmid, _LANE)
    Cout_p = _round_up(Cout, _LANE)
    B = _pick_batch_tile(N)

    x = jnp.transpose(x_nchw, (0, 2, 3, 1)).astype(jnp.bfloat16)   # NCHW->NHWC

    # conv1 weights: im2col rows (ky*3+kx)*Cin + cin, columns padded to Cmid_p.
    w1i = jnp.zeros((9 * Cin, Cmid_p), jnp.bfloat16)
    w1i = w1i.at[:, :Cmid].set(w1.reshape(9 * Cin, Cmid).astype(jnp.bfloat16))
    b1p = jnp.zeros((1, Cmid_p), jnp.float32).at[0, :Cmid].set(b1)

    # conv2 weights: rows (ky*3+kx)*Cmid_p + c (zero rows for padded channels),
    # columns padded to Cout_p.
    w2i = jnp.zeros((9, Cmid_p, Cout_p), jnp.bfloat16)
    w2i = w2i.at[:, :Cmid, :Cout].set(
        w2.reshape(9, Cmid, Cout).astype(jnp.bfloat16))
    w2i = w2i.reshape(9 * Cmid_p, Cout_p)
    b2p = jnp.zeros((1, Cout_p), jnp.float32).at[0, :Cout].set(b2)

    kern = functools.partial(_double_conv_kernel, B=B, H=H, W=W,
                             Cin=Cin, Cmid_p=Cmid_p, Cout_p=Cout_p)

    flops = 2 * N * H * W * (9 * Cin * Cmid_p + 9 * Cmid_p * Cout_p)
    bytes_accessed = (x.size * 2 + w1i.size * 2 + w2i.size * 2
                      + b1p.size * 4 + b2p.size * 4 + N * H * W * Cout_p * 4)

    y = pl.pallas_call(
        kern,
        out_shape=jax.ShapeDtypeStruct((N, H, W, Cout_p), jnp.float32),
        grid=(N // B,),
        in_specs=[
            pl.BlockSpec((B, H, W, Cin), lambda n: (n, 0, 0, 0)),
            pl.BlockSpec((9 * Cin, Cmid_p), lambda n: (0, 0)),
            pl.BlockSpec((1, Cmid_p), lambda n: (0, 0)),
            pl.BlockSpec((9 * Cmid_p, Cout_p), lambda n: (0, 0)),
            pl.BlockSpec((1, Cout_p), lambda n: (0, 0)),
        ],
        out_specs=pl.BlockSpec((B, H, W, Cout_p), lambda n: (n, 0, 0, 0)),
        scratch_shapes=[
            pltpu.VMEM((B * (H + 2), _LEFT + W + 1, Cin), jnp.bfloat16),
            pltpu.VMEM((B * (H + 2), _LEFT + W + 1, Cmid_p), jnp.bfloat16),
            pltpu.VMEM((B * H * W, 9 * Cmid_p), jnp.bfloat16),
        ],
        compiler_params=pltpu.CompilerParams(
            dimension_semantics=("parallel",),
            vmem_limit_bytes=32 * 1024 * 1024),
        cost_estimate=pl.CostEstimate(flops=flops, transcendentals=0,
                                      bytes_accessed=bytes_accessed),
    )(x, w1i, b1p, w2i, b2p)

    # drop the lane padding, back to NCHW
    return jnp.transpose(y[..., :Cout], (0, 3, 1, 2))


# ----------------------------------------------------------------------------
# Pure-JAX reference (same bf16-operand / f32-accumulation precision)
# ----------------------------------------------------------------------------
def _double_conv_ref(x_nchw, w1, b1, w2, b2):
    dn = ("NHWC", "HWIO", "NHWC")
    x = jnp.transpose(x_nchw, (0, 2, 3, 1)).astype(jnp.bfloat16)
    h = lax.conv_general_dilated(
        x, w1.astype(jnp.bfloat16), (1, 1), ((1, 1), (1, 1)),
        dimension_numbers=dn, preferred_element_type=jnp.float32)
    h = jnp.maximum(h + b1.astype(jnp.float32), 0.0).astype(jnp.bfloat16)
    y = lax.conv_general_dilated(
        h, w2.astype(jnp.bfloat16), (1, 1), ((1, 1), (1, 1)),
        dimension_numbers=dn, preferred_element_type=jnp.float32)
    y = jnp.maximum(y + b2.astype(jnp.float32), 0.0)
    return jnp.transpose(y, (0, 3, 1, 2))


if __name__ == "__main__":
    key = jax.random.PRNGKey(0)
    kx_, k1, k2, k3, k4 = jax.random.split(key, 5)

    # DoubleConv(in_channels=4, out_channels=16) at small shapes
    N, Cin, H, W = 2, 4, 16, 16
    Cmid = Cout = 16

    x = jax.random.normal(kx_, (N, Cin, H, W), jnp.float32)
    w1 = jax.random.normal(k1, (3, 3, Cin, Cmid), jnp.float32) * (2.0 / (9 * Cin)) ** 0.5
    b1 = jax.random.normal(k2, (Cmid,), jnp.float32) * 0.01
    w2 = jax.random.normal(k3, (3, 3, Cmid, Cout), jnp.float32) * (2.0 / (9 * Cmid)) ** 0.5
    b2 = jax.random.normal(k4, (Cout,), jnp.float32) * 0.01

    fwd = jax.jit(double_conv)
    y = fwd(x, w1, b1, w2, b2)
    jax.block_until_ready(y)

    y_ref = _double_conv_ref(x, w1, b1, w2, b2)

    assert y.shape == (N, Cout, H, W), y.shape
    assert bool(jnp.all(jnp.isfinite(y)))
    max_err = float(jnp.max(jnp.abs(y - y_ref)))
    assert max_err < 2e-2, f"max abs err {max_err}"
    print("KERNEL_OK")
</pallas_src>

<mosaic_0001>
module attributes {stable_mosaic.version = 11 : i64} {
  func.func @_double_conv_kernel(%arg0: i32, %arg1: memref<1x16x16x4xbf16, #tpu.memory_space<vmem>>, %arg2: memref<36x128xbf16, #tpu.memory_space<vmem>>, %arg3: memref<1x128xf32, #tpu.memory_space<vmem>>, %arg4: memref<1152x128xbf16, #tpu.memory_space<vmem>>, %arg5: memref<1x128xf32, #tpu.memory_space<vmem>>, %arg6: memref<1x16x16x128xf32, #tpu.memory_space<vmem>>, %arg7: memref<18x25x4xbf16, #tpu.memory_space<vmem>>, %arg8: memref<18x25x128xbf16, #tpu.memory_space<vmem>>, %arg9: memref<256x1152xbf16, #tpu.memory_space<vmem>>) attributes {dimension_semantics = [#tpu.dimension_semantics<parallel>], iteration_bounds = array<i64: 2>, scalar_prefetch = 0 : i64, scratch_operands = 3 : i64, tpu.core_type = #tpu.core_type<tc>, window_params = [{transform_indices = @transform_0, window_bounds = array<i64: 1, 16, 16, 4>}, {pipeline_mode = #tpu.pipeline_mode<synchronous>, transform_indices = @transform_1, window_bounds = array<i64: 36, 128>}, {pipeline_mode = #tpu.pipeline_mode<synchronous>, transform_indices = @transform_2, window_bounds = array<i64: 1, 128>}, {pipeline_mode = #tpu.pipeline_mode<synchronous>, transform_indices = @transform_3, window_bounds = array<i64: 1152, 128>}, {pipeline_mode = #tpu.pipeline_mode<synchronous>, transform_indices = @transform_4, window_bounds = array<i64: 1, 128>}, {transform_indices = @transform_5, window_bounds = array<i64: 1, 16, 16, 128>}]} {
    %cst = arith.constant 0.000000e+00 : bf16
    %0 = vector.broadcast %cst : bf16 to vector<1x25x4xbf16>
    %cst_0 = arith.constant 0.000000e+00 : bf16
    %1 = vector.broadcast %cst_0 : bf16 to vector<18x1x4xbf16>
    %c0 = arith.constant 0 : index
    %c0_1 = arith.constant 0 : index
    %c0_2 = arith.constant 0 : index
    %2 = vector.load %arg7[%c0, %c0_1, %c0_2] : memref<18x25x4xbf16, #tpu.memory_space<vmem>>, vector<1x25x4xbf16>
    tpu.vector_store %arg7[%c0, %c0_1, %c0_2], %0 {strides = array<i32>} : memref<18x25x4xbf16, #tpu.memory_space<vmem>>, vector<1x25x4xbf16>,
    %c17 = arith.constant 17 : index
    %c0_3 = arith.constant 0 : index
    %c0_4 = arith.constant 0 : index
    %3 = vector.load %arg7[%c17, %c0_3, %c0_4] : memref<18x25x4xbf16, #tpu.memory_space<vmem>>, vector<1x25x4xbf16>
    tpu.vector_store %arg7[%c17, %c0_3, %c0_4], %0 {strides = array<i32>} : memref<18x25x4xbf16, #tpu.memory_space<vmem>>, vector<1x25x4xbf16>,
    %c0_5 = arith.constant 0 : index
    %c7 = arith.constant 7 : index
    %c0_6 = arith.constant 0 : index
    %4 = vector.load %arg7[%c0_5, %c7, %c0_6] : memref<18x25x4xbf16, #tpu.memory_space<vmem>>, vector<18x1x4xbf16>
    tpu.vector_store %arg7[%c0_5, %c7, %c0_6], %1 {strides = array<i32>} : memref<18x25x4xbf16, #tpu.memory_space<vmem>>, vector<18x1x4xbf16>,
    %c0_7 = arith.constant 0 : index
    %c24 = arith.constant 24 : index
    %c0_8 = arith.constant 0 : index
    %5 = vector.load %arg7[%c0_7, %c24, %c0_8] : memref<18x25x4xbf16, #tpu.memory_space<vmem>>, vector<18x1x4xbf16>
    tpu.vector_store %arg7[%c0_7, %c24, %c0_8], %1 {strides = array<i32>} : memref<18x25x4xbf16, #tpu.memory_space<vmem>>, vector<18x1x4xbf16>,
    %c0_9 = arith.constant 0 : index
    %c0_10 = arith.constant 0 : index
    %c0_11 = arith.constant 0 : index
    %c0_12 = arith.constant 0 : index
    %6 = vector.load %arg1[%c0_9, %c0_10, %c0_11, %c0_12] : memref<1x16x16x4xbf16, #tpu.memory_space<vmem>>, vector<1x16x16x4xbf16>
    %7 = vector.shape_cast %6 : vector<1x16x16x4xbf16> to vector<16x16x4xbf16>
    %c1 = arith.constant 1 : index
    %c8 = arith.constant 8 : index
    %c0_13 = arith.constant 0 : index
    %8 = vector.load %arg7[%c1, %c8, %c0_13] : memref<18x25x4xbf16, #tpu.memory_space<vmem>>, vector<16x16x4xbf16>
    tpu.vector_store %arg7[%c1, %c8, %c0_13], %7 {strides = array<i32>} : memref<18x25x4xbf16, #tpu.memory_space<vmem>>, vector<16x16x4xbf16>,
    %c0_14 = arith.constant 0 : index
    %c7_15 = arith.constant 7 : index
    %c0_16 = arith.constant 0 : index
    %9 = vector.load %arg7[%c0_14, %c7_15, %c0_16] : memref<18x25x4xbf16, #tpu.memory_space<vmem>>, vector<16x16x4xbf16>
    %10 = vector.shape_cast %9 : vector<16x16x4xbf16> to vector<256x4xbf16>
    %c0_17 = arith.constant 0 : index
    %c0_18 = arith.constant 0 : index
    %11 = vector.load %arg9[%c0_17, %c0_18] : memref<256x1152xbf16, #tpu.memory_space<vmem>>, vector<256x4xbf16>
    tpu.vector_store %arg9[%c0_17, %c0_18], %10 {strides = array<i32>} : memref<256x1152xbf16, #tpu.memory_space<vmem>>, vector<256x4xbf16>,
    %c0_19 = arith.constant 0 : index
    %c8_20 = arith.constant 8 : index
    %c0_21 = arith.constant 0 : index
    %12 = vector.load %arg7[%c0_19, %c8_20, %c0_21] : memref<18x25x4xbf16, #tpu.memory_space<vmem>>, vector<16x16x4xbf16>
    %13 = vector.shape_cast %12 : vector<16x16x4xbf16> to vector<256x4xbf16>
    %c0_22 = arith.constant 0 : index
    %c4 = arith.constant 4 : index
    %14 = vector.load %arg9[%c0_22, %c4] : memref<256x1152xbf16, #tpu.memory_space<vmem>>, vector<256x4xbf16>
    tpu.vector_store %arg9[%c0_22, %c4], %13 {strides = array<i32>} : memref<256x1152xbf16, #tpu.memory_space<vmem>>, vector<256x4xbf16>,
    %c0_23 = arith.constant 0 : index
    %c9 = arith.constant 9 : index
    %c0_24 = arith.constant 0 : index
    %15 = vector.load %arg7[%c0_23, %c9, %c0_24] : memref<18x25x4xbf16, #tpu.memory_space<vmem>>, vector<16x16x4xbf16>
    %16 = vector.shape_cast %15 : vector<16x16x4xbf16> to vector<256x4xbf16>
    %c0_25 = arith.constant 0 : index
    %c8_26 = arith.constant 8 : index
    %17 = vector.load %arg9[%c0_25, %c8_26] : memref<256x1152xbf16, #tpu.memory_space<vmem>>, vector<256x4xbf16>
    tpu.vector_store %arg9[%c0_25, %c8_26], %16 {strides = array<i32>} : memref<256x1152xbf16, #tpu.memory_space<vmem>>, vector<256x4xbf16>,
    %c1_27 = arith.constant 1 : index
    %c7_28 = arith.constant 7 : index
    %c0_29 = arith.constant 0 : index
    %18 = vector.load %arg7[%c1_27, %c7_28, %c0_29] : memref<18x25x4xbf16, #tpu.memory_space<vmem>>, vector<16x16x4xbf16>
    %19 = vector.shape_cast %18 : vector<16x16x4xbf16> to vector<256x4xbf16>
    %c0_30 = arith.constant 0 : index
    %c12 = arith.constant 12 : index
    %20 = vector.load %arg9[%c0_30, %c12] : memref<256x1152xbf16, #tpu.memory_space<vmem>>, vector<256x4xbf16>
    tpu.vector_store %arg9[%c0_30, %c12], %19 {strides = array<i32>} : memref<256x1152xbf16, #tpu.memory_space<vmem>>, vector<256x4xbf16>,
    %c1_31 = arith.constant 1 : index
    %c8_32 = arith.constant 8 : index
    %c0_33 = arith.constant 0 : index
    %21 = vector.load %arg7[%c1_31, %c8_32, %c0_33] : memref<18x25x4xbf16, #tpu.memory_space<vmem>>, vector<16x16x4xbf16>
    %22 = vector.shape_cast %21 : vector<16x16x4xbf16> to vector<256x4xbf16>
    %c0_34 = arith.constant 0 : index
    %c16 = arith.constant 16 : index
    %23 = vector.load %arg9[%c0_34, %c16] : memref<256x1152xbf16, #tpu.memory_space<vmem>>, vector<256x4xbf16>
    tpu.vector_store %arg9[%c0_34, %c16], %22 {strides = array<i32>} : memref<256x1152xbf16, #tpu.memory_space<vmem>>, vector<256x4xbf16>,
    %c1_35 = arith.constant 1 : index
    %c9_36 = arith.constant 9 : index
    %c0_37 = arith.constant 0 : index
    %24 = vector.load %arg7[%c1_35, %c9_36, %c0_37] : memref<18x25x4xbf16, #tpu.memory_space<vmem>>, vector<16x16x4xbf16>
    %25 = vector.shape_cast %24 : vector<16x16x4xbf16> to vector<256x4xbf16>
    %c0_38 = arith.constant 0 : index
    %c20 = arith.constant 20 : index
    %26 = vector.load %arg9[%c0_38, %c20] : memref<256x1152xbf16, #tpu.memory_space<vmem>>, vector<256x4xbf16>
    tpu.vector_store %arg9[%c0_38, %c20], %25 {strides = array<i32>} : memref<256x1152xbf16, #tpu.memory_space<vmem>>, vector<256x4xbf16>,
    %c2 = arith.constant 2 : index
    %c7_39 = arith.constant 7 : index
    %c0_40 = arith.constant 0 : index
    %27 = vector.load %arg7[%c2, %c7_39, %c0_40] : memref<18x25x4xbf16, #tpu.memory_space<vmem>>, vector<16x16x4xbf16>
    %28 = vector.shape_cast %27 : vector<16x16x4xbf16> to vector<256x4xbf16>
    %c0_41 = arith.constant 0 : index
    %c24_42 = arith.constant 24 : index
    %29 = vector.load %arg9[%c0_41, %c24_42] : memref<256x1152xbf16, #tpu.memory_space<vmem>>, vector<256x4xbf16>
    tpu.vector_store %arg9[%c0_41, %c24_42], %28 {strides = array<i32>} : memref<256x1152xbf16, #tpu.memory_space<vmem>>, vector<256x4xbf16>,
    %c2_43 = arith.constant 2 : index
    %c8_44 = arith.constant 8 : index
    %c0_45 = arith.constant 0 : index
    %30 = vector.load %arg7[%c2_43, %c8_44, %c0_45] : memref<18x25x4xbf16, #tpu.memory_space<vmem>>, vector<16x16x4xbf16>
    %31 = vector.shape_cast %30 : vector<16x16x4xbf16> to vector<256x4xbf16>
    %c0_46 = arith.constant 0 : index
    %c28 = arith.constant 28 : index
    %32 = vector.load %arg9[%c0_46, %c28] : memref<256x1152xbf16, #tpu.memory_space<vmem>>, vector<256x4xbf16>
    tpu.vector_store %arg9[%c0_46, %c28], %31 {strides = array<i32>} : memref<256x1152xbf16, #tpu.memory_space<vmem>>, vector<256x4xbf16>,
    %c2_47 = arith.constant 2 : index
    %c9_48 = arith.constant 9 : index
    %c0_49 = arith.constant 0 : index
    %33 = vector.load %arg7[%c2_47, %c9_48, %c0_49] : memref<18x25x4xbf16, #tpu.memory_space<vmem>>, vector<16x16x4xbf16>
    %34 = vector.shape_cast %33 : vector<16x16x4xbf16> to vector<256x4xbf16>
    %c0_50 = arith.constant 0 : index
    %c32 = arith.constant 32 : index
    %35 = vector.load %arg9[%c0_50, %c32] : memref<256x1152xbf16, #tpu.memory_space<vmem>>, vector<256x4xbf16>
    tpu.vector_store %arg9[%c0_50, %c32], %34 {strides = array<i32>} : memref<256x1152xbf16, #tpu.memory_space<vmem>>, vector<256x4xbf16>,
    %c0_51 = arith.constant 0 : index
    %c0_52 = arith.constant 0 : index
    %36 = vector.load %arg9[%c0_51, %c0_52] : memref<256x1152xbf16, #tpu.memory_space<vmem>>, vector<256x36xbf16>
    %c0_53 = arith.constant 0 : index
    %c0_54 = arith.constant 0 : index
    %37 = vector.load %arg2[%c0_53, %c0_54] : memref<36x128xbf16, #tpu.memory_space<vmem>>, vector<36x128xbf16>
    %cst_55 = arith.constant dense<0.000000e+00> : vector<256x128xf32>
    %38 = tpu.matmul %36, %37, %cst_55 {dimension_numbers = #tpu.dot_dimension_numbers<[1], [0], [0], [1], [0, 0, 1, 1], [], []>} : vector<256x36xbf16>, vector<36x128xbf16>, vector<256x128xf32> -> vector<256x128xf32>
    %c0_56 = arith.constant 0 : index
    %c0_57 = arith.constant 0 : index
    %39 = vector.load %arg3[%c0_56, %c0_57] : memref<1x128xf32, #tpu.memory_space<vmem>>, vector<1x128xf32>
    %40 = vector.broadcast %39 : vector<1x128xf32> to vector<256x128xf32>
    %41 = arith.addf %38, %40 : vector<256x128xf32>
    %cst_58 = arith.constant 0.000000e+00 : f32
    %42 = vector.broadcast %cst_58 : f32 to vector<256x128xf32>
    %43 = arith.maximumf %41, %42 : vector<256x128xf32>
    %cst_59 = arith.constant 0.000000e+00 : bf16
    %44 = vector.broadcast %cst_59 : bf16 to vector<1x25x128xbf16>
    %cst_60 = arith.constant 0.000000e+00 : bf16
    %45 = vector.broadcast %cst_60 : bf16 to vector<18x1x128xbf16>
    %c0_61 = arith.constant 0 : index
    %c0_62 = arith.constant 0 : index
    %c0_63 = arith.constant 0 : index
    %46 = vector.load %arg8[%c0_61, %c0_62, %c0_63] : memref<18x25x128xbf16, #tpu.memory_space<vmem>>, vector<1x25x128xbf16>
    tpu.vector_store %arg8[%c0_61, %c0_62, %c0_63], %44 {strides = array<i32>} : memref<18x25x128xbf16, #tpu.memory_space<vmem>>, vector<1x25x128xbf16>,
    %c17_64 = arith.constant 17 : index
    %c0_65 = arith.constant 0 : index
    %c0_66 = arith.constant 0 : index
    %47 = vector.load %arg8[%c17_64, %c0_65, %c0_66] : memref<18x25x128xbf16, #tpu.memory_space<vmem>>, vector<1x25x128xbf16>
    tpu.vector_store %arg8[%c17_64, %c0_65, %c0_66], %44 {strides = array<i32>} : memref<18x25x128xbf16, #tpu.memory_space<vmem>>, vector<1x25x128xbf16>,
    %c0_67 = arith.constant 0 : index
    %c7_68 = arith.constant 7 : index
    %c0_69 = arith.constant 0 : index
    %48 = vector.load %arg8[%c0_67, %c7_68, %c0_69] : memref<18x25x128xbf16, #tpu.memory_space<vmem>>, vector<18x1x128xbf16>
    tpu.vector_store %arg8[%c0_67, %c7_68, %c0_69], %45 {strides = array<i32>} : memref<18x25x128xbf16, #tpu.memory_space<vmem>>, vector<18x1x128xbf16>,
    %c0_70 = arith.constant 0 : index
    %c24_71 = arith.constant 24 : index
    %c0_72 = arith.constant 0 : index
    %49 = vector.load %arg8[%c0_70, %c24_71, %c0_72] : memref<18x25x128xbf16, #tpu.memory_space<vmem>>, vector<18x1x128xbf16>
    tpu.vector_store %arg8[%c0_70, %c24_71, %c0_72], %45 {strides = array<i32>} : memref<18x25x128xbf16, #tpu.memory_space<vmem>>, vector<18x1x128xbf16>,
    %50 = vector.shape_cast %43 : vector<256x128xf32> to vector<16x16x128xf32>
    %51 = arith.truncf %50 : vector<16x16x128xf32> to vector<16x16x128xbf16>
    %c1_73 = arith.constant 1 : index
    %c8_74 = arith.constant 8 : index
    %c0_75 = arith.constant 0 : index
    %52 = vector.load %arg8[%c1_73, %c8_74, %c0_75] : memref<18x25x128xbf16, #tpu.memory_space<vmem>>, vector<16x16x128xbf16>
    tpu.vector_store %arg8[%c1_73, %c8_74, %c0_75], %51 {strides = array<i32>} : memref<18x25x128xbf16, #tpu.memory_space<vmem>>, vector<16x16x128xbf16>,
    %c0_76 = arith.constant 0 : index
    %c7_77 = arith.constant 7 : index
    %c0_78 = arith.constant 0 : index
    %53 = vector.load %arg8[%c0_76, %c7_77, %c0_78] : memref<18x25x128xbf16, #tpu.memory_space<vmem>>, vector<16x16x128xbf16>
    %54 = vector.shape_cast %53 : vector<16x16x128xbf16> to vector<256x128xbf16>
    %c0_79 = arith.constant 0 : index
    %c0_80 = arith.constant 0 : index
    %55 = vector.load %arg9[%c0_79, %c0_80] : memref<256x1152xbf16, #tpu.memory_space<vmem>>, vector<256x128xbf16>
    tpu.vector_store %arg9[%c0_79, %c0_80], %54 {strides = array<i32>} : memref<256x1152xbf16, #tpu.memory_space<vmem>>, vector<256x128xbf16>,
    %c0_81 = arith.constant 0 : index
    %c8_82 = arith.constant 8 : index
    %c0_83 = arith.constant 0 : index
    %56 = vector.load %arg8[%c0_81, %c8_82, %c0_83] : memref<18x25x128xbf16, #tpu.memory_space<vmem>>, vector<16x16x128xbf16>
    %57 = vector.shape_cast %56 : vector<16x16x128xbf16> to vector<256x128xbf16>
    %c0_84 = arith.constant 0 : index
    %c128 = arith.constant 128 : index
    %58 = vector.load %arg9[%c0_84, %c128] : memref<256x1152xbf16, #tpu.memory_space<vmem>>, vector<256x128xbf16>
    tpu.vector_store %arg9[%c0_84, %c128], %57 {strides = array<i32>} : memref<256x1152xbf16, #tpu.memory_space<vmem>>, vector<256x128xbf16>,
    %c0_85 = arith.constant 0 : index
    %c9_86 = arith.constant 9 : index
    %c0_87 = arith.constant 0 : index
    %59 = vector.load %arg8[%c0_85, %c9_86, %c0_87] : memref<18x25x128xbf16, #tpu.memory_space<vmem>>, vector<16x16x128xbf16>
    %60 = vector.shape_cast %59 : vector<16x16x128xbf16> to vector<256x128xbf16>
    %c0_88 = arith.constant 0 : index
    %c256 = arith.constant 256 : index
    %61 = vector.load %arg9[%c0_88, %c256] : memref<256x1152xbf16, #tpu.memory_space<vmem>>, vector<256x128xbf16>
    tpu.vector_store %arg9[%c0_88, %c256], %60 {strides = array<i32>} : memref<256x1152xbf16, #tpu.memory_space<vmem>>, vector<256x128xbf16>,
    %c1_89 = arith.constant 1 : index
    %c7_90 = arith.constant 7 : index
    %c0_91 = arith.constant 0 : index
    %62 = vector.load %arg8[%c1_89, %c7_90, %c0_91] : memref<18x25x128xbf16, #tpu.memory_space<vmem>>, vector<16x16x128xbf16>
    %63 = vector.shape_cast %62 : vector<16x16x128xbf16> to vector<256x128xbf16>
    %c0_92 = arith.constant 0 : index
    %c384 = arith.constant 384 : index
    %64 = vector.load %arg9[%c0_92, %c384] : memref<256x1152xbf16, #tpu.memory_space<vmem>>, vector<256x128xbf16>
    tpu.vector_store %arg9[%c0_92, %c384], %63 {strides = array<i32>} : memref<256x1152xbf16, #tpu.memory_space<vmem>>, vector<256x128xbf16>,
    %c1_93 = arith.constant 1 : index
    %c8_94 = arith.constant 8 : index
    %c0_95 = arith.constant 0 : index
    %65 = vector.load %arg8[%c1_93, %c8_94, %c0_95] : memref<18x25x128xbf16, #tpu.memory_space<vmem>>, vector<16x16x128xbf16>
    %66 = vector.shape_cast %65 : vector<16x16x128xbf16> to vector<256x128xbf16>
    %c0_96 = arith.constant 0 : index
    %c512 = arith.constant 512 : index
    %67 = vector.load %arg9[%c0_96, %c512] : memref<256x1152xbf16, #tpu.memory_space<vmem>>, vector<256x128xbf16>
    tpu.vector_store %arg9[%c0_96, %c512], %66 {strides = array<i32>} : memref<256x1152xbf16, #tpu.memory_space<vmem>>, vector<256x128xbf16>,
    %c1_97 = arith.constant 1 : index
    %c9_98 = arith.constant 9 : index
    %c0_99 = arith.constant 0 : index
    %68 = vector.load %arg8[%c1_97, %c9_98, %c0_99] : memref<18x25x128xbf16, #tpu.memory_space<vmem>>, vector<16x16x128xbf16>
    %69 = vector.shape_cast %68 : vector<16x16x128xbf16> to vector<256x128xbf16>
    %c0_100 = arith.constant 0 : index
    %c640 = arith.constant 640 : index
    %70 = vector.load %arg9[%c0_100, %c640] : memref<256x1152xbf16, #tpu.memory_space<vmem>>, vector<256x128xbf16>
    tpu.vector_store %arg9[%c0_100, %c640], %69 {strides = array<i32>} : memref<256x1152xbf16, #tpu.memory_space<vmem>>, vector<256x128xbf16>,
    %c2_101 = arith.constant 2 : index
    %c7_102 = arith.constant 7 : index
    %c0_103 = arith.constant 0 : index
    %71 = vector.load %arg8[%c2_101, %c7_102, %c0_103] : memref<18x25x128xbf16, #tpu.memory_space<vmem>>, vector<16x16x128xbf16>
    %72 = vector.shape_cast %71 : vector<16x16x128xbf16> to vector<256x128xbf16>
    %c0_104 = arith.constant 0 : index
    %c768 = arith.constant 768 : index
    %73 = vector.load %arg9[%c0_104, %c768] : memref<256x1152xbf16, #tpu.memory_space<vmem>>, vector<256x128xbf16>
    tpu.vector_store %arg9[%c0_104, %c768], %72 {strides = array<i32>} : memref<256x1152xbf16, #tpu.memory_space<vmem>>, vector<256x128xbf16>,
    %c2_105 = arith.constant 2 : index
    %c8_106 = arith.constant 8 : index
    %c0_107 = arith.constant 0 : index
    %74 = vector.load %arg8[%c2_105, %c8_106, %c0_107] : memref<18x25x128xbf16, #tpu.memory_space<vmem>>, vector<16x16x128xbf16>
    %75 = vector.shape_cast %74 : vector<16x16x128xbf16> to vector<256x128xbf16>
    %c0_108 = arith.constant 0 : index
    %c896 = arith.constant 896 : index
    %76 = vector.load %arg9[%c0_108, %c896] : memref<256x1152xbf16, #tpu.memory_space<vmem>>, vector<256x128xbf16>
    tpu.vector_store %arg9[%c0_108, %c896], %75 {strides = array<i32>} : memref<256x1152xbf16, #tpu.memory_space<vmem>>, vector<256x128xbf16>,
    %c2_109 = arith.constant 2 : index
    %c9_110 = arith.constant 9 : index
    %c0_111 = arith.constant 0 : index
    %77 = vector.load %arg8[%c2_109, %c9_110, %c0_111] : memref<18x25x128xbf16, #tpu.memory_space<vmem>>, vector<16x16x128xbf16>
    %78 = vector.shape_cast %77 : vector<16x16x128xbf16> to vector<256x128xbf16>
    %c0_112 = arith.constant 0 : index
    %c1024 = arith.constant 1024 : index
    %79 = vector.load %arg9[%c0_112, %c1024] : memref<256x1152xbf16, #tpu.memory_space<vmem>>, vector<256x128xbf16>
    tpu.vector_store %arg9[%c0_112, %c1024], %78 {strides = array<i32>} : memref<256x1152xbf16, #tpu.memory_space<vmem>>, vector<256x128xbf16>,
    %c0_113 = arith.constant 0 : index
    %c0_114 = arith.constant 0 : index
    %80 = vector.load %arg9[%c0_113, %c0_114] : memref<256x1152xbf16, #tpu.memory_space<vmem>>, vector<256x1152xbf16>
    %c0_115 = arith.constant 0 : index
    %c0_116 = arith.constant 0 : index
    %81 = vector.load %arg4[%c0_115, %c0_116] : memref<1152x128xbf16, #tpu.memory_space<vmem>>, vector<1152x128xbf16>
    %cst_117 = arith.constant dense<0.000000e+00> : vector<256x128xf32>
    %82 = tpu.matmul %80, %81, %cst_117 {dimension_numbers = #tpu.dot_dimension_numbers<[1], [0], [0], [1], [0, 0, 1, 1], [], []>} : vector<256x1152xbf16>, vector<1152x128xbf16>, vector<256x128xf32> -> vector<256x128xf32>
    %c0_118 = arith.constant 0 : index
    %c0_119 = arith.constant 0 : index
    %83 = vector.load %arg5[%c0_118, %c0_119] : memref<1x128xf32, #tpu.memory_space<vmem>>, vector<1x128xf32>
    %84 = vector.broadcast %83 : vector<1x128xf32> to vector<256x128xf32>
    %85 = arith.addf %82, %84 : vector<256x128xf32>
    %cst_120 = arith.constant 0.000000e+00 : f32
    %86 = vector.broadcast %cst_120 : f32 to vector<256x128xf32>
    %87 = arith.maximumf %85, %86 : vector<256x128xf32>
    %88 = vector.shape_cast %87 : vector<256x128xf32> to vector<1x16x16x128xf32>
    %c0_121 = arith.constant 0 : index
    %c0_122 = arith.constant 0 : index
    %c0_123 = arith.constant 0 : index
    %c0_124 = arith.constant 0 : index
    %89 = vector.load %arg6[%c0_121, %c0_122, %c0_123, %c0_124] : memref<1x16x16x128xf32, #tpu.memory_space<vmem>>, vector<1x16x16x128xf32>
    tpu.vector_store %arg6[%c0_121, %c0_122, %c0_123, %c0_124], %88 {strides = array<i32>} : memref<1x16x16x128xf32, #tpu.memory_space<vmem>>, vector<1x16x16x128xf32>,
    return
  }
  func.func @transform_0(%arg0: i32) -> (i32, i32, i32, i32) {
    %c0_i32 = arith.constant 0 : i32
    %c0_i32_0 = arith.constant 0 : i32
    %c0_i32_1 = arith.constant 0 : i32
    %c0_i32_2 = arith.constant 0 : i32
    return %arg0, %c0_i32, %c0_i32_0, %c0_i32_1 : i32, i32, i32, i32
  }
  func.func @transform_1(%arg0: i32) -> (i32, i32) {
    %c0_i32 = arith.constant 0 : i32
    %c0_i32_0 = arith.constant 0 : i32
    %c0_i32_1 = arith.constant 0 : i32
    return %c0_i32, %c0_i32_0 : i32, i32
  }
  func.func @transform_2(%arg0: i32) -> (i32, i32) {
    %c0_i32 = arith.constant 0 : i32
    %c0_i32_0 = arith.constant 0 : i32
    %c0_i32_1 = arith.constant 0 : i32
    return %c0_i32, %c0_i32_0 : i32, i32
  }
  func.func @transform_3(%arg0: i32) -> (i32, i32) {
    %c0_i32 = arith.constant 0 : i32
    %c0_i32_0 = arith.constant 0 : i32
    %c0_i32_1 = arith.constant 0 : i32
    return %c0_i32, %c0_i32_0 : i32, i32
  }
  func.func @transform_4(%arg0: i32) -> (i32, i32) {
    %c0_i32 = arith.constant 0 : i32
    %c0_i32_0 = arith.constant 0 : i32
    %c0_i32_1 = arith.constant 0 : i32
    return %c0_i32, %c0_i32_0 : i32, i32
  }
  func.func @transform_5(%arg0: i32) -> (i32, i32, i32, i32) {
    %c0_i32 = arith.constant 0 : i32
    %c0_i32_0 = arith.constant 0 : i32
    %c0_i32_1 = arith.constant 0 : i32
    %c0_i32_2 = arith.constant 0 : i32
    return %arg0, %c0_i32, %c0_i32_0, %c0_i32_1 : i32, i32, i32, i32
  }
}

</mosaic_0001>

<bundles_post_ra>
// kernel: double_conv.1
= control target key start
LH: loop header
LB: loop body
LE: loop exit
PB: predicated region body
PF: predicated region fallthrough
CT: control target
= control target key end

     0   :  { %s11558_s18 = smov 0   ;;  %s15107_s0 = inlined_call_operand.vmem [shape: bf16[2,16,16,4], index: 0, kind: input, shape index: {}]   ;;  %s15108_s1 = inlined_call_operand.vmem [shape: bf16[36,128], index: 1, kind: input, shape index: {}]   ;;  %s15109_s2 = inlined_call_operand.vmem [shape: f32[1,128], index: 2, kind: input, shape index: {}]   ;;  %s15110_s3 = inlined_call_operand.vmem [shape: bf16[1152,128], index: 3, kind: input, shape index: {}]   ;;  %s15111_s4 = inlined_call_operand.vmem [shape: f32[1,128], index: 4, kind: input, shape index: {}]   ;;  %s15112_s5 = inlined_call_operand.vmem [shape: f32[2,16,16,128], index: 5, kind: output, shape index: {}]  }
   0x1 LB: > { %s10178_s19 = sadd.s32 4294967295, %s11517_s18   ;;  %p10182_p0 = scmp.ge.s32.totalorder %s11517_s18, 1  ;;  %s11517_s18 = sphi %s11558_s18, %s15_s18  }
   0x2   : > { %p187_p1 = scmp.lt.s32.totalorder %s11517_s18, 3 }
   0x4   : > { %p188_p2 = pnand %p10182_p0, %p187_p1 }
   0x6   : > { %191 = sbr.rel (%p188_p2) target bundleno = 1677 (0x68d), region = 40 }
   0xb   : > { %vm226_vm0 = vcmask 27648   ;;  %p215_p3 = scmp.lt.s32.totalorder %s10178_s19, 1  ;;  %v11519_v0 = vmov 0   ;;  %vm243_vm1 = vcmask 27651   ;;  %vm244_vm2 = vsmask.f32 7950 }
   0xc   : > { %228 = vst.msk [vmem:[#allocation2 + $0x4] sm:$0xf] %vm226_vm0, %v11519_v0  ;;  %vm231_vm3 = vsmask.f32 256  ;;  %vm11581_vm4 = vmand %vm243_vm1, %vm244_vm2  ;;  %v249_v2 = vld [vmem:[#allocation2 + $0x10] sm:$0x8] }
   0xd   : > { %227 = vst.msk [vmem:[#allocation2] sm:$0xf] %vm226_vm0, %v11519_v0  ;;  %s15437_s19 = smov (!%p215_p3, %s10178_s19), 1  ;;  %s11520_s24 = smov 4   ;;  %v252_v7 = vld [vmem:[#allocation2 + $0x20] sm:$0x8] }
   0xe   : > { %229 = vst.msk [vmem:[#allocation2 + $0x8] sm:$0xf] %vm226_vm0, %v11519_v0  ;;  %s11237_s20 = sshll.u32 %s15437_s19, 7  ;;  %v250_v9 = vsel %vm11581_vm4, 0, %v249_v2  ;;  %vm230_vm5 = vcmask 24576   ;;  %v253_v15 = vsel %vm11581_vm4, 0, %v252_v7 }
   0xf   : > { %237 = vst.msk [vmem:[#allocation2 + $0x110] sm:$0xf] %vm226_vm0, %v11519_v0  ;;  %s11578_s23 = scalar_lea.vmem %s15107_s0, %s11237_s20  ;;  %v303_v14 = vld [vmem:[#allocation2 + $0x1c] sm:$0x1]  ;;  %vm11594_vm6 = vmand %vm230_vm5, %vm231_vm3  ;;  %v233_v17 = vld [vmem:[#allocation2 + $0xc] sm:$0x1] }
  0x10   : > { %238 = vst.msk [vmem:[#allocation2 + $0x114] sm:$0xf] %vm226_vm0, %v11519_v0  ;;  %v355_v8 = vld [vmem:[%s11578_s23 + $0x4] sm:$0xf]  ;;  %v354_v12 = vld [vmem:[%s11578_s23] sm:$0xf] }
  0x11   : > { %239 = vst.msk [vmem:[#allocation2 + $0x118] sm:$0xf] %vm226_vm0, %v11519_v0  ;;  %v356_v19 = vld [vmem:[%s11578_s23 + $0x8] sm:$0xf]  ;;  %vm1126_vm7 = vsmask.f32 3328 }
  0x12   : > { %4519 = vst [vmem:[#allocation3] sm:$0xf] %v11519_v0  ;;  %v304_v22 = vsel %vm11594_vm6, 0, %v303_v14  ;;  %v234_v23 = vsel %vm11594_vm6, 0, %v233_v17  ;;  %vm1127_vm8 = vsmask.f32 7440 }
  0x13   : > { %v885_v3 = vld [vmem:[#allocation2 + $0x4] sm:$0xf]  ;;  %4520 = vst [vmem:[#allocation3 + $0x4] sm:$0xf] %v11519_v0  ;;  %vm467_vm9 = vsmask.f32 4368  ;;  %vm11610_vm10 = vmor %vm1126_vm7, %vm1127_vm8 }
  0x14   : > { %v1078_v4 = vld [vmem:[#allocation2 + $0x4] sm:$0xf]  ;;  %949 = vrot.lane.b32.xlu0 %v885_v3, %s11520_s24  ;;  %4521 = vst [vmem:[#allocation3 + $0x8] sm:$0xf] %v11519_v0  ;;  %s11521_s25 = smov 16   ;;  %vm11623_vm11 = vmor %vm231_vm3, %vm467_vm9  ;;  %s11522_s26 = smov 8  }
  0x15   : > { %v1130_v5 = vshrl.u32 %v1078_v4, 16  ;;  %v1133_v6 = vshll.u32 %v1078_v4, 16  ;;  %4528 = vst [vmem:[#allocation3 + $0x110] sm:$0xf] %v11519_v0  ;;  %v1079_v13 = vld [vmem:[#allocation2 + $0x8] sm:$0xf] }
  0x16   : > { %4529 = vst [vmem:[#allocation3 + $0x114] sm:$0xf] %v11519_v0  ;;  %v886_v18 = vld [vmem:[#allocation2 + $0x8] sm:$0xf]  ;;  %v1139_v21 = vshll.u32 %v1079_v13, 16  ;;  %v1143_v26 = vshrl.u32 %v1079_v13, 16 }
  0x17   : > { %v1132_v10 = vrot.slane %v1130_v5, 4  ;;  %v1135_v11 = vrot.slane %v1133_v6, 5  ;;  %4530 = vst [vmem:[#allocation3 + $0x118] sm:$0xf] %v11519_v0  ;;  %v357_v48 = vld [vmem:[%s11578_s23 + $0xc] sm:$0xf] }
  0x18   : > { %388 = vst.msk [vmem:[#allocation2 + $0x18] sm:$0xf] %vm226_vm0, %v355_v8  ;;  %v11606_v25 = vrot.slane %v1139_v21, 5  ;;  %v1145_v43 = vrot.slane %v1143_v26, 4  ;;  %v306_v49 = vld [vmem:[#allocation2 + $0x2c] sm:$0x1] }
  0x19   : > { %387 = vst.msk [vmem:[#allocation2 + $0x14] sm:$0xf] %vm226_vm0, %v354_v12  ;;  %v1136_v20 = vor.u32 %v1135_v11, %v1132_v10  ;;  %v307_v0 = vsel %vm11594_vm6, 0, %v306_v49  ;;  %s11523_s27 = smov 12   ;;  %s11524_s28 = smov 20   ;;  %vm1045_vm12 = vcmask 60448  }
  0x1a   : > { %251 = vst [vmem:[#allocation2 + $0x10] sm:$0x8] %v250_v9  ;;  %v1146_v10 = vor.u32 %v1145_v43, %v11606_v25  ;;  %s11525_s29 = smov 24   ;;  %s11526_s30 = smov 28   ;;  %vm4534_vm13 = vcmask 1043459   ;;  %vm1609_vm15 = vcmask 93248  }
  0x1b   : > { %254 = vst [vmem:[#allocation2 + $0x20] sm:$0x8] %v253_v15  ;;  %v1137_v24 = vrot.slane %v1136_v20, 4  ;;  %s11527_s6 = smov 32   ;;  %vm11798_vm14 = vmand %vm4534_vm13, %vm244_vm2  ;;  %vm4394_vm1 = vcmask 1041408   ;;  %vm15115_vm2 = vcmask 126048  }
  0x1c   : > { %951 = vrot.lane.b32.xlu0 %v886_v18, %s11520_s24  ;;  %389 = vst.msk [vmem:[#allocation2 + $0x24] sm:$0xf] %vm226_vm0, %v356_v19  ;;  %v1147_v18 = vrot.slane %v1146_v10, 4  ;;  %vm2331_vm5 = vcmask 158848   ;;  %vm15114_vm7 = vcmask 191648   ;;  %vm15113_vm8 = vcmask 224448  }
  0x1d   : > { %305 = vst [vmem:[#allocation2 + $0x1c] sm:$0x1] %v304_v22  ;;  %v1142_v44 = vsel %vm11610_vm10, %v1137_v24, %v11606_v25  ;;  %vm3615_vm9 = vcmask 257248   ;;  %vm4176_vm13 = vcmask 290048   ;;  %s11238_s20 = sshll.u32 %s15437_s19, 8 }
  0x1e   : > { %235 = vst [vmem:[#allocation2 + $0xc] sm:$0x1] %v234_v23  ;;  %s14799_s7 = scalar_lea.vmem %s15112_s5, %s11238_s20 }
  0x1f   : > { %v2172_v27 = vld [vmem:[#allocation2 + $0x18] sm:$0xf]  ;;  %390 = vst.msk [vmem:[#allocation2 + $0x28] sm:$0xf] %vm226_vm0, %v357_v48 }
  0x20   : > { %v2365_v28 = vld [vmem:[#allocation2 + $0x18] sm:$0xf]  ;;  %2237 = vrot.lane.b32.xlu1 %v2172_v27, %s11521_s25  ;;  %v2171_v31 = vld [vmem:[#allocation2 + $0x14] sm:$0xf]  ;;  %308 = vst [vmem:[#allocation2 + $0x2c] sm:$0x1] %v307_v0 }
  0x21   : > { %v1644_v29 = vld [vmem:[#allocation2 + $0x18] sm:$0xf]  ;;  %v1643_v32 = vld [vmem:[#allocation2 + $0x14] sm:$0xf]  ;;  %v2422_v33 = vshll.u32 %v2365_v28, 16  ;;  %v2426_v34 = vshrl.u32 %v2365_v28, 16 }
  0x22   : > { %v1642_v35 = vld [vmem:[#allocation2 + $0x10] sm:$0x8]  ;;  %v1696_v36 = vshrl.u32 %v1643_v32, 16  ;;  %v1699_v37 = vshll.u32 %v1643_v32, 16  ;;  %v1705_v38 = vshrl.u32 %v1644_v29, 16  ;;  %v1708_v47 = vshll.u32 %v1644_v29, 16 }
  0x23   : > { %v1691_v39 = vshrl.u32 %v1642_v35, 16  ;;  %v2926_v40 = vld [vmem:[#allocation2 + $0x20] sm:$0x8]  ;;  %v11614_v41 = vrot.slane %v2422_v33, 5  ;;  %v2428_v42 = vrot.slane %v2426_v34, 4 }
  0x24   : > { %v1698_v45 = vrot.slane %v1696_v36, 7  ;;  %v2927_v46 = vld [vmem:[#allocation2 + $0x24] sm:$0xf]  ;;  %2235 = vrot.lane.b32.xlu0 %v2171_v31, %s11521_s25  ;;  %v2975_v52 = vshrl.u32 %v2926_v40, 16  ;;  %v2366_v54 = vld [vmem:[#allocation2 + $0x1c] sm:$0x1] }
  0x25   : > { %v10203_v51 = vrot.slane %v1691_v39, 11  ;;  %v2980_v53 = vshrl.u32 %v2927_v46, 16  ;;  %v2429_v55 = vor.u32 %v2428_v42, %v11614_v41  ;;  %v2983_v57 = vshll.u32 %v2927_v46, 16  ;;  %v300_v60 = vld [vmem:[#allocation2 + $0xc] sm:$0x1] }
  0x26   : > { %v1701_v56 = vor.u32 %v1699_v37, %v1698_v45  ;;  %v2432_v58 = vshll.u32 %v2366_v54, 16  ;;  %v1707_v59 = vrot.slane %v1705_v38, 7  ;;  %v301_v63 = vsel %vm11594_vm6, 0, %v300_v60  ;;  %v2364_v4 = vld [vmem:[#allocation2 + $0x14] sm:$0xf] }
  0x27   : > { %v11628_v61 = vrot.slane %v2980_v53, 7  ;;  %v2430_v62 = vrot.slane %v2429_v55, 4  ;;  %302 = vst [vmem:[#allocation2 + $0xc] sm:$0x1] %v301_v63  ;;  %v10219_v5 = vrot.slane %v2975_v52, 11  ;;  %v1703_v8 = vrot.slane %v1698_v45, 4 }
  0x28   : > { %v1702_v2 = vsel %vm11623_vm11, %v10203_v51, %v1701_v56  ;;  %v2434_v3 = vrot.slane %v2432_v58, 5  ;;  %1513 = vrot.lane.b32.xlu1 %v1142_v44, %s11522_s26  ;;  %v1710_v9 = vor.u32 %v1708_v47, %v1707_v59  ;;  %v2413_v11 = vshrl.u32 %v2364_v4, 16  ;;  %v1081_v13 = vld [vmem:[#allocation2 + $0x14] sm:$0xf]  ;;  %v2928_v21 = vld [vmem:[#allocation2 + $0x28] sm:$0xf] }
  0x29   : > { %2042 = vrot.lane.b32.xlu2 %v1702_v2, %s11523_s27  ;;  %v2985_v6 = vor.u32 %v2983_v57, %v11628_v61  ;;  %v2416_v12 = vshll.u32 %v2364_v4, 16  ;;  %v1154_v23 = vshrl.u32 %v1081_v13, 16  ;;  %v1157_v24 = vshll.u32 %v1081_v13, 16  ;;  %v3649_v27 = vld [vmem:[#allocation2 + $0x28] sm:$0xf] }
  0x2a   : > { %v2435_v7 = vsel %vm11610_vm10, %v2430_v62, %v2434_v3  ;;  %v1711_v15 = vsel %vm11623_vm11, %v1703_v8, %v1710_v9  ;;  %v2415_v19 = vrot.slane %v2413_v11, 4  ;;  %v2989_v25 = vshrl.u32 %v2928_v21, 16  ;;  %v3650_v28 = vld [vmem:[#allocation2 + $0x2c] sm:$0x1]  ;;  %v3455_v31 = vld [vmem:[#allocation2 + $0x24] sm:$0xf] }
  0x2b   : > { %v2986_v14 = vsel %vm11623_vm11, %v10219_v5, %v2985_v6  ;;  %v2418_v22 = vrot.slane %v2416_v12, 5  ;;  %v2992_v26 = vshll.u32 %v2928_v21, 16  ;;  %v3706_v32 = vshll.u32 %v3649_v27, 16  ;;  %v3648_v37 = vld [vmem:[#allocation2 + $0x24] sm:$0xf] }
  0x2c   : > { %2798 = vrot.lane.b32.xlu0 %v2435_v7, %s11524_s28  ;;  %v3710_v33 = vshrl.u32 %v3649_v27, 16  ;;  %v3716_v34 = vshll.u32 %v3650_v28, 16  ;;  %v2987_v35 = vrot.slane %v11628_v61, 4  ;;  %v2991_v36 = vrot.slane %v2989_v25, 7  ;;  %v358_v45 = vld [vmem:[%s11578_s23 + $0x10] sm:$0xf] }
  0x2d   : > { %v11651_v38 = vrot.slane %v3706_v32, 5  ;;  %v2419_v42 = vor.u32 %v2418_v22, %v2415_v19  ;;  %v1156_v43 = vrot.slane %v1154_v23, 4  ;;  %v1159_v44 = vrot.slane %v1157_v24, 5  ;;  %v1082_v49 = vld [vmem:[#allocation2 + $0x18] sm:$0xf] }
  0x2e   : > { %v1080_v17 = vld [vmem:[#allocation2 + $0xc] sm:$0x1]  ;;  %v3712_v39 = vrot.slane %v3710_v33, 4  ;;  %v2994_v40 = vor.u32 %v2992_v26, %v2991_v36  ;;  %v3718_v48 = vrot.slane %v3716_v34, 5  ;;  %v3697_v51 = vshrl.u32 %v3648_v37, 16 }
  0x2f   : > { %v1149_v20 = vshll.u32 %v1080_v17, 16  ;;  %v359_v52 = vld [vmem:[%s11578_s23 + $0x14] sm:$0xf]  ;;  %v3700_v54 = vshll.u32 %v3648_v37, 16  ;;  %391 = vst.msk [vmem:[#allocation2 + $0x34] sm:$0xf] %vm226_vm0, %v358_v45  ;;  %v1160_v56 = vor.u32 %v1159_v44, %v1156_v43 }
  0x30   : > { %3326 = vrot.lane.b32.xlu1 %v2986_v14, %s11525_s29  ;;  %v3713_v47 = vor.u32 %v3712_v39, %v11651_v38  ;;  %v2995_v53 = vsel %vm11623_vm11, %v2987_v35, %v2994_v40  ;;  %392 = vst.msk [vmem:[#allocation2 + $0x38] sm:$0xf] %vm226_vm0, %v359_v52  ;;  %v1163_v57 = vshll.u32 %v1082_v49, 16  ;;  %v2420_v59 = vrot.slane %v2419_v42, 4  ;;  %v11667_v62 = vld [vmem:[#allocation2 + $0x24] sm:$0xf] }
  0x31   : > { %2044 = vrot.lane.b32.xlu2 %v1711_v15, %s11523_s27  ;;  %v1151_v29 = vrot.slane %v1149_v20, 5  ;;  %v3699_v60 = vrot.slane %v3697_v51, 4  ;;  %v3702_v61 = vrot.slane %v3700_v54, 5  ;;  %v1647_v63 = vld [vmem:[#allocation2 + $0x28] sm:$0xf]  ;;  %v1161_v0 = vrot.slane %v1160_v56, 4 }
  0x32   : > { %v3714_v55 = vrot.slane %v3713_v47, 4  ;;  %v1165_v2 = vrot.slane %v1163_v57, 5  ;;  %v1167_v3 = vshrl.u32 %v1082_v49, 16  ;;  %v3456_v4 = vld [vmem:[#allocation2 + $0x28] sm:$0xf]  ;;  %v2425_v5 = vsel %vm11610_vm10, %v2420_v59, %v11614_v41 }
  0x33   : > { %v1152_v46 = vsel %vm11610_vm10, %v1147_v18, %v1151_v29  ;;  %v1718_v6 = vshrl.u32 %v11667_v62, 16  ;;  %v1727_v7 = vshrl.u32 %v1647_v63, 16  ;;  %v3703_v8 = vor.u32 %v3702_v61, %v3699_v60  ;;  %v2367_v9 = vld [vmem:[#allocation2 + $0x24] sm:$0xf]  ;;  %v1083_v11 = vld [vmem:[#allocation2 + $0x1c] sm:$0x1] }
  0x34   : > { %3519 = vrot.lane.b32.xlu0 %v3455_v31, %s11526_s30  ;;  %v3719_v58 = vsel %vm11610_vm10, %v3714_v55, %v3718_v48  ;;  %v1166_v10 = vsel %vm11610_vm10, %v1161_v0, %v1165_v2  ;;  %v1169_v12 = vrot.slane %v1167_v3, 4  ;;  %v2437_v13 = vshrl.u32 %v2367_v9, 16  ;;  %v309_v19 = vld [vmem:[#allocation2 + $0x3c] sm:$0x1]  ;;  %v887_v25 = vld [vmem:[#allocation2 + $0x14] sm:$0xf] }
  0x35   : > { %v2440_v14 = vshll.u32 %v2367_v9, 16  ;;  %v1720_v15 = vrot.slane %v1718_v6, 7  ;;  %v1729_v17 = vrot.slane %v1727_v7, 7  ;;  %v1730_v18 = vshll.u32 %v1647_v63, 16  ;;  %v2368_v29 = vld [vmem:[#allocation2 + $0x28] sm:$0xf] }
  0x36   : > { %v3704_v41 = vrot.slane %v3703_v8, 4  ;;  %v310_v20 = vsel %vm11594_vm6, 0, %v309_v19  ;;  %v1170_v21 = vor.u32 %v1169_v12, %v1165_v2  ;;  %v1173_v22 = vshll.u32 %v1083_v11, 16  ;;  %v11688_v36 = vld [vmem:[#allocation2 + $0x34] sm:$0xf] }
  0x37   : > { %v2439_v23 = vrot.slane %v2437_v13, 4  ;;  %v2442_v24 = vrot.slane %v2440_v14, 5  ;;  %311 = vst [vmem:[#allocation2 + $0x3c] sm:$0x1] %v310_v20  ;;  %v1725_v26 = vrot.slane %v1720_v15, 4  ;;  %v1732_v27 = vor.u32 %v1730_v18, %v1729_v17 }
  0x38   : > { %1515 = vrot.lane.b32.xlu1 %v1152_v46, %s11522_s26  ;;  %v3709_v28 = vsel %vm11610_vm10, %v3704_v41, %v11651_v38  ;;  %v1171_v31 = vrot.slane %v1170_v21, 4  ;;  %v1175_v32 = vrot.slane %v1173_v22, 5  ;;  %v2446_v34 = vshll.u32 %v2368_v29, 16  ;;  %v255_v37 = vld [vmem:[#allocation2 + $0x30] sm:$0x8] }
  0x39   : > { %3328 = vrot.lane.b32.xlu2 %v2995_v53, %s11525_s29  ;;  %v2443_v33 = vor.u32 %v2442_v24, %v2439_v23  ;;  %v1733_v35 = vsel %vm11623_vm11, %v1725_v26, %v1732_v27  ;;  %v2931_v39 = vld [vmem:[#allocation2 + $0x38] sm:$0xf]  ;;  %v1645_v40 = vld [vmem:[#allocation2 + $0x20] sm:$0x8]  ;;  %v256_v38 = vsel %vm11581_vm4, 0, %v255_v37  ;;  %v2450_v42 = vshrl.u32 %v2368_v29, 16 }
  0x3a   : > { %257 = vst [vmem:[#allocation2 + $0x30] sm:$0x8] %v256_v38  ;;  %v1176_v43 = vsel %vm11610_vm10, %v1171_v31, %v1175_v32  ;;  %v2448_v45 = vrot.slane %v2446_v34, 5  ;;  %v888_v46 = vld [vmem:[#allocation2 + $0x18] sm:$0xf]  ;;  %v3002_v47 = vshrl.u32 %v11688_v36, 16 }
  0x3b   : > { %v2444_v44 = vrot.slane %v2443_v33, 4  ;;  %v3011_v48 = vshrl.u32 %v2931_v39, 16  ;;  %v1713_v49 = vshrl.u32 %v1645_v40, 16  ;;  %v1721_v51 = vshll.u32 %v11667_v62, 16  ;;  %v3651_v52 = vld [vmem:[#allocation2 + $0x34] sm:$0xf] }
  0x3c   : > { %4082 = vrot.lane.b32.xlu0 %v3719_v58, %s11527_s6  ;;  %v2452_v53 = vrot.slane %v2450_v42, 4  ;;  %v3014_v55 = vshll.u32 %v2931_v39, 16  ;;  %v3721_v56 = vshrl.u32 %v3651_v52, 16  ;;  %v3724_v57 = vshll.u32 %v3651_v52, 16  ;;  %v2369_v58 = vld [vmem:[#allocation2 + $0x2c] sm:$0x1] }
  0x3d   : > { %v2449_v54 = vsel %vm11610_vm10, %v2444_v44, %v2448_v45  ;;  %v3004_v59 = vrot.slane %v3002_v47, 7  ;;  %v3013_v60 = vrot.slane %v3011_v48, 7  ;;  %v10204_v61 = vrot.slane %v1713_v49, 11  ;;  %v2173_v3 = vld [vmem:[#allocation2 + $0x24] sm:$0xf] }
  0x3e   : > { %v1723_v63 = vor.u32 %v1721_v51, %v1720_v15  ;;  %v2456_v62 = vshll.u32 %v2369_v58, 16  ;;  %v3723_v0 = vrot.slane %v3721_v56, 4  ;;  %v3726_v2 = vrot.slane %v3724_v57, 5  ;;  %v3652_v8 = vld [vmem:[#allocation2 + $0x38] sm:$0xf] }
  0x3f   : > { %v3016_v6 = vor.u32 %v3014_v55, %v3013_v60  ;;  %v360_v15 = vld [vmem:[%s11578_s23 + $0x18] sm:$0xf]  ;;  %v3734_v17 = vshrl.u32 %v3652_v8, 16  ;;  %v258_v18 = vld [vmem:[#allocation2 + $0x40] sm:$0x8]  ;;  %v3005_v24 = vshll.u32 %v11688_v36, 16 }
  0x40   : > { %3521 = vrot.lane.b32.xlu1 %v3456_v4, %s11526_s30  ;;  %v2453_v4 = vor.u32 %v2452_v53, %v2448_v45  ;;  %v1724_v7 = vsel %vm11623_vm11, %v10204_v61, %v1723_v63  ;;  %v3727_v9 = vor.u32 %v3726_v2, %v3723_v0  ;;  %v2458_v12 = vrot.slane %v2456_v62, 5  ;;  %393 = vst.msk [vmem:[#allocation2 + $0x44] sm:$0xf] %vm226_vm0, %v360_v15  ;;  %v2174_v22 = vld [vmem:[#allocation2 + $0x28] sm:$0xf] }
  0x41   : > { %2796 = vrot.lane.b32.xlu2 %v2425_v5, %s11524_s28  ;;  %v3009_v5 = vrot.slane %v3004_v59, 4  ;;  %v2929_v14 = vld [vmem:[#allocation2 + $0x30] sm:$0x8]  ;;  %v259_v20 = vsel %vm11581_vm4, 0, %v258_v18  ;;  %v3653_v26 = vld [vmem:[#allocation2 + $0x3c] sm:$0x1]  ;;  %v3007_v29 = vor.u32 %v3005_v24, %v3004_v59 }
  0x42   : > { %v2454_v11 = vrot.slane %v2453_v4, 4  ;;  %v3728_v41 = vrot.slane %v3727_v9, 4  ;;  %v2997_v23 = vshrl.u32 %v2929_v14, 16  ;;  %260 = vst [vmem:[#allocation2 + $0x40] sm:$0x8] %v259_v20  ;;  %v3740_v37 = vshll.u32 %v3653_v26, 16 }
  0x43   : > { %v3017_v13 = vsel %vm11623_vm11, %v3009_v5, %v3016_v6  ;;  %v1084_v31 = vld [vmem:[#allocation2 + $0x24] sm:$0xf]  ;;  %v361_v32 = vld [vmem:[%s11578_s23 + $0x1c] sm:$0xf]  ;;  %v1649_v33 = vld [vmem:[#allocation2 + $0x34] sm:$0xf] }
  0x44   : > { %1517 = vrot.lane.b32.xlu0 %v1166_v10, %s11522_s26  ;;  %v3730_v10 = vshll.u32 %v3652_v8, 16  ;;  %v2459_v21 = vsel %vm11610_vm10, %v2454_v11, %v2458_v12  ;;  %v246_v34 = vld [vmem:[#allocation2] sm:$0x8]  ;;  %394 = vst.msk [vmem:[#allocation2 + $0x48] sm:$0xf] %vm226_vm0, %v361_v32  ;;  %v1178_v39 = vshrl.u32 %v1084_v31, 16 }
  0x45   : > { %v247_v36 = vsel %vm11581_vm4, 0, %v246_v34  ;;  %v1181_v40 = vshll.u32 %v1084_v31, 16  ;;  %v3457_v38 = vld [vmem:[#allocation2 + $0x34] sm:$0xf]  ;;  %v1740_v44 = vshrl.u32 %v1649_v33, 16  ;;  %v3742_v47 = vrot.slane %v3740_v37, 5 }
  0x46   : > { %v3732_v19 = vrot.slane %v3730_v10, 5  ;;  %248 = vst [vmem:[#allocation2] sm:$0x8] %v247_v36  ;;  %v1180_v48 = vrot.slane %v1178_v39, 4  ;;  %v420_v52 = vld [vmem:[#allocation2 + $0x4] sm:$0xf] }
  0x47   : > { %v1183_v49 = vrot.slane %v1181_v40, 5  ;;  %v1085_v53 = vld [vmem:[#allocation2 + $0x28] sm:$0xf]  ;;  %v1743_v55 = vshll.u32 %v1649_v33, 16  ;;  %v475_v56 = vshrl.u32 %v420_v52, 16  ;;  %v478_v57 = vshll.u32 %v420_v52, 16 }
  0x48   : > { %953 = vrot.lane.b32.xlu1 %v887_v25, %s11520_s24  ;;  %v3736_v25 = vrot.slane %v3734_v17, 4  ;;  %v3733_v27 = vsel %vm11610_vm10, %v3728_v41, %v3732_v19  ;;  %v1187_v61 = vshll.u32 %v1085_v53, 16  ;;  %v1191_v63 = vshrl.u32 %v1085_v53, 16  ;;  %v1650_v62 = vld [vmem:[#allocation2 + $0x38] sm:$0xf] }
  0x49   : > { %4080 = vrot.lane.b32.xlu2 %v3709_v28, %s11527_s6  ;;  %v10220_v28 = vrot.slane %v2997_v23, 11  ;;  %v477_v59 = vrot.slane %v475_v56, 7  ;;  %v1184_v2 = vor.u32 %v1183_v49, %v1180_v48  ;;  %v3458_v5 = vld [vmem:[#allocation2 + $0x38] sm:$0xf]  ;;  %v1749_v8 = vshrl.u32 %v1650_v62, 16 }
  0x4a   : > { %v1189_v9 = vrot.slane %v1187_v61, 5  ;;  %v2370_v10 = vld [vmem:[#allocation2 + $0x34] sm:$0xf]  ;;  %v1193_v14 = vrot.slane %v1191_v63, 4  ;;  %v421_v15 = vld [vmem:[#allocation2 + $0x8] sm:$0xf] }
  0x4b   : > { %v3008_v42 = vsel %vm11623_vm11, %v10220_v28, %v3007_v29  ;;  %v480_v6 = vor.u32 %v478_v57, %v477_v59  ;;  %v1185_v12 = vrot.slane %v1184_v2, 4  ;;  %v2933_v17 = vld [vmem:[#allocation2 + $0x44] sm:$0xf]  ;;  %v1086_v18 = vld [vmem:[#allocation2 + $0x2c] sm:$0x1]  ;;  %v484_v41 = vshrl.u32 %v421_v15, 16 }
  0x4c   : > { %2048 = vrot.lane.b32.xlu0 %v1733_v35, %s11523_s27  ;;  %v3737_v35 = vor.u32 %v3736_v25, %v3732_v19  ;;  %v487_v19 = vshll.u32 %v421_v15, 16  ;;  %v1751_v20 = vrot.slane %v1749_v8, 7  ;;  %v2464_v23 = vshll.u32 %v2370_v10, 16  ;;  %v2932_v28 = vld [vmem:[#allocation2 + $0x40] sm:$0x8] }
  0x4d   : > { %v419_v58 = vld [vmem:[#allocation2] sm:$0x8]  ;;  %v486_v24 = vrot.slane %v484_v41, 7  ;;  %v482_v25 = vrot.slane %v477_v59, 4  ;;  %v1190_v26 = vsel %vm11610_vm10, %v1185_v12, %v1189_v9  ;;  %v3024_v29 = vshrl.u32 %v2933_v17, 16 }
  0x4e   : > { %v3738_v45 = vrot.slane %v3737_v35, 4  ;;  %v470_v0 = vshrl.u32 %v419_v58, 16  ;;  %v1194_v31 = vor.u32 %v1193_v14, %v1189_v9  ;;  %v1197_v32 = vshll.u32 %v1086_v18, 16  ;;  %v2176_v36 = vld [vmem:[#allocation2 + $0x38] sm:$0xf] }
  0x4f   : > { %v489_v33 = vor.u32 %v487_v19, %v486_v24  ;;  %v2371_v37 = vld [vmem:[#allocation2 + $0x38] sm:$0xf]  ;;  %v2466_v40 = vrot.slane %v2464_v23, 5  ;;  %v312_v63 = vld [vmem:[#allocation2 + $0x4c] sm:$0x1] }
  0x50   : > { %1519 = vrot.lane.b32.xlu1 %v1176_v43, %s11522_s26  ;;  %v1648_v43 = vld [vmem:[#allocation2 + $0x30] sm:$0x8]  ;;  %v3743_v60 = vsel %vm11610_vm10, %v3738_v45, %v3742_v47  ;;  %v1195_v45 = vrot.slane %v1194_v31, 4  ;;  %v2470_v49 = vshll.u32 %v2371_v37, 16  ;;  %v313_v2 = vsel %vm11594_vm6, 0, %v312_v63 }
  0x51   : > { %955 = vrot.lane.b32.xlu2 %v888_v46, %s11520_s24  ;;  %v890_v46 = vld [vmem:[#allocation2 + $0x28] sm:$0xf]  ;;  %v1735_v51 = vshrl.u32 %v1648_v43, 16  ;;  %v11750_v43 = vrot.slane %v3024_v29, 7  ;;  %314 = vst [vmem:[#allocation2 + $0x4c] sm:$0x1] %v313_v2 }
  0x52   : > { %v2472_v57 = vrot.slane %v2470_v49, 5  ;;  %v2175_v9 = vld [vmem:[#allocation2 + $0x34] sm:$0xf]  ;;  %v3655_v15 = vld [vmem:[#allocation2 + $0x48] sm:$0xf] }
  0x53   : > { %v362_v41 = vld [vmem:[%s11578_s23 + $0x20] sm:$0xf]  ;;  %v3031_v19 = vrot.slane %v11750_v43, 4  ;;  %v1089_v29 = vld [vmem:[#allocation2 + $0x3c] sm:$0x1] }
  0x54   : > { %2800 = vrot.lane.b32.xlu0 %v2449_v54, %s11524_s28  ;;  %v11729_v54 = vrot.slane %v1740_v44, 7  ;;  %v3027_v44 = vshll.u32 %v2933_v17, 16  ;;  %395 = vst.msk [vmem:[#allocation2 + $0x54] sm:$0xf] %vm226_vm0, %v362_v41 }
  0x56   : > { %v1745_v4 = vor.u32 %v1743_v55, %v11729_v54  ;;  %v1747_v34 = vrot.slane %v11729_v54, 4  ;;  %v3029_v53 = vor.u32 %v3027_v44, %v11750_v43  ;;  %v2934_v55 = vld [vmem:[#allocation2 + $0x48] sm:$0xf]  ;;  %v11794_v44 = vld [vmem:[#allocation2 + $0x44] sm:$0xf] }
  0x57   : > { %v3033_v59 = vshrl.u32 %v2934_v55, 16  ;;  %v3036_v8 = vshll.u32 %v2934_v55, 16 }
  0x58   : > { %2239 = vrot.lane.b32.xlu1 %v2173_v3, %s11521_s25  ;;  %v10205_v3 = vrot.slane %v1735_v51, 11  ;;  %v2474_v51 = vshrl.u32 %v2371_v37, 16  ;;  %v3656_v49 = vld [vmem:[#allocation2 + $0x4c] sm:$0x1] }
  0x59   : > { %2046 = vrot.lane.b32.xlu2 %v1724_v7, %s11523_s27  ;;  %v10187_v7 = vrot.slane %v470_v0, 11  ;;  %v2372_v0 = vld [vmem:[#allocation2 + $0x3c] sm:$0x1] }
  0x5a   : > { %v2476_v61 = vrot.slane %v2474_v51, 4 }
  0x5b   : > { %v481_v11 = vsel %vm11623_vm11, %v10187_v7, %v480_v6  ;;  %v3035_v7 = vrot.slane %v3033_v59, 7  ;;  %v2374_v59 = vld [vmem:[#allocation2 + $0x48] sm:$0xf] }
  0x5c   : > { %3332 = vrot.lane.b32.xlu0 %v3017_v13, %s11525_s29  ;;  %v1746_v13 = vsel %vm11623_vm11, %v10205_v3, %v1745_v4  ;;  %853 = vst.msk [vmem:[#allocation4] sm:$0xf] %vm226_vm0, %v481_v11  ;;  %v1088_v3 = vld [vmem:[#allocation2 + $0x38] sm:$0xf]  ;;  %v2480_v11 = vshll.u32 %v2372_v0, 16  ;;  %v3764_v0 = vshll.u32 %v3656_v49, 16 }
  0x5d   : > { %v1215_v14 = vshrl.u32 %v1088_v3, 16 }
  0x5e   : > { %v2482_v23 = vrot.slane %v2480_v11, 5 }
  0x60   : > { %2802 = vrot.lane.b32.xlu1 %v2459_v21, %s11524_s28  ;;  %v1752_v21 = vshll.u32 %v1650_v62, 16 }
  0x61   : > { %2241 = vrot.lane.b32.xlu2 %v2174_v22, %s11521_s25  ;;  %v2461_v22 = vshrl.u32 %v2370_v10, 16  ;;  %v2477_v10 = vor.u32 %v2476_v61, %v2472_v57  ;;  %v11809_v61 = vld [vmem:[#allocation2 + $0x40] sm:$0x8] }
  0x62   : > { %v1754_v35 = vor.u32 %v1752_v21, %v1751_v20  ;;  %v3038_v20 = vor.u32 %v3036_v8, %v3035_v7  ;;  %v3460_v21 = vld [vmem:[#allocation2 + $0x48] sm:$0xf] }
  0x63   : > { %v2463_v39 = vrot.slane %v2461_v22, 4  ;;  %v2478_v22 = vrot.slane %v2477_v10, 4  ;;  %v11256_v10 = vld [vmem:[%s15108_s1 + $0x8] sm:$0xff] }
  0x64   : > { %4084 = vrot.lane.b32.xlu0 %v3733_v27, %s11527_s6  ;;  %v889_v27 = vld [vmem:[#allocation2 + $0x24] sm:$0xf]  ;;  %v1755_v47 = vsel %vm11623_vm11, %v1747_v34, %v1754_v35  ;;  %v3039_v34 = vsel %vm11623_vm11, %v3031_v19, %v3038_v20  ;;  %v3766_v19 = vrot.slane %v3764_v0, 5  ;;  %v422_v20 = vld [vmem:[#allocation2 + $0x10] sm:$0x8] }
  0x65   : > { %v2467_v48 = vor.u32 %v2466_v40, %v2463_v39  ;;  %v2483_v35 = vsel %vm11610_vm10, %v2478_v22, %v2482_v23  ;;  %v1221_v39 = vshll.u32 %v1089_v29, 16  ;;  %v4245_v40 = vld [vmem:[%s15108_s1 + $0x10] sm:$0x3]  ;;  %v1765_v29 = vshll.u32 %v11794_v44, 16 }
  0x67   : > { %v2468_v56 = vrot.slane %v2467_v48, 4  ;;  %v891_v48 = vld [vmem:[#allocation2 + $0x34] sm:$0xf]  ;;  %v1223_v55 = vrot.slane %v1221_v39, 5 }
  0x68   : > { %3523 = vrot.lane.b32.xlu1 %v3457_v38, %s11526_s30  ;;  %v3019_v38 = vshrl.u32 %v2932_v28, 16  ;;  %v3754_v28 = vshll.u32 %v3655_v15, 16 }
  0x69   : > { %3330 = vrot.lane.b32.xlu2 %v3008_v42, %s11525_s29  ;;  %v490_v42 = vsel %vm11623_vm11, %v482_v25, %v489_v33  ;;  %v2473_v4 = vsel %vm11610_vm10, %v2468_v56, %v2472_v57  ;;  %v3758_v33 = vshrl.u32 %v3655_v15, 16  ;;  %v1087_v56 = vld [vmem:[#allocation2 + $0x34] sm:$0xf]  ;;  %v1762_v57 = vshrl.u32 %v11794_v44, 16  ;;  %v4710_v44 = vld [vmem:[#allocation3 + $0x4] sm:$0xf] }
  0x6a   : > { %854 = vst.msk [vmem:[#allocation4 + $0x24] sm:$0xf] %vm226_vm0, %v490_v42  ;;  %v10221_v52 = vrot.slane %v3019_v38, 11  ;;  %v3756_v38 = vrot.slane %v3754_v28, 5  ;;  %v4339_v42 = vunpack.c.l.b16 %v4245_v40  ;;  %v1205_v7 = vshll.u32 %v1087_v56, 16 }
  0x6b   : > { %v423_v15 = vld [vmem:[#allocation2 + $0x14] sm:$0xf]  ;;  %v315_v40 = vld [vmem:[#allocation2 + $0x5c] sm:$0x1] }
  0x6c   : > { %959 = vrot.lane.b32.xlu0 %v890_v46, %s11520_s24  ;;  %v1199_v46 = vrot.slane %v1197_v32, 5  ;;  %v3030_v58 = vsel %vm11623_vm11, %v10221_v52, %v3029_v53  ;;  %v4342_v51 = vpack.c.b16 %v4339_v42, %v4339_v42  ;;  %v1207_v22 = vrot.slane %v1205_v7, 5  ;;  %v2375_v42 = vld [vmem:[#allocation2 + $0x4c] sm:$0x1] }
  0x6e   : > { %v1200_v54 = vsel %vm11610_vm10, %v1195_v45, %v1199_v46  ;;  %v3760_v45 = vrot.slane %v3758_v33, 4  ;;  %v363_v46 = vld [vmem:[%s11578_s23 + $0x24] sm:$0xf]  ;;  %v500_v33 = vshll.u32 %v423_v15, 16 }
  0x6f   : > { %396 = vst.msk [vmem:[#allocation2 + $0x58] sm:$0xf] %vm226_vm0, %v363_v46 }
  0x70   : > { %4086 = vrot.lane.b32.xlu1 %v3743_v60, %s11527_s6  ;;  %v3654_v60 = vld [vmem:[#allocation2 + $0x44] sm:$0xf]  ;;  %v3761_v63 = vor.u32 %v3760_v45, %v3756_v38 }
  0x71   : > { %3525 = vrot.lane.b32.xlu2 %v3458_v5, %s11526_s30  ;;  %v3745_v5 = vshrl.u32 %v3654_v60, 16  ;;  %v3748_v6 = vshll.u32 %v3654_v60, 16  ;;  %v4396_v60 = vsel %vm4394_vm1, %v4342_v51, 0  ;;  %vm4345_vm1 = vcmask 293888  }
  0x72   : > { %4403 = vmatpush.bf16.msra.mxu0 %v4396_v60  ;;  %11473 = vmatpush.bf16.msra.mxu3 %v4396_v60  ;;  %v3762_v41 = vrot.slane %v3761_v63, 4  ;;  %v2177_v60 = vld [vmem:[#allocation2 + $0x44] sm:$0xf] }
  0x73   : > { %v3747_v17 = vrot.slane %v3745_v5, 4  ;;  %v3750_v18 = vrot.slane %v3748_v6, 5  ;;  %v3459_v5 = vld [vmem:[#allocation2 + $0x44] sm:$0xf]  ;;  %v1202_v6 = vshrl.u32 %v1087_v56, 16 }
  0x74   : > { %2050 = vrot.lane.b32.xlu0 %v1746_v13, %s11523_s27  ;;  %v1211_v13 = vshll.u32 %v1088_v3, 16  ;;  %v424_v3 = vld [vmem:[#allocation2 + $0x18] sm:$0xf] }
  0x75   : > { %v3751_v32 = vor.u32 %v3750_v18, %v3747_v17  ;;  %v1757_v17 = vshrl.u32 %v11809_v61, 16  ;;  %v11823_v18 = vrot.slane %v1762_v57, 7  ;;  %v2504_v57 = vshll.u32 %v2375_v42, 16 }
  0x76   : > { %v11777_v25 = vrot.slane %v1211_v13, 5  ;;  %v506_v13 = vshrl.u32 %v424_v3, 16  ;;  %4404 = vmatpush.bf16.msra.mxu0 %v11256_v10  ;;  %11474 = vmatpush.bf16.msra.mxu3 %v11256_v10  ;;  %v4763_v61 = vshrl.u32 %v4710_v44, 16  ;;  %v4766_v10 = vshll.u32 %v4710_v44, 16 }
  0x77   : > { %v3752_v43 = vrot.slane %v3751_v32, 4  ;;  %v492_v32 = vshrl.u32 %v422_v20, 16  ;;  %v1767_v51 = vor.u32 %v1765_v29, %v11823_v18 }
  0x78   : > { %1521 = vrot.lane.b32.xlu1 %v1190_v26, %s11522_s26  ;;  %v1217_v26 = vrot.slane %v1215_v14, 4  ;;  %v509_v14 = vshll.u32 %v424_v3, 16  ;;  %v508_v23 = vrot.slane %v506_v13, 7 }
  0x79   : > { %957 = vrot.lane.b32.xlu2 %v889_v27, %s11520_s24  ;;  %v261_v27 = vld [vmem:[#allocation2 + $0x50] sm:$0x8] }
  0x7a   : > { %v262_v31 = vsel %vm11581_vm4, 0, %v261_v27  ;;  %v1218_v37 = vor.u32 %v1217_v26, %v11777_v25  ;;  %v497_v26 = vshrl.u32 %v423_v15, 16 }
  0x7b   : > { %263 = vst [vmem:[#allocation2 + $0x50] sm:$0x8] %v262_v31 }
  0x7c   : > { %2245 = vrot.lane.b32.xlu0 %v2176_v36, %s11521_s25  ;;  %v499_v39 = vrot.slane %v497_v26, 7 }
  0x7e   : > { %v504_v46 = vrot.slane %v499_v39, 4 }
  0x80   : > { %2052 = vrot.lane.b32.xlu1 %v1755_v47, %s11523_s27  ;;  %v15127_v47 = vmov 0 }
  0x81   : > { %1523 = vrot.lane.b32.xlu2 %v1200_v54, %s11522_s26  ;;  %v15128_v47 = vsel %vm11798_vm14, 4294967295, %v15127_v47  ;;  %v1219_v54 = vrot.slane %v1218_v37, 4  ;;  %v511_v37 = vor.u32 %v509_v14, %v508_v23 }
  0x82   : > { %15129 = vst [vmem:[#allocation5_spill] sm:$0xff] %v15128_v47  ;;  %v2935_v23 = vld [vmem:[#allocation2 + $0x50] sm:$0x8] }
  0x83   : > { %v11763_v62 = vpop.permute.xlu2 %2042  ;;  %v1224_v11 = vsel %vm11610_vm10, %v1219_v54, %v1223_v55  ;;  %v1653_v54 = vld [vmem:[#allocation2 + $0x48] sm:$0xf]  ;;  %v316_v55 = vsel %vm11594_vm6, 0, %v315_v40 }
  0x84   : > { %3334 = vrot.lane.b32.xlu0 %v3030_v58, %s11525_s29  ;;  %v4536_v58 = vld [vmem:[#allocation3] sm:$0x8]  ;;  %317 = vst [vmem:[#allocation2 + $0x5c] sm:$0x1] %v316_v55  ;;  %v1771_v0 = vshrl.u32 %v1653_v54, 16 }
  0x85   : > { %v4537_v2 = vsel %vm11798_vm14, 0, %v4536_v58  ;;  %v512_v58 = vsel %vm11623_vm11, %v504_v46, %v511_v37  ;;  %v2178_v40 = vld [vmem:[#allocation2 + $0x48] sm:$0xf] }
  0x86   : > { %v950_v12 = vpop.permute.xlu0 %949  ;;  %4538 = vst [vmem:[#allocation3] sm:$0x8] %v4537_v2  ;;  %v2373_v2 = vld [vmem:[#allocation2 + $0x44] sm:$0xf] }
  0x87   : > { %1046 = vst.msk [vmem:[#allocation4] sm:$0xf] %vm1045_vm12, %v950_v12  ;;  %v2498_v12 = vshrl.u32 %v2374_v59, 16  ;;  %v2488_v13 = vshll.u32 %v2373_v2, 16 }
  0x88   : > { %2804 = vrot.lane.b32.xlu1 %v2473_v4, %s11524_s28  ;;  %v3757_v4 = vsel %vm11610_vm10, %v3752_v43, %v3756_v38  ;;  %v3767_v38 = vsel %vm11610_vm10, %v3762_v41, %v3766_v19  ;;  %v10188_v43 = vrot.slane %v492_v32, 11  ;;  %856 = vst.msk [vmem:[#allocation4 + $0x6c] sm:$0xf] %vm226_vm0, %v512_v58  ;;  %v1774_v41 = vshll.u32 %v1653_v54, 16  ;;  %v3658_v19 = vld [vmem:[#allocation2 + $0x58] sm:$0xf] }
  0x89   : > { %2243 = vrot.lane.b32.xlu2 %v2175_v9, %s11521_s25  ;;  %v2494_v9 = vshll.u32 %v2374_v59, 16  ;;  %v2490_v29 = vrot.slane %v2488_v13, 5 }
  0x8b   : > { %v11775_v24 = vpop.permute.xlu2 %2044  ;;  %v11826_v31 = vrot.slane %v2494_v9, 5  ;;  %v11857_v9 = vrot.slane %v4763_v61, 7  ;;  %v3659_v54 = vld [vmem:[#allocation2 + $0x5c] sm:$0x1] }
  0x8c   : > { %3529 = vrot.lane.b32.xlu0 %v3460_v21, %s11526_s30  ;;  %v1204_v21 = vrot.slane %v1202_v6, 4  ;;  %v3788_v61 = vshll.u32 %v3659_v54, 16 }
  0x8e   : > { %v952_v36 = vpop.permute.xlu0 %951  ;;  %v1208_v45 = vor.u32 %v1207_v22, %v1204_v21  ;;  %v11862_v21 = vld [vmem:[#allocation3 + $0x8] sm:$0xf] }
  0x8f   : > { %1047 = vst.msk [vmem:[#allocation4 + $0x24] sm:$0xf] %vm1045_vm12, %v952_v36  ;;  %v2500_v36 = vrot.slane %v2498_v12, 4  ;;  %v2485_v12 = vshrl.u32 %v2373_v2, 16  ;;  %v4772_v37 = vshrl.u32 %v11862_v21, 16 }
  0x90   : > { %3336 = vrot.lane.b32.xlu1 %v3039_v34, %s11525_s29  ;;  %v11255_v34 = vld [vmem:[%s15108_s1] sm:$0xff]  ;;  %v1209_v63 = vrot.slane %v1208_v45, 4 }
  0x91   : > { %2806 = vrot.lane.b32.xlu2 %v2483_v35, %s11524_s28  ;;  %v892_v35 = vld [vmem:[#allocation2 + $0x38] sm:$0xf]  ;;  %4405 = vmatpush.bf16.msra.mxu0 %v11255_v34  ;;  %v2501_v56 = vor.u32 %v2500_v36, %v11826_v31  ;;  %v4774_v58 = vrot.slane %v4772_v37, 7 }
  0x92   : > { %v11803_v52 = vpop.permute.xlu1 %2237  ;;  %11475 = vmatpush.bf16.msra.mxu3 %v11255_v34  ;;  %v1214_v15 = vsel %vm11610_vm10, %v1209_v63, %v11777_v25  ;;  %v3778_v25 = vshll.u32 %v3658_v19, 16  ;;  %v1769_v34 = vrot.slane %v11823_v18, 4 }
  0x93   : > { %v11805_v53 = vpop.permute.xlu2 %3328  ;;  %v2502_v7 = vrot.slane %v2501_v56, 4 }
  0x94   : > { %961 = vrot.lane.b32.xlu0 %v891_v48, %s11520_s24  ;;  %v502_v48 = vor.u32 %v500_v33, %v499_v39  ;;  %v4768_v33 = vor.u32 %v4766_v10, %v11857_v9  ;;  %v11879_v45 = vrot.slane %v3778_v25, 5 }
  0x96   : > { %v2236_v8 = vpop.permute.xlu0 %2235  ;;  %v503_v59 = vsel %vm11623_vm11, %v10188_v43, %v502_v48  ;;  %v1090_v43 = vld [vmem:[#allocation2 + $0x44] sm:$0xf] }
  0x97   : > { %855 = vst.msk [vmem:[#allocation4 + $0x48] sm:$0xf] %vm226_vm0, %v503_v59  ;;  %v1226_v55 = vshrl.u32 %v1090_v43, 16  ;;  %v1229_v56 = vshll.u32 %v1090_v43, 16 }
  0x98   : > { %4088 = vrot.lane.b32.xlu1 %v3757_v4, %s11527_s6 }
  0x99   : > { %3527 = vrot.lane.b32.xlu2 %v3459_v5, %s11526_s30  ;;  %v4709_v5 = vld [vmem:[#allocation3] sm:$0x8] }
  0x9a   : > { %v1514_v27 = vpop.permute.xlu1 %1513  ;;  %v4758_v14 = vshrl.u32 %v4709_v5, 16  ;;  %v1228_v5 = vrot.slane %v1226_v55, 4 }
  0x9b   : > { %v2797_v28 = vpop.permute.xlu2 %2796  ;;  %1610 = vst.msk [vmem:[#allocation4] sm:$0xf] %vm1609_vm15, %v1514_v27  ;;  %v3782_v27 = vshrl.u32 %v3658_v19, 16 }
  0x9c   : > { %2139 = vst.msk [vmem:[#allocation4] sm:$0xf] %vm15115_vm2, %v11763_v62  ;;  %1527 = vrot.lane.b32.xlu0 %v1224_v11, %s11522_s26  ;;  %v10206_v62 = vrot.slane %v1757_v17, 11  ;;  %v2936_v11 = vld [vmem:[#allocation2 + $0x54] sm:$0xf]  ;;  %v1773_v17 = vrot.slane %v1771_v0, 7 }
  0x9d   : > { %2332 = vst.msk [vmem:[#allocation4] sm:$0xf] %vm2331_vm5, %v2236_v8  ;;  %v2506_v8 = vrot.slane %v2504_v57, 5  ;;  %v3046_v26 = vshrl.u32 %v2936_v11, 16  ;;  %v10323_v32 = vrot.slane %v4758_v14, 11  ;;  %v3049_v44 = vshll.u32 %v2936_v11, 16 }
  0x9e   : > { %2893 = vst.msk [vmem:[#allocation4] sm:$0xf] %vm15114_vm7, %v2797_v28  ;;  %v11839_v49 = vpop.permute.xlu0 %2798  ;;  %v1768_v4 = vsel %vm11623_vm11, %v10206_v62, %v1767_v51  ;;  %v2487_v28 = vrot.slane %v2485_v12, 4  ;;  %v3784_v18 = vrot.slane %v3782_v27, 4  ;;  %v4775_v62 = vshll.u32 %v11862_v21, 16 }
  0x9f   : > { %v2507_v22 = vsel %vm11610_vm10, %v2502_v7, %v2506_v8  ;;  %v11874_v42 = vrot.slane %v3046_v26, 7  ;;  %v4769_v48 = vsel %vm11623_vm11, %v10323_v32, %v4768_v33  ;;  %v2937_v57 = vld [vmem:[#allocation2 + $0x58] sm:$0xf]  ;;  %v4770_v0 = vrot.slane %v11857_v9, 4  ;;  %v3657_v7 = vld [vmem:[#allocation2 + $0x54] sm:$0xf] }
  0xa0   : > { %963 = vrot.lane.b32.xlu1 %v892_v35, %s11520_s24  ;;  %v1776_v35 = vor.u32 %v1774_v41, %v1773_v17  ;;  %v2491_v46 = vor.u32 %v2490_v29, %v2487_v28  ;;  %v3055_v2 = vshrl.u32 %v2937_v57, 16  ;;  %v364_v8 = vld [vmem:[%s11578_s23 + $0x28] sm:$0xf]  ;;  %v4777_v10 = vor.u32 %v4775_v62, %v4774_v58  ;;  %v365_v12 = vld [vmem:[%s11578_s23 + $0x2c] sm:$0xf] }
  0xa1   : > { %4090 = vrot.lane.b32.xlu2 %v3767_v38, %s11527_s6  ;;  %v3041_v38 = vshrl.u32 %v2935_v23, 16  ;;  %v1091_v11 = vld [vmem:[#allocation2 + $0x48] sm:$0xf]  ;;  %v3790_v14 = vrot.slane %v3788_v61, 5  ;;  %v3058_v41 = vshll.u32 %v2937_v57, 16  ;;  %v3769_v19 = vshrl.u32 %v3657_v7, 16 }
  0xa2   : > { %v3327_v3 = vpop.permute.xlu1 %3326  ;;  %v1777_v51 = vsel %vm11623_vm11, %v1769_v34, %v1776_v35  ;;  %v2492_v63 = vrot.slane %v2491_v46, 4  ;;  %v3057_v17 = vrot.slane %v3055_v2, 7  ;;  %397 = vst.msk [vmem:[#allocation2 + $0x64] sm:$0xf] %vm226_vm0, %v364_v8  ;;  %v1235_v23 = vshll.u32 %v1091_v11, 16 }
  0xa3   : > { %v4081_v6 = vpop.permute.xlu2 %4080  ;;  %3423 = vst.msk [vmem:[#allocation4] sm:$0xf] %vm15113_vm8, %v3327_v3  ;;  %v10222_v59 = vrot.slane %v3041_v38, 11  ;;  %v11912_v26 = vld [vmem:[#allocation2 + $0x54] sm:$0xf]  ;;  %v4778_v25 = vsel %vm11623_vm11, %v4770_v0, %v4777_v10  ;;  %v3053_v28 = vrot.slane %v11874_v42, 4 }
  0xa4   : > { %2247 = vrot.lane.b32.xlu0 %v2177_v60, %s11521_s25  ;;  %v3051_v60 = vor.u32 %v3049_v44, %v11874_v42  ;;  %398 = vst.msk [vmem:[#allocation2 + $0x68] sm:$0xf] %vm226_vm0, %v365_v12  ;;  %v11920_v27 = vld [vmem:[#allocation2 + $0x58] sm:$0xf]  ;;  %v3060_v29 = vor.u32 %v3058_v41, %v3057_v17  ;;  %v3771_v32 = vrot.slane %v3769_v19, 4  ;;  %v11923_v37 = vrot.slane %v1235_v23, 5 }
  0xa5   : > { %v426_v38 = vld [vmem:[#allocation2 + $0x24] sm:$0xf]  ;;  %v1793_v44 = vshrl.u32 %v11920_v27, 16  ;;  %v2376_v46 = vld [vmem:[#allocation2 + $0x54] sm:$0xf]  ;;  %v1796_v2 = vshll.u32 %v11920_v27, 16 }
  0xa6   : > { %v3520_v20 = vpop.permute.xlu0 %3519  ;;  %v3052_v9 = vsel %vm11623_vm11, %v10222_v59, %v3051_v60  ;;  %v3462_v62 = vld [vmem:[#allocation2 + $0x58] sm:$0xf]  ;;  %v522_v57 = vshll.u32 %v426_v38, 16  ;;  %v2509_v58 = vshrl.u32 %v2376_v46, 16  ;;  %v2512_v59 = vshll.u32 %v2376_v46, 16 }
  0xa7   : > { %3616 = vst.msk [vmem:[#allocation4] sm:$0xf] %vm3615_vm9, %v3520_v20  ;;  %v3772_v20 = vshll.u32 %v3657_v7, 16  ;;  %v2377_v8 = vld [vmem:[#allocation2 + $0x58] sm:$0xf] }
  0xa8   : > { %2054 = vrot.lane.b32.xlu1 %v1768_v4, %s11523_s27  ;;  %4177 = vst.msk [vmem:[#allocation4] sm:$0xf] %vm4176_vm13, %v4081_v6  ;;  %v1231_v6 = vrot.slane %v1229_v56, 5  ;;  %v2514_v12 = vrot.slane %v2512_v59, 5  ;;  %v318_v41 = vld [vmem:[#allocation2 + $0x6c] sm:$0x1] }
  0xa9   : > { %1525 = vrot.lane.b32.xlu2 %v1214_v15, %s11522_s26  ;;  %v2497_v15 = vsel %vm11610_vm10, %v2492_v63, %v11826_v31  ;;  %v3774_v33 = vrot.slane %v3772_v20, 5  ;;  %v893_v19 = vld [vmem:[#allocation2 + $0x44] sm:$0xf]  ;;  %v2518_v27 = vshll.u32 %v2377_v8, 16 }
  0xaa   : > { %v1516_v36 = vpop.permute.xlu1 %1515 }
  0xab   : > { %v956_v39 = vpop.permute.xlu2 %955  ;;  %1611 = vst.msk [vmem:[#allocation4 + $0x24] sm:$0xf] %vm1609_vm15, %v1516_v36  ;;  %v3775_v54 = vor.u32 %v3774_v33, %v3771_v32  ;;  %v11959_v33 = vld [vmem:[#allocation2 + $0x64] sm:$0xf] }
  0xac   : > { %2140 = vst.msk [vmem:[#allocation4 + $0x24] sm:$0xf] %vm15115_vm2, %v11775_v24  ;;  %2810 = vrot.lane.b32.xlu0 %v2507_v22, %s11524_s28  ;;  %v1232_v22 = vor.u32 %v1231_v6, %v1228_v5  ;;  %v3068_v46 = vshrl.u32 %v11959_v33, 16 }
  0xad   : > { %2333 = vst.msk [vmem:[#allocation4 + $0x24] sm:$0xf] %vm2331_vm5, %v11803_v52 }
  0xae   : > { %2894 = vst.msk [vmem:[#allocation4 + $0x24] sm:$0xf] %vm15114_vm7, %v11839_v49  ;;  %v4083_v24 = vpop.permute.xlu0 %4082  ;;  %v3785_v49 = vor.u32 %v3784_v18, %v11879_v45  ;;  %v1233_v36 = vrot.slane %v1232_v22, 4  ;;  %v519_v18 = vshrl.u32 %v426_v38, 16 }
  0xaf   : > { %3424 = vst.msk [vmem:[#allocation4 + $0x24] sm:$0xf] %vm15113_vm8, %v11805_v53  ;;  %v11892_v52 = vld [vmem:[#allocation4] sm:$0xf]  ;;  %v3461_v53 = vld [vmem:[#allocation2 + $0x54] sm:$0xf] }
  0xb0   : > { %2249 = vrot.lane.b32.xlu1 %v2178_v40, %s11521_s25  ;;  %5141 = vst [vmem:[#allocation4] sm:$0xf] %v4769_v48  ;;  %v3786_v13 = vrot.slane %v3785_v49, 4  ;;  %v1784_v40 = vshrl.u32 %v11912_v26, 16  ;;  %v425_v48 = vld [vmem:[#allocation2 + $0x20] sm:$0x8]  ;;  %v1238_v49 = vsel %vm11610_vm10, %v1233_v36, %v11923_v37 }
  0xb1   : > { %2056 = vrot.lane.b32.xlu2 %v1777_v51, %s11523_s27  ;;  %1049 = vst.msk [vmem:[#allocation4 + $0x6c] sm:$0xf] %vm1045_vm12, %v956_v39  ;;  %v1239_v39 = vshrl.u32 %v1091_v11, 16  ;;  %v3061_v51 = vsel %vm11623_vm11, %v3053_v28, %v3060_v29  ;;  %v521_v55 = vrot.slane %v519_v18, 7  ;;  %v2511_v11 = vrot.slane %v2509_v58, 4 }
  0xb2   : > { %v3522_v3 = vpop.permute.xlu1 %3521  ;;  %v3791_v31 = vsel %vm11610_vm10, %v3786_v13, %v3790_v14  ;;  %v11940_v0 = vrot.slane %v1784_v40, 7  ;;  %v319_v28 = vsel %vm11594_vm6, 0, %v318_v41  ;;  %v264_v36 = vld [vmem:[#allocation2 + $0x60] sm:$0x8]  ;;  %v1654_v40 = vld [vmem:[#allocation2 + $0x50] sm:$0x8] }
  0xb3   : > { %v2047_v4 = vpop.permute.xlu2 %2046  ;;  %3617 = vst.msk [vmem:[#allocation4 + $0x24] sm:$0xf] %vm3615_vm9, %v3522_v3  ;;  %v1241_v61 = vrot.slane %v1239_v39, 4  ;;  %v524_v63 = vor.u32 %v522_v57, %v521_v55  ;;  %v3776_v3 = vrot.slane %v3775_v54, 4  ;;  %v265_v18 = vsel %vm11581_vm4, 0, %v264_v36 }
  0xb4   : > { %4178 = vst.msk [vmem:[#allocation4 + $0x24] sm:$0xf] %vm4176_vm13, %v4083_v24  ;;  %3531 = vrot.lane.b32.xlu0 %v3461_v53, %s11526_s30  ;;  %v514_v24 = vshrl.u32 %v425_v48, 16  ;;  %v1795_v53 = vrot.slane %v1793_v44, 7  ;;  %v1791_v20 = vrot.slane %v11940_v0, 4  ;;  %v2522_v44 = vshrl.u32 %v2377_v8, 16 }
  0xb5   : > { %v1242_v14 = vor.u32 %v1241_v61, %v11923_v37  ;;  %v3781_v22 = vsel %vm11610_vm10, %v3776_v3, %v11879_v45  ;;  %320 = vst [vmem:[#allocation2 + $0x6c] sm:$0x1] %v319_v28  ;;  %v1787_v54 = vshll.u32 %v11912_v26, 16  ;;  %v2179_v3 = vld [vmem:[#allocation2 + $0x54] sm:$0xf] }
  0xb6   : > { %v1518_v21 = vpop.permute.xlu0 %1517  ;;  %v10189_v60 = vrot.slane %v514_v24, 11  ;;  %v3660_v24 = vld [vmem:[#allocation2 + $0x64] sm:$0xf]  ;;  %266 = vst [vmem:[#allocation2 + $0x60] sm:$0x8] %v265_v18 }
  0xb7   : > { %v1243_v29 = vrot.slane %v1242_v14, 4  ;;  %v3793_v58 = vshrl.u32 %v3660_v24, 16  ;;  %v3796_v59 = vshll.u32 %v3660_v24, 16  ;;  %v367_v36 = vld [vmem:[%s11578_s23 + $0x34] sm:$0xf] }
  0xb8   : > { %3338 = vrot.lane.b32.xlu1 %v3052_v9, %s11525_s29  ;;  %v525_v9 = vsel %vm11623_vm11, %v10189_v60, %v524_v63  ;;  %v3070_v60 = vrot.slane %v3068_v46, 7  ;;  %v1789_v63 = vor.u32 %v1787_v54, %v11940_v0  ;;  %400 = vst.msk [vmem:[#allocation2 + $0x78] sm:$0xf] %vm226_vm0, %v367_v36  ;;  %v1658_v18 = vld [vmem:[#allocation2 + $0x64] sm:$0xf] }
  0xb9   : > { %2808 = vrot.lane.b32.xlu2 %v2497_v15, %s11524_s28  ;;  %v526_v15 = vrot.slane %v521_v55, 4  ;;  %857 = vst.msk [vmem:[#allocation4 + $0x90] sm:$0xf] %vm226_vm0, %v525_v9  ;;  %v1806_v24 = vshrl.u32 %v1658_v18, 16 }
  0xba   : > { %v954_v34 = vpop.permute.xlu1 %953  ;;  %v3075_v8 = vrot.slane %v3070_v60, 4 }
  0xbb   : > { %v2242_v35 = vpop.permute.xlu2 %2241  ;;  %v11239_v43 = vld [vmem:[#allocation4 + $0x20] sm:$0xf0]  ;;  %1048 = vst.msk [vmem:[#allocation4 + $0x48] sm:$0xf] %vm1045_vm12, %v954_v34 }
  0xbc   : > { %5142 = vst [vmem:[#allocation4 + $0x24] sm:$0xf] %v4778_v25  ;;  %v10238_v42 = vor.u32 %v11239_v43, %v11892_v52  ;;  %4094 = vrot.lane.b32.xlu0 %v3791_v31, %s11527_s6  ;;  %v1092_v52 = vld [vmem:[#allocation2 + $0x4c] sm:$0x1]  ;;  %v2515_v31 = vor.u32 %v2514_v12, %v2511_v11  ;;  %v2520_v43 = vrot.slane %v2518_v27, 5 }
  0xbd   : > { %1612 = vst.msk [vmem:[#allocation4 + $0x48] sm:$0xf] %vm1609_vm15, %v1518_v21  ;;  %v1245_v6 = vshll.u32 %v1092_v52, 16  ;;  %v1798_v21 = vor.u32 %v1796_v2, %v1795_v53  ;;  %v2378_v53 = vld [vmem:[#allocation2 + $0x5c] sm:$0x1] }
  0xbe   : > { %10307 = vmatmul.msk.bf16.vlgmr.msra.gmra.mxu0 %vm4345_vm1, %v10238_v42  ;;  %2141 = vst.msk [vmem:[#allocation4 + $0x48] sm:$0xf] %vm15115_vm2, %v2047_v4  ;;  %v2049_v56 = vpop.permute.xlu0 %2048  ;;  %v427_v4 = vld [vmem:[#allocation2 + $0x28] sm:$0xf]  ;;  %v2516_v38 = vrot.slane %v2515_v31, 4 }
  0xbf   : > { %v528_v10 = vshrl.u32 %v427_v4, 16  ;;  %v531_v13 = vshll.u32 %v427_v4, 16  ;;  %v1247_v32 = vrot.slane %v1245_v6, 5  ;;  %v1799_v34 = vsel %vm11623_vm11, %v1791_v20, %v1798_v21  ;;  %v894_v42 = vld [vmem:[#allocation2 + $0x48] sm:$0xf] }
  0xc0   : > { %3533 = vrot.lane.b32.xlu1 %v3462_v62, %s11526_s30  ;;  %v2521_v57 = vsel %vm11610_vm10, %v2516_v38, %v2520_v43  ;;  %v3798_v6 = vrot.slane %v3796_v59, 5  ;;  %v3661_v11 = vld [vmem:[#allocation2 + $0x68] sm:$0xf]  ;;  %v2938_v21 = vld [vmem:[#allocation2 + $0x60] sm:$0x8] }
  0xc1   : > { %3340 = vrot.lane.b32.xlu2 %v3061_v51, %s11525_s29  ;;  %v530_v17 = vrot.slane %v528_v10, 7  ;;  %v1248_v62 = vsel %vm11610_vm10, %v1243_v29, %v1247_v32  ;;  %v1779_v51 = vshrl.u32 %v1654_v40, 16  ;;  %v3806_v20 = vshrl.u32 %v3661_v11, 16  ;;  %v2180_v29 = vld [vmem:[#allocation2 + $0x58] sm:$0xf] }
  0xc2   : > { %v1520_v5 = vpop.permute.xlu1 %1519  ;;  %v3063_v32 = vshrl.u32 %v2938_v21, 16  ;;  %v1094_v59 = vld [vmem:[#allocation2 + $0x58] sm:$0xf] }
  0xc3   : > { %v3331_v7 = vpop.permute.xlu2 %3330  ;;  %1613 = vst.msk [vmem:[#allocation4 + $0x6c] sm:$0xf] %vm1609_vm15, %v1520_v5  ;;  %v533_v25 = vor.u32 %v531_v13, %v530_v17  ;;  %v10207_v61 = vrot.slane %v1779_v51, 11  ;;  %v3795_v5 = vrot.slane %v3793_v58, 4  ;;  %v3802_v13 = vshll.u32 %v3661_v11, 16 }
  0xc4   : > { %2142 = vst.msk [vmem:[#allocation4 + $0x6c] sm:$0xf] %vm15115_vm2, %v2049_v56  ;;  %1529 = vrot.lane.b32.xlu0 %v1238_v49, %s11522_s26  ;;  %v2524_v56 = vrot.slane %v2522_v44, 4 }
  0xc5   : > { %2335 = vst.msk [vmem:[#allocation4 + $0x6c] sm:$0xf] %vm2331_vm5, %v2242_v35  ;;  %v534_v45 = vsel %vm11623_vm11, %v526_v15, %v533_v25  ;;  %v2940_v35 = vld [vmem:[#allocation2 + $0x68] sm:$0xf]  ;;  %v1790_v0 = vsel %vm11623_vm11, %v10207_v61, %v1789_v63  ;;  %v3799_v9 = vor.u32 %v3798_v6, %v3795_v5  ;;  %v3804_v31 = vrot.slane %v3802_v13, 5 }
  0xc6   : > { %v2801_v23 = vpop.permute.xlu0 %2800  ;;  %858 = vst.msk [vmem:[#allocation4 + $0xb4] sm:$0xf] %vm226_vm0, %v534_v45  ;;  %v3077_v48 = vshrl.u32 %v2940_v35, 16  ;;  %v3080_v52 = vshll.u32 %v2940_v35, 16  ;;  %v2525_v4 = vor.u32 %v2524_v56, %v2520_v43  ;;  %v3071_v45 = vshll.u32 %v11959_v33, 16 }
  0xc7   : > { %v3800_v25 = vrot.slane %v3799_v9, 4  ;;  %v3808_v35 = vrot.slane %v3806_v20, 4  ;;  %v1093_v33 = vld [vmem:[#allocation2 + $0x54] sm:$0xf]  ;;  %v3662_v43 = vld [vmem:[#allocation2 + $0x6c] sm:$0x1] }
  0xc8   : > { %965 = vrot.lane.b32.xlu1 %v893_v19, %s11520_s24  ;;  %v3079_v49 = vrot.slane %v3077_v48, 7  ;;  %v2526_v14 = vrot.slane %v2525_v4, 4  ;;  %v3073_v40 = vor.u32 %v3071_v45, %v3070_v60  ;;  %v1250_v46 = vshrl.u32 %v1093_v33, 16  ;;  %v1657_v56 = vld [vmem:[#allocation2 + $0x60] sm:$0x8] }
  0xc9   : > { %4092 = vrot.lane.b32.xlu2 %v3781_v22, %s11527_s6  ;;  %v267_v22 = vld [vmem:[#allocation2 + $0x70] sm:$0x8]  ;;  %v1253_v48 = vshll.u32 %v1093_v33, 16  ;;  %v3812_v51 = vshll.u32 %v3662_v43, 16  ;;  %v1801_v63 = vshrl.u32 %v1657_v56, 16 }
  0xca   : > { %v2240_v37 = vpop.permute.xlu1 %2239  ;;  %v3082_v10 = vor.u32 %v3080_v52, %v3079_v49  ;;  %v268_v27 = vsel %vm11581_vm4, 0, %v267_v22  ;;  %v896_v52 = vld [vmem:[#allocation2 + $0x58] sm:$0xf]  ;;  %v1252_v60 = vrot.slane %v1250_v46, 4  ;;  %v895_v46 = vld [vmem:[#allocation2 + $0x54] sm:$0xf] }
  0xcb   : > { %v3526_v39 = vpop.permute.xlu2 %3525  ;;  %2334 = vst.msk [vmem:[#allocation4 + $0x48] sm:$0xf] %vm2331_vm5, %v2240_v37  ;;  %v3805_v37 = vsel %vm11610_vm10, %v3800_v25, %v3804_v31  ;;  %v1255_v49 = vrot.slane %v1253_v48, 5  ;;  %v3814_v61 = vrot.slane %v3812_v51, 5 }
  0xcc   : > { %2895 = vst.msk [vmem:[#allocation4 + $0x48] sm:$0xf] %vm15114_vm7, %v2801_v23  ;;  %2060 = vrot.lane.b32.xlu0 %v1799_v34, %s11523_s27  ;;  %v3083_v17 = vsel %vm11623_vm11, %v3075_v8, %v3082_v10  ;;  %v366_v23 = vld [vmem:[%s11578_s23 + $0x30] sm:$0xf]  ;;  %v1259_v8 = vshll.u32 %v1094_v59, 16 }
  0xcd   : > { %3425 = vst.msk [vmem:[#allocation4 + $0x48] sm:$0xf] %vm15113_vm8, %v3331_v7  ;;  %v2528_v7 = vshll.u32 %v2378_v53, 16  ;;  %v1809_v53 = vshll.u32 %v1658_v18, 16  ;;  %v428_v10 = vld [vmem:[#allocation2 + $0x30] sm:$0x8]  ;;  %v1256_v11 = vor.u32 %v1255_v49, %v1252_v60 }
  0xce   : > { %v3333_v55 = vpop.permute.xlu0 %3332  ;;  %269 = vst [vmem:[#allocation2 + $0x70] sm:$0x8] %v268_v27  ;;  %v536_v9 = vshrl.u32 %v428_v10, 16 }
  0xcf   : > { %v2530_v15 = vrot.slane %v2528_v7, 5  ;;  %399 = vst.msk [vmem:[#allocation2 + $0x74] sm:$0xf] %vm226_vm0, %v366_v23  ;;  %v430_v23 = vld [vmem:[#allocation2 + $0x38] sm:$0xf]  ;;  %v1257_v27 = vrot.slane %v1256_v11, 4 }
  0xd0   : > { %1531 = vrot.lane.b32.xlu1 %v1248_v62, %s11522_s26  ;;  %v3463_v62 = vld [vmem:[#allocation2 + $0x64] sm:$0xf]  ;;  %v10190_v21 = vrot.slane %v536_v9, 11  ;;  %v553_v45 = vshll.u32 %v430_v23, 16  ;;  %v2943_v9 = vld [vmem:[#allocation2 + $0x78] sm:$0xf] }
  0xd1   : > { %967 = vrot.lane.b32.xlu2 %v894_v42, %s11520_s24  ;;  %v2531_v28 = vsel %vm11610_vm10, %v2526_v14, %v2530_v15  ;;  %v3809_v42 = vor.u32 %v3808_v35, %v3804_v31  ;;  %v1263_v15 = vshrl.u32 %v1094_v59, 16  ;;  %v550_v31 = vshrl.u32 %v430_v23, 16  ;;  %v2182_v59 = vld [vmem:[#allocation2 + $0x68] sm:$0xf] }
  0xd2   : > { %v2803_v26 = vpop.permute.xlu1 %2802 }
  0xd3   : > { %v958_v2 = vpop.permute.xlu2 %957  ;;  %2896 = vst.msk [vmem:[#allocation4 + $0x6c] sm:$0xf] %vm15114_vm7, %v2803_v26  ;;  %v12016_v26 = vrot.slane %v1806_v24, 7  ;;  %v1265_v35 = vrot.slane %v1263_v15, 4  ;;  %v3099_v15 = vshrl.u32 %v2943_v9, 16 }
  0xd4   : > { %3426 = vst.msk [vmem:[#allocation4 + $0x6c] sm:$0xf] %vm15113_vm8, %v3333_v55  ;;  %2812 = vrot.lane.b32.xlu0 %v2521_v57, %s11524_s28  ;;  %v3810_v57 = vrot.slane %v3809_v42, 4 }
  0xd5   : > { %3619 = vst.msk [vmem:[#allocation4 + $0x6c] sm:$0xf] %vm3615_vm9, %v3526_v39  ;;  %v10223_v39 = vrot.slane %v3063_v32, 11  ;;  %v2941_v51 = vld [vmem:[#allocation2 + $0x70] sm:$0x8] }
  0xd6   : > { %v4085_v12 = vpop.permute.xlu0 %4084  ;;  %1050 = vst.msk [vmem:[#allocation4 + $0x90] sm:$0xf] %vm1045_vm12, %v958_v2  ;;  %v429_v2 = vld [vmem:[#allocation2 + $0x34] sm:$0xf]  ;;  %v3815_v14 = vsel %vm11610_vm10, %v3810_v57, %v3814_v61  ;;  %v3085_v61 = vshrl.u32 %v2941_v51, 16 }
  0xd7   : > { %v3074_v54 = vsel %vm11623_vm11, %v10223_v39, %v3073_v40  ;;  %v541_v6 = vshrl.u32 %v429_v2, 16  ;;  %v2942_v33 = vld [vmem:[#allocation2 + $0x74] sm:$0xf] }
  0xd8   : > { %2251 = vrot.lane.b32.xlu1 %v2179_v3, %s11521_s25 }
  0xd9   : > { %2058 = vrot.lane.b32.xlu2 %v1790_v0, %s11523_s27  ;;  %v544_v0 = vshll.u32 %v429_v2, 16  ;;  %v543_v13 = vrot.slane %v541_v6, 7  ;;  %v3093_v2 = vshll.u32 %v2942_v33, 16 }
  0xda   : > { %v3524_v41 = vpop.permute.xlu1 %3523 }
  0xdb   : > { %v1524_v19 = vpop.permute.xlu2 %1523  ;;  %3618 = vst.msk [vmem:[#allocation4 + $0x48] sm:$0xf] %vm3615_vm9, %v3524_v41  ;;  %v1811_v41 = vor.u32 %v1809_v53, %v12016_v26  ;;  %v546_v22 = vor.u32 %v544_v0, %v543_v13  ;;  %v548_v36 = vrot.slane %v543_v13, 4  ;;  %v10224_v0 = vrot.slane %v3085_v61, 11 }
  0xdc   : > { %4179 = vst.msk [vmem:[#allocation4 + $0x48] sm:$0xf] %vm4176_vm13, %v4085_v12  ;;  %3344 = vrot.lane.b32.xlu0 %v3083_v17, %s11525_s29  ;;  %v1659_v12 = vld [vmem:[#allocation2 + $0x68] sm:$0xf]  ;;  %v10208_v17 = vrot.slane %v1801_v63, 11 }
  0xdd   : > { %v1815_v25 = vshrl.u32 %v1659_v12, 16  ;;  %v547_v32 = vsel %vm11623_vm11, %v10190_v21, %v546_v22  ;;  %v2380_v63 = vld [vmem:[#allocation2 + $0x68] sm:$0xf]  ;;  %v321_v22 = vld [vmem:[#allocation2 + $0x7c] sm:$0x1] }
  0xde   : > { %v960_v34 = vpop.permute.xlu0 %959  ;;  %859 = vst.msk [vmem:[#allocation4 + $0xd8] sm:$0xf] %vm226_vm0, %v547_v32  ;;  %v2546_v10 = vshrl.u32 %v2380_v63, 16  ;;  %v1097_v21 = vld [vmem:[#allocation2 + $0x68] sm:$0xf]  ;;  %v3101_v32 = vrot.slane %v3099_v15, 7 }
  0xdf   : > { %1051 = vst.msk [vmem:[#allocation4 + $0xb4] sm:$0xf] %vm1045_vm12, %v960_v34  ;;  %v1812_v34 = vsel %vm11623_vm11, %v10208_v17, %v1811_v41  ;;  %v1817_v43 = vrot.slane %v1815_v25, 7  ;;  %v3663_v17 = vld [vmem:[#allocation2 + $0x74] sm:$0xf] }
  0xe0   : > { %2814 = vrot.lane.b32.xlu1 %v2531_v28, %s11524_s28  ;;  %1615 = vst.msk [vmem:[#allocation4 + $0xb4] sm:$0xf] %vm1609_vm15, %v1524_v19  ;;  %v3464_v19 = vld [vmem:[#allocation2 + $0x68] sm:$0xf]  ;;  %v1261_v28 = vrot.slane %v1259_v8, 5  ;;  %v2542_v8 = vshll.u32 %v2380_v63, 16 }
  0xe1   : > { %2253 = vrot.lane.b32.xlu2 %v2180_v29, %s11521_s25  ;;  %v2379_v29 = vld [vmem:[#allocation2 + $0x64] sm:$0xf] }
  0xe2   : > { %v4087_v38 = vpop.permute.xlu1 %4086  ;;  %v1262_v42 = vsel %vm11610_vm10, %v1257_v27, %v1261_v28  ;;  %v2533_v48 = vshrl.u32 %v2379_v29, 16  ;;  %v1266_v24 = vor.u32 %v1265_v35, %v1261_v28  ;;  %v2544_v41 = vrot.slane %v2542_v8, 5  ;;  %v432_v15 = vld [vmem:[#allocation2 + $0x44] sm:$0xf] }
  0xe3   : > { %v2244_v44 = vpop.permute.xlu2 %2243  ;;  %4180 = vst.msk [vmem:[#allocation4 + $0x6c] sm:$0xf] %vm4176_vm13, %v4087_v38  ;;  %v10241_v58 = vld [vmem:[#allocation4 + $0x48] sm:$0xf]  ;;  %v1095_v38 = vld [vmem:[#allocation2 + $0x5c] sm:$0x1] }
  0xe4   : > { %4096 = vrot.lane.b32.xlu0 %v3805_v37, %s11527_s6  ;;  %v552_v37 = vrot.slane %v550_v31, 7  ;;  %v2535_v60 = vrot.slane %v2533_v48, 4  ;;  %v2381_v31 = vld [vmem:[#allocation2 + $0x6c] sm:$0x1]  ;;  %v3817_v27 = vshrl.u32 %v3663_v17, 16  ;;  %v3820_v28 = vshll.u32 %v3663_v17, 16 }
  0xe5   : > { %v433_v17 = vld [vmem:[#allocation2 + $0x48] sm:$0xf] }
  0xe6   : > { %v2051_v55 = vpop.permute.xlu0 %2050  ;;  %v555_v18 = vor.u32 %v553_v45, %v552_v37  ;;  %v1283_v45 = vshll.u32 %v1097_v21, 16  ;;  %v2181_v37 = vld [vmem:[#allocation2 + $0x64] sm:$0xf] }
  0xe8   : > { %3535 = vrot.lane.b32.xlu1 %v3463_v62, %s11526_s30  ;;  %v2536_v62 = vshll.u32 %v2379_v29, 16  ;;  %v556_v56 = vsel %vm11623_vm11, %v548_v36, %v555_v18  ;;  %v322_v29 = vsel %vm11594_vm6, 0, %v321_v22  ;;  %v3102_v36 = vshll.u32 %v2943_v9, 16  ;;  %v3664_v18 = vld [vmem:[#allocation2 + $0x78] sm:$0xf] }
  0xe9   : > { %3342 = vrot.lane.b32.xlu2 %v3074_v54, %s11525_s29  ;;  %v3090_v54 = vshrl.u32 %v2942_v33, 16  ;;  %860 = vst.msk [vmem:[#allocation4 + $0xfc] sm:$0xf] %vm226_vm0, %v556_v56  ;;  %v563_v22 = vshrl.u32 %v432_v15, 16 }
  0xea   : > { %v1522_v3 = vpop.permute.xlu1 %1521  ;;  %v11240_v4 = vld [vmem:[#allocation4 + $0x68] sm:$0xf0]  ;;  %v2538_v49 = vrot.slane %v2536_v62, 5  ;;  %323 = vst [vmem:[#allocation2 + $0x7c] sm:$0x1] %v322_v29  ;;  %v3104_v48 = vor.u32 %v3102_v36, %v3101_v32 }
  0xeb   : > { %v2807_v5 = vpop.permute.xlu2 %2806  ;;  %1614 = vst.msk [vmem:[#allocation4 + $0x90] sm:$0xf] %vm1609_vm15, %v1522_v3  ;;  %v10242_v7 = vor.u32 %v11240_v4, %v10241_v58  ;;  %v12045_v53 = vrot.slane %v3090_v54, 7  ;;  %v1267_v3 = vrot.slane %v1266_v24, 4  ;;  %v3466_v62 = vld [vmem:[#allocation2 + $0x78] sm:$0xf] }
  0xec   : > { %2143 = vst.msk [vmem:[#allocation4 + $0x90] sm:$0xf] %vm15115_vm2, %v2051_v55  ;;  %971 = vrot.lane.b32.xlu0 %v896_v52, %s11520_s24  ;;  %v1269_v55 = vshll.u32 %v1095_v38, 16  ;;  %v1813_v52 = vrot.slane %v12016_v26, 4  ;;  %v270_v24 = vld [vmem:[#allocation2 + $0x80] sm:$0x8] }
  0xed   : > { %10308 = vmatmul.msk.bf16.gmra.mxu0 %vm4345_vm1, %v10242_v7  ;;  %2336 = vst.msk [vmem:[#allocation4 + $0x90] sm:$0xf] %vm2331_vm5, %v2244_v44  ;;  %v1818_v44 = vshll.u32 %v1659_v12, 16  ;;  %v2539_v7 = vor.u32 %v2538_v49, %v2535_v60  ;;  %v3095_v11 = vor.u32 %v3093_v2, %v12045_v53  ;;  %v3097_v38 = vrot.slane %v12045_v53, 4  ;;  %v1098_v49 = vld [vmem:[#allocation2 + $0x6c] sm:$0x1] }
  0xee   : > { %v2246_v20 = vpop.permute.xlu0 %2245  ;;  %v1271_v4 = vrot.slane %v1269_v55, 5  ;;  %v3830_v60 = vshrl.u32 %v3664_v18, 16  ;;  %v3465_v29 = vld [vmem:[#allocation2 + $0x74] sm:$0xf] }
  0xef   : > { %v1820_v58 = vor.u32 %v1818_v44, %v1817_v43  ;;  %v3819_v43 = vrot.slane %v3817_v27, 4  ;;  %v3822_v44 = vrot.slane %v3820_v28, 5  ;;  %v3105_v63 = vsel %vm11623_vm11, %v3097_v38, %v3104_v48  ;;  %v431_v27 = vld [vmem:[#allocation2 + $0x40] sm:$0x8] }
  0xf0   : > { %4098 = vrot.lane.b32.xlu1 %v3815_v14, %s11527_s6  ;;  %v1272_v12 = vsel %vm11610_vm10, %v1267_v3, %v1271_v4  ;;  %v2540_v14 = vrot.slane %v2539_v7, 4  ;;  %v3832_v8 = vrot.slane %v3830_v60, 4 }
  0xf1   : > { %3537 = vrot.lane.b32.xlu2 %v3464_v19, %s11526_s30  ;;  %v1821_v26 = vsel %vm11623_vm11, %v1813_v52, %v1820_v58  ;;  %v3096_v19 = vsel %vm11623_vm11, %v10224_v0, %v3095_v11  ;;  %v3823_v52 = vor.u32 %v3822_v44, %v3819_v43  ;;  %v3826_v58 = vshll.u32 %v3664_v18, 16  ;;  %v12090_v0 = vld [vmem:[#allocation2 + $0x74] sm:$0xf]  ;;  %v3665_v11 = vld [vmem:[#allocation2 + $0x7c] sm:$0x1] }
  0xf2   : > { %v2053_v39 = vpop.permute.xlu1 %2052  ;;  %v2545_v35 = vsel %vm11610_vm10, %v2540_v14, %v2544_v41  ;;  %v3836_v32 = vshll.u32 %v3665_v11, 16  ;;  %v1828_v36 = vshrl.u32 %v12090_v0, 16  ;;  %v11407_v43 = vld [vmem:[%s15110_s3 + $0x30] sm:$0xff]  ;;  %v575_v18 = vshll.u32 %v433_v17, 16 }
  0xf3   : > { %v3528_v40 = vpop.permute.xlu2 %3527  ;;  %2144 = vst.msk [vmem:[#allocation4 + $0xb4] sm:$0xf] %vm15115_vm2, %v2053_v39  ;;  %v3824_v3 = vrot.slane %v3823_v52, 4  ;;  %v3828_v4 = vrot.slane %v3826_v58, 5 }
  0xf4   : > { %2337 = vst.msk [vmem:[#allocation4 + $0xb4] sm:$0xf] %vm2331_vm5, %v2246_v20  ;;  %2062 = vrot.lane.b32.xlu0 %v1812_v34, %s11523_s27  ;;  %v2548_v20 = vrot.slane %v2546_v10, 4  ;;  %v1287_v34 = vshrl.u32 %v1097_v21, 16  ;;  %v1096_v10 = vld [vmem:[#allocation2 + $0x64] sm:$0xf] }
  0xf5   : > { %2898 = vst.msk [vmem:[#allocation4 + $0xb4] sm:$0xf] %vm15114_vm7, %v2807_v5  ;;  %v1274_v21 = vshrl.u32 %v1096_v10, 16  ;;  %v3829_v28 = vsel %vm11610_vm10, %v3824_v3, %v3828_v4  ;;  %v1831_v3 = vshll.u32 %v12090_v0, 16  ;;  %v1662_v0 = vld [vmem:[#allocation2 + $0x78] sm:$0xf] }
  0xf6   : > { %v3335_v57 = vpop.permute.xlu0 %3334  ;;  %v2549_v39 = vor.u32 %v2548_v20, %v2544_v41  ;;  %v11408_v20 = vld [vmem:[%s15110_s3 + $0x38] sm:$0xff] }
  0xf7   : > { %9258 = vmatpush.bf16.msra.mxu1 %v11408_v20  ;;  %11476 = vmatpush.bf16.msra.mxu2 %v11408_v20 }
  0xf8   : > { %1533 = vrot.lane.b32.xlu1 %v1262_v42, %s11522_s26  ;;  %v12073_v42 = vrot.slane %v1283_v45, 5  ;;  %v2550_v51 = vrot.slane %v2549_v39, 4  ;;  %v565_v45 = vrot.slane %v563_v22, 7 }
  0xf9   : > { %969 = vrot.lane.b32.xlu2 %v895_v46, %s11520_s24  ;;  %v1289_v46 = vrot.slane %v1287_v34, 4 }
  0xfa   : > { %v2805_v5 = vpop.permute.xlu1 %2804  ;;  %v570_v44 = vrot.slane %v565_v45, 4 }
  0xfb   : > { %v4091_v6 = vpop.permute.xlu2 %4090  ;;  %2897 = vst.msk [vmem:[#allocation4 + $0x90] sm:$0xf] %vm15114_vm7, %v2805_v5  ;;  %v1290_v61 = vor.u32 %v1289_v46, %v12073_v42  ;;  %v897_v5 = vld [vmem:[#allocation2 + $0x64] sm:$0xf]  ;;  %v558_v46 = vshrl.u32 %v431_v27, 16  ;;  %9259 = vmatpush.bf16.msra.mxu1 %v11407_v43  ;;  %11477 = vmatpush.bf16.msra.mxu2 %v11407_v43 }
  0xfc   : > { %3427 = vst.msk [vmem:[#allocation4 + $0x90] sm:$0xf] %vm15113_vm8, %v3335_v57  ;;  %2257 = vrot.lane.b32.xlu0 %v2182_v59, %s11521_s25  ;;  %v271_v57 = vsel %vm11581_vm4, 0, %v270_v24  ;;  %v368_v59 = vld [vmem:[%s11578_s23 + $0x38] sm:$0xf] }
  0xfd   : > { %3620 = vst.msk [vmem:[#allocation4 + $0x90] sm:$0xf] %vm3615_vm9, %v3528_v40  ;;  %v2552_v40 = vshll.u32 %v2381_v31, 16  ;;  %v12088_v7 = vrot.slane %v1290_v61, 4  ;;  %v572_v31 = vshrl.u32 %v433_v17, 16  ;;  %v1837_v17 = vshrl.u32 %v1662_v0, 16 }
  0xfe   : > { %v3530_v13 = vpop.permute.xlu0 %3529  ;;  %272 = vst [vmem:[#allocation2 + $0x80] sm:$0x8] %v271_v57  ;;  %v324_v24 = vld [vmem:[#allocation2 + $0x8c] sm:$0x1]  ;;  %v10191_v57 = vrot.slane %v558_v46, 11 }
  0xff   : > { %v2554_v54 = vrot.slane %v2552_v40, 5  ;;  %401 = vst.msk [vmem:[#allocation2 + $0x84] sm:$0xf] %vm226_vm0, %v368_v59  ;;  %v574_v40 = vrot.slane %v572_v31, 7  ;;  %v325_v52 = vsel %vm11594_vm6, 0, %v324_v24 }
 0x100   : > { %2064 = vrot.lane.b32.xlu1 %v1821_v26, %s11523_s27  ;;  %326 = vst [vmem:[#allocation2 + $0x8c] sm:$0x1] %v325_v52  ;;  %v1099_v52 = vld [vmem:[#allocation2 + $0x74] sm:$0xf] }
 0x101   : > { %1535 = vrot.lane.b32.xlu2 %v1272_v12, %s11522_s26  ;;  %v2555_v53 = vsel %vm11610_vm10, %v2550_v51, %v2554_v54  ;;  %v2383_v12 = vld [vmem:[#allocation2 + $0x78] sm:$0xf]  ;;  %v566_v54 = vshll.u32 %v432_v15, 16  ;;  %v2183_v15 = vld [vmem:[#allocation2 + $0x74] sm:$0xf] }
 0x102   : > { %v3337_v23 = vpop.permute.xlu1 %3336  ;;  %v2570_v39 = vshrl.u32 %v2383_v12, 16 }
 0x103   : > { %v1526_v25 = vpop.permute.xlu2 %1525  ;;  %3428 = vst.msk [vmem:[#allocation4 + $0xb4] sm:$0xf] %vm15113_vm8, %v3337_v23  ;;  %v3833_v23 = vor.u32 %v3832_v8, %v3828_v4  ;;  %v568_v60 = vor.u32 %v566_v54, %v565_v45  ;;  %v2384_v4 = vld [vmem:[#allocation2 + $0x7c] sm:$0x1]  ;;  %v11406_v8 = vld [vmem:[%s15110_s3 + $0x28] sm:$0xff] }
 0x104   : > { %3621 = vst.msk [vmem:[#allocation4 + $0xb4] sm:$0xf] %vm3615_vm9, %v3530_v13  ;;  %3346 = vrot.lane.b32.xlu0 %v3096_v19, %s11525_s29  ;;  %9260 = vmatpush.bf16.msra.mxu1 %v11406_v8 }
 0x105   : > { %4182 = vst.msk [vmem:[#allocation4 + $0xb4] sm:$0xf] %vm4176_vm13, %v4091_v6  ;;  %v1293_v6 = vshll.u32 %v1098_v49, 16  ;;  %v3834_v48 = vrot.slane %v3833_v23, 4  ;;  %11478 = vmatpush.bf16.msra.mxu2 %v11406_v8  ;;  %v2382_v23 = vld [vmem:[#allocation2 + $0x74] sm:$0xf] }
 0x106   : > { %v962_v33 = vpop.permute.xlu0 %961  ;;  %v2945_v27 = vld [vmem:[#allocation2 + $0x84] sm:$0xf]  ;;  %v2557_v45 = vshrl.u32 %v2382_v23, 16  ;;  %v2944_v43 = vld [vmem:[#allocation2 + $0x80] sm:$0x8] }
 0x107   : > { %1052 = vst.msk [vmem:[#allocation4 + $0xd8] sm:$0xf] %vm1045_vm12, %v962_v33  ;;  %v1295_v19 = vrot.slane %v1293_v6, 5  ;;  %v369_v33 = vld [vmem:[%s11578_s23 + $0x3c] sm:$0xf]  ;;  %v569_v6 = vsel %vm11623_vm11, %v10191_v57, %v568_v60  ;;  %v11403_v57 = vld [vmem:[%s15110_s3 + $0x10] sm:$0xff] }
 0x108   : > { %2816 = vrot.lane.b32.xlu1 %v2545_v35, %s11524_s28  ;;  %1616 = vst.msk [vmem:[#allocation4 + $0xd8] sm:$0xf] %vm1609_vm15, %v1526_v25  ;;  %v1277_v25 = vshll.u32 %v1096_v10, 16  ;;  %v1660_v35 = vld [vmem:[#allocation2 + $0x70] sm:$0x8]  ;;  %v3115_v60 = vshll.u32 %v2945_v27, 16 }
 0x109   : > { %2255 = vrot.lane.b32.xlu2 %v2181_v37, %s11521_s25  ;;  %v2566_v37 = vshll.u32 %v2383_v12, 16  ;;  %v1296_v38 = vsel %vm11610_vm10, %v12088_v7, %v1295_v19  ;;  %402 = vst.msk [vmem:[#allocation2 + $0x88] sm:$0xf] %vm226_vm0, %v369_v33  ;;  %v1823_v49 = vshrl.u32 %v1660_v35, 16  ;;  %v2576_v12 = vshll.u32 %v2384_v4, 16  ;;  %v11404_v33 = vld [vmem:[%s15110_s3 + $0x18] sm:$0xff] }
 0x10a   : > { %v4089_v55 = vpop.permute.xlu1 %4088  ;;  %v1279_v51 = vrot.slane %v1277_v25, 5  ;;  %861 = vst.msk [vmem:[#allocation4 + $0x120] sm:$0xf] %vm226_vm0, %v569_v6  ;;  %v3668_v54 = vld [vmem:[#allocation2 + $0x8c] sm:$0x1] }
 0x10b   : > { %v2057_v56 = vpop.permute.xlu2 %2056  ;;  %4181 = vst.msk [vmem:[#allocation4 + $0x90] sm:$0xf] %vm4176_vm13, %v4089_v55  ;;  %v3838_v55 = vrot.slane %v3836_v32, 5  ;;  %v12118_v61 = vrot.slane %v2566_v37, 5  ;;  %v2578_v22 = vrot.slane %v2576_v12, 5  ;;  %v1840_v32 = vshll.u32 %v1662_v0, 16 }
 0x10c   : > { %3541 = vrot.lane.b32.xlu0 %v3466_v62, %s11526_s30  ;;  %v11241_v26 = vld [vmem:[#allocation4 + $0xb0] sm:$0xf0]  ;;  %v1276_v62 = vrot.slane %v1274_v21, 4  ;;  %v3860_v4 = vshll.u32 %v3668_v54, 16  ;;  %v4593_v6 = vld [vmem:[#allocation3 + $0x1c] sm:$0x1] }
 0x10d   : > { %v3839_v7 = vsel %vm11610_vm10, %v3834_v48, %v3838_v55  ;;  %v11402_v0 = vld [vmem:[%s15110_s3 + $0x8] sm:$0xff]  ;;  %v3467_v12 = vld [vmem:[#allocation2 + $0x84] sm:$0xf] }
 0x10e   : > { %v1528_v2 = vpop.permute.xlu0 %1527 }
 0x110   : > { %3348 = vrot.lane.b32.xlu1 %v3105_v63, %s11525_s29  ;;  %v2572_v63 = vrot.slane %v2570_v39, 4 }
 0x111   : > { %2818 = vrot.lane.b32.xlu2 %v2555_v53, %s11524_s28 }
 0x112   : > { %v964_v9 = vpop.permute.xlu1 %963  ;;  %v10245_v13 = vld [vmem:[#allocation4 + $0x90] sm:$0xf]  ;;  %v2573_v11 = vor.u32 %v2572_v63, %v12118_v61 }
 0x113   : > { %v12092_v14 = vpop.permute.xlu2 %2808  ;;  %1053 = vst.msk [vmem:[#allocation4 + $0xfc] sm:$0xf] %vm1045_vm12, %v964_v9  ;;  %v10246_v41 = vor.u32 %v11241_v26, %v10245_v13  ;;  %v898_v26 = vld [vmem:[#allocation2 + $0x68] sm:$0xf]  ;;  %v10209_v9 = vrot.slane %v1823_v49, 11 }
 0x114   : > { %1617 = vst.msk [vmem:[#allocation4 + $0xfc] sm:$0xf] %vm1609_vm15, %v1528_v2  ;;  %973 = vrot.lane.b32.xlu0 %v897_v5, %s11520_s24  ;;  %v12124_v2 = vrot.slane %v1828_v36, 7  ;;  %v1280_v5 = vor.u32 %v1279_v51, %v1276_v62  ;;  %v2574_v21 = vrot.slane %v2573_v11, 4 }
 0x115   : > { %10309 = vmatmul.msk.bf16.gmra.mxu0 %vm4345_vm1, %v10246_v41  ;;  %2146 = vst.msk [vmem:[#allocation4 + $0xfc] sm:$0xf] %vm15115_vm2, %v2057_v56  ;;  %v577_v56 = vor.u32 %v575_v18, %v574_v40  ;;  %v11405_v41 = vld [vmem:[%s15110_s3 + $0x20] sm:$0xff]  ;;  %v3112_v40 = vshrl.u32 %v2945_v27, 16  ;;  %v2559_v18 = vrot.slane %v2557_v45, 4 }
 0x116   : > { %v2248_v34 = vpop.permute.xlu0 %2247  ;;  %v1833_v13 = vor.u32 %v1831_v3, %v12124_v2  ;;  %9261 = vmatpush.bf16.msra.mxu1 %v11405_v41  ;;  %11479 = vmatpush.bf16.msra.mxu2 %v11405_v41  ;;  %v2579_v39 = vsel %vm11610_vm10, %v2574_v21, %v2578_v22  ;;  %v3862_v41 = vrot.slane %v3860_v4, 5  ;;  %v11401_v22 = vld [vmem:[%s15110_s3] sm:$0xff] }
 0x117   : > { %v578_v53 = vsel %vm11623_vm11, %v570_v44, %v577_v56  ;;  %v3107_v56 = vshrl.u32 %v2944_v43, 16  ;;  %v10373_v45 = vld [vmem:[#allocation4] sm:$0xf]  ;;  %v12216_v43 = vld [vmem:[#allocation2 + $0x88] sm:$0xf] }
 0x118   : > { %4100 = vrot.lane.b32.xlu1 %v3829_v28, %s11527_s6  ;;  %862 = vst.msk [vmem:[#allocation4 + $0x144] sm:$0xf] %vm226_vm0, %v578_v53  ;;  %v1834_v25 = vsel %vm11623_vm11, %v10209_v9, %v1833_v13  ;;  %v3667_v28 = vld [vmem:[#allocation2 + $0x88] sm:$0xf] }
 0x119   : > { %3539 = vrot.lane.b32.xlu2 %v3465_v29, %s11526_s30  ;;  %v1839_v29 = vrot.slane %v1837_v17, 7  ;;  %v3850_v36 = vshll.u32 %v3667_v28, 16  ;;  %v3854_v37 = vshrl.u32 %v3667_v28, 16  ;;  %v3666_v28 = vld [vmem:[#allocation2 + $0x84] sm:$0xf] }
 0x11a   : > { %v2055_v58 = vpop.permute.xlu1 %2054  ;;  %9262 = vmatpush.bf16.msra.mxu1 %v11404_v33  ;;  %11480 = vmatpush.bf16.msra.mxu2 %v11404_v33 }
 0x11b   : > { %v3341_v59 = vpop.permute.xlu2 %3340  ;;  %2145 = vst.msk [vmem:[#allocation4 + $0xd8] sm:$0xf] %vm15115_vm2, %v2055_v58  ;;  %v1842_v44 = vor.u32 %v1840_v32, %v1839_v29  ;;  %v12165_v24 = vrot.slane %v3850_v36, 5  ;;  %v3856_v55 = vrot.slane %v3854_v37, 4  ;;  %v2184_v58 = vld [vmem:[#allocation2 + $0x78] sm:$0xf] }
 0x11c   : > { %2338 = vst.msk [vmem:[#allocation4 + $0xd8] sm:$0xf] %vm2331_vm5, %v2248_v34  ;;  %1539 = vrot.lane.b32.xlu0 %v1296_v38, %s11522_s26  ;;  %v2560_v34 = vshll.u32 %v2382_v23, 16  ;;  %v4539_v38 = vld [vmem:[#allocation3 + $0x10] sm:$0x8] }
 0x11d   : > { %2899 = vst.msk [vmem:[#allocation4 + $0xd8] sm:$0xf] %vm15114_vm7, %v12092_v14  ;;  %v1281_v14 = vrot.slane %v1280_v5, 4  ;;  %v4540_v48 = vsel %vm11798_vm14, 0, %v4539_v38  ;;  %v3857_v3 = vor.u32 %v3856_v55, %v12165_v24  ;;  %v15130_v5 = vmov 0 }
 0x11e   : > { %v2811_v10 = vpop.permute.xlu0 %2810  ;;  %v2562_v46 = vrot.slane %v2560_v34, 5  ;;  %4541 = vst [vmem:[#allocation3 + $0x10] sm:$0x8] %v4540_v48  ;;  %9263 = vmatpush.bf16.msra.mxu1 %v11403_v57  ;;  %11481 = vmatpush.bf16.msra.mxu2 %v11403_v57  ;;  %v12206_v29 = vld [vmem:[%s15109_s2] ss:$0 sm:$0xff] }
 0x11f   : > { %v1286_v31 = vsel %vm11610_vm10, %v1281_v14, %v12073_v42  ;;  %v1835_v42 = vrot.slane %v12124_v2, 4  ;;  %v2946_v2 = vld [vmem:[#allocation2 + $0x88] sm:$0xf]  ;;  %v3858_v17 = vrot.slane %v3857_v3, 4  ;;  %v11261_v34 = vld [vmem:[#allocation4 + $0x20] sm:$0xf0] }
 0x120   : > { %975 = vrot.lane.b32.xlu1 %v898_v26, %s11520_s24  ;;  %v2563_v63 = vor.u32 %v2562_v46, %v2559_v18  ;;  %v1298_v26 = vshrl.u32 %v1099_v52, 16  ;;  %v3121_v13 = vshrl.u32 %v2946_v2, 16  ;;  %v3124_v27 = vshll.u32 %v2946_v2, 16  ;;  %v12214_v38 = vld [vmem:[#allocation2 + $0x84] sm:$0xf] }
 0x121   : > { %4102 = vrot.lane.b32.xlu2 %v3839_v7, %s11527_s6  ;;  %v1843_v49 = vsel %vm11623_vm11, %v1835_v42, %v1842_v44  ;;  %v10225_v7 = vrot.slane %v3107_v56, 11  ;;  %v10374_v37 = vor.u32 %v11261_v34, %v10373_v45  ;;  %v371_v42 = vld [vmem:[%s11578_s23 + $0x44] sm:$0xf] }
 0x122   : > { %v2250_v19 = vpop.permute.xlu1 %2249  ;;  %v2564_v9 = vrot.slane %v2563_v63, 4  ;;  %9264 = vmatpush.bf16.msra.mxu1 %v11402_v0  ;;  %11482 = vmatpush.bf16.msra.mxu2 %v11402_v0  ;;  %404 = vst.msk [vmem:[#allocation2 + $0x98] sm:$0xf] %vm226_vm0, %v371_v42  ;;  %v3468_v63 = vld [vmem:[#allocation2 + $0x88] sm:$0xf] }
 0x123   : > { %v4093_v20 = vpop.permute.xlu2 %4092  ;;  %2339 = vst.msk [vmem:[#allocation4 + $0xfc] sm:$0xf] %vm2331_vm5, %v2250_v19  ;;  %v1300_v19 = vrot.slane %v1298_v26, 4 }
 0x124   : > { %2900 = vst.msk [vmem:[#allocation4 + $0xfc] sm:$0xf] %vm15114_vm7, %v2811_v10  ;;  %2259 = vrot.lane.b32.xlu0 %v2183_v15, %s11521_s25  ;;  %v1301_v10 = vshll.u32 %v1099_v52, 16  ;;  %v2385_v52 = vld [vmem:[#allocation2 + $0x84] sm:$0xf] }
 0x125   : > { %3430 = vst.msk [vmem:[#allocation4 + $0xfc] sm:$0xf] %vm15113_vm8, %v3341_v59  ;;  %v12173_v59 = vrot.slane %v3112_v40, 7  ;;  %v370_v40 = vld [vmem:[%s11578_s23 + $0x40] sm:$0xf] }
 0x126   : > { %v3532_v35 = vpop.permute.xlu0 %3531  ;;  %v1303_v21 = vrot.slane %v1301_v10, 5  ;;  %9265 = vmatpush.bf16.msra.mxu1 %v11401_v22  ;;  %11483 = vmatpush.bf16.msra.mxu2 %v11401_v22  ;;  %403 = vst.msk [vmem:[#allocation2 + $0x94] sm:$0xf] %vm226_vm0, %v370_v40  ;;  %v1101_v10 = vld [vmem:[#allocation2 + $0x7c] sm:$0x1] }
 0x127   : > { %v3117_v11 = vor.u32 %v3115_v60, %v12173_v59  ;;  %v3119_v44 = vrot.slane %v12173_v59, 4  ;;  %v1850_v60 = vshrl.u32 %v12214_v38, 16 }
 0x128   : > { %2066 = vrot.lane.b32.xlu1 %v1834_v25, %s11523_s27  ;;  %v2569_v25 = vsel %vm11610_vm10, %v2564_v9, %v12118_v61  ;;  %v3863_v61 = vsel %vm11610_vm10, %v3858_v17, %v3862_v41  ;;  %v1304_v33 = vor.u32 %v1303_v21, %v1300_v19  ;;  %v4712_v17 = vld [vmem:[#allocation3 + $0x10] sm:$0x8] }
 0x129   : > { %1537 = vrot.lane.b32.xlu2 %v1286_v31, %s11522_s26  ;;  %v3118_v23 = vsel %vm11623_vm11, %v10225_v7, %v3117_v11  ;;  %v3123_v31 = vrot.slane %v3121_v13, 7  ;;  %9266 = vmatmul.bf16.vlgmr.msra.gmra.mxu1 %v10374_v37  ;;  %v2581_v7 = vshrl.u32 %v2385_v52, 16  ;;  %v1862_v11 = vshll.u32 %v12216_v43, 16  ;;  %v434_v21 = vld [vmem:[#allocation2 + $0x50] sm:$0x8] }
 0x12a   : > { %v3339_v62 = vpop.permute.xlu1 %3338  ;;  %v12234_v13 = vrot.slane %v1850_v60, 7 }
 0x12b   : > { %v968_v51 = vpop.permute.xlu2 %967  ;;  %3429 = vst.msk [vmem:[#allocation4 + $0xd8] sm:$0xf] %vm15113_vm8, %v3339_v62  ;;  %vm4522_vm8 = vcmask 1040384   ;;  %v3126_v18 = vor.u32 %v3124_v27, %v3123_v31  ;;  %v2583_v31 = vrot.slane %v2581_v7, 4 }
 0x12c   : > { %3622 = vst.msk [vmem:[#allocation4 + $0xd8] sm:$0xf] %vm3615_vm9, %v3532_v35  ;;  %2822 = vrot.lane.b32.xlu0 %v2579_v39, %s11524_s28  ;;  %vm12180_vm7 = vmand %vm4522_vm8, %vm231_vm3  ;;  %v3841_v35 = vshrl.u32 %v3666_v28, 16  ;;  %v3844_v39 = vshll.u32 %v3666_v28, 16  ;;  %v580_v28 = vshrl.u32 %v434_v21, 16  ;;  %vm15133_vm3 = vcmask 191648  }
 0x12d   : > { %4183 = vst.msk [vmem:[#allocation4 + $0xd8] sm:$0xf] %vm4176_vm13, %v4093_v20  ;;  %v15131_v5 = vsel %vm12180_vm7, 4294967295, %v15130_v5  ;;  %v4594_v8 = vsel %vm12180_vm7, 0, %v4593_v6  ;;  %v1100_v20 = vld [vmem:[#allocation2 + $0x78] sm:$0xf]  ;;  %v3127_v3 = vsel %vm11623_vm11, %v3119_v44, %v3126_v18 }
 0x12e   : > { %v4095_v53 = vpop.permute.xlu0 %4094  ;;  %1055 = vst.msk [vmem:[#allocation4 + $0x144] sm:$0xf] %vm1045_vm12, %v968_v51  ;;  %v1307_v36 = vshll.u32 %v1100_v20, 16  ;;  %v3843_v46 = vrot.slane %v3841_v35, 4  ;;  %v3846_v48 = vrot.slane %v3844_v39, 5  ;;  %v1311_v55 = vshrl.u32 %v1100_v20, 16 }
 0x12f   : > { %15132 = vst [vmem:[#allocation6_spill] sm:$0xff] %v15131_v5  ;;  %v12238_v20 = vld [vmem:[#allocation2 + $0x88] sm:$0xf]  ;;  %v1317_v35 = vshll.u32 %v1101_v10, 16  ;;  %v10192_v40 = vrot.slane %v580_v28, 11  ;;  %vm15134_vm8 = vcmask 224448  }
 0x130   : > { %2261 = vrot.lane.b32.xlu1 %v2184_v58, %s11521_s25  ;;  %4595 = vst [vmem:[#allocation3 + $0x1c] sm:$0x1] %v4594_v8  ;;  %v1309_v2 = vrot.slane %v1307_v36, 5  ;;  %v3847_v4 = vor.u32 %v3846_v48, %v3843_v46  ;;  %v2584_v8 = vshll.u32 %v2385_v52, 16  ;;  %v1313_v0 = vrot.slane %v1311_v55, 4 }
 0x131   : > { %2068 = vrot.lane.b32.xlu2 %v1843_v49, %s11523_s27  ;;  %v1859_v49 = vshrl.u32 %v12216_v43, 16  ;;  %v4780_v36 = vshrl.u32 %v4712_v17, 16  ;;  %v2590_v39 = vshll.u32 %v12238_v20, 16  ;;  %v1857_v43 = vrot.slane %v12234_v13, 4  ;;  %v12263_v60 = vld [vmem:[#allocation2 + $0x94] sm:$0xf] }
 0x132   : > { %v3534_v14 = vpop.permute.xlu1 %3533  ;;  %v3848_v19 = vrot.slane %v3847_v4, 4  ;;  %v2586_v27 = vrot.slane %v2584_v8, 5  ;;  %v1314_v34 = vor.u32 %v1313_v0, %v1309_v2  ;;  %v1319_v52 = vrot.slane %v1317_v35, 5  ;;  %v1663_v4 = vld [vmem:[#allocation2 + $0x80] sm:$0x8] }
 0x133   : > { %v2059_v15 = vpop.permute.xlu2 %2058  ;;  %3623 = vst.msk [vmem:[#allocation4 + $0xfc] sm:$0xf] %vm3615_vm9, %v3534_v14  ;;  %v1861_v14 = vrot.slane %v1859_v49, 7  ;;  %v12265_v49 = vld [vmem:[#allocation2 + $0x98] sm:$0xf] }
 0x134   : > { %4184 = vst.msk [vmem:[#allocation4 + $0xfc] sm:$0xf] %vm4176_vm13, %v4095_v53  ;;  %3543 = vrot.lane.b32.xlu0 %v3467_v12, %s11526_s30  ;;  %v10249_v51 = vld [vmem:[#allocation4 + $0xd8] sm:$0xf]  ;;  %v1305_v53 = vrot.slane %v1304_v33, 4  ;;  %v3853_v18 = vsel %vm11610_vm10, %v3848_v19, %v12165_v24  ;;  %v2594_v24 = vshrl.u32 %v12238_v20, 16 }
 0x135   : > { %v435_v12 = vld [vmem:[#allocation2 + $0x54] sm:$0xf]  ;;  %v1864_v44 = vor.u32 %v1862_v11, %v1861_v14  ;;  %v3143_v14 = vshrl.u32 %v12265_v49, 16  ;;  %v1853_v19 = vshll.u32 %v12214_v38, 16 }
 0x136   : > { %v1530_v32 = vpop.permute.xlu0 %1529  ;;  %v1310_v41 = vsel %vm11610_vm10, %v1305_v53, %v1309_v2  ;;  %v588_v22 = vshll.u32 %v435_v12, 16  ;;  %v899_v33 = vld [vmem:[#allocation2 + $0x74] sm:$0xf]  ;;  %v2596_v28 = vrot.slane %v2594_v24, 4 }
 0x138   : > { %3350 = vrot.lane.b32.xlu1 %v3118_v23, %s11525_s29 }
 0x139   : > { %2820 = vrot.lane.b32.xlu2 %v2569_v25, %s11524_s28 }
 0x13a   : > { %v966_v62 = vpop.permute.xlu1 %965 }
 0x13b   : > { %v2254_v54 = vpop.permute.xlu2 %2253  ;;  %1054 = vst.msk [vmem:[#allocation4 + $0x120] sm:$0xf] %vm1045_vm12, %v966_v62  ;;  %v4407_v56 = vpop.f32.mrf.mxu0  ;;  %v11242_v57 = vld [vmem:[#allocation4 + $0xf8] sm:$0xf0] }
 0x13c   : > { %v4408_v58 = vadd.f32 %v12206_v29, %v4407_v56  ;;  %1618 = vst.msk [vmem:[#allocation4 + $0x120] sm:$0xf] %vm1609_vm15, %v1530_v32  ;;  %v10250_v59 = vor.u32 %v11242_v57, %v10249_v51  ;;  %4106 = vrot.lane.b32.xlu0 %v3863_v61, %s11527_s6  ;;  %v436_v61 = vld [vmem:[#allocation2 + $0x58] sm:$0xf]  ;;  %v2587_v51 = vor.u32 %v2586_v27, %v2583_v31  ;;  %v1315_v57 = vrot.slane %v1314_v34, 4 }
 0x13d   : > { %2147 = vst.msk [vmem:[#allocation4 + $0x120] sm:$0xf] %vm15115_vm2, %v2059_v15  ;;  %v585_v15 = vshrl.u32 %v435_v12, 16  ;;  %v594_v46 = vshrl.u32 %v436_v61, 16  ;;  %v597_v56 = vshll.u32 %v436_v61, 16  ;;  %v1855_v61 = vor.u32 %v1853_v19, %v12234_v13 }
 0x13e   : > { %v4487_v6 = vmax.f32 %v4408_v58, 0.0  ;;  %10310 = vmatmul.msk.bf16.gmra.mxu0 %vm4345_vm1, %v10250_v59  ;;  %v2061_v26 = vpop.permute.xlu0 %2060  ;;  %v10324_v58 = vrot.slane %v4780_v36, 11  ;;  %v12260_v59 = vrot.slane %v2590_v39, 5  ;;  %v2588_v8 = vrot.slane %v2587_v51, 4  ;;  %v2387_v34 = vld [vmem:[#allocation2 + $0x8c] sm:$0x1] }
 0x13f   : > { %v12242_v32 = vrot.slane %v585_v15, 7  ;;  %v3146_v36 = vshll.u32 %v12265_v49, 16  ;;  %v3145_v39 = vrot.slane %v3143_v14, 7 }
 0x140   : > { %v4644_v9 = vpack.c.bf16 %v4487_v6, %v4487_v6  ;;  %3545 = vrot.lane.b32.xlu1 %v3468_v63, %s11526_s30  ;;  %v2593_v38 = vsel %vm11610_vm10, %v2588_v8, %v12260_v59 }
 0x141   : > { %3352 = vrot.lane.b32.xlu2 %v3127_v3, %s11525_s29  ;;  %v590_v42 = vor.u32 %v588_v22, %v12242_v32  ;;  %v1865_v3 = vsel %vm11623_vm11, %v1857_v43, %v1864_v44  ;;  %v592_v10 = vrot.slane %v12242_v32, 4  ;;  %v1320_v22 = vsel %vm11610_vm10, %v1315_v57, %v1319_v52 }
 0x142   : > { %4677 = vst [vmem:[#allocation3 + $0x14] sm:$0xf] %v4644_v9  ;;  %v1532_v23 = vpop.permute.xlu1 %1531  ;;  %v3134_v9 = vshrl.u32 %v12263_v60, 16  ;;  %v3148_v57 = vor.u32 %v3146_v36, %v3145_v39 }
 0x143   : > { %v12240_v25 = vpop.permute.xlu2 %3342  ;;  %1619 = vst.msk [vmem:[#allocation4 + $0x144] sm:$0xf] %vm1609_vm15, %v1532_v23  ;;  %v4409_v45 = vpop.f32.mrf.mxu0  ;;  %v591_v55 = vsel %vm11623_vm11, %v10192_v40, %v590_v42  ;;  %v900_v23 = vld [vmem:[#allocation2 + $0x78] sm:$0xf] }
 0x144   : > { %v4410_v37 = vadd.f32 %v12206_v29, %v4409_v45  ;;  %2148 = vst.msk [vmem:[#allocation4 + $0x144] sm:$0xf] %vm15115_vm2, %v2061_v26  ;;  %1541 = vrot.lane.b32.xlu0 %v1310_v41, %s11522_s26  ;;  %v1845_v41 = vshrl.u32 %v1663_v4, 16  ;;  %v3669_v45 = vld [vmem:[#allocation2 + $0x94] sm:$0xf]  ;;  %v12288_v35 = vrot.slane %v3134_v9, 7 }
 0x145   : > { %2341 = vst.msk [vmem:[#allocation4 + $0x144] sm:$0xf] %vm2331_vm5, %v2254_v54  ;;  %v596_v54 = vrot.slane %v594_v46, 7  ;;  %v3865_v44 = vshrl.u32 %v3669_v45, 16 }
 0x146   : > { %v4488_v48 = vmax.f32 %v4410_v37, 0.0  ;;  %v2813_v62 = vpop.permute.xlu0 %2812  ;;  %863 = vst.msk [vmem:[#allocation4 + $0x168] sm:$0xf] %vm226_vm0, %v591_v55  ;;  %v12291_v37 = vld [vmem:[#allocation3 + $0x1c] sm:$0x1]  ;;  %v10210_v42 = vrot.slane %v1845_v41, 11 }
 0x147   : > { %v599_v0 = vor.u32 %v597_v56, %v596_v54  ;;  %v6329_v51 = vshll.u32 %v12291_v37, 16  ;;  %v2185_v55 = vld [vmem:[#allocation2 + $0x84] sm:$0xf]  ;;  %v3141_v56 = vrot.slane %v12288_v35, 4  ;;  %v12308_v54 = vld [vmem:[#allocation2 + $0x98] sm:$0xf] }
 0x148   : > { %977 = vrot.lane.b32.xlu1 %v899_v33, %s11520_s24  ;;  %v4645_v2 = vpack.c.bf16 %v4488_v48, %v4488_v48  ;;  %v2597_v48 = vor.u32 %v2596_v28, %v12260_v59  ;;  %v1856_v52 = vsel %vm11623_vm11, %v10210_v42, %v1855_v61  ;;  %v3874_v14 = vshll.u32 %v12308_v54, 16  ;;  %v327_v28 = vld [vmem:[#allocation2 + $0x9c] sm:$0x1]  ;;  %v273_v42 = vld [vmem:[#allocation2 + $0x90] sm:$0x8] }
 0x149   : > { %4104 = vrot.lane.b32.xlu2 %v3853_v18, %s11527_s6  ;;  %v4713_v63 = vld [vmem:[#allocation3 + $0x14] sm:$0xf]  ;;  %v600_v32 = vsel %vm11623_vm11, %v592_v10, %v599_v0  ;;  %v3868_v18 = vshll.u32 %v3669_v45, 16  ;;  %v3149_v9 = vsel %vm11623_vm11, %v3141_v56, %v3148_v57  ;;  %v3878_v39 = vshrl.u32 %v12308_v54, 16 }
 0x14a   : > { %v5175_v53 = vld [vmem:[#allocation3 + $0x14] sm:$0xf]  ;;  %v4785_v6 = vshrl.u32 %v4713_v63, 16  ;;  %v2252_v26 = vpop.permute.xlu1 %2251  ;;  %v4788_v17 = vshll.u32 %v4713_v63, 16  ;;  %4678 = vst [vmem:[#allocation3 + $0x18] sm:$0xf] %v4645_v2 }
 0x14b   : > { %5207 = vst [vmem:[#allocation4 + $0x4c] sm:$0xf] %v5175_v53  ;;  %v12269_v7 = vpop.permute.xlu2 %3537  ;;  %v6197_v11 = vld [vmem:[#allocation3 + $0x14] sm:$0xf]  ;;  %v3867_v63 = vrot.slane %v3865_v44, 4  ;;  %v3870_v53 = vrot.slane %v3868_v18, 5 }
 0x14c   : > { %v6261_v12 = vld [vmem:[#allocation3 + $0x14] sm:$0xf]  ;;  %v12274_v15 = vrot.slane %v4785_v6, 7  ;;  %6229 = vst [vmem:[#allocation4 + $0x10] sm:$0xf] %v6197_v11  ;;  %2072 = vrot.lane.b32.xlu0 %v1865_v3, %s11523_s27  ;;  %v2598_v4 = vrot.slane %v2597_v48, 4 }
 0x14d   : > { %v6310_v20 = vshrl.u32 %v6261_v12, 16  ;;  %v6313_v21 = vshll.u32 %v6261_v12, 16  ;;  %2340 = vst.msk [vmem:[#allocation4 + $0x120] sm:$0xf] %vm2331_vm5, %v2252_v26  ;;  %v1102_v44 = vld [vmem:[#allocation2 + $0x84] sm:$0xf] }
 0x14e   : > { %v4790_v31 = vor.u32 %v4788_v17, %v12274_v15  ;;  %v3345_v27 = vpop.permute.xlu0 %3344  ;;  %2901 = vst.msk [vmem:[#allocation4 + $0x120] sm:$0xf] %vm15133_vm3, %v2813_v62  ;;  %v2600_v62 = vshll.u32 %v2387_v34, 16  ;;  %v4792_v11 = vrot.slane %v12274_v15, 4  ;;  %v2186_v34 = vld [vmem:[#allocation2 + $0x88] sm:$0xf] }
 0x14f   : > { %3431 = vst.msk [vmem:[#allocation4 + $0x120] sm:$0xf] %vm15134_vm8, %v12240_v25  ;;  %v6312_v33 = vrot.slane %v6310_v20, 4  ;;  %v6315_v43 = vrot.slane %v6313_v21, 5  ;;  %v3871_v20 = vor.u32 %v3870_v53, %v3867_v63  ;;  %v3469_v56 = vld [vmem:[#allocation2 + $0x94] sm:$0xf] }
 0x150   : > { %1543 = vrot.lane.b32.xlu1 %v1320_v22, %s11522_s26  ;;  %v4791_v40 = vsel %vm11623_vm11, %v10324_v58, %v4790_v31  ;;  %864 = vst.msk [vmem:[#allocation4 + $0x18c] sm:$0xf] %vm226_vm0, %v600_v32  ;;  %v4542_v58 = vld [vmem:[#allocation3 + $0x20] sm:$0x8]  ;;  %v2602_v6 = vrot.slane %v2600_v62, 5  ;;  %v1325_v57 = vshll.u32 %v1102_v44, 16 }
 0x151   : > { %979 = vrot.lane.b32.xlu2 %v900_v23, %s11520_s24  ;;  %5143 = vst [vmem:[#allocation4 + $0x48] sm:$0xf] %v4791_v40  ;;  %v4714_v13 = vld [vmem:[#allocation3 + $0x18] sm:$0xf]  ;;  %v6316_v59 = vor.u32 %v6315_v43, %v6312_v33  ;;  %v4543_v0 = vsel %vm11798_vm14, 0, %v4542_v58  ;;  %v3872_v45 = vrot.slane %v3871_v20, 4 }
 0x152   : > { %v2815_v46 = vpop.permute.xlu1 %2814  ;;  %v4794_v24 = vshrl.u32 %v4714_v13, 16  ;;  %v6198_v49 = vld [vmem:[#allocation3 + $0x18] sm:$0xf]  ;;  %v4797_v8 = vshll.u32 %v4714_v13, 16  ;;  %4544 = vst [vmem:[#allocation3 + $0x20] sm:$0x8] %v4543_v0  ;;  %v2603_v32 = vsel %vm11610_vm10, %v2598_v4, %v2602_v6 }
 0x153   : > { %v970_v25 = vpop.permute.xlu2 %969  ;;  %2902 = vst.msk [vmem:[#allocation4 + $0x144] sm:$0xf] %vm15133_vm3, %v2815_v46  ;;  %v6262_v2 = vld [vmem:[#allocation3 + $0x18] sm:$0xf]  ;;  %v6317_v17 = vrot.slane %v6316_v59, 4  ;;  %v328_v40 = vsel %vm11594_vm6, 0, %v327_v28 }
 0x154   : > { %2824 = vrot.lane.b32.xlu0 %v2593_v38, %s11524_s28  ;;  %6230 = vst [vmem:[#allocation4 + $0x34] sm:$0xf] %v6198_v49  ;;  %v4796_v26 = vrot.slane %v4794_v24, 7  ;;  %v6319_v10 = vshll.u32 %v6262_v2, 16  ;;  %v6323_v12 = vshrl.u32 %v6262_v2, 16  ;;  %v3876_v38 = vrot.slane %v3874_v14, 5 }
 0x155   : > { %3432 = vst.msk [vmem:[#allocation4 + $0x144] sm:$0xf] %vm15134_vm8, %v3345_v27  ;;  %v6331_v27 = vrot.slane %v6329_v51, 5  ;;  %v12340_v33 = vld [vmem:[#allocation3 + $0x14] sm:$0xf]  ;;  %v3880_v46 = vrot.slane %v3878_v39, 4  ;;  %vm15135_vm8 = vmmov %vm15133_vm3 }
 0x156   : > { %v4097_v3 = vpop.permute.xlu0 %4096  ;;  %3625 = vst.msk [vmem:[#allocation4 + $0x144] sm:$0xf] %vm3615_vm9, %v12269_v7  ;;  %v4799_v41 = vor.u32 %v4797_v8, %v4796_v26  ;;  %v6321_v19 = vrot.slane %v6319_v10, 5  ;;  %v6325_v15 = vrot.slane %v6323_v12, 4  ;;  %v3877_v43 = vsel %vm11610_vm10, %v3872_v45, %v3876_v38  ;;  %v4596_v62 = vld [vmem:[#allocation3 + $0x2c] sm:$0x1] }
 0x157   : > { %1056 = vst.msk [vmem:[#allocation4 + $0x168] sm:$0xf] %vm1045_vm12, %v970_v25  ;;  %v274_v25 = vsel %vm11581_vm4, 0, %v273_v42  ;;  %v4597_v51 = vsel %vm12180_vm7, 0, %v4596_v62  ;;  %v1322_v13 = vshrl.u32 %v1102_v44, 16  ;;  %v5787_v58 = vshrl.u32 %v12340_v33, 16 }
 0x158   : > { %2263 = vrot.lane.b32.xlu1 %v2185_v55, %s11521_s25  ;;  %v6322_v7 = vsel %vm11610_vm10, %v6317_v17, %v6321_v19  ;;  %v4800_v23 = vsel %vm11623_vm11, %v4792_v11, %v4799_v41  ;;  %v6326_v31 = vor.u32 %v6325_v15, %v6321_v19  ;;  %329 = vst [vmem:[#allocation2 + $0x9c] sm:$0x1] %v328_v40  ;;  %v1667_v55 = vld [vmem:[#allocation2 + $0x94] sm:$0xf]  ;;  %v372_v53 = vld [vmem:[%s11578_s23 + $0x48] sm:$0xf] }
 0x159   : > { %2070 = vrot.lane.b32.xlu2 %v1856_v52, %s11523_s27  ;;  %6725 = vst [vmem:[#allocation4 + $0x14] sm:$0xf] %v6322_v7  ;;  %v10409_v52 = vld [vmem:[#allocation4 + $0x48] sm:$0xf]  ;;  %v3881_v49 = vor.u32 %v3880_v46, %v3876_v38  ;;  %v1872_v63 = vshrl.u32 %v1667_v55, 16  ;;  %v3137_v26 = vshll.u32 %v12263_v60, 16 }
 0x15a   : > { %v3536_v21 = vpop.permute.xlu1 %3535  ;;  %v6327_v36 = vrot.slane %v6326_v31, 4  ;;  %5144 = vst [vmem:[#allocation4 + $0x6c] sm:$0xf] %v4800_v23  ;;  %v902_v2 = vld [vmem:[#allocation2 + $0x88] sm:$0xf]  ;;  %v1324_v8 = vrot.slane %v1322_v13, 4 }
 0x15b   : > { %v1536_v22 = vpop.permute.xlu2 %1535  ;;  %3624 = vst.msk [vmem:[#allocation4 + $0x120] sm:$0xf] %vm3615_vm9, %v3536_v21  ;;  %v276_v4 = vld [vmem:[#allocation2 + $0xa0] sm:$0x8]  ;;  %v1327_v10 = vrot.slane %v1325_v57, 5  ;;  %v3882_v41 = vrot.slane %v3881_v49, 4  ;;  %v3139_v38 = vor.u32 %v3137_v26, %v12288_v35 }
 0x15c   : > { %3356 = vrot.lane.b32.xlu0 %v3149_v9, %s11525_s29  ;;  %4185 = vst.msk [vmem:[#allocation4 + $0x120] sm:$0xf] %vm4176_vm13, %v4097_v3  ;;  %v6332_v61 = vsel %vm11610_vm10, %v6327_v36, %v6331_v27  ;;  %v12352_v3 = vld [vmem:[#allocation2 + $0x88] sm:$0xf]  ;;  %v277_v0 = vsel %vm11581_vm4, 0, %v276_v4  ;;  %v12359_v20 = vrot.slane %v1872_v63, 7 }
 0x15d   : > { %6726 = vst [vmem:[#allocation4 + $0x38] sm:$0xf] %v6332_v61  ;;  %v5733_v12 = vld [vmem:[#allocation3 + $0x10] sm:$0x8]  ;;  %v1875_v15 = vshll.u32 %v1667_v55, 16  ;;  %v12361_v21 = vrot.slane %v5787_v58, 7 }
 0x15e   : > { %v972_v37 = vpop.permute.xlu0 %971  ;;  %4598 = vst [vmem:[#allocation3 + $0x2c] sm:$0x1] %v4597_v51  ;;  %v1331_v7 = vshll.u32 %v12352_v3, 16  ;;  %v5782_v28 = vshrl.u32 %v5733_v12, 16  ;;  %v2388_v62 = vld [vmem:[#allocation2 + $0x94] sm:$0xf] }
 0x15f   : > { %1057 = vst.msk [vmem:[#allocation4 + $0x18c] sm:$0xf] %vm1045_vm12, %v972_v37  ;;  %v3671_v11 = vld [vmem:[#allocation2 + $0x9c] sm:$0x1]  ;;  %v5790_v37 = vshll.u32 %v12340_v33, 16  ;;  %v1877_v61 = vor.u32 %v1875_v15, %v12359_v20  ;;  %v2605_v49 = vshrl.u32 %v2388_v62, 16 }
 0x160   : > { %2826 = vrot.lane.b32.xlu1 %v2603_v32, %s11524_s28  ;;  %1621 = vst.msk [vmem:[#allocation4 + $0x18c] sm:$0xf] %vm1609_vm15, %v1536_v22  ;;  %v3884_v19 = vshll.u32 %v3671_v11, 16  ;;  %v12377_v35 = vrot.slane %v1331_v7, 5  ;;  %v10339_v33 = vrot.slane %v5782_v28, 11  ;;  %v2608_v63 = vshll.u32 %v2388_v62, 16 }
 0x161   : > { %2265 = vrot.lane.b32.xlu2 %v2186_v34, %s11521_s25  ;;  %v11270_v54 = vld [vmem:[#allocation4 + $0x68] sm:$0xf0]  ;;  %275 = vst [vmem:[#allocation2 + $0x90] sm:$0x8] %v274_v25  ;;  %v1328_v34 = vor.u32 %v1327_v10, %v1324_v8  ;;  %v5792_v46 = vor.u32 %v5790_v37, %v12361_v21  ;;  %v6758_v58 = vld [vmem:[#allocation3 + $0x20] sm:$0x8] }
 0x162   : > { %v4099_v18 = vpop.permute.xlu1 %4098  ;;  %v10410_v59 = vor.u32 %v11270_v54, %v10409_v52  ;;  %405 = vst.msk [vmem:[#allocation2 + $0xa4] sm:$0xf] %vm226_vm0, %v372_v53  ;;  %v3886_v31 = vrot.slane %v3884_v19, 5  ;;  %v3470_v12 = vld [vmem:[#allocation2 + $0x98] sm:$0xf]  ;;  %v2610_v19 = vrot.slane %v2608_v63, 5 }
 0x163   : > { %v2256_v48 = vpop.permute.xlu2 %2255  ;;  %4186 = vst.msk [vmem:[#allocation4 + $0x144] sm:$0xf] %vm4176_vm13, %v4099_v18  ;;  %v10253_v6 = vld [vmem:[#allocation4 + $0x120] sm:$0xf]  ;;  %v1329_v51 = vrot.slane %v1328_v34, 4  ;;  %v5793_v4 = vsel %vm11623_vm11, %v10339_v33, %v5792_v46 }
 0x164   : > { %4108 = vrot.lane.b32.xlu0 %v3877_v43, %s11527_s6  ;;  %9271 = vmatmul.bf16.gmra.mxu1 %v10410_v59  ;;  %278 = vst [vmem:[#allocation2 + $0xa0] sm:$0x8] %v277_v0  ;;  %v3887_v39 = vsel %vm11610_vm10, %v3882_v41, %v3886_v31  ;;  %v1668_v43 = vld [vmem:[#allocation2 + $0x98] sm:$0xf]  ;;  %v1335_v0 = vshrl.u32 %v12352_v3, 16  ;;  %v2607_v41 = vrot.slane %v2605_v49, 4 }
 0x165   : > { %v1881_v55 = vshrl.u32 %v1668_v43, 16  ;;  %v1884_v53 = vshll.u32 %v1668_v43, 16  ;;  %6165 = vst [vmem:[#allocation4 + $0xc] sm:$0xf] %v5793_v4  ;;  %v2188_v3 = vld [vmem:[#allocation2 + $0x98] sm:$0xf] }
 0x166   : > { %v2063_v24 = vpop.permute.xlu0 %2062  ;;  %v437_v43 = vld [vmem:[#allocation2 + $0x60] sm:$0x8]  ;;  %v1104_v62 = vld [vmem:[#allocation2 + $0x8c] sm:$0x1] }
 0x167   : > { %v1883_v26 = vrot.slane %v1881_v55, 7  ;;  %v602_v49 = vshrl.u32 %v437_v43, 16  ;;  %v1341_v4 = vshll.u32 %v1104_v62, 16 }
 0x168   : > { %3547 = vrot.lane.b32.xlu1 %v3469_v56, %s11526_s30  ;;  %v2947_v27 = vld [vmem:[#allocation2 + $0x90] sm:$0x8]  ;;  %v373_v56 = vld [vmem:[%s11578_s23 + $0x4c] sm:$0xf] }
 0x169   : > { %v3129_v45 = vshrl.u32 %v2947_v27, 16  ;;  %v1666_v36 = vld [vmem:[#allocation2 + $0x90] sm:$0x8]  ;;  %v2951_v54 = vld [vmem:[#allocation2 + $0xa4] sm:$0xf] }
 0x16a   : > { %v1534_v9 = vpop.permute.xlu1 %1533  ;;  %v4412_v14 = vpop.f32.mrf.mxu0  ;;  %v11243_v17 = vld [vmem:[#allocation4 + $0x140] sm:$0xf0]  ;;  %v1867_v42 = vshrl.u32 %v1666_v36, 16  ;;  %406 = vst.msk [vmem:[#allocation2 + $0xa8] sm:$0xf] %vm226_vm0, %v373_v56  ;;  %v3156_v10 = vshrl.u32 %v2951_v54, 16  ;;  %v2611_v36 = vor.u32 %v2610_v19, %v2607_v41 }
 0x16b   : > { %1620 = vst.msk [vmem:[#allocation4 + $0x168] sm:$0xf] %vm1609_vm15, %v1534_v9  ;;  %v4413_v60 = vadd.f32 %v12206_v29, %v4412_v14  ;;  %v10254_v22 = vor.u32 %v11243_v17, %v10253_v6  ;;  %v2819_v23 = vpop.permute.xlu2 %2818  ;;  %v10226_v18 = vrot.slane %v3129_v45, 11  ;;  %v1334_v6 = vsel %vm11610_vm10, %v1329_v51, %v12377_v35  ;;  %v2950_v8 = vld [vmem:[#allocation2 + $0xa0] sm:$0x8] }
 0x16c   : > { %2149 = vst.msk [vmem:[#allocation4 + $0x168] sm:$0xf] %vm15115_vm2, %v2063_v24  ;;  %983 = vrot.lane.b32.xlu0 %v902_v2, %s11520_s24  ;;  %v12392_v2 = vld [vmem:[#allocation2 + $0x98] sm:$0xf]  ;;  %v12401_v9 = vld [vmem:[#allocation3 + $0x20] sm:$0x8] }
 0x16d   : > { %v4489_v32 = vmax.f32 %v4413_v60, 0.0  ;;  %10311 = vmatmul.msk.bf16.gmra.mxu0 %vm4345_vm1, %v10254_v22  ;;  %2342 = vst.msk [vmem:[#allocation4 + $0x168] sm:$0xf] %vm2331_vm5, %v2256_v48  ;;  %v10211_v48 = vrot.slane %v1867_v42, 11  ;;  %v3140_v25 = vsel %vm11623_vm11, %v10226_v18, %v3139_v38  ;;  %v6807_v14 = vshrl.u32 %v6758_v58, 16 }
 0x16e   : > { %v2258_v40 = vpop.permute.xlu0 %2257  ;;  %3354 = vrot.lane.b32.xlu2 %v3140_v25, %s11525_s29  ;;  %v1879_v60 = vrot.slane %v12359_v20, 4  ;;  %v2614_v22 = vshll.u32 %v12392_v2, 16  ;;  %v3151_v7 = vshrl.u32 %v2950_v8, 16  ;;  %v12406_v31 = vrot.slane %v3156_v10, 7  ;;  %v438_v20 = vld [vmem:[#allocation2 + $0x64] sm:$0xf] }
 0x16f   : > { %v4646_v44 = vpack.c.bf16 %v4489_v32, %v4489_v32  ;;  %v1878_v52 = vsel %vm11623_vm11, %v10211_v48, %v1877_v61  ;;  %v3159_v27 = vshll.u32 %v2951_v54, 16  ;;  %v1337_v45 = vrot.slane %v1335_v0, 4 }
 0x170   : > { %4110 = vrot.lane.b32.xlu1 %v3887_v39, %s11527_s6  ;;  %v10355_v38 = vrot.slane %v6807_v14, 11  ;;  %v4802_v39 = vshrl.u32 %v12401_v9, 16  ;;  %v12413_v42 = vrot.slane %v2614_v22, 5  ;;  %v10227_v61 = vrot.slane %v3151_v7, 11 }
 0x171   : > { %4679 = vst [vmem:[#allocation3 + $0x24] sm:$0xf] %v4646_v44  ;;  %v3161_v48 = vor.u32 %v3159_v27, %v12406_v31  ;;  %v607_v55 = vshrl.u32 %v438_v20, 16  ;;  %v1338_v56 = vor.u32 %v1337_v45, %v12377_v35  ;;  %v610_v35 = vshll.u32 %v438_v20, 16  ;;  %v2952_v9 = vld [vmem:[#allocation2 + $0xa8] sm:$0xf] }
 0x172   : > { %v2065_v13 = vpop.permute.xlu1 %2064  ;;  %v4414_v57 = vpop.f32.mrf.mxu0  ;;  %v12439_v41 = vrot.slane %v4802_v39, 11  ;;  %v3168_v22 = vshll.u32 %v2952_v9, 16  ;;  %v3163_v43 = vrot.slane %v12406_v31, 4 }
 0x173   : > { %2150 = vst.msk [vmem:[#allocation4 + $0x18c] sm:$0xf] %vm15115_vm2, %v2065_v13  ;;  %v4415_v59 = vadd.f32 %v12206_v29, %v4414_v57  ;;  %v12388_v24 = vpop.permute.xlu2 %3539  ;;  %v901_v57 = vld [vmem:[#allocation2 + $0x84] sm:$0xf]  ;;  %v12430_v10 = vrot.slane %v607_v55, 7  ;;  %v1339_v0 = vrot.slane %v1338_v56, 4 }
 0x174   : > { %2343 = vst.msk [vmem:[#allocation4 + $0x18c] sm:$0xf] %vm2331_vm5, %v2258_v40  ;;  %2074 = vrot.lane.b32.xlu0 %v1878_v52, %s11523_s27  ;;  %v2612_v52 = vrot.slane %v2611_v36, 4 }
 0x175   : > { %2904 = vst.msk [vmem:[#allocation4 + $0x18c] sm:$0xf] %vm15133_vm3, %v2819_v23  ;;  %v4490_v17 = vmax.f32 %v4415_v59, 0.0  ;;  %v1886_v23 = vor.u32 %v1884_v53, %v1883_v26  ;;  %vm15136_vm3 = vcmask 224448   ;;  %v3162_v53 = vsel %vm11623_vm11, %v10227_v61, %v3161_v48  ;;  %v3472_v48 = vld [vmem:[#allocation2 + $0xa8] sm:$0xf] }
 0x176   : > { %v3347_v11 = vpop.permute.xlu0 %3346  ;;  %3549 = vrot.lane.b32.xlu2 %v3470_v12, %s11526_s30  ;;  %v2618_v61 = vshrl.u32 %v12392_v2, 16  ;;  %v614_v62 = vrot.slane %v12430_v10, 4 }
 0x177   : > { %v4647_v34 = vpack.c.bf16 %v4490_v17, %v4490_v17  ;;  %v1887_v46 = vsel %vm11623_vm11, %v1879_v60, %v1886_v23  ;;  %v2617_v60 = vsel %vm11610_vm10, %v2612_v52, %v12413_v42  ;;  %v10193_v23 = vrot.slane %v602_v49, 11 }
 0x178   : > { %v5177_v15 = vld [vmem:[#allocation3 + $0x24] sm:$0xf]  ;;  %1545 = vrot.lane.b32.xlu1 %v1334_v6, %s11522_s26 }
 0x179   : > { %5209 = vst [vmem:[#allocation4 + $0x94] sm:$0xf] %v5177_v15  ;;  %v6199_v28 = vld [vmem:[#allocation3 + $0x24] sm:$0xf]  ;;  %v12443_v15 = vld [vmem:[#allocation3 + $0x2c] sm:$0x1] }
 0x17a   : > { %v2817_v32 = vpop.permute.xlu1 %2816  ;;  %6231 = vst [vmem:[#allocation4 + $0x58] sm:$0xf] %v6199_v28  ;;  %v6759_v40 = vld [vmem:[#allocation3 + $0x24] sm:$0xf] }
 0x17b   : > { %v12409_v37 = vpop.permute.xlu2 %4102  ;;  %v7222_v44 = vld [vmem:[#allocation3 + $0x24] sm:$0xf]  ;;  %v6812_v25 = vshrl.u32 %v6759_v40, 16  ;;  %4680 = vst [vmem:[#allocation3 + $0x28] sm:$0xf] %v4647_v34  ;;  %v6815_v58 = vshll.u32 %v6759_v40, 16 }
 0x17c   : > { %2269 = vrot.lane.b32.xlu0 %v2188_v3, %s11521_s25  ;;  %v7286_v18 = vld [vmem:[#allocation3 + $0x24] sm:$0xf]  ;;  %7254 = vst [vmem:[#allocation4 + $0x1c] sm:$0xf] %v7222_v44  ;;  %v612_v3 = vor.u32 %v610_v35, %v12430_v10  ;;  %v7354_v40 = vshll.u32 %v12443_v15, 16 }
 0x17d   : > { %v4716_v33 = vld [vmem:[#allocation3 + $0x24] sm:$0xf]  ;;  %v7335_v13 = vshrl.u32 %v7286_v18, 16  ;;  %v12419_v54 = vrot.slane %v6812_v25, 7  ;;  %v7338_v59 = vshll.u32 %v7286_v18, 16 }
 0x17e   : > { %v3542_v51 = vpop.permute.xlu0 %3541  ;;  %2903 = vst.msk [vmem:[#allocation4 + $0x168] sm:$0xf] %vm15135_vm8, %v2817_v32  ;;  %v4807_v63 = vshrl.u32 %v4716_v33, 16  ;;  %981 = vrot.lane.b32.xlu2 %v901_v57, %s11520_s24  ;;  %vm15137_vm8 = vmmov %vm15136_vm3  ;;  %v439_v32 = vld [vmem:[#allocation2 + $0x68] sm:$0xf]  ;;  %v4810_v45 = vshll.u32 %v4716_v33, 16  ;;  %v613_v56 = vsel %vm11623_vm11, %v10193_v23, %v612_v3 }
 0x17f   : > { %3433 = vst.msk [vmem:[#allocation4 + $0x168] sm:$0xf] %vm15136_vm3, %v3347_v11  ;;  %v6817_v6 = vor.u32 %v6815_v58, %v12419_v54  ;;  %v7337_v26 = vrot.slane %v7335_v13, 4  ;;  %v7340_v12 = vrot.slane %v7338_v59, 5  ;;  %v1343_v11 = vrot.slane %v1341_v4, 5 }
 0x180   : > { %2076 = vrot.lane.b32.xlu1 %v1887_v46, %s11523_s27  ;;  %3626 = vst.msk [vmem:[#allocation4 + $0x168] sm:$0xf] %vm3615_vm9, %v12388_v24  ;;  %v3165_v24 = vshrl.u32 %v2952_v9, 16  ;;  %v12441_v19 = vrot.slane %v4807_v63, 7  ;;  %v6819_v20 = vrot.slane %v12419_v54, 4  ;;  %v616_v33 = vshrl.u32 %v439_v32, 16 }
 0x181   : > { %v6818_v17 = vsel %vm11623_vm11, %v10355_v38, %v6817_v6  ;;  %v7341_v38 = vor.u32 %v7340_v12, %v7337_v26  ;;  %v1344_v36 = vsel %vm11610_vm10, %v1339_v0, %v1343_v11  ;;  %v3672_v13 = vld [vmem:[#allocation2 + $0xa4] sm:$0xf]  ;;  %v619_v52 = vshll.u32 %v439_v32, 16  ;;  %865 = vst.msk [vmem:[#allocation4 + $0x1b0] sm:$0xf] %vm226_vm0, %v613_v56 }
 0x182   : > { %v3349_v8 = vpop.permute.xlu1 %3348  ;;  %7190 = vst [vmem:[#allocation4 + $0x18] sm:$0xf] %v6818_v17  ;;  %v4717_v7 = vld [vmem:[#allocation3 + $0x28] sm:$0xf]  ;;  %v3167_v28 = vrot.slane %v3165_v24, 7  ;;  %v4812_v44 = vor.u32 %v4810_v45, %v12441_v19  ;;  %v618_v4 = vrot.slane %v616_v33, 7 }
 0x183   : > { %3434 = vst.msk [vmem:[#allocation4 + $0x18c] sm:$0xf] %vm15137_vm8, %v3349_v8  ;;  %v12433_v14 = vpop.permute.xlu2 %1537  ;;  %v4816_v34 = vshrl.u32 %v4717_v7, 16  ;;  %v6760_v39 = vld [vmem:[#allocation3 + $0x28] sm:$0xf]  ;;  %v7342_v57 = vrot.slane %v7341_v38, 4 }
 0x184   : > { %3627 = vst.msk [vmem:[#allocation4 + $0x18c] sm:$0xf] %vm3615_vm9, %v3542_v51  ;;  %3358 = vrot.lane.b32.xlu0 %v3162_v53, %s11525_s29  ;;  %v7223_v18 = vld [vmem:[#allocation3 + $0x28] sm:$0xf]  ;;  %v3170_v46 = vor.u32 %v3168_v22, %v3167_v28  ;;  %v6821_v51 = vshrl.u32 %v6760_v39, 16  ;;  %v4819_v58 = vshll.u32 %v4717_v7, 16  ;;  %v621_v17 = vor.u32 %v619_v52, %v618_v4 }
 0x185   : > { %v4818_v25 = vrot.slane %v4816_v34, 7  ;;  %7255 = vst [vmem:[#allocation4 + $0x40] sm:$0xf] %v7223_v18  ;;  %v7287_v31 = vld [vmem:[#allocation3 + $0x28] sm:$0xf]  ;;  %v6824_v49 = vshll.u32 %v6760_v39, 16 }
 0x186   : > { %v974_v27 = vpop.permute.xlu0 %973  ;;  %1547 = vrot.lane.b32.xlu2 %v1344_v36, %s11522_s26  ;;  %4188 = vst.msk [vmem:[#allocation4 + $0x18c] sm:$0xf] %vm4176_vm13, %v12409_v37  ;;  %v6823_v59 = vrot.slane %v6821_v51, 7  ;;  %v7344_v63 = vshll.u32 %v7287_v31, 16  ;;  %v7348_v53 = vshrl.u32 %v7287_v31, 16  ;;  %v3171_v35 = vsel %vm11623_vm11, %v3163_v43, %v3170_v46 }
 0x187   : > { %v4813_v37 = vsel %vm11623_vm11, %v12439_v41, %v4812_v44  ;;  %v2187_v6 = vld [vmem:[#allocation2 + $0x94] sm:$0xf]  ;;  %v4821_v26 = vor.u32 %v4819_v58, %v4818_v25  ;;  %1058 = vst.msk [vmem:[#allocation4 + $0x1b0] sm:$0xf] %vm1045_vm12, %v974_v27  ;;  %v12474_v12 = vld [vmem:[#allocation2 + $0xa8] sm:$0xf]  ;;  %v622_v27 = vsel %vm11623_vm11, %v614_v62, %v621_v17 }
 0x188   : > { %2828 = vrot.lane.b32.xlu1 %v2617_v60, %s11524_s28  ;;  %v6826_v8 = vor.u32 %v6824_v49, %v6823_v59  ;;  %v7346_v10 = vrot.slane %v7344_v63, 5  ;;  %v3889_v11 = vshrl.u32 %v3672_v13, 16  ;;  %v7350_v9 = vrot.slane %v7348_v53, 4  ;;  %1622 = vst.msk [vmem:[#allocation4 + $0x1b0] sm:$0xf] %vm1609_vm15, %v12433_v14 }
 0x189   : > { %v3892_v24 = vshll.u32 %v3672_v13, 16  ;;  %v3898_v15 = vshll.u32 %v12474_v12, 16  ;;  %v4814_v41 = vrot.slane %v12441_v19, 4  ;;  %5145 = vst [vmem:[#allocation4 + $0x90] sm:$0xf] %v4813_v37  ;;  %v7356_v14 = vrot.slane %v7354_v40, 5 }
 0x18a   : > { %v4101_v55 = vpop.permute.xlu1 %4100  ;;  %v6827_v60 = vsel %vm11623_vm11, %v6819_v20, %v6826_v8  ;;  %v7347_v22 = vsel %vm11610_vm10, %v7342_v57, %v7346_v10  ;;  %v3891_v7 = vrot.slane %v3889_v11, 4  ;;  %v903_v23 = vld [vmem:[#allocation2 + $0x94] sm:$0xf]  ;;  %v7351_v3 = vor.u32 %v7350_v9, %v7346_v10  ;;  %v2390_v32 = vld [vmem:[#allocation2 + $0x9c] sm:$0x1] }
 0x18b   : > { %v12463_v54 = vpop.permute.xlu2 %2068  ;;  %4187 = vst.msk [vmem:[#allocation4 + $0x168] sm:$0xf] %vm4176_vm13, %v4101_v55  ;;  %v3894_v28 = vrot.slane %v3892_v24, 5  ;;  %v4822_v38 = vsel %vm11623_vm11, %v4814_v41, %v4821_v26  ;;  %v12490_v36 = vrot.slane %v3898_v15, 5  ;;  %v2620_v20 = vrot.slane %v2618_v61, 4 }
 0x18c   : > { %3553 = vrot.lane.b32.xlu0 %v3472_v48, %s11526_s30  ;;  %7191 = vst [vmem:[#allocation4 + $0x3c] sm:$0xf] %v6827_v60  ;;  %v7352_v39 = vrot.slane %v7351_v3, 4  ;;  %v2624_v18 = vshll.u32 %v2390_v32, 16  ;;  %v1106_v62 = vld [vmem:[#allocation2 + $0x98] sm:$0xf] }
 0x18d   : > { %7750 = vst [vmem:[#allocation4 + $0x20] sm:$0xf] %v7347_v22  ;;  %v11244_v34 = vld [vmem:[#allocation4 + $0x188] sm:$0xf0]  ;;  %v3895_v44 = vor.u32 %v3894_v28, %v3891_v7  ;;  %v2621_v48 = vor.u32 %v2620_v20, %v12413_v42  ;;  %v1107_v56 = vld [vmem:[#allocation2 + $0x9c] sm:$0x1] }
 0x18e   : > { %v1540_v0 = vpop.permute.xlu0 %1539  ;;  %2267 = vrot.lane.b32.xlu2 %v2187_v6, %s11521_s25  ;;  %866 = vst.msk [vmem:[#allocation4 + $0x1d4] sm:$0xf] %vm226_vm0, %v622_v27  ;;  %v7357_v2 = vsel %vm11610_vm10, %v7352_v39, %v7356_v14  ;;  %v2626_v25 = vrot.slane %v2624_v18, 5  ;;  %v1355_v13 = vshll.u32 %v1106_v62, 16  ;;  %v1359_v31 = vshrl.u32 %v1106_v62, 16 }
 0x18f   : > { %5146 = vst [vmem:[#allocation4 + $0xb4] sm:$0xf] %v4822_v38  ;;  %v3896_v33 = vrot.slane %v3895_v44, 4  ;;  %v2622_v55 = vrot.slane %v2621_v48, 4  ;;  %v1365_v52 = vshll.u32 %v1107_v56, 16  ;;  %vm15138_vm3 = vcmask 191648  }
 0x190   : > { %3360 = vrot.lane.b32.xlu1 %v3171_v35, %s11525_s29  ;;  %7751 = vst [vmem:[#allocation4 + $0x44] sm:$0xf] %v7357_v2  ;;  %v12511_v59 = vrot.slane %v1355_v13, 5  ;;  %v1361_v49 = vrot.slane %v1359_v31, 4  ;;  %v1669_v63 = vld [vmem:[#allocation2 + $0xa0] sm:$0x8]  ;;  %vm15139_vm8 = vmmov %vm15138_vm3 }
 0x191   : > { %v3901_v42 = vsel %vm11610_vm10, %v3896_v33, %v12490_v36  ;;  %v2627_v58 = vsel %vm11610_vm10, %v2622_v55, %v2626_v25  ;;  %v10445_v53 = vld [vmem:[#allocation4 + $0x90] sm:$0xf]  ;;  %v3902_v35 = vshrl.u32 %v12474_v12, 16  ;;  %v1670_v6 = vld [vmem:[#allocation2 + $0xa4] sm:$0xf]  ;;  %v1889_v17 = vshrl.u32 %v1669_v63, 16 }
 0x192   : > { %v976_v19 = vpop.permute.xlu1 %975  ;;  %v4417_v45 = vpop.f32.mrf.mxu0  ;;  %v10257_v43 = vld [vmem:[#allocation4 + $0x168] sm:$0xf]  ;;  %v904_v8 = vld [vmem:[#allocation2 + $0x98] sm:$0xf]  ;;  %v1362_v10 = vor.u32 %v1361_v49, %v12511_v59  ;;  %v1894_v11 = vshrl.u32 %v1670_v6, 16  ;;  %v1897_v22 = vshll.u32 %v1670_v6, 16 }
 0x193   : > { %v4418_v40 = vadd.f32 %v12206_v29, %v4417_v45  ;;  %1059 = vst.msk [vmem:[#allocation4 + $0x1d4] sm:$0xf] %vm1045_vm12, %v976_v19  ;;  %v10258_v46 = vor.u32 %v11244_v34, %v10257_v43  ;;  %v2821_v51 = vpop.permute.xlu2 %2820  ;;  %v330_v12 = vld [vmem:[#allocation2 + $0xac] sm:$0x1]  ;;  %v3471_v14 = vld [vmem:[#allocation2 + $0xa4] sm:$0xf] }
 0x194   : > { %985 = vrot.lane.b32.xlu0 %v903_v23, %s11520_s24  ;;  %1623 = vst.msk [vmem:[#allocation4 + $0x1d4] sm:$0xf] %vm1609_vm15, %v1540_v0  ;;  %v1367_v0 = vrot.slane %v1365_v52, 5  ;;  %v331_v24 = vsel %vm11594_vm6, 0, %v330_v12  ;;  %v1363_v41 = vrot.slane %v1362_v10, 4  ;;  %v12527_v60 = vrot.slane %v1894_v11, 7 }
 0x195   : > { %v4491_v61 = vmax.f32 %v4418_v40, 0.0  ;;  %10312 = vmatmul.msk.bf16.gmra.mxu0 %vm4345_vm1, %v10258_v46  ;;  %2152 = vst.msk [vmem:[#allocation4 + $0x1d4] sm:$0xf] %vm15115_vm2, %v12463_v54  ;;  %v12519_v54 = vld [vmem:[%s15109_s2] ss:$0 sm:$0xff]  ;;  %v10212_v32 = vrot.slane %v1889_v17, 11 }
 0x196   : > { %v2260_v29 = vpop.permute.xlu0 %2259  ;;  %2830 = vrot.lane.b32.xlu2 %v2627_v58, %s11524_s28  ;;  %v11279_v9 = vld [vmem:[#allocation4 + $0xb0] sm:$0xf0]  ;;  %332 = vst [vmem:[#allocation2 + $0xac] sm:$0x1] %v331_v24  ;;  %v1368_v3 = vsel %vm11610_vm10, %v1363_v41, %v1367_v0  ;;  %v1899_v19 = vor.u32 %v1897_v22, %v12527_v60  ;;  %v3904_v45 = vrot.slane %v3902_v35, 4 }
 0x197   : > { %v4648_v57 = vpack.c.bf16 %v4491_v61, %v4491_v61  ;;  %v10446_v15 = vor.u32 %v11279_v9, %v10445_v53  ;;  %v2189_v43 = vld [vmem:[#allocation2 + $0xa4] sm:$0xf]  ;;  %v2392_v18 = vld [vmem:[#allocation2 + $0xa8] sm:$0xf]  ;;  %v374_v41 = vld [vmem:[%s11578_s23 + $0x50] sm:$0xf] }
 0x198   : > { %4112 = vrot.lane.b32.xlu1 %v3901_v42, %s11527_s6  ;;  %v1900_v40 = vsel %vm11623_vm11, %v10212_v32, %v1899_v19  ;;  %v3905_v44 = vor.u32 %v3904_v45, %v12490_v36  ;;  %v2638_v62 = vshll.u32 %v2392_v18, 16  ;;  %v2642_v55 = vshrl.u32 %v2392_v18, 16  ;;  %v2190_v31 = vld [vmem:[#allocation2 + $0xa8] sm:$0xf]  ;;  %407 = vst.msk [vmem:[#allocation2 + $0xb4] sm:$0xf] %vm226_vm0, %v374_v41 }
 0x199   : > { %4681 = vst [vmem:[#allocation3 + $0x34] sm:$0xf] %v4648_v57  ;;  %9276 = vmatmul.bf16.gmra.mxu1 %v10446_v15  ;;  %v1105_v57 = vld [vmem:[#allocation2 + $0x94] sm:$0xf]  ;;  %v333_v41 = vld [vmem:[#allocation2 + $0xbc] sm:$0x1] }
 0x19a   : > { %v2067_v4 = vpop.permute.xlu1 %2066  ;;  %v4419_v37 = vpop.f32.mrf.mxu0  ;;  %v3906_v61 = vrot.slane %v3905_v44, 4  ;;  %v12548_v13 = vrot.slane %v2638_v62, 5  ;;  %v2644_v52 = vrot.slane %v2642_v55, 4  ;;  %v1346_v35 = vshrl.u32 %v1105_v57, 16  ;;  %v4545_v44 = vld [vmem:[#allocation3 + $0x30] sm:$0x8] }
 0x19b   : > { %2151 = vst.msk [vmem:[#allocation4 + $0x1b0] sm:$0xf] %vm15115_vm2, %v2067_v4  ;;  %v4420_v26 = vadd.f32 %v12519_v54, %v4419_v37  ;;  %v3353_v27 = vpop.permute.xlu2 %3352  ;;  %v279_v4 = vld [vmem:[#allocation2 + $0xb0] sm:$0x8]  ;;  %v1349_v11 = vshll.u32 %v1105_v57, 16 }
 0x19c   : > { %2344 = vst.msk [vmem:[#allocation4 + $0x1b0] sm:$0xf] %vm2331_vm5, %v2260_v29  ;;  %1551 = vrot.lane.b32.xlu0 %v1368_v3, %s11522_s26  ;;  %v2645_v6 = vor.u32 %v2644_v52, %v12548_v13  ;;  %v280_v9 = vsel %vm11581_vm4, 0, %v279_v4  ;;  %v1348_v15 = vrot.slane %v1346_v35, 4  ;;  %v1671_v57 = vld [vmem:[#allocation2 + $0xa8] sm:$0xf] }
 0x19d   : > { %2905 = vst.msk [vmem:[#allocation4 + $0x1b0] sm:$0xf] %vm15138_vm3, %v2821_v51  ;;  %v4492_v23 = vmax.f32 %v4420_v26, 0.0  ;;  %v3674_v48 = vld [vmem:[#allocation2 + $0xac] sm:$0x1]  ;;  %vm15140_vm3 = vcmask 224448  }
 0x19e   : > { %v2823_v7 = vpop.permute.xlu0 %2822  ;;  %3551 = vrot.lane.b32.xlu2 %v3471_v14, %s11526_s30  ;;  %v3908_v33 = vshll.u32 %v3674_v48, 16  ;;  %v2393_v51 = vld [vmem:[#allocation2 + $0xac] sm:$0x1]  ;;  %vm15141_vm2 = vmmov %vm15140_vm3  ;;  %v2646_v24 = vrot.slane %v2645_v6, 4  ;;  %v1351_v3 = vrot.slane %v1349_v11, 5  ;;  %v4546_v48 = vsel %vm11798_vm14, 0, %v4545_v44 }
 0x19f   : > { %v4649_v20 = vpack.c.bf16 %v4492_v23, %v4492_v23  ;;  %v2648_v58 = vshll.u32 %v2393_v51, 16  ;;  %281 = vst [vmem:[#allocation2 + $0xb0] sm:$0x8] %v280_v9  ;;  %v441_v14 = vld [vmem:[#allocation2 + $0x74] sm:$0xf]  ;;  %v1906_v6 = vshll.u32 %v1671_v57, 16 }
 0x1a0   : > { %v5179_v28 = vld [vmem:[#allocation3 + $0x34] sm:$0xf]  ;;  %987 = vrot.lane.b32.xlu1 %v904_v8, %s11520_s24  ;;  %v3910_v29 = vrot.slane %v3908_v33, 5  ;;  %v1352_v19 = vor.u32 %v1351_v3, %v1348_v15  ;;  %4547 = vst [vmem:[#allocation3 + $0x30] sm:$0x8] %v4546_v48 }
 0x1a1   : > { %5211 = vst [vmem:[#allocation4 + $0xdc] sm:$0xf] %v5179_v28  ;;  %v6201_v38 = vld [vmem:[#allocation3 + $0x34] sm:$0xf]  ;;  %v2650_v0 = vrot.slane %v2648_v58, 5  ;;  %v629_v28 = vshrl.u32 %v441_v14, 16 }
 0x1a2   : > { %v2262_v34 = vpop.permute.xlu1 %2261  ;;  %6233 = vst [vmem:[#allocation4 + $0xa0] sm:$0xf] %v6201_v38  ;;  %v7224_v39 = vld [vmem:[#allocation3 + $0x34] sm:$0xf]  ;;  %v3911_v42 = vsel %vm11610_vm10, %v3906_v61, %v3910_v29  ;;  %v1353_v18 = vrot.slane %v1352_v19, 4  ;;  %v1901_v58 = vrot.slane %v12527_v60, 4 }
 0x1a3   : > { %7256 = vst [vmem:[#allocation4 + $0x64] sm:$0xf] %v7224_v39  ;;  %v12541_v2 = vld [vmem:[#allocation3 + $0x34] sm:$0xf]  ;;  %v4105_v25 = vpop.permute.xlu2 %4104  ;;  %v2651_v23 = vsel %vm11610_vm10, %v2646_v24, %v2650_v0  ;;  %v631_v39 = vrot.slane %v629_v28, 7  ;;  %v334_v19 = vsel %vm11594_vm6, 0, %v333_v41 }
 0x1a4   : > { %4682 = vst [vmem:[#allocation3 + $0x38] sm:$0xf] %v4649_v20  ;;  %2271 = vrot.lane.b32.xlu0 %v2189_v43, %s11521_s25  ;;  %v4829_v56 = vshrl.u32 %v12541_v2, 16  ;;  %v632_v43 = vshll.u32 %v441_v14, 16  ;;  %v3473_v35 = vld [vmem:[#allocation2 + $0xb4] sm:$0xf] }
 0x1a5   : > { %2345 = vst.msk [vmem:[#allocation4 + $0x1d4] sm:$0xf] %vm2331_vm5, %v2262_v34  ;;  %v440_v34 = vld [vmem:[#allocation2 + $0x70] sm:$0x8]  ;;  %v636_v62 = vrot.slane %v631_v39, 4  ;;  %v4832_v11 = vshll.u32 %v12541_v2, 16 }
 0x1a6   : > { %v3544_v46 = vpop.permute.xlu0 %3543  ;;  %2906 = vst.msk [vmem:[#allocation4 + $0x1d4] sm:$0xf] %vm15139_vm8, %v2823_v7  ;;  %4114 = vrot.lane.b32.xlu2 %v3911_v42, %s11527_s6  ;;  %v12554_v37 = vrot.slane %v4829_v56, 7  ;;  %v634_v33 = vor.u32 %v632_v43, %v631_v39  ;;  %v2953_v42 = vld [vmem:[#allocation2 + $0xb0] sm:$0x8] }
 0x1a7   : > { %3436 = vst.msk [vmem:[#allocation4 + $0x1d4] sm:$0xf] %vm15140_vm3, %v3353_v27  ;;  %v442_v27 = vld [vmem:[#allocation2 + $0x78] sm:$0xf]  ;;  %v2391_v14 = vld [vmem:[#allocation2 + $0xa4] sm:$0xf] }
 0x1a8   : > { %2078 = vrot.lane.b32.xlu1 %v1900_v40, %s11523_s27  ;;  %v4836_v7 = vrot.slane %v12554_v37, 4  ;;  %v638_v45 = vshrl.u32 %v442_v27, 16  ;;  %v641_v38 = vshll.u32 %v442_v27, 16  ;;  %v624_v40 = vshrl.u32 %v440_v34, 16  ;;  %335 = vst [vmem:[#allocation2 + $0xbc] sm:$0x1] %v334_v19 }
 0x1a9   : > { %v905_v41 = vld [vmem:[#allocation2 + $0xa4] sm:$0xf]  ;;  %vm15144_vm3 = vcmask 191648  }
 0x1aa   : > { %v3351_v36 = vpop.permute.xlu1 %3350  ;;  %v10194_v61 = vrot.slane %v624_v40, 11 }
 0x1ab   : > { %3435 = vst.msk [vmem:[#allocation4 + $0x1b0] sm:$0xf] %vm15141_vm2, %v3351_v36  ;;  %v4720_v49 = vld [vmem:[#allocation3 + $0x38] sm:$0xf]  ;;  %v980_v22 = vpop.permute.xlu2 %979  ;;  %v1358_v36 = vsel %vm11610_vm10, %v1353_v18, %v12511_v59  ;;  %vm15142_vm2 = vcmask 126048  }
 0x1ac   : > { %3628 = vst.msk [vmem:[#allocation4 + $0x1b0] sm:$0xf] %vm3615_vm9, %v3544_v46  ;;  %v4838_v53 = vshrl.u32 %v4720_v49, 16  ;;  %v4841_v8 = vshll.u32 %v4720_v49, 16  ;;  %v7225_v10 = vld [vmem:[#allocation3 + $0x38] sm:$0xf]  ;;  %2834 = vrot.lane.b32.xlu0 %v2651_v23, %s11524_s28  ;;  %v635_v4 = vsel %vm11623_vm11, %v10194_v61, %v634_v33  ;;  %vm15143_vm8 = vmmov %vm15142_vm2 }
 0x1ad   : > { %4189 = vst.msk [vmem:[#allocation4 + $0x1b0] sm:$0xf] %vm4176_vm13, %v4105_v25  ;;  %v640_v46 = vrot.slane %v638_v45, 7  ;;  %v1903_v49 = vshrl.u32 %v1671_v57, 16  ;;  %v4718_v23 = vld [vmem:[#allocation3 + $0x30] sm:$0x8] }
 0x1ae   : > { %v4107_v63 = vpop.permute.xlu0 %4106  ;;  %v4840_v26 = vrot.slane %v4838_v53, 7  ;;  %7257 = vst [vmem:[#allocation4 + $0x88] sm:$0xf] %v7225_v10  ;;  %1549 = vrot.lane.b32.xlu2 %v1358_v36, %s11522_s26  ;;  %v3173_v53 = vshrl.u32 %v2953_v42, 16  ;;  %v4824_v27 = vshrl.u32 %v4718_v23, 16 }
 0x1af   : > { %v643_v51 = vor.u32 %v641_v38, %v640_v46  ;;  %v1905_v0 = vrot.slane %v1903_v49, 7  ;;  %867 = vst.msk [vmem:[#allocation4 + $0x1f8] sm:$0xf] %vm226_vm0, %v635_v4 }
 0x1b0   : > { %2273 = vrot.lane.b32.xlu1 %v2190_v31, %s11521_s25  ;;  %v4843_v17 = vor.u32 %v4841_v8, %v4840_v26  ;;  %v10228_v9 = vrot.slane %v3173_v53, 11  ;;  %v10326_v38 = vrot.slane %v4824_v27, 11 }
 0x1b1   : > { %v644_v59 = vsel %vm11623_vm11, %v636_v62, %v643_v51  ;;  %v1908_v15 = vor.u32 %v1906_v6, %v1905_v0  ;;  %v1110_v0 = vld [vmem:[#allocation2 + $0xac] sm:$0x1] }
 0x1b2   : > { %v3546_v12 = vpop.permute.xlu1 %3545  ;;  %v4844_v32 = vsel %vm11623_vm11, %v4836_v7, %v4843_v17  ;;  %868 = vst.msk [vmem:[#allocation4 + $0x21c] sm:$0xf] %vm226_vm0, %v644_v59  ;;  %v4834_v7 = vor.u32 %v4832_v11, %v12554_v37  ;;  %v2632_v37 = vshll.u32 %v2391_v14, 16  ;;  %v1389_v27 = vshll.u32 %v1110_v0, 16 }
 0x1b3   : > { %3629 = vst.msk [vmem:[#allocation4 + $0x1d4] sm:$0xf] %vm3615_vm9, %v3546_v12  ;;  %v2071_v26 = vpop.permute.xlu2 %2070  ;;  %v375_v12 = vld [vmem:[%s11578_s23 + $0x54] sm:$0xf] }
 0x1b4   : > { %4190 = vst.msk [vmem:[#allocation4 + $0x1d4] sm:$0xf] %vm4176_vm13, %v4107_v63  ;;  %v10261_v55 = vld [vmem:[#allocation4 + $0x1b0] sm:$0xf]  ;;  %v2954_v63 = vld [vmem:[#allocation2 + $0xb4] sm:$0xf]  ;;  %3555 = vrot.lane.b32.xlu0 %v3473_v35, %s11526_s30  ;;  %v4835_v40 = vsel %vm11623_vm11, %v10326_v38, %v4834_v7 }
 0x1b5   : > { %5148 = vst [vmem:[#allocation4 + $0xfc] sm:$0xf] %v4844_v32  ;;  %v3178_v8 = vshrl.u32 %v2954_v63, 16  ;;  %v3181_v10 = vshll.u32 %v2954_v63, 16  ;;  %v2629_v32 = vshrl.u32 %v2391_v14, 16  ;;  %v2634_v39 = vrot.slane %v2632_v37, 5 }
 0x1b6   : > { %v1542_v20 = vpop.permute.xlu0 %1541  ;;  %1061 = vst.msk [vmem:[#allocation4 + $0x21c] sm:$0xf] %vm1045_vm12, %v980_v22  ;;  %v1909_v22 = vsel %vm11623_vm11, %v1901_v58, %v1908_v15  ;;  %v3677_v35 = vld [vmem:[#allocation2 + $0xbc] sm:$0x1] }
 0x1b7   : > { %v12588_v17 = vrot.slane %v3178_v8, 7  ;;  %2080 = vrot.lane.b32.xlu2 %v1909_v22, %s11523_s27  ;;  %408 = vst.msk [vmem:[#allocation2 + $0xb8] sm:$0xf] %vm226_vm0, %v375_v12 }
 0x1b8   : > { %5147 = vst [vmem:[#allocation4 + $0xd8] sm:$0xf] %v4835_v40 }
 0x1b9   : > { %v3183_v2 = vor.u32 %v3181_v10, %v12588_v17  ;;  %v3932_v10 = vshll.u32 %v3677_v35, 16 }
 0x1ba   : > { %v978_v25 = vpop.permute.xlu1 %977 }
 0x1bb   : > { %v4422_v29 = vpop.f32.mrf.mxu0  ;;  %v11245_v56 = vld [vmem:[#allocation4 + $0x1d0] sm:$0xf0]  ;;  %1060 = vst.msk [vmem:[#allocation4 + $0x1f8] sm:$0xf] %vm1045_vm12, %v978_v25  ;;  %v3184_v45 = vsel %vm11623_vm11, %v10228_v9, %v3183_v2  ;;  %v2266_v18 = vpop.permute.xlu2 %2265  ;;  %v3934_v14 = vrot.slane %v3932_v10, 5 }
 0x1bc   : > { %v4423_v31 = vadd.f32 %v12519_v54, %v4422_v29  ;;  %v10262_v52 = vor.u32 %v11245_v56, %v10261_v55  ;;  %1624 = vst.msk [vmem:[#allocation4 + $0x1f8] sm:$0xf] %vm1609_vm15, %v1542_v20  ;;  %v2631_v20 = vrot.slane %v2629_v32, 4  ;;  %3362 = vrot.lane.b32.xlu1 %v3184_v45, %s11525_s29  ;;  %v11288_v25 = vld [vmem:[#allocation4 + $0xf8] sm:$0xf0] }
 0x1bd   : > { %2153 = vst.msk [vmem:[#allocation4 + $0x1f8] sm:$0xf] %vm15142_vm2, %v2071_v26  ;;  %v1109_v29 = vld [vmem:[#allocation2 + $0xa8] sm:$0xf]  ;;  %v1108_v56 = vld [vmem:[#allocation2 + $0xa4] sm:$0xf] }
 0x1be   : > { %v4493_v60 = vmax.f32 %v4423_v31, 0.0  ;;  %10313 = vmatmul.msk.bf16.gmra.mxu0 %vm4345_vm1, %v10262_v52  ;;  %v2073_v3 = vpop.permute.xlu0 %2072  ;;  %v2635_v44 = vor.u32 %v2634_v39, %v2631_v20  ;;  %v1383_v57 = vshrl.u32 %v1109_v29, 16  ;;  %v1379_v49 = vshll.u32 %v1109_v29, 16  ;;  %v3474_v63 = vld [vmem:[#allocation2 + $0xb8] sm:$0xf] }
 0x1bf   : > { %v10481_v55 = vld [vmem:[#allocation4 + $0xd8] sm:$0xf]  ;;  %v1370_v53 = vshrl.u32 %v1108_v56, 16  ;;  %v1373_v59 = vshll.u32 %v1108_v56, 16  ;;  %vm15145_vm2 = vcmask 224448   ;;  %v3185_v20 = vrot.slane %v12588_v17, 4 }
 0x1c0   : > { %v4650_v24 = vpack.c.bf16 %v4493_v60, %v4493_v60  ;;  %v2636_v46 = vrot.slane %v2635_v44, 4  ;;  %v10482_v42 = vor.u32 %v11288_v25, %v10481_v55  ;;  %v1385_v4 = vrot.slane %v1383_v57, 4  ;;  %v2955_v7 = vld [vmem:[#allocation2 + $0xb8] sm:$0xf]  ;;  %v12625_v32 = vld [vmem:[#allocation2 + $0xb4] sm:$0xf] }
 0x1c1   : > { %v12616_v60 = vrot.slane %v1379_v49, 5  ;;  %v1372_v9 = vrot.slane %v1370_v53, 4  ;;  %v3187_v2 = vshrl.u32 %v2955_v7, 16  ;;  %v1391_v44 = vrot.slane %v1389_v27, 5  ;;  %v3675_v57 = vld [vmem:[#allocation2 + $0xb4] sm:$0xf] }
 0x1c2   : > { %v1544_v28 = vpop.permute.xlu1 %1543  ;;  %4683 = vst [vmem:[#allocation3 + $0x44] sm:$0xf] %v4650_v24  ;;  %v2641_v51 = vsel %vm11610_vm10, %v2636_v46, %v12548_v13  ;;  %9281 = vmatmul.bf16.gmra.mxu1 %v10482_v42  ;;  %v3676_v13 = vld [vmem:[#allocation2 + $0xb8] sm:$0xf]  ;;  %v1375_v24 = vrot.slane %v1373_v59, 5  ;;  %v1916_v46 = vshrl.u32 %v12625_v32, 16 }
 0x1c3   : > { %v4424_v34 = vpop.f32.mrf.mxu0  ;;  %1625 = vst.msk [vmem:[#allocation4 + $0x21c] sm:$0xf] %vm1609_vm15, %v1544_v28  ;;  %2832 = vrot.lane.b32.xlu2 %v2641_v51, %s11524_s28  ;;  %v3922_v26 = vshll.u32 %v3676_v13, 16  ;;  %v3926_v8 = vshrl.u32 %v3676_v13, 16  ;;  %v1386_v23 = vor.u32 %v1385_v4, %v12616_v60  ;;  %v3190_v28 = vshll.u32 %v2955_v7, 16 }
 0x1c4   : > { %v4425_v43 = vadd.f32 %v12519_v54, %v4424_v34  ;;  %2154 = vst.msk [vmem:[#allocation4 + $0x21c] sm:$0xf] %vm15143_vm8, %v2073_v3  ;;  %3557 = vrot.lane.b32.xlu1 %v3474_v63, %s11526_s30  ;;  %vm15146_vm8 = vmmov %vm15144_vm3  ;;  %v1376_v37 = vor.u32 %v1375_v24, %v1372_v9  ;;  %v3189_v45 = vrot.slane %v3187_v2, 7  ;;  %v12642_v55 = vrot.slane %v1916_v46, 7  ;;  %v2394_v63 = vld [vmem:[#allocation2 + $0xb4] sm:$0xf] }
 0x1c5   : > { %2347 = vst.msk [vmem:[#allocation4 + $0x21c] sm:$0xf] %vm2331_vm5, %v2266_v18  ;;  %v12618_v11 = vrot.slane %v3922_v26, 5  ;;  %v3928_v12 = vrot.slane %v3926_v8, 4  ;;  %v1387_v39 = vrot.slane %v1386_v23, 4  ;;  %v3913_v13 = vshrl.u32 %v3675_v57, 16 }
 0x1c6   : > { %v4494_v61 = vmax.f32 %v4425_v43, 0.0  ;;  %v2825_v33 = vpop.permute.xlu0 %2824  ;;  %v1674_v18 = vld [vmem:[#allocation2 + $0xb8] sm:$0xf]  ;;  %v1923_v59 = vrot.slane %v12642_v55, 4  ;;  %v3916_v35 = vshll.u32 %v3675_v57, 16  ;;  %v2653_v8 = vshrl.u32 %v2394_v63, 16 }
 0x1c7   : > { %v3929_v3 = vor.u32 %v3928_v12, %v12618_v11  ;;  %v1392_v29 = vsel %vm11610_vm10, %v1387_v39, %v1391_v44  ;;  %v1928_v49 = vshll.u32 %v1674_v18, 16  ;;  %v2395_v4 = vld [vmem:[#allocation2 + $0xb8] sm:$0xf]  ;;  %v2656_v10 = vshll.u32 %v2394_v63, 16  ;;  %v4548_v23 = vld [vmem:[#allocation3 + $0x40] sm:$0x8] }
 0x1c8   : > { %v4651_v52 = vpack.c.bf16 %v4494_v61, %v4494_v61  ;;  %v3355_v58 = vpop.permute.xlu2 %3354  ;;  %v3915_v0 = vrot.slane %v3913_v13, 4  ;;  %v3918_v12 = vrot.slane %v3916_v35, 5  ;;  %v2662_v9 = vshll.u32 %v2395_v4, 16  ;;  %v2191_v27 = vld [vmem:[#allocation2 + $0xb4] sm:$0xf] }
 0x1c9   : > { %v5181_v48 = vld [vmem:[#allocation3 + $0x44] sm:$0xf]  ;;  %v3930_v19 = vrot.slane %v3929_v3, 4  ;;  %v2666_v7 = vshrl.u32 %v2395_v4, 16  ;;  %v1672_v4 = vld [vmem:[#allocation2 + $0xb0] sm:$0x8] }
 0x1ca   : > { %v2264_v62 = vpop.permute.xlu1 %2263  ;;  %5213 = vst [vmem:[#allocation4 + $0x124] sm:$0xf] %v5181_v48  ;;  %v6203_v36 = vld [vmem:[#allocation3 + $0x44] sm:$0xf]  ;;  %v3919_v2 = vor.u32 %v3918_v12, %v3915_v0  ;;  %v1911_v12 = vshrl.u32 %v1672_v4, 16 }
 0x1cb   : > { %6235 = vst [vmem:[#allocation4 + $0xe8] sm:$0xf] %v6203_v36  ;;  %v7226_v31 = vld [vmem:[#allocation3 + $0x44] sm:$0xf]  ;;  %v3935_v43 = vsel %vm11610_vm10, %v3930_v19, %v3934_v14  ;;  %v1925_v36 = vshrl.u32 %v1674_v18, 16  ;;  %v2664_v19 = vrot.slane %v2662_v9, 5 }
 0x1cc   : > { %7258 = vst [vmem:[#allocation4 + $0xac] sm:$0xf] %v7226_v31  ;;  %v12629_v38 = vld [vmem:[#allocation3 + $0x44] sm:$0xf]  ;;  %989 = vrot.lane.b32.xlu1 %v905_v41, %s11520_s24  ;;  %4118 = vrot.lane.b32.xlu0 %v3935_v43, %s11527_s6  ;;  %v2658_v41 = vrot.slane %v2656_v10, 5  ;;  %v3920_v39 = vrot.slane %v3919_v2, 4 }
 0x1cd   : > { %4684 = vst [vmem:[#allocation3 + $0x48] sm:$0xf] %v4651_v52  ;;  %v4851_v61 = vshrl.u32 %v12629_v38, 16  ;;  %v376_v18 = vld [vmem:[%s11578_s23 + $0x58] sm:$0xf]  ;;  %v1919_v9 = vshll.u32 %v12625_v32, 16 }
 0x1ce   : > { %2346 = vst.msk [vmem:[#allocation4 + $0x1f8] sm:$0xf] %vm2331_vm5, %v2264_v62  ;;  %v3357_v15 = vpop.permute.xlu0 %3356  ;;  %v3192_v62 = vor.u32 %v3190_v28, %v3189_v45  ;;  %v443_v28 = vld [vmem:[#allocation2 + $0x80] sm:$0x8] }
 0x1cf   : > { %2907 = vst.msk [vmem:[#allocation4 + $0x1f8] sm:$0xf] %vm15144_vm3, %v2825_v33  ;;  %vm15147_vm3 = vmmov %vm15145_vm2  ;;  %v1377_v33 = vrot.slane %v1376_v37, 4  ;;  %v12645_v42 = vrot.slane %v4851_v61, 7  ;;  %v2668_v37 = vrot.slane %v2666_v7, 4 }
 0x1d0   : > { %3437 = vst.msk [vmem:[#allocation4 + $0x1f8] sm:$0xf] %vm15145_vm2, %v3355_v58  ;;  %v3550_v22 = vpop.permute.xlu2 %3549  ;;  %v3193_v51 = vsel %vm11623_vm11, %v3185_v20, %v3192_v62  ;;  %v1927_v58 = vrot.slane %v1925_v36, 7  ;;  %v646_v20 = vshrl.u32 %v443_v28, 16  ;;  %v377_v61 = vld [vmem:[%s11578_s23 + $0x5c] sm:$0xf]  ;;  %v3925_v36 = vsel %vm11610_vm10, %v3920_v39, %v12618_v11 }
 0x1d1   : > { %3364 = vrot.lane.b32.xlu2 %v3193_v51, %s11525_s29  ;;  %v1382_v31 = vsel %vm11610_vm10, %v1377_v33, %v12616_v60  ;;  %v4858_v24 = vrot.slane %v12645_v42, 4  ;;  %v4549_v33 = vsel %vm11798_vm14, 0, %v4548_v23  ;;  %409 = vst.msk [vmem:[#allocation2 + $0xc4] sm:$0xf] %vm226_vm0, %v376_v18  ;;  %vm15148_vm2 = vcmask 126048  }
 0x1d2   : > { %v2827_v6 = vpop.permute.xlu1 %2826  ;;  %v1930_v26 = vor.u32 %v1928_v49, %v1927_v58  ;;  %410 = vst.msk [vmem:[#allocation2 + $0xc8] sm:$0xf] %vm226_vm0, %v377_v61 }
 0x1d3   : > { %2908 = vst.msk [vmem:[#allocation4 + $0x21c] sm:$0xf] %vm15146_vm8, %v2827_v6  ;;  %vm15149_vm8 = vmmov %vm15148_vm2 }
 0x1d4   : > { %3438 = vst.msk [vmem:[#allocation4 + $0x21c] sm:$0xf] %vm15147_vm3, %v3357_v15  ;;  %v5182_v34 = vld [vmem:[#allocation3 + $0x48] sm:$0xf]  ;;  %1555 = vrot.lane.b32.xlu1 %v1392_v29, %s11522_s26  ;;  %1553 = vrot.lane.b32.xlu0 %v1382_v31, %s11522_s26  ;;  %v2655_v15 = vrot.slane %v2653_v8, 4  ;;  %v1931_v14 = vsel %vm11623_vm11, %v1923_v59, %v1930_v26  ;;  %vm15150_vm3 = vcmask 191648  }
 0x1d5   : > { %5214 = vst [vmem:[#allocation4 + $0x148] sm:$0xf] %v5182_v34  ;;  %v4723_v48 = vld [vmem:[#allocation3 + $0x48] sm:$0xf]  ;;  %v444_v34 = vld [vmem:[#allocation2 + $0x84] sm:$0xf] }
 0x1d6   : > { %v7227_v25 = vld [vmem:[#allocation3 + $0x48] sm:$0xf]  ;;  %v4860_v17 = vshrl.u32 %v4723_v48, 16  ;;  %v4109_v56 = vpop.permute.xlu0 %4108  ;;  %3631 = vst.msk [vmem:[#allocation4 + $0x21c] sm:$0xf] %vm3615_vm9, %v3550_v22  ;;  %v4863_v60 = vshll.u32 %v4723_v48, 16  ;;  %v2669_v48 = vor.u32 %v2668_v37, %v2664_v19 }
 0x1d7   : > { %7259 = vst [vmem:[#allocation4 + $0xd0] sm:$0xf] %v7227_v25  ;;  %v2396_v22 = vld [vmem:[#allocation2 + $0xbc] sm:$0x1]  ;;  %v651_v43 = vshrl.u32 %v444_v34, 16  ;;  %v654_v44 = vshll.u32 %v444_v34, 16 }
 0x1d8   : > { %v12650_v52 = vpop.permute.xlu2 %981  ;;  %v4862_v53 = vrot.slane %v4860_v17, 7  ;;  %v2672_v45 = vshll.u32 %v2396_v22, 16  ;;  %v10195_v17 = vrot.slane %v646_v20, 11  ;;  %v445_v29 = vld [vmem:[#allocation2 + $0x88] sm:$0xf]  ;;  %v2670_v31 = vrot.slane %v2669_v48, 4 }
 0x1d9   : > { %v653_v51 = vrot.slane %v651_v43, 7  ;;  %4116 = vrot.lane.b32.xlu2 %v3925_v36, %s11527_s6  ;;  %v660_v58 = vshrl.u32 %v445_v29, 16  ;;  %v663_v49 = vshll.u32 %v445_v29, 16  ;;  %4550 = vst [vmem:[#allocation3 + $0x40] sm:$0x8] %v4549_v33  ;;  %v10213_v34 = vrot.slane %v1911_v12, 11 }
 0x1da   : > { %v3548_v40 = vpop.permute.xlu1 %3547  ;;  %v4865_v3 = vor.u32 %v4863_v60, %v4862_v53  ;;  %v2674_v62 = vrot.slane %v2672_v45, 5  ;;  %v3678_v7 = vld [vmem:[#allocation2 + $0xc4] sm:$0xf]  ;;  %v1921_v20 = vor.u32 %v1919_v9, %v12642_v55  ;;  %v3679_v18 = vld [vmem:[#allocation2 + $0xc8] sm:$0xf] }
 0x1db   : > { %3630 = vst.msk [vmem:[#allocation4 + $0x1f8] sm:$0xf] %vm3615_vm9, %v3548_v40  ;;  %v2659_v40 = vor.u32 %v2658_v41, %v2655_v15  ;;  %v656_v53 = vor.u32 %v654_v44, %v653_v51  ;;  %v658_v13 = vrot.slane %v653_v51, 4  ;;  %v662_v35 = vrot.slane %v660_v58, 7  ;;  %v12689_v15 = vld [vmem:[#allocation2 + $0xc4] sm:$0xf] }
 0x1dc   : > { %4191 = vst.msk [vmem:[#allocation4 + $0x1f8] sm:$0xf] %vm4176_vm13, %v4109_v56  ;;  %2275 = vrot.lane.b32.xlu1 %v2191_v27, %s11521_s25  ;;  %v4866_v56 = vsel %vm11623_vm11, %v4858_v24, %v4865_v3  ;;  %2084 = vrot.lane.b32.xlu0 %v1931_v14, %s11523_s27  ;;  %v2675_v26 = vsel %vm11610_vm10, %v2670_v31, %v2674_v62  ;;  %v4854_v24 = vshll.u32 %v12629_v38, 16  ;;  %v2958_v3 = vld [vmem:[#allocation2 + $0xc8] sm:$0xf]  ;;  %v3200_v14 = vshrl.u32 %v12689_v15, 16 }
 0x1dd   : > { %v2660_v63 = vrot.slane %v2659_v40, 4  ;;  %v657_v8 = vsel %vm11623_vm11, %v10195_v17, %v656_v53  ;;  %5150 = vst [vmem:[#allocation4 + $0x144] sm:$0xf] %v4866_v56  ;;  %v665_v10 = vor.u32 %v663_v49, %v662_v35  ;;  %v3209_v38 = vshrl.u32 %v2958_v3, 16  ;;  %v3475_v39 = vld [vmem:[#allocation2 + $0xc4] sm:$0xf] }
 0x1de   : > { %v984_v46 = vpop.permute.xlu0 %983  ;;  %869 = vst.msk [vmem:[#allocation4 + $0x240] sm:$0xf] %vm226_vm0, %v657_v8  ;;  %v4856_v32 = vor.u32 %v4854_v24, %v12645_v42  ;;  %v3212_v27 = vshll.u32 %v2958_v3, 16  ;;  %v12699_v37 = vrot.slane %v3200_v14, 7  ;;  %v3946_v51 = vshll.u32 %v3679_v18, 16 }
 0x1df   : > { %v2665_v0 = vsel %vm11610_vm10, %v2660_v63, %v2664_v19  ;;  %1062 = vst.msk [vmem:[#allocation4 + $0x240] sm:$0xf] %vm1045_vm12, %v12650_v52  ;;  %v666_v41 = vsel %vm11623_vm11, %v658_v13, %v665_v10  ;;  %v3937_v52 = vshrl.u32 %v3678_v7, 16  ;;  %v336_v19 = vld [vmem:[#allocation2 + $0xcc] sm:$0x1]  ;;  %v3211_v43 = vrot.slane %v3209_v38, 7 }
 0x1e0   : > { %v1548_v57 = vpop.permute.xlu2 %1547  ;;  %870 = vst.msk [vmem:[#allocation4 + $0x264] sm:$0xf] %vm226_vm0, %v666_v41  ;;  %v4721_v45 = vld [vmem:[#allocation3 + $0x40] sm:$0x8]  ;;  %v3207_v62 = vrot.slane %v12699_v37, 4  ;;  %v337_v33 = vsel %vm11594_vm6, 0, %v336_v19 }
 0x1e1   : > { %1063 = vst.msk [vmem:[#allocation4 + $0x264] sm:$0xf] %vm1045_vm12, %v984_v46  ;;  %v4846_v44 = vshrl.u32 %v4721_v45, 16  ;;  %v3939_v48 = vrot.slane %v3937_v52, 4  ;;  %v3940_v46 = vshll.u32 %v3678_v7, 16  ;;  %v3948_v53 = vrot.slane %v3946_v51, 5 }
 0x1e2   : > { %v4111_v6 = vpop.permute.xlu1 %4110  ;;  %1627 = vst.msk [vmem:[#allocation4 + $0x264] sm:$0xf] %vm1609_vm15, %v1548_v57  ;;  %v1111_v35 = vld [vmem:[#allocation2 + $0xb4] sm:$0xf]  ;;  %v11432_v38 = vld [vmem:[%s15110_s3 + $0xf8] sm:$0xff] }
 0x1e3   : > { %4192 = vst.msk [vmem:[#allocation4 + $0x21c] sm:$0xf] %vm4176_vm13, %v4111_v6  ;;  %v906_v6 = vld [vmem:[#allocation2 + $0xa8] sm:$0xf]  ;;  %v10265_v28 = vld [vmem:[#allocation4 + $0x1f8] sm:$0xf]  ;;  %9525 = vmatpush.bf16.msrb.mxu0 %v11432_v38 }
 0x1e4   : > { %2838 = vrot.lane.b32.xlu1 %v2675_v26, %s11524_s28  ;;  %2836 = vrot.lane.b32.xlu0 %v2665_v0, %s11524_s28  ;;  %v10327_v36 = vrot.slane %v4846_v44, 11  ;;  %v3942_v17 = vrot.slane %v3940_v46, 5  ;;  %338 = vst [vmem:[#allocation2 + $0xcc] sm:$0x1] %v337_v33  ;;  %v11297_v26 = vld [vmem:[#allocation4 + $0x140] sm:$0xf0] }
 0x1e5   : > { %991 = vrot.lane.b32.xlu2 %v906_v6, %s11520_s24  ;;  %v2192_v0 = vld [vmem:[#allocation2 + $0xb8] sm:$0xf]  ;;  %v1394_v9 = vshrl.u32 %v1111_v35, 16  ;;  %v1397_v24 = vshll.u32 %v1111_v35, 16 }
 0x1e6   : > { %v2075_v2 = vpop.permute.xlu0 %2074  ;;  %v4857_v31 = vsel %vm11623_vm11, %v10327_v36, %v4856_v32  ;;  %v3943_v58 = vor.u32 %v3942_v17, %v3939_v48  ;;  %v908_v19 = vld [vmem:[#allocation2 + $0xb8] sm:$0xf] }
 0x1e7   : > { %5149 = vst [vmem:[#allocation4 + $0x120] sm:$0xf] %v4857_v31  ;;  %v1396_v14 = vrot.slane %v1394_v9, 4  ;;  %v1399_v52 = vrot.slane %v1397_v24, 5  ;;  %v1677_v31 = vld [vmem:[#allocation2 + $0xc8] sm:$0xf] }
 0x1e8   : > { %v2268_v42 = vpop.permute.xlu2 %2267  ;;  %v3944_v63 = vrot.slane %v3943_v58, 4 }
 0x1ea   : > { %v4427_v25 = vpop.f32.mrf.mxu0  ;;  %v1546_v59 = vpop.permute.xlu1 %1545  ;;  %v11246_v61 = vld [vmem:[#allocation4 + $0x218] sm:$0xf0]  ;;  %v3949_v10 = vsel %vm11610_vm10, %v3944_v63, %v3948_v53  ;;  %v1947_v63 = vshrl.u32 %v1677_v31, 16 }
 0x1eb   : > { %v4428_v11 = vadd.f32 %v12519_v54, %v4427_v25  ;;  %1626 = vst.msk [vmem:[#allocation4 + $0x240] sm:$0xf] %vm1609_vm15, %v1546_v59  ;;  %v3214_v25 = vor.u32 %v3212_v27, %v3211_v43  ;;  %v10266_v29 = vor.u32 %v11246_v61, %v10265_v28  ;;  %v3680_v3 = vld [vmem:[#allocation2 + $0xcc] sm:$0x1]  ;;  %v1676_v61 = vld [vmem:[#allocation2 + $0xc4] sm:$0xf] }
 0x1ec   : > { %2155 = vst.msk [vmem:[#allocation4 + $0x240] sm:$0xf] %vm15148_vm2, %v2075_v2  ;;  %3559 = vrot.lane.b32.xlu1 %v3475_v39, %s11526_s30  ;;  %v12725_v2 = vld [vmem:[#allocation2 + $0xb8] sm:$0xf]  ;;  %v1400_v39 = vor.u32 %v1399_v52, %v1396_v14  ;;  %v1938_v36 = vshrl.u32 %v1676_v61, 16  ;;  %vm15151_vm2 = vmmov %vm15150_vm3 }
 0x1ed   : > { %v4495_v60 = vmax.f32 %v4428_v11, 0.0  ;;  %v3215_v57 = vsel %vm11623_vm11, %v3207_v62, %v3214_v25  ;;  %10314 = vmatmul.msk.bf16.gmra.mxu0 %vm4345_vm1, %v10266_v29  ;;  %v3950_v11 = vshrl.u32 %v3679_v18, 16  ;;  %2348 = vst.msk [vmem:[#allocation4 + $0x240] sm:$0xf] %vm2331_vm5, %v2268_v42  ;;  %v1403_v42 = vshll.u32 %v12725_v2, 16  ;;  %v11431_v25 = vld [vmem:[%s15110_s3 + $0xf0] sm:$0xff] }
 0x1ee   : > { %3368 = vrot.lane.b32.xlu0 %v3215_v57, %s11525_s29  ;;  %v2270_v59 = vpop.permute.xlu0 %2269  ;;  %v10517_v12 = vld [vmem:[#allocation4 + $0x120] sm:$0xf]  ;;  %v1401_v46 = vrot.slane %v1400_v39, 4  ;;  %9526 = vmatpush.bf16.msrb.mxu0 %v11431_v25  ;;  %v11430_v29 = vld [vmem:[%s15110_s3 + $0xe8] sm:$0xff]  ;;  %v3203_v57 = vshll.u32 %v12689_v15, 16  ;;  %v1407_v25 = vshrl.u32 %v12725_v2, 16 }
 0x1ef   : > { %v4652_v22 = vpack.c.bf16 %v4495_v60, %v4495_v60  ;;  %v3952_v8 = vrot.slane %v3950_v11, 4  ;;  %v10518_v41 = vor.u32 %v11297_v26, %v10517_v12  ;;  %v12737_v62 = vrot.slane %v1403_v42, 5  ;;  %v11429_v15 = vld [vmem:[%s15110_s3 + $0xe0] sm:$0xff]  ;;  %v11428_v2 = vld [vmem:[%s15110_s3 + $0xd8] sm:$0xff] }
 0x1f0   : > { %v2831_v4 = vpop.permute.xlu2 %2830  ;;  %v1941_v11 = vshll.u32 %v1676_v61, 16 }
 0x1f1   : > { %4685 = vst [vmem:[#allocation3 + $0x54] sm:$0xf] %v4652_v22  ;;  %9286 = vmatmul.bf16.gmra.mxu1 %v10518_v41  ;;  %v3956_v22 = vshll.u32 %v3680_v3, 16  ;;  %v1406_v51 = vsel %vm11610_vm10, %v1401_v46, %v12737_v62  ;;  %v12766_v41 = vld [vmem:[#allocation2 + $0xc8] sm:$0xf] }
 0x1f2   : > { %v4429_v23 = vpop.f32.mrf.mxu0  ;;  %v2077_v55 = vpop.permute.xlu1 %2076  ;;  %9527 = vmatpush.bf16.msrb.mxu0 %v11430_v29  ;;  %v2686_v38 = vshll.u32 %v12766_v41, 16  ;;  %v447_v46 = vld [vmem:[#allocation2 + $0x94] sm:$0xf] }
 0x1f3   : > { %v4430_v40 = vadd.f32 %v12519_v54, %v4429_v23  ;;  %v1922_v54 = vsel %vm11623_vm11, %v10213_v34, %v1921_v20  ;;  %2156 = vst.msk [vmem:[#allocation4 + $0x264] sm:$0xf] %vm15149_vm8, %v2077_v55  ;;  %v3953_v23 = vor.u32 %v3952_v8, %v3948_v53  ;;  %v3958_v34 = vrot.slane %v3956_v22, 5  ;;  %v282_v20 = vld [vmem:[#allocation2 + $0xc0] sm:$0x8] }
 0x1f4   : > { %2082 = vrot.lane.b32.xlu2 %v1922_v54, %s11523_s27  ;;  %v283_v18 = vsel %vm11581_vm4, 0, %v282_v20  ;;  %2349 = vst.msk [vmem:[#allocation4 + $0x264] sm:$0xf] %vm2331_vm5, %v2270_v59  ;;  %vm15152_vm8 = vcmask 224448   ;;  %v1950_v53 = vshll.u32 %v1677_v31, 16 }
 0x1f5   : > { %v4496_v56 = vmax.f32 %v4430_v40, 0.0  ;;  %v3954_v27 = vrot.slane %v3953_v23, 4  ;;  %284 = vst [vmem:[#allocation2 + $0xc0] sm:$0x8] %v283_v18  ;;  %v378_v22 = vld [vmem:[%s11578_s23 + $0x60] sm:$0xf] }
 0x1f6   : > { %4120 = vrot.lane.b32.xlu0 %v3949_v10, %s11527_s6  ;;  %v3359_v32 = vpop.permute.xlu0 %3358  ;;  %2910 = vst.msk [vmem:[#allocation4 + $0x264] sm:$0xf] %vm15150_vm3, %v2831_v4  ;;  %v1949_v4 = vrot.slane %v1947_v63, 7  ;;  %vm15153_vm3 = vmmov %vm15152_vm8  ;;  %v2397_v10 = vld [vmem:[#allocation2 + $0xc4] sm:$0xf]  ;;  %9528 = vmatpush.bf16.msrb.mxu0 %v11429_v15 }
 0x1f7   : > { %v4653_v49 = vpack.c.bf16 %v4496_v56, %v4496_v56  ;;  %v3959_v44 = vsel %vm11610_vm10, %v3954_v27, %v3958_v34  ;;  %v2677_v3 = vshrl.u32 %v2397_v10, 16  ;;  %v2680_v14 = vshll.u32 %v2397_v10, 16  ;;  %v285_v27 = vld [vmem:[#allocation2 + $0xd0] sm:$0x8]  ;;  %411 = vst.msk [vmem:[#allocation2 + $0xd4] sm:$0xf] %vm226_vm0, %v378_v22 }
 0x1f8   : > { %v5183_v13 = vld [vmem:[#allocation3 + $0x54] sm:$0xf]  ;;  %v3552_v45 = vpop.permute.xlu2 %3551  ;;  %4122 = vrot.lane.b32.xlu1 %v3959_v44, %s11527_s6  ;;  %v1952_v24 = vor.u32 %v1950_v53, %v1949_v4  ;;  %v3476_v63 = vld [vmem:[#allocation2 + $0xc8] sm:$0xf] }
 0x1f9   : > { %4686 = vst [vmem:[#allocation3 + $0x58] sm:$0xf] %v4653_v49  ;;  %v6205_v60 = vld [vmem:[#allocation3 + $0x54] sm:$0xf]  ;;  %v1940_v49 = vrot.slane %v1938_v36, 7  ;;  %v2679_v34 = vrot.slane %v2677_v3, 4 }
 0x1fa   : > { %5215 = vst [vmem:[#allocation4 + $0x16c] sm:$0xf] %v5183_v13  ;;  %v2829_v6 = vpop.permute.xlu1 %2828  ;;  %v7228_v7 = vld [vmem:[#allocation3 + $0x54] sm:$0xf]  ;;  %v2682_v20 = vrot.slane %v2680_v14, 5  ;;  %v12792_v36 = vrot.slane %v2686_v38, 5  ;;  %9529 = vmatpush.bf16.msrb.mxu0 %v11428_v2 }
 0x1fb   : > { %6237 = vst [vmem:[#allocation4 + $0x130] sm:$0xf] %v6205_v60  ;;  %v12739_v55 = vld [vmem:[#allocation3 + $0x54] sm:$0xf]  ;;  %v1945_v35 = vrot.slane %v1940_v49, 4  ;;  %v1943_v9 = vor.u32 %v1941_v11, %v1940_v49 }
 0x1fc   : > { %2277 = vrot.lane.b32.xlu2 %v2192_v0, %s11521_s25  ;;  %7260 = vst [vmem:[#allocation4 + $0xf4] sm:$0xf] %v7228_v7  ;;  %v4873_v56 = vshrl.u32 %v12739_v55, 16  ;;  %v2956_v0 = vld [vmem:[#allocation2 + $0xc0] sm:$0x8] }
 0x1fd   : > { %2909 = vst.msk [vmem:[#allocation4 + $0x240] sm:$0xf] %vm15151_vm2, %v2829_v6  ;;  %v3205_v6 = vor.u32 %v3203_v57, %v12699_v37  ;;  %v1675_v12 = vld [vmem:[#allocation2 + $0xc0] sm:$0x8]  ;;  %v3195_v7 = vshrl.u32 %v2956_v0, 16  ;;  %v11427_v0 = vld [vmem:[%s15110_s3 + $0xd0] sm:$0xff] }
 0x1fe   : > { %995 = vrot.lane.b32.xlu0 %v908_v19, %s11520_s24  ;;  %v3554_v17 = vpop.permute.xlu0 %3553  ;;  %3439 = vst.msk [vmem:[#allocation4 + $0x240] sm:$0xf] %vm15152_vm8, %v3359_v32  ;;  %v12762_v26 = vrot.slane %v4873_v56, 7  ;;  %v1933_v23 = vshrl.u32 %v1675_v12, 16  ;;  %v1953_v32 = vsel %vm11623_vm11, %v1945_v35, %v1952_v24  ;;  %v12776_v37 = vld [vmem:[%s15109_s2] ss:$0 sm:$0xff]  ;;  %9530 = vmatpush.bf16.msrb.mxu0 %v11427_v0 }
 0x1ff   : > { %3632 = vst.msk [vmem:[#allocation4 + $0x240] sm:$0xf] %vm3615_vm9, %v3552_v45  ;;  %v10229_v19 = vrot.slane %v3195_v7, 11  ;;  %v379_v56 = vld [vmem:[%s11578_s23 + $0x64] sm:$0xf]  ;;  %vm15154_vm2 = vcmask 126048  }
 0x200   : > { %v5184_v28 = vld [vmem:[#allocation3 + $0x58] sm:$0xf]  ;;  %v4115_v58 = vpop.permute.xlu2 %4114  ;;  %1557 = vrot.lane.b32.xlu1 %v1406_v51, %s11522_s26  ;;  %v10214_v45 = vrot.slane %v1933_v23, 11  ;;  %v4880_v42 = vrot.slane %v12762_v26, 4  ;;  %412 = vst.msk [vmem:[#allocation2 + $0xd8] sm:$0xf] %vm226_vm0, %v379_v56  ;;  %vm15155_vm8 = vmmov %vm15154_vm2 }
 0x201   : > { %5216 = vst [vmem:[#allocation4 + $0x190] sm:$0xf] %v5184_v28  ;;  %v6206_v40 = vld [vmem:[#allocation3 + $0x58] sm:$0xf]  ;;  %v3206_v44 = vsel %vm11623_vm11, %v10229_v19, %v3205_v6  ;;  %v2194_v53 = vld [vmem:[#allocation2 + $0xc8] sm:$0xf] }
 0x202   : > { %v3361_v43 = vpop.permute.xlu1 %3360  ;;  %6238 = vst [vmem:[#allocation4 + $0x154] sm:$0xf] %v6206_v40  ;;  %v7229_v48 = vld [vmem:[#allocation3 + $0x58] sm:$0xf]  ;;  %v286_v40 = vsel %vm11581_vm4, 0, %v285_v27  ;;  %v1944_v18 = vsel %vm11623_vm11, %v10214_v45, %v1943_v9  ;;  %v1409_v45 = vrot.slane %v1407_v25, 4 }
 0x203   : > { %v4726_v33 = vld [vmem:[#allocation3 + $0x58] sm:$0xf]  ;;  %7261 = vst [vmem:[#allocation4 + $0x118] sm:$0xf] %v7229_v48  ;;  %v2683_v48 = vor.u32 %v2682_v20, %v2679_v34  ;;  %v4551_v35 = vld [vmem:[#allocation3 + $0x50] sm:$0x8] }
 0x204   : > { %v4882_v54 = vshrl.u32 %v4726_v33, 16  ;;  %3440 = vst.msk [vmem:[#allocation4 + $0x264] sm:$0xf] %vm15153_vm3, %v3361_v43  ;;  %v4885_v8 = vshll.u32 %v4726_v33, 16  ;;  %v446_v43 = vld [vmem:[#allocation2 + $0x90] sm:$0x8]  ;;  %3366 = vrot.lane.b32.xlu2 %v3206_v44, %s11525_s29  ;;  %v1410_v25 = vor.u32 %v1409_v45, %v12737_v62 }
 0x205   : > { %3633 = vst.msk [vmem:[#allocation4 + $0x264] sm:$0xf] %vm3615_vm9, %v3554_v17  ;;  %v668_v61 = vshrl.u32 %v446_v43, 16  ;;  %v673_v17 = vshrl.u32 %v447_v46, 16  ;;  %v2684_v51 = vrot.slane %v2683_v48, 4  ;;  %vm15156_vm3 = vcmask 191648  }
 0x206   : > { %v4884_v13 = vrot.slane %v4882_v54, 7  ;;  %4194 = vst.msk [vmem:[#allocation4 + $0x264] sm:$0xf] %vm4176_vm13, %v4115_v58  ;;  %v986_v39 = vpop.permute.xlu0 %985  ;;  %2086 = vrot.lane.b32.xlu0 %v1944_v18, %s11523_s27  ;;  %v676_v54 = vshll.u32 %v447_v46, 16  ;;  %v448_v11 = vld [vmem:[#allocation2 + $0x98] sm:$0xf] }
 0x207   : > { %287 = vst [vmem:[#allocation2 + $0xd0] sm:$0x8] %v286_v40  ;;  %v10196_v29 = vrot.slane %v668_v61, 11  ;;  %v675_v49 = vrot.slane %v673_v17, 7  ;;  %v2689_v4 = vsel %vm11610_vm10, %v2684_v51, %v12792_v36  ;;  %v2960_v15 = vld [vmem:[#allocation2 + $0xd4] sm:$0xf] }
 0x208   : > { %v4887_v52 = vor.u32 %v4885_v8, %v4884_v13  ;;  %2088 = vrot.lane.b32.xlu1 %v1953_v32, %s11523_s27  ;;  %v1550_v33 = vpop.permute.xlu2 %1549  ;;  %v685_v13 = vshll.u32 %v448_v11, 16  ;;  %v3222_v6 = vshrl.u32 %v2960_v15, 16  ;;  %v3225_v12 = vshll.u32 %v2960_v15, 16  ;;  %v2961_v34 = vld [vmem:[#allocation2 + $0xd8] sm:$0xf] }
 0x209   : > { %v678_v8 = vor.u32 %v676_v54, %v675_v49  ;;  %v680_v9 = vrot.slane %v675_v49, 4  ;;  %v1113_v40 = vld [vmem:[#allocation2 + $0xbc] sm:$0x1]  ;;  %v3231_v43 = vshrl.u32 %v2961_v34, 16  ;;  %v3234_v44 = vshll.u32 %v2961_v34, 16 }
 0x20a   : > { %v4113_v59 = vpop.permute.xlu1 %4112  ;;  %v4888_v58 = vsel %vm11623_vm11, %v4880_v42, %v4887_v52  ;;  %v3224_v52 = vrot.slane %v3222_v6, 7  ;;  %v907_v48 = vld [vmem:[#allocation2 + $0xb4] sm:$0xf]  ;;  %v1413_v17 = vshll.u32 %v1113_v40, 16  ;;  %v1411_v62 = vrot.slane %v1410_v25, 4 }
 0x20b   : > { %4193 = vst.msk [vmem:[#allocation4 + $0x240] sm:$0xf] %vm4176_vm13, %v4113_v59  ;;  %v682_v59 = vshrl.u32 %v448_v11, 16  ;;  %v679_v23 = vsel %vm11623_vm11, %v10196_v29, %v678_v8  ;;  %v3233_v61 = vrot.slane %v3231_v43, 7  ;;  %v3478_v8 = vld [vmem:[#allocation2 + $0xd8] sm:$0xf] }
 0x20c   : > { %5152 = vst [vmem:[#allocation4 + $0x18c] sm:$0xf] %v4888_v58  ;;  %3561 = vrot.lane.b32.xlu2 %v3476_v63, %s11526_s30  ;;  %v3227_v19 = vor.u32 %v3225_v12, %v3224_v52  ;;  %v3229_v46 = vrot.slane %v3224_v52, 4  ;;  %v1415_v2 = vrot.slane %v1413_v17, 5  ;;  %v12839_v6 = vld [vmem:[#allocation2 + $0xd8] sm:$0xf] }
 0x20d   : > { %v684_v24 = vrot.slane %v682_v59, 7  ;;  %871 = vst.msk [vmem:[#allocation4 + $0x288] sm:$0xf] %vm226_vm0, %v679_v23  ;;  %v11247_v27 = vld [vmem:[#allocation4 + $0x260] sm:$0xf0]  ;;  %v3236_v29 = vor.u32 %v3234_v44, %v3233_v61  ;;  %v3970_v52 = vshll.u32 %v12839_v6, 16 }
 0x20e   : > { %v2959_v7 = vld [vmem:[#allocation2 + $0xd0] sm:$0x8]  ;;  %v1552_v38 = vpop.permute.xlu0 %1551  ;;  %2281 = vrot.lane.b32.xlu0 %v2194_v53, %s11521_s25  ;;  %1064 = vst.msk [vmem:[#allocation4 + $0x288] sm:$0xf] %vm1045_vm12, %v986_v39  ;;  %v5735_v39 = vld [vmem:[#allocation3 + $0x18] sm:$0xf]  ;;  %v1416_v0 = vsel %vm11610_vm10, %v1411_v62, %v1415_v2 }
 0x20f   : > { %v3217_v14 = vshrl.u32 %v2959_v7, 16  ;;  %v687_v32 = vor.u32 %v685_v13, %v684_v24  ;;  %1628 = vst.msk [vmem:[#allocation4 + $0x288] sm:$0xf] %vm1609_vm15, %v1550_v33  ;;  %v5796_v58 = vshrl.u32 %v5735_v39, 16  ;;  %v3237_v49 = vsel %vm11623_vm11, %v3229_v46, %v3236_v29  ;;  %v11425_v12 = vld [vmem:[%s15110_s3 + $0xc0] sm:$0xff] }
 0x210   : > { %2840 = vrot.lane.b32.xlu1 %v2689_v4, %s11524_s28  ;;  %v5799_v24 = vshll.u32 %v5735_v39, 16  ;;  %v2399_v45 = vld [vmem:[#allocation2 + $0xcc] sm:$0x1]  ;;  %v12857_v34 = vld [vmem:[#allocation3 + $0x24] sm:$0xf] }
 0x211   : > { %v688_v20 = vsel %vm11623_vm11, %v680_v9, %v687_v32  ;;  %v2081_v42 = vpop.permute.xlu2 %2080  ;;  %v5798_v15 = vrot.slane %v5796_v58, 7  ;;  %v2193_v40 = vld [vmem:[#allocation2 + $0xc4] sm:$0xf]  ;;  %v1115_v44 = vld [vmem:[#allocation2 + $0xc8] sm:$0xf]  ;;  %v2696_v25 = vshll.u32 %v2399_v45, 16 }
 0x212   : > { %v4432_v60 = vpop.f32.mrf.mxu0  ;;  %v988_v57 = vpop.permute.xlu1 %987  ;;  %v10269_v3 = vld [vmem:[#allocation4 + $0x240] sm:$0xf]  ;;  %872 = vst.msk [vmem:[#allocation4 + $0x2ac] sm:$0xf] %vm226_vm0, %v688_v20  ;;  %v5738_v20 = vld [vmem:[#allocation3 + $0x28] sm:$0xf] }
 0x213   : > { %v4433_v28 = vadd.f32 %v12776_v37, %v4432_v60  ;;  %v4552_v60 = vsel %vm11798_vm14, 0, %v4551_v35  ;;  %v10270_v22 = vor.u32 %v11247_v27, %v10269_v3  ;;  %1065 = vst.msk [vmem:[#allocation4 + $0x2ac] sm:$0xf] %vm1045_vm12, %v988_v57  ;;  %v4876_v57 = vshll.u32 %v12739_v55, 16  ;;  %v11426_v55 = vld [vmem:[%s15110_s3 + $0xc8] sm:$0xff] }
 0x214   : > { %4553 = vst [vmem:[#allocation3 + $0x50] sm:$0x8] %v4552_v60  ;;  %993 = vrot.lane.b32.xlu2 %v907_v48, %s11520_s24  ;;  %9531 = vmatpush.bf16.msrb.mxu0 %v11426_v55  ;;  %v2690_v60 = vshrl.u32 %v12766_v41, 16  ;;  %v5801_v3 = vor.u32 %v5799_v24, %v5798_v15  ;;  %v1116_v39 = vld [vmem:[#allocation2 + $0xcc] sm:$0x1]  ;;  %v1427_v48 = vshll.u32 %v1115_v44, 16 }
 0x215   : > { %v4497_v31 = vmax.f32 %v4433_v28, 0.0  ;;  %v10230_v28 = vrot.slane %v3217_v14, 11  ;;  %10315 = vmatmul.msk.bf16.gmra.mxu0 %vm4345_vm1, %v10270_v22  ;;  %1629 = vst.msk [vmem:[#allocation4 + $0x2ac] sm:$0xf] %vm1609_vm15, %v1552_v38  ;;  %v4878_v53 = vor.u32 %v4876_v57, %v12762_v26  ;;  %v5794_v22 = vrot.slane %v12361_v21, 4 }
 0x216   : > { %v2272_v63 = vpop.permute.xlu0 %2271  ;;  %2158 = vst.msk [vmem:[#allocation4 + $0x2ac] sm:$0xf] %vm15154_vm2, %v2081_v42  ;;  %v2692_v38 = vrot.slane %v2690_v60, 4  ;;  %v11306_v42 = vld [vmem:[#allocation4 + $0x188] sm:$0xf0]  ;;  %v1431_v46 = vshrl.u32 %v1115_v44, 16  ;;  %vm15157_vm2 = vmmov %vm15156_vm3 }
 0x217   : > { %v4654_v10 = vpack.c.bf16 %v4497_v31, %v4497_v31  ;;  %v3228_v33 = vsel %vm11623_vm11, %v10230_v28, %v3227_v19  ;;  %v3681_v31 = vld [vmem:[#allocation2 + $0xd4] sm:$0xf]  ;;  %v12854_v19 = vrot.slane %v3970_v52, 5  ;;  %v5802_v21 = vsel %vm11623_vm11, %v5794_v22, %v5801_v3  ;;  %v909_v61 = vld [vmem:[#allocation2 + $0xc4] sm:$0xf] }
 0x218   : > { %3370 = vrot.lane.b32.xlu0 %v3228_v33, %s11525_s29  ;;  %3372 = vrot.lane.b32.xlu1 %v3237_v49, %s11525_s29  ;;  %v3961_v13 = vshrl.u32 %v3681_v31, 16  ;;  %v3964_v41 = vshll.u32 %v3681_v31, 16  ;;  %v2693_v33 = vor.u32 %v2692_v38, %v12792_v36  ;;  %v1437_v17 = vshll.u32 %v1116_v39, 16  ;;  %6166 = vst [vmem:[#allocation4 + $0x30] sm:$0xf] %v5802_v21 }
 0x219   : > { %4687 = vst [vmem:[#allocation3 + $0x64] sm:$0xf] %v4654_v10  ;;  %9532 = vmatpush.bf16.msrb.mxu0 %v11425_v12  ;;  %v1433_v31 = vrot.slane %v1431_v46, 4  ;;  %v5809_v36 = vshrl.u32 %v12857_v34, 16  ;;  %v5818_v49 = vshrl.u32 %v5738_v20, 16  ;;  %v5821_v12 = vshll.u32 %v5738_v20, 16 }
 0x21a   : > { %v2079_v18 = vpop.permute.xlu1 %2078  ;;  %v4434_v35 = vpop.f32.mrf.mxu0  ;;  %v3963_v23 = vrot.slane %v3961_v13, 4  ;;  %v3966_v14 = vrot.slane %v3964_v41, 5  ;;  %v1679_v62 = vld [vmem:[#allocation2 + $0xd4] sm:$0xf]  ;;  %v2694_v2 = vrot.slane %v2693_v33, 4 }
 0x21b   : > { %v4724_v51 = vld [vmem:[#allocation3 + $0x50] sm:$0x8]  ;;  %v4435_v26 = vadd.f32 %v12776_v37, %v4434_v35  ;;  %2157 = vst.msk [vmem:[#allocation4 + $0x288] sm:$0xf] %vm15155_vm8, %v2079_v18  ;;  %vm15158_vm8 = vcmask 224448   ;;  %v1960_v13 = vshrl.u32 %v1679_v62, 16 }
 0x21c   : > { %v4868_v11 = vshrl.u32 %v4724_v51, 16  ;;  %1559 = vrot.lane.b32.xlu2 %v1416_v0, %s11522_s26  ;;  %2350 = vst.msk [vmem:[#allocation4 + $0x288] sm:$0xf] %vm2331_vm5, %v2272_v63  ;;  %v3967_v28 = vor.u32 %v3966_v14, %v3963_v23  ;;  %v2698_v63 = vrot.slane %v2696_v25, 5  ;;  %v5820_v15 = vrot.slane %v5818_v49, 7 }
 0x21d   : > { %v2833_v4 = vpop.permute.xlu2 %2832  ;;  %v4498_v32 = vmax.f32 %v4435_v26, 0.0  ;;  %v12877_v60 = vrot.slane %v1960_v13, 7  ;;  %v1963_v0 = vshll.u32 %v1679_v62, 16  ;;  %v5811_v26 = vrot.slane %v5809_v36, 7  ;;  %v339_v3 = vld [vmem:[#allocation2 + $0xdc] sm:$0x1] }
 0x21e   : > { %v10328_v10 = vrot.slane %v4868_v11, 11  ;;  %v2835_v27 = vpop.permute.xlu0 %2834  ;;  %2911 = vst.msk [vmem:[#allocation4 + $0x288] sm:$0xf] %vm15156_vm3, %v2833_v4  ;;  %v3968_v18 = vrot.slane %v3967_v28, 4  ;;  %vm15159_vm3 = vmmov %vm15158_vm8  ;;  %v910_v4 = vld [vmem:[#allocation2 + $0xc8] sm:$0xf]  ;;  %v2699_v24 = vsel %vm11610_vm10, %v2694_v2, %v2698_v63  ;;  %v5823_v52 = vor.u32 %v5821_v12, %v5820_v15 }
 0x21f   : > { %v4655_v43 = vpack.c.bf16 %v4498_v32, %v4498_v32  ;;  %v3974_v14 = vshrl.u32 %v12839_v6, 16  ;;  %v1965_v38 = vor.u32 %v1963_v0, %v12877_v60  ;;  %v340_v45 = vsel %vm11594_vm6, 0, %v339_v3  ;;  %v2195_v21 = vld [vmem:[#allocation2 + $0xd4] sm:$0xf]  ;;  %v288_v63 = vld [vmem:[#allocation2 + $0xe0] sm:$0x8] }
 0x220   : > { %v5185_v54 = vld [vmem:[#allocation3 + $0x64] sm:$0xf]  ;;  %v4879_v7 = vsel %vm11623_vm11, %v10328_v10, %v4878_v53  ;;  %3565 = vrot.lane.b32.xlu0 %v3478_v8, %s11526_s30  ;;  %v3973_v29 = vsel %vm11610_vm10, %v3968_v18, %v12854_v19  ;;  %v1439_v53 = vrot.slane %v1437_v17, 5  ;;  %v5816_v20 = vrot.slane %v5811_v26, 4  ;;  %341 = vst [vmem:[#allocation2 + $0xdc] sm:$0x1] %v340_v45 }
 0x221   : > { %5217 = vst [vmem:[#allocation4 + $0x1b4] sm:$0xf] %v5185_v54  ;;  %v6207_v56 = vld [vmem:[#allocation3 + $0x64] sm:$0xf]  ;;  %4124 = vrot.lane.b32.xlu1 %v3973_v29, %s11527_s6  ;;  %v3976_v44 = vrot.slane %v3974_v14, 4  ;;  %v289_v13 = vsel %vm11581_vm4, 0, %v288_v63 }
 0x222   : > { %6239 = vst [vmem:[#allocation4 + $0x178] sm:$0xf] %v6207_v56  ;;  %v7230_v59 = vld [vmem:[#allocation3 + $0x64] sm:$0xf]  ;;  %v2274_v9 = vpop.permute.xlu1 %2273  ;;  %v12866_v56 = vrot.slane %v1427_v48, 5 }
 0x223   : > { %7262 = vst [vmem:[#allocation4 + $0x13c] sm:$0xf] %v7230_v59  ;;  %v1678_v59 = vld [vmem:[#allocation2 + $0xd0] sm:$0x8]  ;;  %v3477_v48 = vld [vmem:[#allocation2 + $0xd4] sm:$0xf] }
 0x224   : > { %5151 = vst [vmem:[#allocation4 + $0x168] sm:$0xf] %v4879_v7  ;;  %2279 = vrot.lane.b32.xlu2 %v2193_v40, %s11521_s25  ;;  %v1434_v11 = vor.u32 %v1433_v31, %v12866_v56  ;;  %v1955_v10 = vshrl.u32 %v1678_v59, 16  ;;  %v11258_v40 = vld [vmem:[#allocation4 + $0xc] sm:$0xf]  ;;  %v3977_v31 = vor.u32 %v3976_v44, %v12854_v19 }
 0x225   : > { %2351 = vst.msk [vmem:[#allocation4 + $0x2ac] sm:$0xf] %vm2331_vm5, %v2274_v9  ;;  %v12879_v9 = vld [vmem:[#allocation3 + $0x64] sm:$0xf] }
 0x226   : > { %4688 = vst [vmem:[#allocation3 + $0x68] sm:$0xf] %v4655_v43  ;;  %v1435_v35 = vrot.slane %v1434_v11, 4  ;;  %v3556_v55 = vpop.permute.xlu0 %3555  ;;  %v10215_v32 = vrot.slane %v1955_v10, 11  ;;  %v10383_v43 = vld [vmem:[#allocation4 + $0x2c] sm:$0xf0] }
 0x227   : > { %2912 = vst.msk [vmem:[#allocation4 + $0x2ac] sm:$0xf] %vm15157_vm2, %v2835_v27  ;;  %v4895_v27 = vshrl.u32 %v12879_v9, 16  ;;  %v10386_v18 = vor.u32 %v11258_v40, %v10383_v43  ;;  %v380_v10 = vld [vmem:[%s11578_s23 + $0x68] sm:$0xf]  ;;  %vm15160_vm2 = vcmask 126048  }
 0x228   : > { %997 = vrot.lane.b32.xlu0 %v909_v61, %s11520_s24  ;;  %v1440_v7 = vsel %vm11610_vm10, %v1435_v35, %v1439_v53  ;;  %v1966_v46 = vsel %vm11623_vm11, %v10215_v32, %v1965_v38  ;;  %v5824_v61 = vsel %vm11623_vm11, %v5816_v20, %v5823_v52  ;;  %290 = vst [vmem:[#allocation2 + $0xe0] sm:$0x8] %v289_v13  ;;  %v3683_v0 = vld [vmem:[#allocation2 + $0xdc] sm:$0x1]  ;;  %v450_v32 = vld [vmem:[#allocation2 + $0xa4] sm:$0xf] }
 0x229   : > { %999 = vrot.lane.b32.xlu1 %v910_v4, %s11520_s24  ;;  %v12898_v33 = vrot.slane %v4895_v27, 7  ;;  %9533 = vmatmul.bf16.vlgmr.msrb.gmra.mxu0 %v10386_v18  ;;  %6168 = vst [vmem:[#allocation4 + $0x78] sm:$0xf] %v5824_v61  ;;  %v2402_v12 = vld [vmem:[#allocation2 + $0xdc] sm:$0x1]  ;;  %v695_v45 = vshrl.u32 %v450_v32, 16 }
 0x22a   : > { %v2720_v3 = vshll.u32 %v2402_v12, 16  ;;  %413 = vst.msk [vmem:[#allocation2 + $0xe4] sm:$0xf] %vm226_vm0, %v380_v10  ;;  %v451_v38 = vld [vmem:[#allocation2 + $0xa8] sm:$0xf]  ;;  %v698_v44 = vshll.u32 %v450_v32, 16 }
 0x22b   : > { %v3365_v54 = vpop.permute.xlu2 %3364  ;;  %v10553_v51 = vld [vmem:[#allocation4 + $0x168] sm:$0xf]  ;;  %v4902_v53 = vrot.slane %v12898_v33, 4  ;;  %v704_v20 = vshrl.u32 %v451_v38, 16  ;;  %v449_v43 = vld [vmem:[#allocation2 + $0xa0] sm:$0x8] }
 0x22c   : > { %v10554_v58 = vor.u32 %v11306_v42, %v10553_v51  ;;  %3442 = vst.msk [vmem:[#allocation4 + $0x2ac] sm:$0xf] %vm15158_vm8, %v3365_v54  ;;  %2842 = vrot.lane.b32.xlu2 %v2699_v24, %s11524_s28  ;;  %v5812_v42 = vshll.u32 %v12857_v34, 16  ;;  %v2401_v34 = vld [vmem:[#allocation2 + $0xd8] sm:$0xf]  ;;  %vm15161_vm8 = vmmov %vm15160_vm2 }
 0x22d   : > { %v5186_v8 = vld [vmem:[#allocation3 + $0x68] sm:$0xf]  ;;  %v2710_v54 = vshll.u32 %v2401_v34, 16  ;;  %v2714_v51 = vshrl.u32 %v2401_v34, 16  ;;  %v706_v61 = vrot.slane %v704_v20, 7 }
 0x22e   : > { %v3363_v57 = vpop.permute.xlu1 %3362  ;;  %9291 = vmatmul.bf16.gmra.mxu1 %v10554_v58  ;;  %5218 = vst [vmem:[#allocation4 + $0x1d8] sm:$0xf] %v5186_v8  ;;  %v4729_v23 = vld [vmem:[#allocation3 + $0x68] sm:$0xf]  ;;  %v5814_v29 = vor.u32 %v5812_v42, %v5811_v26  ;;  %v5736_v58 = vld [vmem:[#allocation3 + $0x20] sm:$0x8] }
 0x22f   : > { %3441 = vst.msk [vmem:[#allocation4 + $0x288] sm:$0xf] %vm15159_vm3, %v3363_v57  ;;  %v6208_v41 = vld [vmem:[#allocation3 + $0x68] sm:$0xf]  ;;  %v4904_v22 = vshrl.u32 %v4729_v23, 16  ;;  %v4907_v17 = vshll.u32 %v4729_v23, 16 }
 0x230   : > { %3634 = vst.msk [vmem:[#allocation4 + $0x288] sm:$0xf] %vm3615_vm9, %v3556_v55  ;;  %1563 = vrot.lane.b32.xlu0 %v1440_v7, %s11522_s26  ;;  %v7231_v28 = vld [vmem:[#allocation3 + $0x68] sm:$0xf]  ;;  %v1114_v57 = vld [vmem:[#allocation2 + $0xc4] sm:$0xf] }
 0x231   : > { %6240 = vst [vmem:[#allocation4 + $0x19c] sm:$0xf] %v6208_v41  ;;  %v4906_v25 = vrot.slane %v4904_v22, 7  ;;  %2090 = vrot.lane.b32.xlu1 %v1966_v46, %s11523_s27  ;;  %v12906_v36 = vrot.slane %v2710_v54, 5  ;;  %v2716_v49 = vrot.slane %v2714_v51, 4  ;;  %v5804_v62 = vshrl.u32 %v5736_v58, 16 }
 0x232   : > { %7263 = vst [vmem:[#allocation4 + $0x160] sm:$0xf] %v7231_v28  ;;  %v1418_v2 = vshrl.u32 %v1114_v57, 16  ;;  %v1421_v19 = vshll.u32 %v1114_v57, 16  ;;  %v2196_v55 = vld [vmem:[#allocation2 + $0xd8] sm:$0xf] }
 0x233   : > { %v4117_v6 = vpop.permute.xlu2 %4116  ;;  %v4909_v59 = vor.u32 %v4907_v17, %v4906_v25  ;;  %v2717_v4 = vor.u32 %v2716_v49, %v12906_v36  ;;  %v10340_v15 = vrot.slane %v5804_v62, 11  ;;  %v3978_v26 = vrot.slane %v3977_v31, 4  ;;  %v10419_v46 = vld [vmem:[#allocation4 + $0x74] sm:$0xf0]  ;;  %v4554_v25 = vld [vmem:[#allocation3 + $0x60] sm:$0x8] }
 0x234   : > { %4195 = vst.msk [vmem:[#allocation4 + $0x288] sm:$0xf] %vm4176_vm13, %v4117_v6  ;;  %3563 = vrot.lane.b32.xlu2 %v3477_v48, %s11526_s30  ;;  %v1420_v8 = vrot.slane %v1418_v2, 4  ;;  %v1423_v24 = vrot.slane %v1421_v19, 5  ;;  %v3980_v23 = vshll.u32 %v3683_v0, 16  ;;  %v2722_v28 = vrot.slane %v2720_v3, 5 }
 0x235   : > { %v2718_v41 = vrot.slane %v2717_v4, 4  ;;  %v5815_v14 = vsel %vm11623_vm11, %v10340_v15, %v5814_v29  ;;  %v4910_v27 = vsel %vm11623_vm11, %v4902_v53, %v4909_v59  ;;  %v707_v42 = vshll.u32 %v451_v38, 16  ;;  %v2962_v34 = vld [vmem:[#allocation2 + $0xe0] sm:$0x8]  ;;  %v2963_v62 = vld [vmem:[#allocation2 + $0xe4] sm:$0xf] }
 0x236   : > { %v3558_v39 = vpop.permute.xlu1 %3557  ;;  %6167 = vst [vmem:[#allocation4 + $0x54] sm:$0xf] %v5815_v14  ;;  %v1424_v52 = vor.u32 %v1423_v24, %v1420_v8  ;;  %v3982_v22 = vrot.slane %v3980_v23, 5  ;;  %v690_v17 = vshrl.u32 %v449_v43, 16  ;;  %v4555_v51 = vsel %vm11798_vm14, 0, %v4554_v25 }
 0x237   : > { %3635 = vst.msk [vmem:[#allocation4 + $0x2ac] sm:$0xf] %vm3615_vm9, %v3558_v39  ;;  %v2723_v48 = vsel %vm11610_vm10, %v2718_v41, %v2722_v28  ;;  %v3239_v31 = vshrl.u32 %v2962_v34, 16  ;;  %v709_v57 = vor.u32 %v707_v42, %v706_v61  ;;  %v3244_v19 = vshrl.u32 %v2963_v62, 16  ;;  %v3479_v4 = vld [vmem:[#allocation2 + $0xe4] sm:$0xf] }
 0x238   : > { %2283 = vrot.lane.b32.xlu0 %v2195_v21, %s11521_s25  ;;  %v1425_v6 = vrot.slane %v1424_v52, 4  ;;  %v3983_v18 = vsel %vm11610_vm10, %v3978_v26, %v3982_v22  ;;  %v697_v21 = vrot.slane %v695_v45, 7  ;;  %5154 = vst [vmem:[#allocation4 + $0x1d4] sm:$0xf] %v4910_v27  ;;  %v10197_v2 = vrot.slane %v690_v17, 11 }
 0x239   : > { %2285 = vrot.lane.b32.xlu1 %v2196_v55, %s11521_s25  ;;  %4556 = vst [vmem:[#allocation3 + $0x60] sm:$0x8] %v4555_v51  ;;  %v3247_v13 = vshll.u32 %v2963_v62, 16  ;;  %v1680_v0 = vld [vmem:[#allocation2 + $0xd8] sm:$0xf]  ;;  %v10231_v26 = vrot.slane %v3239_v31, 11 }
 0x23a   : > { %v702_v58 = vrot.slane %v697_v21, 4  ;;  %v700_v49 = vor.u32 %v698_v44, %v697_v21  ;;  %v1430_v59 = vsel %vm11610_vm10, %v1425_v6, %v12866_v56  ;;  %v12938_v56 = vrot.slane %v3244_v19, 7  ;;  %v342_v23 = vld [vmem:[#allocation2 + $0xec] sm:$0x1]  ;;  %v5741_v27 = vld [vmem:[#allocation3 + $0x38] sm:$0xf] }
 0x23b   : > { %v4437_v35 = vpop.f32.mrf.mxu0  ;;  %v10273_v29 = vld [vmem:[#allocation4 + $0x288] sm:$0xf]  ;;  %v1969_v12 = vshrl.u32 %v1680_v0, 16  ;;  %v1972_v24 = vshll.u32 %v1680_v0, 16  ;;  %v381_v14 = vld [vmem:[%s11578_s23 + $0x6c] sm:$0xf] }
 0x23c   : > { %v4438_v7 = vadd.f32 %v12776_v37, %v4437_v35  ;;  %4126 = vrot.lane.b32.xlu2 %v3983_v18, %s11527_s6  ;;  %v710_v35 = vsel %vm11623_vm11, %v702_v58, %v709_v57  ;;  %v701_v15 = vsel %vm11623_vm11, %v10197_v2, %v700_v49  ;;  %v3249_v41 = vor.u32 %v3247_v13, %v12938_v56  ;;  %v5740_v20 = vld [vmem:[#allocation3 + $0x34] sm:$0xf]  ;;  %v12971_v0 = vld [vmem:[#allocation3 + $0x44] sm:$0xf] }
 0x23d   : > { %v11267_v53 = vld [vmem:[#allocation4 + $0x54] sm:$0xf]  ;;  %874 = vst.msk [vmem:[#allocation4 + $0x2f4] sm:$0xf] %vm226_vm0, %v710_v35  ;;  %v1971_v3 = vrot.slane %v1969_v12, 7  ;;  %v5831_v43 = vshrl.u32 %v5740_v20, 16 }
 0x23e   : > { %v4119_v11 = vpop.permute.xlu0 %4118  ;;  %v4499_v39 = vmax.f32 %v4438_v7, 0.0  ;;  %v990_v54 = vpop.permute.xlu1 %989  ;;  %v10422_v55 = vor.u32 %v11267_v53, %v10419_v46  ;;  %v4898_v7 = vshll.u32 %v12879_v9, 16  ;;  %873 = vst.msk [vmem:[#allocation4 + $0x2d0] sm:$0xf] %vm226_vm0, %v701_v15  ;;  %v1967_v9 = vrot.slane %v12877_v60, 4 }
 0x23f   : > { %4196 = vst.msk [vmem:[#allocation4 + $0x2ac] sm:$0xf] %vm4176_vm13, %v4119_v11  ;;  %v992_v40 = vpop.permute.xlu2 %991  ;;  %v3250_v22 = vsel %vm11623_vm11, %v10231_v26, %v3249_v41  ;;  %v1974_v45 = vor.u32 %v1972_v24, %v1971_v3  ;;  %v5840_v60 = vshrl.u32 %v5741_v27, 16  ;;  %v5739_v46 = vld [vmem:[#allocation3 + $0x30] sm:$0x8]  ;;  %v5833_v25 = vrot.slane %v5831_v43, 7 }
 0x240   : > { %2846 = vrot.lane.b32.xlu0 %v2723_v48, %s11524_s28  ;;  %v4656_v10 = vpack.c.bf16 %v4499_v39, %v4499_v39  ;;  %1067 = vst.msk [vmem:[#allocation4 + $0x2f4] sm:$0xf] %vm1045_vm12, %v992_v40  ;;  %9538 = vmatmul.bf16.gmra.mxu0 %v10422_v55  ;;  %v4900_v52 = vor.u32 %v4898_v7, %v12898_v33  ;;  %v4727_v32 = vld [vmem:[#allocation3 + $0x60] sm:$0x8]  ;;  %v343_v33 = vsel %vm11594_vm6, 0, %v342_v23  ;;  %v5826_v17 = vshrl.u32 %v5739_v46, 16 }
 0x241   : > { %1066 = vst.msk [vmem:[#allocation4 + $0x2d0] sm:$0xf] %vm1045_vm12, %v990_v54  ;;  %v4890_v28 = vshrl.u32 %v4727_v32, 16  ;;  %3374 = vrot.lane.b32.xlu1 %v3250_v22, %s11525_s29  ;;  %v1975_v39 = vsel %vm11623_vm11, %v1967_v9, %v1974_v45  ;;  %v5842_v21 = vrot.slane %v5840_v60, 7  ;;  %v5843_v54 = vshll.u32 %v5741_v27, 16 }
 0x242   : > { %4689 = vst [vmem:[#allocation3 + $0x74] sm:$0xf] %v4656_v10  ;;  %v11315_v31 = vld [vmem:[#allocation4 + $0x1d0] sm:$0xf0]  ;;  %v10341_v2 = vrot.slane %v5826_v17, 11  ;;  %v5853_v32 = vshrl.u32 %v12971_v0, 16 }
 0x243   : > { %414 = vst.msk [vmem:[#allocation2 + $0xe8] sm:$0xf] %vm226_vm0, %v381_v14  ;;  %v4439_v42 = vpop.f32.mrf.mxu0  ;;  %v10329_v40 = vrot.slane %v4890_v28, 11  ;;  %v5845_v58 = vor.u32 %v5843_v54, %v5842_v21  ;;  %v5744_v26 = vld [vmem:[#allocation3 + $0x48] sm:$0xf]  ;;  %vm15162_vm3 = vcmask 191648  }
 0x244   : > { %1561 = vrot.lane.b32.xlu2 %v1430_v59, %s11522_s26  ;;  %344 = vst [vmem:[#allocation2 + $0xec] sm:$0x1] %v343_v33  ;;  %v4440_v18 = vadd.f32 %v12776_v37, %v4439_v42  ;;  %v2400_v37 = vld [vmem:[#allocation2 + $0xd4] sm:$0xf]  ;;  %v5862_v9 = vshrl.u32 %v5744_v26, 16 }
 0x245   : > { %v4901_v44 = vsel %vm11623_vm11, %v10329_v40, %v4900_v52  ;;  %v2701_v55 = vshrl.u32 %v2400_v37, 16  ;;  %v12973_v23 = vld [vmem:[#allocation3 + $0x54] sm:$0xf]  ;;  %v1118_v54 = vld [vmem:[#allocation2 + $0xd8] sm:$0xf] }
 0x246   : > { %v11248_v11 = vld [vmem:[#allocation4 + $0x2a8] sm:$0xf0]  ;;  %v1554_v8 = vpop.permute.xlu0 %1553  ;;  %v1556_v6 = vpop.permute.xlu1 %1555  ;;  %5153 = vst [vmem:[#allocation4 + $0x1b0] sm:$0xf] %v4901_v44  ;;  %v4500_v34 = vmax.f32 %v4440_v18, 0.0  ;;  %v5875_v28 = vshrl.u32 %v12973_v23, 16 }
 0x247   : > { %v10274_v63 = vor.u32 %v11248_v11, %v10273_v29  ;;  %1630 = vst.msk [vmem:[#allocation4 + $0x2d0] sm:$0xf] %vm1609_vm15, %v1554_v8  ;;  %v5834_v29 = vshll.u32 %v5740_v20, 16  ;;  %v2703_v41 = vrot.slane %v2701_v55, 4  ;;  %v911_v27 = vld [vmem:[#allocation2 + $0xd4] sm:$0xf] }
 0x248   : > { %3567 = vrot.lane.b32.xlu0 %v3479_v4, %s11526_s30  ;;  %1631 = vst.msk [vmem:[#allocation4 + $0x2f4] sm:$0xf] %vm1609_vm15, %v1556_v6  ;;  %v4657_v62 = vpack.c.bf16 %v4500_v34, %v4500_v34  ;;  %v2704_v4 = vshll.u32 %v2400_v37, 16  ;;  %v11440_v20 = vld [vmem:[%s15110_s3 + $0x138] sm:$0xff]  ;;  %v1117_v60 = vld [vmem:[#allocation2 + $0xd4] sm:$0xf] }
 0x249   : > { %10316 = vmatmul.msk.bf16.vlgmr.msra.gmra.mxu3 %vm4345_vm1, %v10274_v63  ;;  %v5187_v61 = vld [vmem:[#allocation3 + $0x74] sm:$0xf]  ;;  %v5836_v57 = vor.u32 %v5834_v29, %v5833_v25  ;;  %v5838_v63 = vrot.slane %v5833_v25, 4  ;;  %9614 = vmatpush.bf16.msrb.mxu1 %v11440_v20  ;;  %v5855_v44 = vrot.slane %v5853_v32, 7  ;;  %v12989_v46 = vrot.slane %v5875_v28, 7 }
 0x24a   : > { %5219 = vst [vmem:[#allocation4 + $0x1fc] sm:$0xf] %v5187_v61  ;;  %v6209_v51 = vld [vmem:[#allocation3 + $0x74] sm:$0xf]  ;;  %v3480_v13 = vld [vmem:[#allocation2 + $0xe8] sm:$0xf] }
 0x24b   : > { %6241 = vst [vmem:[#allocation4 + $0x1c0] sm:$0xf] %v6209_v51  ;;  %v7232_v11 = vld [vmem:[#allocation3 + $0x74] sm:$0xf]  ;;  %v5846_v35 = vsel %vm11623_vm11, %v5838_v63, %v5845_v58  ;;  %3569 = vrot.lane.b32.xlu1 %v3480_v13, %s11526_s30  ;;  %v3685_v15 = vld [vmem:[#allocation2 + $0xe8] sm:$0xf]  ;;  %v5837_v10 = vsel %vm11623_vm11, %v10341_v2, %v5836_v57 }
 0x24c   : > { %2092 = vrot.lane.b32.xlu2 %v1975_v39, %s11523_s27  ;;  %7264 = vst [vmem:[#allocation4 + $0x184] sm:$0xf] %v7232_v11  ;;  %v3686_v8 = vld [vmem:[#allocation2 + $0xec] sm:$0x1]  ;;  %v3994_v12 = vshll.u32 %v3685_v15, 16  ;;  %v3998_v24 = vshrl.u32 %v3685_v15, 16 }
 0x24d   : > { %v10589_v49 = vld [vmem:[#allocation4 + $0x1b0] sm:$0xf]  ;;  %4690 = vst [vmem:[#allocation3 + $0x78] sm:$0xf] %v4657_v62  ;;  %v4004_v7 = vshll.u32 %v3686_v8, 16  ;;  %v2706_v3 = vrot.slane %v2704_v4, 5 }
 0x24e   : > { %v2083_v38 = vpop.permute.xlu2 %2082  ;;  %v2085_v48 = vpop.permute.xlu0 %2084  ;;  %v10590_v53 = vor.u32 %v11315_v31, %v10589_v49  ;;  %6169 = vst [vmem:[#allocation4 + $0x9c] sm:$0xf] %v5837_v10  ;;  %v12976_v14 = vrot.slane %v3994_v12, 5  ;;  %v4000_v52 = vrot.slane %v3998_v24, 4  ;;  %v5864_v39 = vrot.slane %v5862_v9, 7  ;;  %v11439_v61 = vld [vmem:[%s15110_s3 + $0x130] sm:$0xff] }
 0x24f   : > { %2159 = vst.msk [vmem:[#allocation4 + $0x2d0] sm:$0xf] %vm15160_vm2, %v2083_v38  ;;  %v2276_v59 = vpop.permute.xlu1 %2275  ;;  %v2707_v38 = vor.u32 %v2706_v3, %v2703_v41  ;;  %v4006_v33 = vrot.slane %v4004_v7, 5  ;;  %v5865_v25 = vshll.u32 %v5744_v26, 16  ;;  %v12996_v34 = vld [vmem:[#allocation3 + $0x58] sm:$0xf]  ;;  %9615 = vmatpush.bf16.msrb.mxu1 %v11439_v61 }
 0x250   : > { %2160 = vst.msk [vmem:[#allocation4 + $0x2f4] sm:$0xf] %vm15161_vm8, %v2085_v48  ;;  %9296 = vmatmul.bf16.gmra.mxu1 %v10590_v53  ;;  %v4001_v45 = vor.u32 %v4000_v52, %v12976_v14  ;;  %v1442_v51 = vshrl.u32 %v1117_v60, 16  ;;  %v1445_v31 = vshll.u32 %v1117_v60, 16  ;;  %v11438_v58 = vld [vmem:[%s15110_s3 + $0x128] sm:$0xff]  ;;  %v5856_v37 = vshll.u32 %v12971_v0, 16  ;;  %vm15164_vm8 = vmmov %vm15162_vm3 }
 0x251   : > { %6170 = vst [vmem:[#allocation4 + $0xc0] sm:$0xf] %v5846_v35  ;;  %v2708_v48 = vrot.slane %v2707_v38, 4  ;;  %v5860_v57 = vrot.slane %v5855_v44, 4  ;;  %v5867_v49 = vor.u32 %v5865_v25, %v5864_v39  ;;  %v5878_v11 = vshll.u32 %v12973_v23, 16  ;;  %v11437_v0 = vld [vmem:[%s15110_s3 + $0x120] sm:$0xff] }
 0x252   : > { %2352 = vst.msk [vmem:[#allocation4 + $0x2d0] sm:$0xf] %vm2331_vm5, %v2276_v59  ;;  %v4002_v40 = vrot.slane %v4001_v45, 4  ;;  %v5884_v62 = vshrl.u32 %v12996_v34, 16  ;;  %v13010_v2 = vld [vmem:[#allocation3 + $0x74] sm:$0xf]  ;;  %v13015_v26 = vor.u32 %v5856_v37, %v5855_v44 }
 0x253   : > { %1001 = vrot.lane.b32.xlu1 %v911_v27, %s11520_s24  ;;  %v2713_v17 = vsel %vm11610_vm10, %v2708_v48, %v12906_v36  ;;  %v5882_v36 = vrot.slane %v12989_v46, 4  ;;  %v1451_v63 = vshll.u32 %v1118_v54, 16  ;;  %v1455_v13 = vshrl.u32 %v1118_v54, 16  ;;  %v2964_v4 = vld [vmem:[#allocation2 + $0xe8] sm:$0xf]  ;;  %9616 = vmatpush.bf16.msrb.mxu1 %v11438_v58 }
 0x254   : > { %v5188_v6 = vld [vmem:[#allocation3 + $0x78] sm:$0xf]  ;;  %v4007_v21 = vsel %vm11610_vm10, %v4002_v40, %v4006_v33  ;;  %2844 = vrot.lane.b32.xlu2 %v2713_v17, %s11524_s28  ;;  %v1447_v55 = vrot.slane %v1445_v31, 5  ;;  %v1119_v15 = vld [vmem:[#allocation2 + $0xdc] sm:$0x1]  ;;  %v5887_v12 = vshll.u32 %v12996_v34, 16  ;;  %v5868_v41 = vsel %vm11623_vm11, %v5860_v57, %v5867_v49 }
 0x255   : > { %5220 = vst [vmem:[#allocation4 + $0x220] sm:$0xf] %v5188_v6  ;;  %v6210_v18 = vld [vmem:[#allocation3 + $0x78] sm:$0xf]  ;;  %4130 = vrot.lane.b32.xlu0 %v4007_v21, %s11527_s6  ;;  %v11276_v53 = vld [vmem:[#allocation4 + $0x9c] sm:$0xf] }
 0x256   : > { %v2278_v19 = vpop.permute.xlu2 %2277  ;;  %v2837_v22 = vpop.permute.xlu0 %2836  ;;  %6242 = vst [vmem:[#allocation4 + $0x1e4] sm:$0xf] %v6210_v18  ;;  %v7233_v29 = vld [vmem:[#allocation3 + $0x78] sm:$0xf]  ;;  %v4917_v24 = vshrl.u32 %v13010_v2, 16  ;;  %vm15163_vm2 = vcmask 224448  }
 0x257   : > { %2353 = vst.msk [vmem:[#allocation4 + $0x2f4] sm:$0xf] %vm2331_vm5, %v2278_v19  ;;  %v12986_v42 = vpop.permute.xlu1 %2838  ;;  %v1444_v19 = vrot.slane %v1442_v51, 4  ;;  %v13019_v7 = vld [vmem:[#allocation3 + $0x78] sm:$0xf]  ;;  %v1453_v32 = vrot.slane %v1451_v63, 5  ;;  %9617 = vmatpush.bf16.msrb.mxu1 %v11437_v0 }
 0x258   : > { %2913 = vst.msk [vmem:[#allocation4 + $0x2d0] sm:$0xf] %vm15162_vm3, %v2837_v22  ;;  %v10455_v59 = vld [vmem:[#allocation4 + $0xbc] sm:$0xf0]  ;;  %v3253_v9 = vshrl.u32 %v2964_v4, 16  ;;  %v3256_v38 = vshll.u32 %v2964_v4, 16  ;;  %vm15165_vm3 = vmmov %vm15163_vm2 }
 0x259   : > { %7265 = vst [vmem:[#allocation4 + $0x1a8] sm:$0xf] %v7233_v29  ;;  %v10458_v35 = vor.u32 %v11276_v53, %v10455_v59  ;;  %v1448_v52 = vor.u32 %v1447_v55, %v1444_v19  ;;  %v13024_v27 = vld [vmem:[#allocation2 + $0xe4] sm:$0xf]  ;;  %v3251_v22 = vrot.slane %v12938_v56, 4  ;;  %v1457_v28 = vrot.slane %v1455_v13, 4 }
 0x25a   : > { %v1461_v45 = vshll.u32 %v1119_v15, 16  ;;  %v1683_v33 = vld [vmem:[#allocation2 + $0xe8] sm:$0xf]  ;;  %v1982_v20 = vshrl.u32 %v13024_v27, 16  ;;  %v3255_v40 = vrot.slane %v3253_v9, 7  ;;  %v4926_v44 = vshrl.u32 %v13019_v7, 16 }
 0x25b   : > { %9543 = vmatmul.bf16.gmra.mxu0 %v10458_v35  ;;  %v1449_v6 = vrot.slane %v1448_v52, 4  ;;  %v1991_v60 = vshrl.u32 %v1683_v33, 16  ;;  %2914 = vst.msk [vmem:[#allocation4 + $0x2f4] sm:$0xf] %vm15164_vm8, %v12986_v42  ;;  %v1458_v39 = vor.u32 %v1457_v28, %v1453_v32  ;;  %v5886_v56 = vrot.slane %v5884_v62, 7 }
 0x25c   : > { %v1463_v18 = vrot.slane %v1461_v45, 5  ;;  %v13031_v48 = vrot.slane %v1982_v20, 7  ;;  %v3258_v61 = vor.u32 %v3256_v38, %v3255_v40  ;;  %v5742_v17 = vld [vmem:[#allocation3 + $0x40] sm:$0x8]  ;;  %6172 = vst [vmem:[#allocation4 + $0x108] sm:$0xf] %v5868_v41 }
 0x25d   : > { %v1454_v21 = vsel %vm11610_vm10, %v1449_v6, %v1453_v32  ;;  %v1993_v25 = vrot.slane %v1991_v60, 7  ;;  %v13036_v54 = vrot.slane %v4917_v24, 7  ;;  %v1459_v42 = vrot.slane %v1458_v39, 4  ;;  %v3684_v31 = vld [vmem:[#allocation2 + $0xe4] sm:$0xf] }
 0x25e   : > { %v3367_v43 = vpop.permute.xlu2 %3366  ;;  %1565 = vrot.lane.b32.xlu0 %v1454_v21, %s11522_s26  ;;  %v1989_v51 = vrot.slane %v13031_v48, 4  ;;  %v5848_v29 = vshrl.u32 %v5742_v17, 16  ;;  %v3259_v58 = vsel %vm11623_vm11, %v3251_v22, %v3258_v61  ;;  %v3985_v57 = vshrl.u32 %v3684_v31, 16  ;;  %v2403_v59 = vld [vmem:[#allocation2 + $0xe4] sm:$0xf] }
 0x25f   : > { %3443 = vst.msk [vmem:[#allocation4 + $0x2d0] sm:$0xf] %vm15163_vm2, %v3367_v43  ;;  %v3560_v3 = vpop.permute.xlu1 %3559  ;;  %v1994_v43 = vshll.u32 %v1683_v33, 16  ;;  %v3988_v49 = vshll.u32 %v3684_v31, 16  ;;  %v4928_v62 = vrot.slane %v4926_v44, 7  ;;  %3376 = vrot.lane.b32.xlu2 %v3259_v58, %s11525_s29  ;;  %v1464_v63 = vsel %vm11610_vm10, %v1459_v42, %v1463_v18 }
 0x260   : > { %v3369_v8 = vpop.permute.xlu0 %3368  ;;  %v10342_v53 = vrot.slane %v5848_v29, 11  ;;  %v2404_v19 = vld [vmem:[#allocation2 + $0xe8] sm:$0xf]  ;;  %v4929_v13 = vshll.u32 %v13019_v7, 16  ;;  %1567 = vrot.lane.b32.xlu1 %v1464_v63, %s11522_s26  ;;  %v3987_v35 = vrot.slane %v3985_v57, 4  ;;  %v2725_v4 = vshrl.u32 %v2403_v59, 16 }
 0x261   : > { %3444 = vst.msk [vmem:[#allocation4 + $0x2f4] sm:$0xf] %vm15165_vm3, %v3369_v8  ;;  %v1996_v37 = vor.u32 %v1994_v43, %v1993_v25  ;;  %v3990_v55 = vrot.slane %v3988_v49, 5  ;;  %v2728_v0 = vshll.u32 %v2403_v59, 16  ;;  %v2734_v24 = vshll.u32 %v2404_v19, 16  ;;  %v11436_v43 = vld [vmem:[%s15110_s3 + $0x118] sm:$0xff] }
 0x262   : > { %3636 = vst.msk [vmem:[#allocation4 + $0x2d0] sm:$0xf] %vm3615_vm9, %v3560_v3  ;;  %v2738_v41 = vshrl.u32 %v2404_v19, 16  ;;  %v4920_v52 = vshll.u32 %v13010_v2, 16  ;;  %v2727_v9 = vrot.slane %v2725_v4, 4  ;;  %v4931_v38 = vor.u32 %v4929_v13, %v4928_v62  ;;  %9618 = vmatpush.bf16.msrb.mxu1 %v11436_v43 }
 0x263   : > { %v1997_v32 = vsel %vm11623_vm11, %v1989_v51, %v1996_v37  ;;  %v3991_v3 = vor.u32 %v3990_v55, %v3987_v35  ;;  %v2197_v22 = vld [vmem:[#allocation2 + $0xe4] sm:$0xf]  ;;  %v2730_v28 = vrot.slane %v2728_v0, 5  ;;  %v13058_v45 = vrot.slane %v2734_v24, 5  ;;  %v452_v60 = vld [vmem:[#allocation2 + $0xb0] sm:$0x8] }
 0x264   : > { %v5889_v33 = vor.u32 %v5887_v12, %v5886_v56  ;;  %v2740_v6 = vrot.slane %v2738_v41, 4  ;;  %v4924_v39 = vrot.slane %v13036_v54, 4  ;;  %v10491_v18 = vld [vmem:[#allocation4 + $0x104] sm:$0xf0]  ;;  %v453_v61 = vld [vmem:[#allocation2 + $0xb4] sm:$0xf]  ;;  %v5880_v19 = vor.u32 %v5878_v11, %v12989_v46 }
 0x265   : > { %v3992_v20 = vrot.slane %v3991_v3, 4  ;;  %v2731_v21 = vor.u32 %v2730_v28, %v2727_v9  ;;  %v712_v25 = vshrl.u32 %v452_v60, 16  ;;  %v382_v34 = vld [vmem:[%s11578_s23 + $0x70] sm:$0xf]  ;;  %v717_v42 = vshrl.u32 %v453_v61, 16  ;;  %v11434_v60 = vld [vmem:[%s15110_s3 + $0x108] sm:$0xff] }
 0x266   : > { %v3562_v10 = vpop.permute.xlu2 %3561  ;;  %2096 = vrot.lane.b32.xlu0 %v1997_v32, %s11523_s27  ;;  %v2741_v56 = vor.u32 %v2740_v6, %v13058_v45  ;;  %v383_v51 = vld [vmem:[%s11578_s23 + $0x74] sm:$0xf]  ;;  %415 = vst.msk [vmem:[#allocation2 + $0xf4] sm:$0xf] %vm226_vm0, %v382_v34  ;;  %v720_v58 = vshll.u32 %v453_v61, 16  ;;  %v4932_v37 = vsel %vm11623_vm11, %v4924_v39, %v4931_v38  ;;  %v5890_v63 = vsel %vm11623_vm11, %v5882_v36, %v5889_v33 }
 0x267   : > { %3637 = vst.msk [vmem:[#allocation4 + $0x2f4] sm:$0xf] %vm3615_vm9, %v3562_v10  ;;  %v5859_v10 = vsel %vm11623_vm11, %v10342_v53, %v13015_v26  ;;  %v2405_v26 = vld [vmem:[#allocation2 + $0xec] sm:$0x1]  ;;  %v3997_v12 = vsel %vm11610_vm10, %v3992_v20, %v12976_v14  ;;  %v2732_v29 = vrot.slane %v2731_v21, 4  ;;  %v10198_v31 = vrot.slane %v712_v25, 11 }
 0x268   : > { %v4121_v15 = vpop.permute.xlu0 %4120  ;;  %6171 = vst [vmem:[#allocation4 + $0xe4] sm:$0xf] %v5859_v10  ;;  %v2744_v40 = vshll.u32 %v2405_v26, 16  ;;  %4128 = vrot.lane.b32.xlu2 %v3997_v12, %s11527_s6  ;;  %v11435_v14 = vld [vmem:[%s15110_s3 + $0x110] sm:$0xff]  ;;  %2287 = vrot.lane.b32.xlu1 %v2197_v22, %s11521_s25  ;;  %v2742_v57 = vrot.slane %v2741_v56, 4  ;;  %v719_v49 = vrot.slane %v717_v42, 7 }
 0x269   : > { %4197 = vst.msk [vmem:[#allocation4 + $0x2d0] sm:$0xf] %vm4176_vm13, %v4121_v15  ;;  %v454_v62 = vld [vmem:[#allocation2 + $0xb8] sm:$0xf]  ;;  %v13092_v53 = vld [vmem:[%s15109_s2] ss:$0 sm:$0xff]  ;;  %v2737_v36 = vsel %vm11610_vm10, %v2732_v29, %v13058_v45  ;;  %9619 = vmatpush.bf16.msrb.mxu1 %v11435_v14 }
 0x26a   : > { %v4123_v7 = vpop.permute.xlu1 %4122  ;;  %v4442_v44 = vpop.f32.mrf.mxu0  ;;  %v13072_v17 = vrot.slane %v2744_v40, 5  ;;  %416 = vst.msk [vmem:[#allocation2 + $0xf8] sm:$0xf] %vm226_vm0, %v383_v51  ;;  %v726_v35 = vshrl.u32 %v454_v62, 16  ;;  %v729_v55 = vshll.u32 %v454_v62, 16  ;;  %v722_v0 = vor.u32 %v720_v58, %v719_v49 }
 0x26b   : > { %4198 = vst.msk [vmem:[#allocation4 + $0x2f4] sm:$0xf] %vm4176_vm13, %v4123_v7  ;;  %v4443_v59 = vadd.f32 %v13092_v53, %v4442_v44  ;;  %v4557_v4 = vld [vmem:[#allocation3 + $0x70] sm:$0x8]  ;;  %v912_v10 = vld [vmem:[#allocation2 + $0xd8] sm:$0xf]  ;;  %v4922_v62 = vor.u32 %v4920_v52, %v13036_v54 }
 0x26c   : > { %5156 = vst [vmem:[#allocation4 + $0x21c] sm:$0xf] %v4932_v37  ;;  %v5745_v24 = vld [vmem:[#allocation3 + $0x50] sm:$0x8]  ;;  %v724_v7 = vrot.slane %v719_v49, 4  ;;  %v728_v32 = vrot.slane %v726_v35, 7  ;;  %v723_v9 = vsel %vm11623_vm11, %v10198_v31, %v722_v0  ;;  %v2747_v45 = vsel %vm11610_vm10, %v2742_v57, %v13072_v17 }
 0x26d   : > { %v4558_v23 = vsel %vm11798_vm14, 0, %v4557_v4  ;;  %v5870_v46 = vshrl.u32 %v5745_v24, 16  ;;  %6174 = vst [vmem:[#allocation4 + $0x150] sm:$0xf] %v5890_v63  ;;  %v1681_v38 = vld [vmem:[#allocation2 + $0xe0] sm:$0x8]  ;;  %9620 = vmatpush.bf16.msrb.mxu1 %v11434_v60 }
 0x26e   : > { %v13049_v8 = vpop.permute.xlu2 %993  ;;  %4559 = vst [vmem:[#allocation3 + $0x70] sm:$0x8] %v4558_v23  ;;  %v1985_v22 = vshll.u32 %v13024_v27, 16  ;;  %v4501_v28 = vmax.f32 %v4443_v59, 0.0  ;;  %2848 = vrot.lane.b32.xlu0 %v2737_v36, %s11524_s28  ;;  %v13111_v26 = vld [vmem:[#allocation2 + $0xf4] sm:$0xf]  ;;  %v731_v33 = vor.u32 %v729_v55, %v728_v32 }
 0x26f   : > { %v11285_v13 = vld [vmem:[#allocation4 + $0xe4] sm:$0xf]  ;;  %875 = vst.msk [vmem:[#allocation4 + $0x318] sm:$0xf] %vm226_vm0, %v723_v9  ;;  %v10343_v20 = vrot.slane %v5870_v46, 11  ;;  %v1977_v6 = vshrl.u32 %v1681_v38, 16 }
 0x270   : > { %v10494_v15 = vor.u32 %v11285_v13, %v10491_v18  ;;  %v996_v3 = vpop.permute.xlu0 %995  ;;  %1068 = vst.msk [vmem:[#allocation4 + $0x318] sm:$0xf] %vm1045_vm12, %v13049_v8  ;;  %v3266_v27 = vshrl.u32 %v13111_v26, 16  ;;  %1003 = vrot.lane.b32.xlu2 %v912_v10, %s11520_s24  ;;  %v732_v18 = vsel %vm11623_vm11, %v724_v7, %v731_v33  ;;  %v3687_v61 = vld [vmem:[#allocation2 + $0xf4] sm:$0xf]  ;;  %2850 = vrot.lane.b32.xlu1 %v2747_v45, %s11524_s28  ;;  %v11433_v13 = vld [vmem:[%s15110_s3 + $0x100] sm:$0xff] }
 0x271   : > { %v2967_v40 = vld [vmem:[#allocation2 + $0xf8] sm:$0xf]  ;;  %v5881_v21 = vsel %vm11623_vm11, %v10343_v20, %v5880_v19  ;;  %876 = vst.msk [vmem:[#allocation4 + $0x33c] sm:$0xf] %vm226_vm0, %v732_v18  ;;  %v10216_v25 = vrot.slane %v1977_v6, 11  ;;  %v1987_v34 = vor.u32 %v1985_v22, %v13031_v48  ;;  %v4009_v17 = vshrl.u32 %v3687_v61, 16  ;;  %9621 = vmatpush.bf16.msrb.mxu1 %v11433_v13 }
 0x272   : > { %v1558_v11 = vpop.permute.xlu1 %1557  ;;  %9548 = vmatmul.bf16.gmra.mxu0 %v10494_v15  ;;  %v4444_v43 = vpop.f32.mrf.mxu0  ;;  %v3275_v44 = vshrl.u32 %v2967_v40, 16  ;;  %v3278_v39 = vshll.u32 %v2967_v40, 16  ;;  %v13125_v8 = vrot.slane %v3266_v27, 7  ;;  %v3688_v12 = vld [vmem:[#allocation2 + $0xf8] sm:$0xf]  ;;  %v4658_v42 = vpack.c.bf16 %v4501_v28, %v4501_v28 }
 0x273   : > { %1069 = vst.msk [vmem:[#allocation4 + $0x33c] sm:$0xf] %vm1045_vm12, %v996_v3  ;;  %v4445_v51 = vadd.f32 %v13092_v53, %v4444_v43  ;;  %v4012_v31 = vshll.u32 %v3687_v61, 16  ;;  %v10277_v58 = vld [vmem:[#allocation4 + $0x2d0] sm:$0xf]  ;;  %v4011_v48 = vrot.slane %v4009_v17, 4  ;;  %v1988_v59 = vsel %vm11623_vm11, %v10216_v25, %v1987_v34 }
 0x274   : > { %v3277_v56 = vrot.slane %v3275_v44, 7  ;;  %v3273_v29 = vrot.slane %v13125_v8, 4  ;;  %6173 = vst [vmem:[#allocation4 + $0x12c] sm:$0xf] %v5881_v21  ;;  %v3481_v57 = vld [vmem:[#allocation2 + $0xf4] sm:$0xf] }
 0x275   : > { %v4730_v14 = vld [vmem:[#allocation3 + $0x70] sm:$0x8]  ;;  %v4018_v49 = vshll.u32 %v3688_v12, 16  ;;  %v4014_v19 = vrot.slane %v4012_v31, 5  ;;  %1632 = vst.msk [vmem:[#allocation4 + $0x318] sm:$0xf] %vm1609_vm15, %v1558_v11 }
 0x276   : > { %v1560_v41 = vpop.permute.xlu2 %1559  ;;  %v3280_v37 = vor.u32 %v3278_v39, %v3277_v56  ;;  %v4912_v63 = vshrl.u32 %v4730_v14, 16  ;;  %4691 = vst [vmem:[#allocation3 + $0x84] sm:$0xf] %v4658_v42  ;;  %v11249_v15 = vld [vmem:[#allocation4 + $0x2f0] sm:$0xf0]  ;;  %v4502_v54 = vmax.f32 %v4445_v51, 0.0 }
 0x277   : > { %1633 = vst.msk [vmem:[#allocation4 + $0x33c] sm:$0xf] %vm1609_vm15, %v1560_v41  ;;  %v10527_v36 = vld [vmem:[#allocation4 + $0x14c] sm:$0xf0]  ;;  %v4015_v10 = vor.u32 %v4014_v19, %v4011_v48  ;;  %vm15166_vm2 = vcmask 126048   ;;  %v10278_v0 = vor.u32 %v11249_v15, %v10277_v58  ;;  %v4020_v24 = vrot.slane %v4018_v49, 5 }
 0x278   : > { %v3281_v55 = vsel %vm11623_vm11, %v3273_v29, %v3280_v37  ;;  %v2087_v4 = vpop.permute.xlu0 %2086  ;;  %v10330_v52 = vrot.slane %v4912_v63, 11  ;;  %2094 = vrot.lane.b32.xlu2 %v1988_v59, %s11523_s27  ;;  %v345_v41 = vld [vmem:[#allocation2 + $0xfc] sm:$0x1]  ;;  %v4659_v7 = vpack.c.bf16 %v4502_v54, %v4502_v54  ;;  %3571 = vrot.lane.b32.xlu1 %v3481_v57, %s11526_s30  ;;  %vm15167_vm8 = vmmov %vm15166_vm2  ;;  %v4022_v11 = vshrl.u32 %v3688_v12, 16  ;;  %v5749_v38 = vld [vmem:[#allocation3 + $0x64] sm:$0xf] }
 0x279   : > { %3380 = vrot.lane.b32.xlu0 %v3281_v55, %s11525_s29  ;;  %2161 = vst.msk [vmem:[#allocation4 + $0x318] sm:$0xf] %vm15166_vm2, %v2087_v4  ;;  %v4016_v3 = vrot.slane %v4015_v10, 4  ;;  %10317 = vmatmul.msk.bf16.gmra.mxu3 %vm4345_vm1, %v10278_v0  ;;  %v346_v23 = vsel %vm11594_vm6, 0, %v345_v41  ;;  %v5750_v28 = vld [vmem:[#allocation3 + $0x68] sm:$0xf] }
 0x27a   : > { %v2089_v2 = vpop.permute.xlu1 %2088  ;;  %v4923_v32 = vsel %vm11623_vm11, %v10330_v52, %v4922_v62  ;;  %347 = vst [vmem:[#allocation2 + $0xfc] sm:$0x1] %v346_v23  ;;  %v2198_v33 = vld [vmem:[#allocation2 + $0xe8] sm:$0xf]  ;;  %v4024_v20 = vrot.slane %v4022_v11, 4  ;;  %v5897_v6 = vshrl.u32 %v5749_v38, 16 }
 0x27b   : > { %2162 = vst.msk [vmem:[#allocation4 + $0x33c] sm:$0xf] %vm15167_vm8, %v2089_v2  ;;  %v11294_v46 = vld [vmem:[#allocation4 + $0x12c] sm:$0xf]  ;;  %v4021_v22 = vsel %vm11610_vm10, %v4016_v3, %v4020_v24  ;;  %v11324_v40 = vld [vmem:[#allocation4 + $0x218] sm:$0xf0] }
 0x27c   : > { %5155 = vst [vmem:[#allocation4 + $0x1f8] sm:$0xf] %v4923_v32  ;;  %v10530_v9 = vor.u32 %v11294_v46, %v10527_v36  ;;  %v5906_v60 = vshrl.u32 %v5750_v28, 16  ;;  %v5748_v43 = vld [vmem:[#allocation3 + $0x60] sm:$0x8]  ;;  %v4025_v61 = vor.u32 %v4024_v20, %v4020_v24  ;;  %v5899_v25 = vrot.slane %v5897_v6, 7 }
 0x27d   : > { %4692 = vst [vmem:[#allocation3 + $0x88] sm:$0xf] %v4659_v7  ;;  %v5189_v45 = vld [vmem:[#allocation3 + $0x84] sm:$0xf]  ;;  %v5892_v34 = vshrl.u32 %v5748_v43, 16  ;;  %v5900_v42 = vshll.u32 %v5749_v38, 16 }
 0x27e   : > { %v2280_v35 = vpop.permute.xlu2 %2279  ;;  %5221 = vst [vmem:[#allocation4 + $0x244] sm:$0xf] %v5189_v45  ;;  %v6211_v27 = vld [vmem:[#allocation3 + $0x84] sm:$0xf]  ;;  %v5908_v12 = vrot.slane %v5906_v60, 7  ;;  %v5909_v31 = vshll.u32 %v5750_v28, 16 }
 0x27f   : > { %2354 = vst.msk [vmem:[#allocation4 + $0x318] sm:$0xf] %vm2331_vm5, %v2280_v35  ;;  %v7234_v21 = vld [vmem:[#allocation3 + $0x84] sm:$0xf]  ;;  %v914_v17 = vld [vmem:[#allocation2 + $0xe8] sm:$0xf]  ;;  %v5902_v57 = vor.u32 %v5900_v42, %v5899_v25 }
 0x280   : > { %6243 = vst [vmem:[#allocation4 + $0x208] sm:$0xf] %v6211_v27  ;;  %2289 = vrot.lane.b32.xlu2 %v2198_v33, %s11521_s25  ;;  %v2282_v39 = vpop.permute.xlu0 %2281  ;;  %v4026_v58 = vrot.slane %v4025_v61, 4  ;;  %v5753_v48 = vld [vmem:[#allocation3 + $0x78] sm:$0xf]  ;;  %v10344_v49 = vrot.slane %v5892_v34, 11  ;;  %v5911_v62 = vor.u32 %v5909_v31, %v5908_v12 }
 0x281   : > { %4132 = vrot.lane.b32.xlu0 %v4021_v22, %s11527_s6  ;;  %7266 = vst [vmem:[#allocation4 + $0x1cc] sm:$0xf] %v7234_v21  ;;  %v3689_v56 = vld [vmem:[#allocation2 + $0xfc] sm:$0x1]  ;;  %v13160_v59 = vld [vmem:[#allocation3 + $0x74] sm:$0xf] }
 0x282   : > { %9553 = vmatmul.bf16.gmra.mxu0 %v10530_v9  ;;  %v4028_v37 = vshll.u32 %v3689_v56, 16  ;;  %v2841_v14 = vpop.permute.xlu1 %2840  ;;  %v5904_v13 = vrot.slane %v5899_v25, 4  ;;  %v5928_v35 = vshrl.u32 %v5753_v48, 16  ;;  %v291_v4 = vld [vmem:[#allocation2 + $0xf0] sm:$0x8]  ;;  %v5903_v2 = vsel %vm11623_vm11, %v10344_v49, %v5902_v57 }
 0x283   : > { %v10625_v44 = vld [vmem:[#allocation4 + $0x1f8] sm:$0xf]  ;;  %v5919_v52 = vshrl.u32 %v13160_v59, 16  ;;  %2355 = vst.msk [vmem:[#allocation4 + $0x33c] sm:$0xf] %vm2331_vm5, %v2282_v39  ;;  %v292_v10 = vsel %vm11581_vm4, 0, %v291_v4 }
 0x284   : > { %v10626_v18 = vor.u32 %v11324_v40, %v10625_v44  ;;  %v5190_v51 = vld [vmem:[#allocation3 + $0x88] sm:$0xf]  ;;  %v4030_v63 = vrot.slane %v4028_v37, 5  ;;  %v5912_v36 = vsel %vm11623_vm11, %v5904_v13, %v5911_v62  ;;  %v5930_v0 = vrot.slane %v5928_v35, 7  ;;  %6175 = vst [vmem:[#allocation4 + $0x174] sm:$0xf] %v5903_v2 }
 0x285   : > { %5222 = vst [vmem:[#allocation4 + $0x268] sm:$0xf] %v5190_v51  ;;  %v6212_v19 = vld [vmem:[#allocation3 + $0x88] sm:$0xf]  ;;  %v10389_v24 = vld [vmem:[#allocation4 + $0x10] sm:$0xf] }
 0x286   : > { %9301 = vmatmul.bf16.gmra.mxu1 %v10626_v18  ;;  %v2843_v29 = vpop.permute.xlu2 %2842  ;;  %v4031_v55 = vsel %vm11610_vm10, %v4026_v58, %v4030_v63  ;;  %6244 = vst [vmem:[#allocation4 + $0x22c] sm:$0xf] %v6212_v19  ;;  %v7235_v15 = vld [vmem:[#allocation3 + $0x88] sm:$0xf]  ;;  %v11263_v41 = vld [vmem:[#allocation4 + $0x30] sm:$0xf0] }
 0x287   : > { %4134 = vrot.lane.b32.xlu1 %v4031_v55, %s11527_s6  ;;  %7267 = vst [vmem:[#allocation4 + $0x1f0] sm:$0xf] %v7235_v15  ;;  %v1120_v7 = vld [vmem:[#allocation2 + $0xe4] sm:$0xf]  ;;  %v5921_v3 = vrot.slane %v5919_v52, 7  ;;  %v5931_v23 = vshll.u32 %v5753_v48, 16  ;;  %v10390_v45 = vor.u32 %v11263_v41, %v10389_v24 }
 0x288   : > { %6176 = vst [vmem:[#allocation4 + $0x198] sm:$0xf] %v5912_v36  ;;  %v13173_v46 = vld [vmem:[#allocation2 + $0xe8] sm:$0xf]  ;;  %v1466_v9 = vshrl.u32 %v1120_v7, 16  ;;  %v1469_v38 = vshll.u32 %v1120_v7, 16 }
 0x289   : > { %1007 = vrot.lane.b32.xlu0 %v914_v17, %s11520_s24  ;;  %293 = vst [vmem:[#allocation2 + $0xf0] sm:$0x8] %v292_v10  ;;  %v1475_v22 = vshll.u32 %v13173_v46, 16  ;;  %vm15168_vm3 = vcmask 191648   ;;  %v5933_v28 = vor.u32 %v5931_v23, %v5930_v0  ;;  %v1685_v33 = vld [vmem:[#allocation2 + $0xf4] sm:$0xf] }
 0x28a   : > { %v3371_v54 = vpop.permute.xlu0 %3370  ;;  %v3373_v11 = vpop.permute.xlu1 %3372  ;;  %2916 = vst.msk [vmem:[#allocation4 + $0x33c] sm:$0xf] %vm15168_vm3, %v2843_v29  ;;  %vm15169_vm2 = vmmov %vm15168_vm3  ;;  %v3269_v20 = vshll.u32 %v13111_v26, 16  ;;  %v1468_v6 = vrot.slane %v1466_v9, 4  ;;  %v1471_v40 = vrot.slane %v1469_v38, 5  ;;  %v2004_v27 = vshrl.u32 %v1685_v33, 16 }
 0x28b   : > { %2915 = vst.msk [vmem:[#allocation4 + $0x318] sm:$0xf] %vm15169_vm2, %v2841_v14  ;;  %vm15170_vm8 = vcmask 224448   ;;  %v5926_v60 = vrot.slane %v5921_v3, 4  ;;  %v2007_v43 = vshll.u32 %v1685_v33, 16  ;;  %v13180_v21 = vrot.slane %v1475_v22, 5 }
 0x28c   : > { %3445 = vst.msk [vmem:[#allocation4 + $0x318] sm:$0xf] %vm15170_vm8, %v3371_v54  ;;  %v1686_v44 = vld [vmem:[#allocation2 + $0xf8] sm:$0xf]  ;;  %v11303_v39 = vld [vmem:[#allocation4 + $0x174] sm:$0xf]  ;;  %v1472_v18 = vor.u32 %v1471_v40, %v1468_v6  ;;  %v3271_v29 = vor.u32 %v3269_v20, %v13125_v8  ;;  %vm15171_vm3 = vmmov %vm15170_vm8 }
 0x28d   : > { %v2006_v61 = vrot.slane %v2004_v27, 7  ;;  %v2013_v25 = vshrl.u32 %v1686_v44, 16  ;;  %v6200_v12 = vld [vmem:[#allocation3 + $0x28] sm:$0xf]  ;;  %v5922_v56 = vshll.u32 %v13160_v59, 16  ;;  %v2016_v17 = vshll.u32 %v1686_v44, 16 }
 0x28e   : > { %v3564_v32 = vpop.permute.xlu2 %3563  ;;  %v1473_v31 = vrot.slane %v1472_v18, 4  ;;  %v5934_v37 = vsel %vm11623_vm11, %v5926_v60, %v5933_v28  ;;  %3446 = vst.msk [vmem:[#allocation4 + $0x33c] sm:$0xf] %vm15171_vm3, %v3373_v11  ;;  %v5751_v8 = vld [vmem:[#allocation3 + $0x70] sm:$0x8]  ;;  %vm15172_vm2 = vcmask 126048  }
 0x28f   : > { %v10563_v26 = vld [vmem:[#allocation4 + $0x194] sm:$0xf0]  ;;  %3638 = vst.msk [vmem:[#allocation4 + $0x318] sm:$0xf] %vm3615_vm9, %v3564_v32  ;;  %v2009_v48 = vor.u32 %v2007_v43, %v2006_v61  ;;  %v2015_v49 = vrot.slane %v2013_v25, 7  ;;  %v5924_v63 = vor.u32 %v5922_v56, %v5921_v3  ;;  %v2011_v19 = vrot.slane %v2006_v61, 4  ;;  %vm15173_vm8 = vmmov %vm15172_vm2 }
 0x290   : > { %v10566_v42 = vor.u32 %v11303_v39, %v10563_v26  ;;  %v2965_v51 = vld [vmem:[#allocation2 + $0xf0] sm:$0x8]  ;;  %v1478_v59 = vsel %vm11610_vm10, %v1473_v31, %v13180_v21  ;;  %6232 = vst [vmem:[#allocation4 + $0x7c] sm:$0xf] %v6200_v12  ;;  %v5914_v15 = vshrl.u32 %v5751_v8, 16  ;;  %v1479_v56 = vshrl.u32 %v13173_v46, 16 }
 0x291   : > { %v1684_v58 = vld [vmem:[#allocation2 + $0xf0] sm:$0x8]  ;;  %v3261_v14 = vshrl.u32 %v2965_v51, 16  ;;  %1569 = vrot.lane.b32.xlu1 %v1478_v59, %s11522_s26  ;;  %v2018_v4 = vor.u32 %v2016_v17, %v2015_v49  ;;  %v13193_v54 = vld [vmem:[#allocation3 + $0x84] sm:$0xf]  ;;  %vm15174_vm3 = vcmask 191648  }
 0x292   : > { %v3566_v34 = vpop.permute.xlu0 %3565  ;;  %v1999_v57 = vshrl.u32 %v1684_v58, 16  ;;  %v4447_v62 = vpop.f32.mrf.mxu0  ;;  %9558 = vmatmul.bf16.gmra.mxu0 %v10566_v42  ;;  %6178 = vst [vmem:[#allocation4 + $0x1e0] sm:$0xf] %v5934_v37  ;;  %v2406_v52 = vld [vmem:[#allocation2 + $0xf4] sm:$0xf]  ;;  %v10345_v24 = vrot.slane %v5914_v15, 11 }
 0x293   : > { %3639 = vst.msk [vmem:[#allocation4 + $0x33c] sm:$0xf] %vm3615_vm9, %v3566_v34  ;;  %v10232_v35 = vrot.slane %v3261_v14, 11  ;;  %v4125_v2 = vpop.permute.xlu1 %4124  ;;  %v4448_v36 = vadd.f32 %v13092_v53, %v4447_v62  ;;  %v13200_v41 = vld [vmem:[#allocation2 + $0xf8] sm:$0xf]  ;;  %v2749_v7 = vshrl.u32 %v2406_v52, 16  ;;  %v2019_v11 = vsel %vm11623_vm11, %v2011_v19, %v2018_v4 }
 0x294   : > { %v10217_v55 = vrot.slane %v1999_v57, 11  ;;  %v2752_v32 = vshll.u32 %v2406_v52, 16  ;;  %v294_v3 = vld [vmem:[#allocation2 + $0x100] sm:$0x8]  ;;  %v4939_v23 = vshrl.u32 %v13193_v54, 16  ;;  %v5925_v9 = vsel %vm11623_vm11, %v10345_v24, %v5924_v63 }
 0x295   : > { %v3272_v10 = vsel %vm11623_vm11, %v10232_v35, %v3271_v29  ;;  %v295_v38 = vsel %vm11581_vm4, 0, %v294_v3  ;;  %v384_v22 = vld [vmem:[%s11578_s23 + $0x78] sm:$0xf]  ;;  %4199 = vst.msk [vmem:[#allocation4 + $0x318] sm:$0xf] %vm4176_vm13, %v4125_v2  ;;  %v2758_v20 = vshll.u32 %v13200_v41, 16 }
 0x296   : > { %9622 = vmatmul.bf16.vlgmr.msrb.gmra.mxu1 %v10390_v45  ;;  %v4127_v13 = vpop.permute.xlu2 %4126  ;;  %v2010_v0 = vsel %vm11623_vm11, %v10217_v55, %v2009_v48  ;;  %3378 = vrot.lane.b32.xlu2 %v3272_v10, %s11525_s29  ;;  %v10425_v28 = vld [vmem:[#allocation4 + $0x58] sm:$0xf]  ;;  %6177 = vst [vmem:[#allocation4 + $0x1bc] sm:$0xf] %v5925_v9  ;;  %v2751_v45 = vrot.slane %v2749_v7, 4  ;;  %v2754_v33 = vrot.slane %v2752_v32, 5 }
 0x297   : > { %4200 = vst.msk [vmem:[#allocation4 + $0x33c] sm:$0xf] %vm4176_vm13, %v4127_v13  ;;  %2098 = vrot.lane.b32.xlu0 %v2010_v0, %s11523_s27  ;;  %v4503_v40 = vmax.f32 %v4448_v36, 0.0  ;;  %v13215_v27 = vld [vmem:[#allocation3 + $0x88] sm:$0xf]  ;;  %v13222_v31 = vrot.slane %v2758_v20, 5 }
 0x298   : > { %v13217_v60 = vld [vmem:[#allocation3 + $0x88] sm:$0xf]  ;;  %v3482_v43 = vld [vmem:[#allocation2 + $0xf8] sm:$0xf]  ;;  %296 = vst [vmem:[#allocation2 + $0x100] sm:$0x8] %v295_v38  ;;  %v2755_v61 = vor.u32 %v2754_v33, %v2751_v45 }
 0x299   : > { %v455_v44 = vld [vmem:[#allocation2 + $0xc0] sm:$0x8]  ;;  %v456_v39 = vld [vmem:[#allocation2 + $0xc4] sm:$0xf]  ;;  %v11272_v18 = vld [vmem:[#allocation4 + $0x78] sm:$0xf0]  ;;  %v4660_v12 = vpack.c.bf16 %v4503_v40, %v4503_v40  ;;  %2100 = vrot.lane.b32.xlu1 %v2019_v11, %s11523_s27 }
 0x29a   : > { %v998_v6 = vpop.permute.xlu0 %997  ;;  %417 = vst.msk [vmem:[#allocation2 + $0x104] sm:$0xf] %vm226_vm0, %v384_v22  ;;  %v734_v25 = vshrl.u32 %v455_v44, 16  ;;  %v739_v34 = vshrl.u32 %v456_v39, 16  ;;  %v2200_v26 = vld [vmem:[#allocation2 + $0xf8] sm:$0xf]  ;;  %v10426_v17 = vor.u32 %v11272_v18, %v10425_v28 }
 0x29b   : > { %v10599_v42 = vld [vmem:[#allocation4 + $0x1dc] sm:$0xf0]  ;;  %v742_v51 = vshll.u32 %v456_v39, 16  ;;  %v2756_v29 = vrot.slane %v2755_v61, 4  ;;  %v385_v14 = vld [vmem:[%s11578_s23 + $0x7c] sm:$0xf]  ;;  %v1000_v48 = vpop.permute.xlu1 %999 }
 0x29c   : > { %v10199_v58 = vrot.slane %v734_v25, 11  ;;  %v741_v37 = vrot.slane %v739_v34, 7  ;;  %418 = vst.msk [vmem:[#allocation2 + $0x108] sm:$0xf] %vm226_vm0, %v385_v14  ;;  %v457_v57 = vld [vmem:[#allocation2 + $0xc8] sm:$0xf] }
 0x29d   : > { %v4560_v49 = vld [vmem:[#allocation3 + $0x80] sm:$0x8]  ;;  %v4948_v46 = vshrl.u32 %v13215_v27, 16  ;;  %v5950_v62 = vshrl.u32 %v13217_v60, 16  ;;  %v1122_v59 = vld [vmem:[#allocation2 + $0xec] sm:$0x1]  ;;  %v2761_v52 = vsel %vm11610_vm10, %v2756_v29, %v13222_v31 }
 0x29e   : > { %3573 = vrot.lane.b32.xlu2 %v3482_v43, %s11526_s30  ;;  %v744_v63 = vor.u32 %v742_v51, %v741_v37  ;;  %v1562_v19 = vpop.permute.xlu2 %1561  ;;  %4693 = vst [vmem:[#allocation3 + $0x94] sm:$0xf] %v4660_v12  ;;  %v11312_v8 = vld [vmem:[#allocation4 + $0x1bc] sm:$0xf]  ;;  %v1481_v13 = vrot.slane %v1479_v56, 4  ;;  %v748_v35 = vshrl.u32 %v457_v57, 16 }
 0x29f   : > { %2293 = vrot.lane.b32.xlu0 %v2200_v26, %s11521_s25  ;;  %v751_v55 = vshll.u32 %v457_v57, 16  ;;  %v4561_v4 = vsel %vm11798_vm14, 0, %v4560_v49  ;;  %v13232_v15 = vld [vmem:[#allocation3 + $0x84] sm:$0xf]  ;;  %v10602_v2 = vor.u32 %v11312_v8, %v10599_v42  ;;  %v2968_v36 = vld [vmem:[#allocation2 + $0x100] sm:$0x8] }
 0x2a0   : > { %v745_v10 = vsel %vm11623_vm11, %v10199_v58, %v744_v63  ;;  %v746_v0 = vrot.slane %v741_v37, 4  ;;  %4562 = vst [vmem:[#allocation3 + $0x80] sm:$0x8] %v4561_v4  ;;  %v913_v24 = vld [vmem:[#allocation2 + $0xe4] sm:$0xf]  ;;  %v3283_v32 = vshrl.u32 %v2968_v36, 16  ;;  %v1482_v28 = vor.u32 %v1481_v13, %v13180_v21  ;;  %v4449_v63 = vpop.f32.mrf.mxu0 }
 0x2a1   : > { %v2969_v7 = vld [vmem:[#allocation2 + $0x104] sm:$0xf]  ;;  %877 = vst.msk [vmem:[#allocation4 + $0x360] sm:$0xf] %vm226_vm0, %v745_v10  ;;  %v750_v3 = vrot.slane %v748_v35, 7  ;;  %2852 = vrot.lane.b32.xlu1 %v2761_v52, %s11524_s28  ;;  %v1485_v45 = vshll.u32 %v1122_v59, 16  ;;  %v4450_v35 = vadd.f32 %v13092_v53, %v4449_v63 }
 0x2a2   : > { %9563 = vmatmul.bf16.gmra.mxu0 %v10602_v2  ;;  %v3288_v11 = vshrl.u32 %v2969_v7, 16  ;;  %v3291_v9 = vshll.u32 %v2969_v7, 16  ;;  %1070 = vst.msk [vmem:[#allocation4 + $0x360] sm:$0xf] %vm1045_vm12, %v998_v6  ;;  %v13241_v38 = vpop.permute.xlu0 %1563  ;;  %v10281_v22 = vld [vmem:[#allocation4 + $0x318] sm:$0xf] }
 0x2a3   : > { %1634 = vst.msk [vmem:[#allocation4 + $0x360] sm:$0xf] %vm1609_vm15, %v1562_v19  ;;  %v753_v33 = vor.u32 %v751_v55, %v750_v3  ;;  %v11250_v20 = vld [vmem:[#allocation4 + $0x338] sm:$0xf0]  ;;  %v4950_v40 = vrot.slane %v4948_v46, 7  ;;  %v10233_v43 = vrot.slane %v3283_v32, 11  ;;  %v13256_v37 = vpop.permute.xlu1 %2090 }
 0x2a4   : > { %v3290_v44 = vrot.slane %v3288_v11, 7  ;;  %v2970_v39 = vld [vmem:[#allocation2 + $0x108] sm:$0xf]  ;;  %v10282_v18 = vor.u32 %v11250_v20, %v10281_v22  ;;  %v5941_v61 = vshrl.u32 %v13232_v15, 16  ;;  %v4941_v21 = vrot.slane %v4939_v23, 7 }
 0x2a5   : > { %v3297_v6 = vshrl.u32 %v2970_v39, 16  ;;  %v3300_v25 = vshll.u32 %v2970_v39, 16  ;;  %v754_v34 = vsel %vm11623_vm11, %v746_v0, %v753_v33  ;;  %v5191_v12 = vld [vmem:[#allocation3 + $0x94] sm:$0xf]  ;;  %v4951_v56 = vshll.u32 %v13215_v27, 16 }
 0x2a6   : > { %9627 = vmatmul.bf16.gmra.mxu1 %v10426_v17  ;;  %v5952_v26 = vrot.slane %v5950_v62, 7  ;;  %1005 = vrot.lane.b32.xlu2 %v913_v24, %s11520_s24  ;;  %v3293_v17 = vor.u32 %v3291_v9, %v3290_v44  ;;  %878 = vst.msk [vmem:[#allocation4 + $0x384] sm:$0xf] %vm226_vm0, %v754_v34  ;;  %v1483_v42 = vrot.slane %v1482_v28, 4  ;;  %v1487_v51 = vrot.slane %v1485_v45, 5  ;;  %v2093_v27 = vpop.permute.xlu2 %2092 }
 0x2a7   : > { %10318 = vmatmul.msk.bf16.gmra.mxu3 %vm4345_vm1, %v10282_v18  ;;  %v3295_v29 = vrot.slane %v3290_v44, 4  ;;  %v3299_v58 = vrot.slane %v3297_v6, 7  ;;  %1071 = vst.msk [vmem:[#allocation4 + $0x384] sm:$0xf] %vm1045_vm12, %v1000_v48  ;;  %v4953_v14 = vor.u32 %v4951_v56, %v4950_v40  ;;  %v5943_v57 = vrot.slane %v5941_v61, 7 }
 0x2a8   : > { %v3294_v23 = vsel %vm11623_vm11, %v10233_v43, %v3293_v17  ;;  %5223 = vst [vmem:[#allocation4 + $0x28c] sm:$0xf] %v5191_v12  ;;  %v5953_v49 = vshll.u32 %v13217_v60, 16  ;;  %v6213_v62 = vld [vmem:[#allocation3 + $0x94] sm:$0xf]  ;;  %v4946_v59 = vrot.slane %v4941_v21, 4  ;;  %v1488_v48 = vsel %vm11610_vm10, %v1483_v42, %v1487_v51 }
 0x2a9   : > { %3382 = vrot.lane.b32.xlu0 %v3294_v23, %s11525_s29  ;;  %v3302_v46 = vor.u32 %v3300_v25, %v3299_v58  ;;  %6245 = vst [vmem:[#allocation4 + $0x250] sm:$0xf] %v6213_v62  ;;  %v7236_v13 = vld [vmem:[#allocation3 + $0x94] sm:$0xf]  ;;  %v4942_v4 = vshll.u32 %v13193_v54, 16  ;;  %v5948_v2 = vrot.slane %v5943_v57, 4 }
 0x2aa   : > { %v5955_v19 = vor.u32 %v5953_v49, %v5952_v26  ;;  %v4954_v60 = vsel %vm11623_vm11, %v4946_v59, %v4953_v14  ;;  %v2284_v55 = vpop.permute.xlu0 %2283  ;;  %v2762_v52 = vshrl.u32 %v13200_v41, 16  ;;  %7268 = vst [vmem:[#allocation4 + $0x214] sm:$0xf] %v7236_v13  ;;  %v3484_v36 = vld [vmem:[#allocation2 + $0x108] sm:$0xf]  ;;  %v5944_v7 = vshll.u32 %v13232_v15, 16 }
 0x2ab   : > { %v3303_v8 = vsel %vm11623_vm11, %v3295_v29, %v3302_v46  ;;  %v4733_v10 = vld [vmem:[#allocation3 + $0x80] sm:$0x8]  ;;  %v6202_v0 = vld [vmem:[#allocation3 + $0x38] sm:$0xf]  ;;  %v4944_v24 = vor.u32 %v4942_v4, %v4941_v21  ;;  %5158 = vst [vmem:[#allocation4 + $0x264] sm:$0xf] %v4954_v60  ;;  %v2286_v28 = vpop.permute.xlu1 %2285 }
 0x2ac   : > { %3384 = vrot.lane.b32.xlu1 %v3303_v8, %s11525_s29  ;;  %v4934_v32 = vshrl.u32 %v4733_v10, 16  ;;  %v5956_v53 = vsel %vm11623_vm11, %v5948_v2, %v5955_v19  ;;  %1635 = vst.msk [vmem:[#allocation4 + $0x384] sm:$0xf] %vm1609_vm15, %v13241_v38  ;;  %v5754_v54 = vld [vmem:[#allocation3 + $0x80] sm:$0x8]  ;;  %v4504_v3 = vmax.f32 %v4450_v35, 0.0  ;;  %v5946_v41 = vor.u32 %v5944_v7, %v5943_v57 }
 0x2ad   : > { %6234 = vst [vmem:[#allocation4 + $0xc4] sm:$0xf] %v6202_v0  ;;  %v5936_v9 = vshrl.u32 %v5754_v54, 16  ;;  %v2764_v22 = vrot.slane %v2762_v52, 4  ;;  %v2199_v15 = vld [vmem:[#allocation2 + $0xf4] sm:$0xf] }
 0x2ae   : > { %1571 = vrot.lane.b32.xlu2 %v1488_v48, %s11522_s26  ;;  %v10331_v11 = vrot.slane %v4934_v32, 11  ;;  %6180 = vst [vmem:[#allocation4 + $0x228] sm:$0xf] %v5956_v53  ;;  %v2845_v45 = vpop.permute.xlu2 %2844  ;;  %v3690_v40 = vld [vmem:[#allocation2 + $0x104] sm:$0xf]  ;;  %v4661_v61 = vpack.c.bf16 %v4504_v3, %v4504_v3 }
 0x2af   : > { %v10346_v20 = vrot.slane %v5936_v9, 11  ;;  %v13281_v43 = vld [vmem:[#allocation2 + $0x108] sm:$0xf]  ;;  %v2765_v38 = vor.u32 %v2764_v22, %v13222_v31  ;;  %v4033_v44 = vshrl.u32 %v3690_v40, 16  ;;  %v4036_v39 = vshll.u32 %v3690_v40, 16 }
 0x2b0   : > { %v4945_v33 = vsel %vm11623_vm11, %v10331_v11, %v4944_v24  ;;  %v4042_v18 = vshll.u32 %v13281_v43, 16  ;;  %2164 = vst.msk [vmem:[#allocation4 + $0x384] sm:$0xf] %vm15172_vm2, %v2093_v27  ;;  %v10461_v34 = vld [vmem:[#allocation4 + $0xa0] sm:$0xf]  ;;  %vm15175_vm2 = vmmov %vm15174_vm3 }
 0x2b1   : > { %3577 = vrot.lane.b32.xlu0 %v3484_v36, %s11526_s30  ;;  %5157 = vst [vmem:[#allocation4 + $0x240] sm:$0xf] %v4945_v33  ;;  %v5947_v25 = vsel %vm11623_vm11, %v10346_v20, %v5946_v41  ;;  %v4035_v12 = vrot.slane %v4033_v44, 4  ;;  %v4038_v21 = vrot.slane %v4036_v39, 5  ;;  %v915_v56 = vld [vmem:[#allocation2 + $0xf4] sm:$0xf]  ;;  %v13316_v41 = vpop.f32.mrf.mxu1 }
 0x2b2   : > { %v2847_v6 = vpop.permute.xlu0 %2846  ;;  %6179 = vst [vmem:[#allocation4 + $0x204] sm:$0xf] %v5947_v25  ;;  %v2408_v31 = vld [vmem:[#allocation2 + $0xfc] sm:$0x1]  ;;  %v2766_v26 = vrot.slane %v2765_v38, 4  ;;  %v13291_v51 = vrot.slane %v4042_v18, 5 }
 0x2b3   : > { %2163 = vst.msk [vmem:[#allocation4 + $0x360] sm:$0xf] %vm15173_vm8, %v13256_v37  ;;  %v4039_v42 = vor.u32 %v4038_v21, %v4035_v12  ;;  %v2768_v29 = vshll.u32 %v2408_v31, 16  ;;  %v11333_v58 = vld [vmem:[#allocation4 + $0x260] sm:$0xf0]  ;;  %v13296_v63 = vpop.permute.xlu1 %3374  ;;  %vm15176_vm8 = vcmask 224448  }
 0x2b4   : > { %v11281_v17 = vld [vmem:[#allocation4 + $0xc0] sm:$0xf0]  ;;  %4694 = vst [vmem:[#allocation3 + $0x98] sm:$0xf] %v4661_v61  ;;  %v1124_v57 = vld [vmem:[#allocation2 + $0xf8] sm:$0xf] }
 0x2b5   : > { %v10462_v14 = vor.u32 %v11281_v17, %v10461_v34  ;;  %2356 = vst.msk [vmem:[#allocation4 + $0x360] sm:$0xf] %vm2331_vm5, %v2284_v55  ;;  %v4040_v23 = vrot.slane %v4039_v42, 4  ;;  %v2770_v27 = vrot.slane %v2768_v29, 5  ;;  %v10635_v49 = vld [vmem:[#allocation4 + $0x224] sm:$0xf0] }
 0x2b6   : > { %2291 = vrot.lane.b32.xlu2 %v2199_v15, %s11521_s25  ;;  %2917 = vst.msk [vmem:[#allocation4 + $0x360] sm:$0xf] %vm15174_vm3, %v2845_v45  ;;  %v1499_v46 = vshll.u32 %v1124_v57, 16  ;;  %v1503_v62 = vshrl.u32 %v1124_v57, 16  ;;  %v1125_v8 = vld [vmem:[#allocation2 + $0xfc] sm:$0x1]  ;;  %vm15177_vm3 = vmmov %vm15176_vm8 }
 0x2b7   : > { %9632 = vmatmul.bf16.gmra.mxu1 %v10462_v14  ;;  %v4045_v19 = vsel %vm11610_vm10, %v4040_v23, %v13291_v51  ;;  %v2771_v48 = vsel %vm11610_vm10, %v2766_v26, %v2770_v27  ;;  %2357 = vst.msk [vmem:[#allocation4 + $0x384] sm:$0xf] %vm2331_vm5, %v2286_v28  ;;  %v6204_v13 = vld [vmem:[#allocation3 + $0x48] sm:$0xf]  ;;  %v13308_v52 = vld [vmem:[#allocation3 + $0x94] sm:$0xf] }
 0x2b8   : > { %v10661_v37 = vld [vmem:[#allocation4 + $0x240] sm:$0xf]  ;;  %4136 = vrot.lane.b32.xlu1 %v4045_v19, %s11527_s6  ;;  %v13305_v4 = vrot.slane %v1499_v46, 5  ;;  %v1505_v2 = vrot.slane %v1503_v62, 4  ;;  %2918 = vst.msk [vmem:[#allocation4 + $0x384] sm:$0xf] %vm15175_vm2, %v2847_v6 }
 0x2b9   : > { %1009 = vrot.lane.b32.xlu0 %v915_v56, %s11520_s24  ;;  %v10662_v59 = vor.u32 %v11333_v58, %v10661_v37  ;;  %v3377_v60 = vpop.permute.xlu2 %3376  ;;  %v11321_v55 = vld [vmem:[#allocation4 + $0x204] sm:$0xf]  ;;  %6236 = vst [vmem:[#allocation4 + $0x10c] sm:$0xf] %v6204_v13  ;;  %v13311_v10 = vld [vmem:[#allocation3 + $0x94] sm:$0xf]  ;;  %v13339_v19 = vpop.f32.mrf.mxu1 }
 0x2ba   : > { %v3568_v35 = vpop.permute.xlu0 %3567  ;;  %v10638_v36 = vor.u32 %v11321_v55, %v10635_v49  ;;  %v1506_v24 = vor.u32 %v1505_v2, %v13305_v4  ;;  %v1509_v7 = vshll.u32 %v1125_v8, 16  ;;  %v4961_v32 = vshrl.u32 %v13308_v52, 16  ;;  %v916_v3 = vld [vmem:[#allocation2 + $0xf8] sm:$0xf]  ;;  %v10497_v44 = vld [vmem:[#allocation4 + $0xe8] sm:$0xf] }
 0x2bb   : > { %9306 = vmatmul.bf16.vlgmr.msra.gmra.mxu2 %v10662_v59  ;;  %v5192_v0 = vld [vmem:[#allocation3 + $0x98] sm:$0xf]  ;;  %v5963_v54 = vshrl.u32 %v13311_v10, 16  ;;  %v4046_v28 = vshrl.u32 %v13281_v43, 16  ;;  %v3483_v43 = vld [vmem:[#allocation2 + $0x104] sm:$0xf] }
 0x2bc   : > { %9568 = vmatmul.bf16.gmra.mxu0 %v10638_v36  ;;  %5224 = vst [vmem:[#allocation4 + $0x2b0] sm:$0xf] %v5192_v0  ;;  %v6214_v53 = vld [vmem:[#allocation3 + $0x98] sm:$0xf]  ;;  %v1507_v9 = vrot.slane %v1506_v24, 4  ;;  %v1511_v22 = vrot.slane %v1509_v7, 5 }
 0x2bd   : > { %6246 = vst [vmem:[#allocation4 + $0x274] sm:$0xf] %v6214_v53  ;;  %v4738_v11 = vld [vmem:[#allocation3 + $0x98] sm:$0xf]  ;;  %v13319_v33 = vrot.slane %v4961_v32, 7  ;;  %v3570_v20 = vpop.permute.xlu1 %3569  ;;  %v13322_v40 = vrot.slane %v5963_v54, 7 }
 0x2be   : > { %2854 = vrot.lane.b32.xlu2 %v2771_v48, %s11524_s28  ;;  %v5759_v15 = vld [vmem:[#allocation3 + $0x98] sm:$0xf]  ;;  %v4970_v38 = vshrl.u32 %v4738_v11, 16  ;;  %v1512_v25 = vsel %vm11610_vm10, %v1507_v9, %v1511_v22  ;;  %v1687_v34 = vld [vmem:[#allocation2 + $0x100] sm:$0x8]  ;;  %v4048_v56 = vrot.slane %v4046_v28, 4 }
 0x2bf   : > { %v7237_v45 = vld [vmem:[#allocation3 + $0x98] sm:$0xf]  ;;  %v5972_v6 = vshrl.u32 %v5759_v15, 16  ;;  %v1688_v12 = vld [vmem:[#allocation2 + $0x104] sm:$0xf]  ;;  %v2021_v21 = vshrl.u32 %v1687_v34, 16 }
 0x2c0   : > { %7269 = vst [vmem:[#allocation4 + $0x238] sm:$0xf] %v7237_v45  ;;  %1011 = vrot.lane.b32.xlu1 %v916_v3, %s11520_s24  ;;  %v11290_v39 = vld [vmem:[#allocation4 + $0x108] sm:$0xf0]  ;;  %v4968_v31 = vrot.slane %v13319_v33, 4  ;;  %v2026_v17 = vshrl.u32 %v1688_v12, 16  ;;  %v4049_v62 = vor.u32 %v4048_v56, %v13291_v51 }
 0x2c1   : > { %1575 = vrot.lane.b32.xlu0 %v1512_v25, %s11522_s26  ;;  %3448 = vst.msk [vmem:[#allocation4 + $0x384] sm:$0xf] %vm15176_vm8, %v3377_v60  ;;  %v10498_v26 = vor.u32 %v11290_v39, %v10497_v44  ;;  %v2029_v42 = vshll.u32 %v1688_v12, 16  ;;  %v5970_v29 = vrot.slane %v13322_v40, 4  ;;  %v4972_v58 = vrot.slane %v4970_v38, 7  ;;  %vm15182_vm8 = vmmov %vm15177_vm3 }
 0x2c2   : > { %v4129_v18 = vpop.permute.xlu2 %4128  ;;  %3447 = vst.msk [vmem:[#allocation4 + $0x360] sm:$0xf] %vm15177_vm3, %v13296_v63  ;;  %v348_v14 = vld [vmem:[#allocation2 + $0x10c] sm:$0x1]  ;;  %v5974_v23 = vrot.slane %v5972_v6, 7  ;;  %v10218_v27 = vrot.slane %v2021_v21, 11 }
 0x2c3   : > { %v13333_v57 = vrot.slane %v2026_v17, 7  ;;  %3640 = vst.msk [vmem:[#allocation4 + $0x360] sm:$0xf] %vm3615_vm9, %v3568_v35  ;;  %v349_v37 = vsel %vm11594_vm6, 0, %v348_v14  ;;  %v4973_v49 = vshll.u32 %v4738_v11, 16  ;;  %v5975_v46 = vshll.u32 %v5759_v15, 16 }
 0x2c4   : > { %350 = vst [vmem:[#allocation2 + $0x10c] sm:$0x1] %v349_v37  ;;  %v2410_v59 = vld [vmem:[#allocation2 + $0x108] sm:$0xf]  ;;  %v2201_v48 = vld [vmem:[#allocation2 + $0x104] sm:$0xf] }
 0x2c5   : > { %v2031_v63 = vor.u32 %v2029_v42, %v13333_v57  ;;  %4201 = vst.msk [vmem:[#allocation4 + $0x360] sm:$0xf] %vm4176_vm13, %v4129_v18  ;;  %v2782_v8 = vshll.u32 %v2410_v59, 16  ;;  %v2786_v13 = vshrl.u32 %v2410_v59, 16  ;;  %v4975_v60 = vor.u32 %v4973_v49, %v4972_v58  ;;  %v13344_v35 = vld [vmem:[#allocation4 + $0x150] sm:$0xf0]  ;;  %v13351_v7 = vpop.permute.xlu1 %1001 }
 0x2c6   : > { %3575 = vrot.lane.b32.xlu2 %v3483_v43, %s11526_s30  ;;  %3641 = vst.msk [vmem:[#allocation4 + $0x384] sm:$0xf] %vm3615_vm9, %v3570_v20  ;;  %v297_v55 = vld [vmem:[#allocation2 + $0x110] sm:$0x8]  ;;  %v5977_v2 = vor.u32 %v5975_v46, %v5974_v23  ;;  %v2972_v24 = vld [vmem:[#allocation2 + $0x114] sm:$0xf] }
 0x2c7   : > { %v4131_v61 = vpop.permute.xlu0 %4130  ;;  %9637 = vmatmul.bf16.gmra.mxu1 %v10498_v26  ;;  %v2032_v51 = vsel %vm11623_vm11, %v10218_v27, %v2031_v63  ;;  %v13348_v36 = vrot.slane %v2782_v8, 5  ;;  %v2788_v0 = vrot.slane %v2786_v13, 4  ;;  %v4050_v32 = vrot.slane %v4049_v62, 4  ;;  %v1123_v11 = vld [vmem:[#allocation2 + $0xf4] sm:$0xf]  ;;  %v13372_v63 = vpop.f32.mrf.mxu1 }
 0x2c8   : > { %4202 = vst.msk [vmem:[#allocation4 + $0x384] sm:$0xf] %vm4176_vm13, %v4131_v61  ;;  %2102 = vrot.lane.b32.xlu1 %v2032_v51, %s11523_s27  ;;  %v298_v53 = vsel %vm11581_vm4, 0, %v297_v55  ;;  %v3310_v54 = vshrl.u32 %v2972_v24, 16  ;;  %v3313_v3 = vshll.u32 %v2972_v24, 16  ;;  %v1490_v15 = vshrl.u32 %v1123_v11, 16 }
 0x2c9   : > { %2295 = vrot.lane.b32.xlu0 %v2201_v48, %s11521_s25  ;;  %v2789_v28 = vor.u32 %v2788_v0, %v13348_v36  ;;  %299 = vst [vmem:[#allocation2 + $0x110] sm:$0x8] %v298_v53  ;;  %v1493_v45 = vshll.u32 %v1123_v11, 16  ;;  %v459_v20 = vld [vmem:[#allocation2 + $0xd4] sm:$0xf]  ;;  %v4976_v1 = vsel %vm11623_vm11, %v4968_v31, %v4975_v60  ;;  %v5978_v21 = vsel %vm11623_vm11, %v5970_v29, %v5977_v2 }
 0x2ca   : > { %v13357_v9 = vpop.permute.xlu2 %1003  ;;  %v10533_v38 = vld [vmem:[#allocation4 + $0x130] sm:$0xf]  ;;  %v13362_v44 = vrot.slane %v3310_v54, 7  ;;  %v460_v39 = vld [vmem:[#allocation2 + $0xd8] sm:$0xf]  ;;  %v761_v18 = vshrl.u32 %v459_v20, 16 }
 0x2cb   : > { %v3692_v61 = vld [vmem:[#allocation2 + $0x10c] sm:$0x1]  ;;  %v2202_v6 = vld [vmem:[#allocation2 + $0x108] sm:$0xf]  ;;  %v2790_v43 = vrot.slane %v2789_v28, 4  ;;  %v10534_v34 = vor.u32 %v13344_v35, %v10533_v38  ;;  %v1492_v12 = vrot.slane %v1490_v15, 4 }
 0x2cc   : > { %v2411_v25 = vld [vmem:[#allocation2 + $0x10c] sm:$0x1]  ;;  %v4052_v56 = vshll.u32 %v3692_v61, 16  ;;  %v13370_v17 = vor.u32 %v3313_v3, %v13362_v44  ;;  %v1495_v42 = vrot.slane %v1493_v45, 5  ;;  %v458_v58 = vld [vmem:[#allocation2 + $0xd0] sm:$0x8]  ;;  %v4452_v60 = vpop.f32.mrf.mxu3 }
 0x2cd   : > { %v2792_v26 = vshll.u32 %v2411_v25, 16  ;;  %v763_v14 = vrot.slane %v761_v18, 7  ;;  %v770_v23 = vshrl.u32 %v460_v39, 16  ;;  %v773_v31 = vshll.u32 %v460_v39, 16  ;;  %v4563_v37 = vld [vmem:[#allocation3 + $0x90] sm:$0x8] }
 0x2ce   : > { %v756_v27 = vshrl.u32 %v458_v58, 16  ;;  %v4054_v49 = vrot.slane %v4052_v56, 5  ;;  %v1496_v62 = vor.u32 %v1495_v42, %v1492_v12  ;;  %v764_v59 = vshll.u32 %v459_v20, 16  ;;  %5160 = vst [vmem:[#allocation4 + $0x2ac] sm:$0xf] %v4976_v1 }
 0x2cf   : > { %v2794_v46 = vrot.slane %v2792_v26, 5  ;;  %v768_v29 = vrot.slane %v763_v14, 4  ;;  %v772_v48 = vrot.slane %v770_v23, 7  ;;  %v4564_v13 = vsel %vm11798_vm14, 0, %v4563_v37  ;;  %6182 = vst [vmem:[#allocation4 + $0x270] sm:$0xf] %v5978_v21 }
 0x2d0   : > { %v13359_v22 = vpop.permute.xlu0 %1565  ;;  %v10200_v8 = vrot.slane %v756_v27, 11  ;;  %v4055_v35 = vsel %vm11610_vm10, %v4050_v32, %v4054_v49  ;;  %2297 = vrot.lane.b32.xlu1 %v2202_v6, %s11521_s25  ;;  %v2971_v2 = vld [vmem:[#allocation2 + $0x110] sm:$0x8]  ;;  %v766_v51 = vor.u32 %v764_v59, %v763_v14  ;;  %4565 = vst [vmem:[#allocation3 + $0x90] sm:$0x8] %v4564_v13  ;;  %v1497_v24 = vrot.slane %v1496_v62, 4 }
 0x2d1   : > { %v2795_v55 = vsel %vm11610_vm10, %v2790_v43, %v2794_v46  ;;  %4138 = vrot.lane.b32.xlu2 %v4055_v35, %s11527_s6  ;;  %v3305_v0 = vshrl.u32 %v2971_v2, 16  ;;  %v775_v53 = vor.u32 %v773_v31, %v772_v48  ;;  %v10285_v54 = vld [vmem:[#allocation4 + $0x360] sm:$0xf]  ;;  %v11251_v3 = vld [vmem:[#allocation4 + $0x380] sm:$0xf0]  ;;  %v4964_v43 = vshll.u32 %v13308_v52, 16  ;;  %v13416_v31 = vpop.f32.mrf.mxu1 }
 0x2d2   : > { %2858 = vrot.lane.b32.xlu0 %v2795_v55, %s11524_s28  ;;  %v13386_v32 = vld [vmem:[%s15109_s2] ss:$0 sm:$0xff]  ;;  %v1568_v28 = vpop.permute.xlu1 %1567  ;;  %v767_v15 = vsel %vm11623_vm11, %v10200_v8, %v766_v51  ;;  %v10286_v45 = vor.u32 %v11251_v3, %v10285_v54  ;;  %v1689_v20 = vld [vmem:[#allocation2 + $0x108] sm:$0xf]  ;;  %v2095_v38 = vpop.permute.xlu2 %2094  ;;  %v240_v6 = vld [vmem:[#allocation2 + $0x11c] sm:$0x1]  ;;  %v1502_v21 = vsel %vm11610_vm10, %v1497_v24, %v13305_v4 }
 0x2d3   : > { %v4453_v11 = vadd.f32 %v13386_v32, %v4452_v60  ;;  %v10234_v18 = vrot.slane %v3305_v0, 11  ;;  %v776_v1 = vsel %vm11623_vm11, %v768_v29, %v775_v53  ;;  %879 = vst.msk [vmem:[#allocation4 + $0x3a8] sm:$0xf] %vm226_vm0, %v767_v15  ;;  %v2035_v61 = vshrl.u32 %v1689_v20, 16  ;;  %v3485_v56 = vld [vmem:[#allocation2 + $0x114] sm:$0xf] }
 0x2d4   : > { %880 = vst.msk [vmem:[#allocation4 + $0x3cc] sm:$0xf] %vm226_vm0, %v776_v1  ;;  %10319 = vmatmul.msk.bf16.gmra.mxu3 %vm4345_vm1, %v10286_v45  ;;  %v5966_v12 = vshll.u32 %v13311_v10, 16  ;;  %v2038_v42 = vshll.u32 %v1689_v20, 16  ;;  %v241_v52 = vsel %vm11594_vm6, 0, %v240_v6  ;;  %v4966_v4 = vor.u32 %v4964_v43, %v13319_v33 }
 0x2d5   : > { %v4505_v25 = vmax.f32 %v4453_v11, 0.0  ;;  %1073 = vst.msk [vmem:[#allocation4 + $0x3cc] sm:$0xf] %vm1045_vm12, %v13357_v9  ;;  %v2037_v26 = vrot.slane %v2035_v61, 7  ;;  %vm15178_vm4 = vcmask 126048   ;;  %v2033_v27 = vrot.slane %v13333_v57, 4 }
 0x2d6   : > { %1072 = vst.msk [vmem:[#allocation4 + $0x3a8] sm:$0xf] %vm1045_vm12, %v13351_v7  ;;  %v5968_v9 = vor.u32 %v5966_v12, %v13322_v40  ;;  %v2409_v62 = vld [vmem:[#allocation2 + $0x104] sm:$0xf]  ;;  %v3486_v60 = vld [vmem:[#allocation2 + $0x118] sm:$0xf]  ;;  %vm15179_vm2 = vmmov %vm15178_vm4 }
 0x2d7   : > { %9642 = vmatmul.bf16.gmra.mxu1 %v10534_v34  ;;  %v3316_v34 = vsel %vm11623_vm11, %v10234_v18, %v13370_v17  ;;  %v4662_v10 = vpack.c.bf16 %v4505_v25, %v4505_v25  ;;  %v4736_v58 = vld [vmem:[#allocation3 + $0x90] sm:$0x8]  ;;  %1636 = vst.msk [vmem:[#allocation4 + $0x3a8] sm:$0xf] %vm1609_vm15, %v13359_v22  ;;  %v4454_v17 = vpop.f32.mrf.mxu3  ;;  %v3694_v22 = vld [vmem:[#allocation2 + $0x118] sm:$0xf]  ;;  %v2040_v46 = vor.u32 %v2038_v42, %v2037_v26 }
 0x2d8   : > { %v2097_v39 = vpop.permute.xlu0 %2096  ;;  %v5757_v14 = vld [vmem:[#allocation3 + $0x90] sm:$0x8]  ;;  %3386 = vrot.lane.b32.xlu1 %v3316_v34, %s11525_s29  ;;  %v4956_v23 = vshrl.u32 %v4736_v58, 16  ;;  %2165 = vst.msk [vmem:[#allocation4 + $0x3a8] sm:$0xf] %vm15178_vm4, %v2095_v38  ;;  %v4455_v33 = vadd.f32 %v13386_v32, %v4454_v17  ;;  %v2773_v29 = vshrl.u32 %v2409_v62, 16  ;;  %vm15184_vm4 = vmmov %vm15182_vm8 }
 0x2d9   : > { %v5958_v7 = vshrl.u32 %v5757_v14, 16  ;;  %1573 = vrot.lane.b32.xlu2 %v1502_v21, %s11522_s26  ;;  %242 = vst [vmem:[#allocation2 + $0x11c] sm:$0x1] %v241_v52  ;;  %v2776_v48 = vshll.u32 %v2409_v62, 16  ;;  %v4066_v35 = vshll.u32 %v3694_v22, 16  ;;  %v4070_v2 = vshrl.u32 %v3694_v22, 16  ;;  %v13436_v45 = vpop.f32.mrf.mxu1 }
 0x2da   : > { %3579 = vrot.lane.b32.xlu0 %v3485_v56, %s11526_s30  ;;  %v13422_v37 = vpop.permute.xlu1 %2287  ;;  %v10332_v40 = vrot.slane %v4956_v23, 11  ;;  %4695 = vst [vmem:[#allocation3 + $0xa4] sm:$0xf] %v4662_v10  ;;  %v4506_v8 = vmax.f32 %v4455_v33, 0.0  ;;  %v2290_v55 = vpop.permute.xlu2 %2289  ;;  %v2775_v51 = vrot.slane %v2773_v29, 4  ;;  %v2041_v53 = vsel %vm11623_vm11, %v2033_v27, %v2040_v46 }
 0x2db   : > { %v10347_v49 = vrot.slane %v5958_v7, 11  ;;  %1637 = vst.msk [vmem:[#allocation4 + $0x3cc] sm:$0xf] %vm1609_vm15, %v1568_v28  ;;  %v2778_v0 = vrot.slane %v2776_v48, 5  ;;  %v11308_v54 = vld [vmem:[#allocation4 + $0x198] sm:$0xf0] }
 0x2dc   : > { %v4967_v57 = vsel %vm11623_vm11, %v10332_v40, %v4966_v4  ;;  %2166 = vst.msk [vmem:[#allocation4 + $0x3cc] sm:$0xf] %vm15179_vm2, %v2097_v39  ;;  %v4663_v24 = vpack.c.bf16 %v4506_v8, %v4506_v8  ;;  %v2973_v11 = vld [vmem:[#allocation2 + $0x118] sm:$0xf]  ;;  %v13441_v38 = vrot.slane %v4066_v35, 5  ;;  %v4072_v39 = vrot.slane %v4070_v2, 4 }
 0x2dd   : > { %v5969_v13 = vsel %vm11623_vm11, %v10347_v49, %v5968_v9  ;;  %5159 = vst [vmem:[#allocation4 + $0x288] sm:$0xf] %v4967_v57  ;;  %v2779_v3 = vor.u32 %v2778_v0, %v2775_v51  ;;  %v10569_v15 = vld [vmem:[#allocation4 + $0x178] sm:$0xf]  ;;  %v11342_v6 = vld [vmem:[#allocation4 + $0x2a8] sm:$0xf0] }
 0x2de   : > { %6181 = vst [vmem:[#allocation4 + $0x24c] sm:$0xf] %v5969_v13  ;;  %v10570_v1 = vor.u32 %v11308_v54, %v10569_v15  ;;  %v3319_v43 = vshrl.u32 %v2973_v11, 16  ;;  %v10671_v34 = vld [vmem:[#allocation4 + $0x26c] sm:$0xf0]  ;;  %v4073_v26 = vor.u32 %v4072_v39, %v13441_v38  ;;  %v3322_v14 = vshll.u32 %v2973_v11, 16 }
 0x2df   : > { %2359 = vst.msk [vmem:[#allocation4 + $0x3cc] sm:$0xf] %vm2331_vm5, %v2290_v55  ;;  %v2780_v25 = vrot.slane %v2779_v3, 4  ;;  %v3317_v33 = vrot.slane %v13362_v44, 4  ;;  %v3693_v8 = vld [vmem:[#allocation2 + $0x114] sm:$0xf] }
 0x2e0   : > { %v13424_v59 = vpop.permute.xlu0 %2848  ;;  %3581 = vrot.lane.b32.xlu1 %v3486_v60, %s11526_s30  ;;  %v351_v28 = vld [vmem:[#allocation2 + $0x11c] sm:$0x1]  ;;  %4696 = vst [vmem:[#allocation3 + $0xa8] sm:$0xf] %v4663_v24  ;;  %v3321_v58 = vrot.slane %v3319_v43, 7  ;;  %v4074_v7 = vrot.slane %v4073_v26, 4 }
 0x2e1   : > { %2104 = vrot.lane.b32.xlu2 %v2041_v53, %s11523_s27  ;;  %v352_v20 = vsel %vm11594_vm6, 0, %v351_v28  ;;  %v5193_v18 = vld [vmem:[#allocation3 + $0xa4] sm:$0xf]  ;;  %v2785_v10 = vsel %vm11610_vm10, %v2780_v25, %v13348_v36  ;;  %v13455_v49 = vpop.f32.mrf.mxu1  ;;  %v13459_v57 = vld [vmem:[#allocation3 + $0x14] sm:$0xf]  ;;  %v4057_v51 = vshrl.u32 %v3693_v8, 16 }
 0x2e2   : > { %v13443_v61 = vpop.permute.xlu1 %2850  ;;  %353 = vst [vmem:[#allocation2 + $0x11c] sm:$0x1] %v352_v20  ;;  %v6215_v42 = vld [vmem:[#allocation3 + $0xa4] sm:$0xf]  ;;  %v3324_v40 = vor.u32 %v3322_v14, %v3321_v58  ;;  %v10605_v2 = vld [vmem:[#allocation4 + $0x1c0] sm:$0xf] }
 0x2e3   : > { %5225 = vst [vmem:[#allocation4 + $0x2d4] sm:$0xf] %v5193_v18  ;;  %v7238_v17 = vld [vmem:[#allocation3 + $0xa4] sm:$0xf]  ;;  %v5310_v24 = vshrl.u32 %v13459_v57, 16  ;;  %v5313_v53 = vshll.u32 %v13459_v57, 16 }
 0x2e4   : > { %v10697_v21 = vld [vmem:[#allocation4 + $0x288] sm:$0xf]  ;;  %6247 = vst [vmem:[#allocation4 + $0x298] sm:$0xf] %v6215_v42  ;;  %v13457_v62 = vld [vmem:[#allocation3 + $0xa4] sm:$0xf]  ;;  %v3325_v44 = vsel %vm11623_vm11, %v3317_v33, %v3324_v40 }
 0x2e5   : > { %v10698_v56 = vor.u32 %v11342_v6, %v10697_v21  ;;  %v11330_v16 = vld [vmem:[#allocation4 + $0x24c] sm:$0xf]  ;;  %7270 = vst [vmem:[#allocation4 + $0x25c] sm:$0xf] %v7238_v17  ;;  %v11317_v35 = vld [vmem:[#allocation4 + $0x1e0] sm:$0xf0] }
 0x2e6   : > { %v10674_v52 = vor.u32 %v11330_v16, %v10671_v34  ;;  %15180 = vst [vmem:[#allocation7_spill] sm:$0xff] %v13455_v49  ;;  %v4983_v55 = vshrl.u32 %v13457_v62, 16  ;;  %v10606_v11 = vor.u32 %v11317_v35, %v10605_v2  ;;  %v5241_v28 = vld [vmem:[#allocation3 + $0x18] sm:$0xf]  ;;  %v13474_v18 = vld [vmem:[#allocation3 + $0xa4] sm:$0xf] }
 0x2e7   : > { %9647 = vmatmul.bf16.gmra.mxu1 %v10570_v1  ;;  %9311 = vmatmul.bf16.gmra.mxu2 %v10698_v56  ;;  %v4741_v22 = vld [vmem:[#allocation3 + $0xa8] sm:$0xf]  ;;  %2358 = vst.msk [vmem:[#allocation4 + $0x3a8] sm:$0xf] %vm2331_vm5, %v13422_v37  ;;  %vm15181_vm6 = vcmask 191648   ;;  %v4059_v25 = vrot.slane %v4057_v51, 4 }
 0x2e8   : > { %9573 = vmatmul.bf16.gmra.mxu0 %v10674_v52  ;;  %v5194_v36 = vld [vmem:[#allocation3 + $0xa8] sm:$0xf]  ;;  %v4992_v48 = vshrl.u32 %v4741_v22, 16  ;;  %v13472_v39 = vrot.slane %v4983_v55, 7  ;;  %v4995_v1 = vshll.u32 %v4741_v22, 16  ;;  %v4060_v43 = vshll.u32 %v3693_v8, 16  ;;  %vm15183_vm3 = vmmov %vm15181_vm6 }
 0x2e9   : > { %v3695_v9 = vld [vmem:[#allocation2 + $0x11c] sm:$0x1]  ;;  %2856 = vrot.lane.b32.xlu2 %v2785_v10, %s11524_s28  ;;  %5226 = vst [vmem:[#allocation4 + $0x2f8] sm:$0xf] %v5194_v36  ;;  %v6216_v60 = vld [vmem:[#allocation3 + $0xa8] sm:$0xf]  ;;  %v13470_v20 = vpop.f32.mrf.mxu1 }
 0x2ea   : > { %v13452_v23 = vpop.permute.xlu1 %3571  ;;  %v4076_v27 = vshll.u32 %v3695_v9, 16  ;;  %6248 = vst [vmem:[#allocation4 + $0x2bc] sm:$0xf] %v6216_v60  ;;  %v4994_v54 = vrot.slane %v4992_v48, 7  ;;  %v7239_v3 = vld [vmem:[#allocation3 + $0xa8] sm:$0xf] }
 0x2eb   : > { %v13445_v12 = vpop.permute.xlu0 %3380  ;;  %v5762_v15 = vld [vmem:[#allocation3 + $0xa8] sm:$0xf]  ;;  %7271 = vst [vmem:[#allocation4 + $0x280] sm:$0xf] %v7239_v3  ;;  %v461_v34 = vld [vmem:[#allocation2 + $0xe0] sm:$0x8] }
 0x2ec   : > { %v4078_v46 = vrot.slane %v4076_v27, 5  ;;  %2919 = vst.msk [vmem:[#allocation4 + $0x3a8] sm:$0xf] %vm15181_vm6, %v13424_v59  ;;  %v5319_v21 = vshll.u32 %v5241_v28, 16  ;;  %v4997_v56 = vor.u32 %v4995_v1, %v4994_v54  ;;  %v5994_v16 = vshrl.u32 %v5762_v15, 16  ;;  %vm15186_vm6 = vmmov %vm15179_vm2 }
 0x2ed   : > { %v462_v26 = vld [vmem:[#allocation2 + $0xe4] sm:$0xf]  ;;  %v5985_v42 = vshrl.u32 %v13474_v18, 16  ;;  %2920 = vst.msk [vmem:[#allocation4 + $0x3cc] sm:$0xf] %vm15183_vm3, %v13443_v61  ;;  %v4062_v37 = vrot.slane %v4060_v43, 5 }
 0x2ee   : > { %v4079_v13 = vsel %vm11610_vm10, %v4074_v7, %v4078_v46  ;;  %v778_v52 = vshrl.u32 %v461_v34, 16  ;;  %v783_v10 = vshrl.u32 %v462_v26, 16  ;;  %v4990_v59 = vrot.slane %v13472_v39, 4  ;;  %3450 = vst.msk [vmem:[#allocation4 + $0x3cc] sm:$0xf] %vm15184_vm4, %v13445_v12 }
 0x2ef   : > { %4142 = vrot.lane.b32.xlu0 %v4079_v13, %s11527_s6  ;;  %v786_v14 = vshll.u32 %v462_v26, 16  ;;  %v463_v17 = vld [vmem:[#allocation2 + $0xe8] sm:$0xf]  ;;  %v4063_v9 = vor.u32 %v4062_v37, %v4059_v25  ;;  %v5323_v33 = vshrl.u32 %v5241_v28, 16  ;;  %v5996_v61 = vrot.slane %v5994_v16, 7 }
 0x2f0   : > { %v3379_v4 = vpop.permute.xlu2 %3378  ;;  %v785_v7 = vrot.slane %v783_v10, 7  ;;  %v792_v22 = vshrl.u32 %v463_v17, 16  ;;  %v795_v40 = vshll.u32 %v463_v17, 16  ;;  %v4998_v36 = vsel %vm11623_vm11, %v4990_v59, %v4997_v56  ;;  %v4566_v54 = vld [vmem:[#allocation3 + $0xa0] sm:$0x8] }
 0x2f1   : > { %3388 = vrot.lane.b32.xlu2 %v3325_v44, %s11525_s29  ;;  %3449 = vst.msk [vmem:[#allocation4 + $0x3a8] sm:$0xf] %vm15182_vm8, %v3379_v4  ;;  %v10201_v4 = vrot.slane %v778_v52, 11  ;;  %v4064_v46 = vrot.slane %v4063_v9, 4  ;;  %v5312_v57 = vrot.slane %v5310_v24, 4  ;;  %v5315_v13 = vrot.slane %v5313_v53, 5  ;;  %vm15188_vm8 = vmmov %vm15183_vm3 }
 0x2f2   : > { %3642 = vst.msk [vmem:[#allocation4 + $0x3a8] sm:$0xf] %vm3615_vm9, %v13452_v23  ;;  %v788_v12 = vor.u32 %v786_v14, %v785_v7  ;;  %v790_v48 = vrot.slane %v785_v7, 4  ;;  %v794_v8 = vrot.slane %v792_v22, 7  ;;  %v13493_v60 = vrot.slane %v5985_v42, 7 }
 0x2f3   : > { %v4133_v29 = vpop.permute.xlu0 %4132  ;;  %v5997_v44 = vshll.u32 %v5762_v15, 16  ;;  %v4069_v23 = vsel %vm11610_vm10, %v4064_v46, %v13441_v38  ;;  %5162 = vst [vmem:[#allocation4 + $0x2f4] sm:$0xf] %v4998_v36  ;;  %v5325_v51 = vrot.slane %v5323_v33, 4  ;;  %v5242_v28 = vld [vmem:[#allocation3 + $0x1c] sm:$0x1]  ;;  %v5316_v15 = vor.u32 %v5315_v13, %v5312_v57 }
 0x2f4   : > { %4203 = vst.msk [vmem:[#allocation4 + $0x3a8] sm:$0xf] %vm4176_vm13, %v4133_v29  ;;  %v789_v55 = vsel %vm11623_vm11, %v10201_v4, %v788_v12  ;;  %v797_v2 = vor.u32 %v795_v40, %v794_v8  ;;  %v5321_v29 = vrot.slane %v5319_v21, 5  ;;  %v5992_v1 = vrot.slane %v13493_v60, 4  ;;  %v10641_v25 = vld [vmem:[#allocation4 + $0x208] sm:$0xf] }
 0x2f5   : > { %v5999_v24 = vor.u32 %v5997_v44, %v5996_v61  ;;  %881 = vst.msk [vmem:[#allocation4 + $0x3f0] sm:$0xf] %vm226_vm0, %v789_v55  ;;  %v4567_v34 = vsel %vm11798_vm14, 0, %v4566_v54  ;;  %v5329_v37 = vshll.u32 %v5242_v28, 16  ;;  %v4986_v36 = vshll.u32 %v13457_v62, 16 }
 0x2f6   : > { %v798_v38 = vsel %vm11623_vm11, %v790_v48, %v797_v2  ;;  %v5326_v56 = vor.u32 %v5325_v51, %v5321_v29  ;;  %4568 = vst [vmem:[#allocation3 + $0xa0] sm:$0x8] %v4567_v34  ;;  %v5988_v46 = vshll.u32 %v13474_v18, 16  ;;  %v11335_v2 = vld [vmem:[#allocation4 + $0x270] sm:$0xf0] }
 0x2f7   : > { %9652 = vmatmul.bf16.gmra.mxu1 %v10606_v11  ;;  %v11326_v11 = vld [vmem:[#allocation4 + $0x228] sm:$0xf0]  ;;  %882 = vst.msk [vmem:[#allocation4 + $0x414] sm:$0xf] %vm226_vm0, %v798_v38  ;;  %v6000_v26 = vsel %vm11623_vm11, %v5992_v1, %v5999_v24  ;;  %v5331_v22 = vrot.slane %v5329_v37, 5  ;;  %v4988_v13 = vor.u32 %v4986_v36, %v13472_v39 }
 0x2f8   : > { %v3574_v0 = vpop.permute.xlu2 %3573  ;;  %v10642_v16 = vor.u32 %v11326_v11, %v10641_v25  ;;  %6184 = vst [vmem:[#allocation4 + $0x2b8] sm:$0xf] %v6000_v26  ;;  %v5990_v44 = vor.u32 %v5988_v46, %v13493_v60  ;;  %v10677_v60 = vld [vmem:[#allocation4 + $0x250] sm:$0xf]  ;;  %v465_v37 = vld [vmem:[#allocation2 + $0xf4] sm:$0xf] }
 0x2f9   : > { %v4135_v6 = vpop.permute.xlu1 %4134  ;;  %3643 = vst.msk [vmem:[#allocation4 + $0x3cc] sm:$0xf] %vm3615_vm9, %v3574_v0  ;;  %v13501_v0 = vpop.f32.mrf.mxu1  ;;  %4140 = vrot.lane.b32.xlu2 %v4069_v23, %s11527_s6  ;;  %v13547_v36 = vld [vmem:[#allocation3 + $0x28] sm:$0xf] }
 0x2fa   : > { %4204 = vst.msk [vmem:[#allocation4 + $0x3cc] sm:$0xf] %vm4176_vm13, %v4135_v6  ;;  %v11351_v11 = vld [vmem:[#allocation4 + $0x2f0] sm:$0xf0] }
 0x2fb   : > { %v1008_v58 = vpop.permute.xlu0 %1007  ;;  %15185 = vst [vmem:[#allocation8_spill] sm:$0xff] %v13501_v0  ;;  %v10289_v42 = vld [vmem:[#allocation4 + $0x3a8] sm:$0xf] }
 0x2fc   : > { %v4457_v35 = vpop.f32.mrf.mxu3  ;;  %1075 = vst.msk [vmem:[#allocation4 + $0x414] sm:$0xf] %vm1045_vm12, %v1008_v58  ;;  %v5317_v58 = vrot.slane %v5316_v15, 4  ;;  %v5243_v15 = vld [vmem:[#allocation3 + $0x24] sm:$0xf] }
 0x2fd   : > { %v4458_v3 = vadd.f32 %v13386_v32, %v4457_v35  ;;  %v4739_v8 = vld [vmem:[#allocation3 + $0xa0] sm:$0x8] }
 0x2fe   : > { %v5322_v7 = vsel %vm11610_vm10, %v5317_v58, %v5321_v29  ;;  %v5760_v57 = vld [vmem:[#allocation3 + $0xa0] sm:$0x8]  ;;  %v4978_v35 = vshrl.u32 %v4739_v8, 16 }
 0x2ff   : > { %v4507_v6 = vmax.f32 %v4458_v3, 0.0  ;;  %5703 = vst [vmem:[#allocation4 + $0x50] sm:$0xf] %v5322_v7  ;;  %v5980_v23 = vshrl.u32 %v5760_v57, 16  ;;  %v10707_v1 = vld [vmem:[#allocation4 + $0x2b4] sm:$0xf0] }
 0x300   : > { %v1006_v27 = vpop.permute.xlu2 %1005  ;;  %v10333_v62 = vrot.slane %v4978_v35, 11  ;;  %v805_v7 = vshrl.u32 %v465_v37, 16 }
 0x301   : > { %1074 = vst.msk [vmem:[#allocation4 + $0x3f0] sm:$0xf] %vm1045_vm12, %v1006_v27  ;;  %v11252_v52 = vld [vmem:[#allocation4 + $0x3c8] sm:$0xf0]  ;;  %v4664_v10 = vpack.c.bf16 %v4507_v6, %v4507_v6  ;;  %v13519_v9 = vpop.f32.mrf.mxu1  ;;  %v5327_v27 = vrot.slane %v5326_v56, 4  ;;  %v10348_v18 = vrot.slane %v5980_v23, 11 }
 0x302   : > { %v10290_v59 = vor.u32 %v11252_v52, %v10289_v42  ;;  %v4989_v51 = vsel %vm11623_vm11, %v10333_v62, %v4988_v13  ;;  %v464_v56 = vld [vmem:[#allocation2 + $0xf0] sm:$0x8]  ;;  %v10713_v13 = vld [vmem:[#allocation4 + $0x298] sm:$0xf]  ;;  %v807_v23 = vrot.slane %v805_v7, 7 }
 0x303   : > { %v1570_v53 = vpop.permute.xlu1 %1569  ;;  %4697 = vst [vmem:[#allocation3 + $0xb4] sm:$0xf] %v4664_v10  ;;  %v5332_v48 = vsel %vm11610_vm10, %v5327_v27, %v5331_v22  ;;  %v5991_v24 = vsel %vm11623_vm11, %v10348_v18, %v5990_v44  ;;  %v5337_v22 = vshll.u32 %v5243_v15, 16  ;;  %v466_v62 = vld [vmem:[#allocation2 + $0xf8] sm:$0xf] }
 0x304   : > { %1638 = vst.msk [vmem:[#allocation4 + $0x3f0] sm:$0xf] %vm1609_vm15, %v1570_v53  ;;  %v4459_v14 = vpop.f32.mrf.mxu3  ;;  %10320 = vmatmul.msk.bf16.gmra.mxu3 %vm4345_vm1, %v10290_v59  ;;  %v10678_v53 = vor.u32 %v11335_v2, %v10677_v60 }
 0x305   : > { %v4460_v17 = vadd.f32 %v13386_v32, %v4459_v14  ;;  %5704 = vst [vmem:[#allocation4 + $0x74] sm:$0xf] %v5332_v48  ;;  %v800_v14 = vshrl.u32 %v464_v56, 16  ;;  %v808_v48 = vshll.u32 %v465_v37, 16  ;;  %v5339_v18 = vrot.slane %v5337_v22, 5 }
 0x306   : > { %5161 = vst [vmem:[#allocation4 + $0x2d0] sm:$0xf] %v4989_v51 }
 0x307   : > { %9657 = vmatmul.bf16.gmra.mxu1 %v10642_v16  ;;  %v4508_v33 = vmax.f32 %v4460_v17, 0.0  ;;  %6183 = vst [vmem:[#allocation4 + $0x294] sm:$0xf] %v5991_v24  ;;  %v5334_v16 = vshrl.u32 %v5243_v15, 16  ;;  %v10202_v44 = vrot.slane %v800_v14, 11  ;;  %v814_v24 = vshrl.u32 %v466_v62, 16 }
 0x308   : > { %v1572_v43 = vpop.permute.xlu2 %1571 }
 0x309   : > { %v2099_v21 = vpop.permute.xlu0 %2098  ;;  %1639 = vst.msk [vmem:[#allocation4 + $0x414] sm:$0xf] %vm1609_vm15, %v1572_v43  ;;  %v4665_v40 = vpack.c.bf16 %v4508_v33, %v4508_v33  ;;  %v13534_v29 = vpop.f32.mrf.mxu1  ;;  %v5336_v27 = vrot.slane %v5334_v16, 4  ;;  %v816_v15 = vrot.slane %v814_v24, 7 }
 0x30a   : > { %2167 = vst.msk [vmem:[#allocation4 + $0x3f0] sm:$0xf] %vm15179_vm2, %v2099_v21  ;;  %v5195_v55 = vld [vmem:[#allocation3 + $0xb4] sm:$0xf]  ;;  %vm15190_vm2 = vmmov %vm15184_vm4 }
 0x30b   : > { %v2101_v4 = vpop.permute.xlu1 %2100  ;;  %4698 = vst [vmem:[#allocation3 + $0xb8] sm:$0xf] %v4665_v40  ;;  %v6217_v39 = vld [vmem:[#allocation3 + $0xb4] sm:$0xf]  ;;  %v5340_v56 = vor.u32 %v5339_v18, %v5336_v27 }
 0x30c   : > { %2168 = vst.msk [vmem:[#allocation4 + $0x414] sm:$0xf] %vm15186_vm6, %v2101_v4  ;;  %v7240_v54 = vld [vmem:[#allocation3 + $0xb4] sm:$0xf] }
 0x30d   : > { %5227 = vst [vmem:[#allocation4 + $0x31c] sm:$0xf] %v5195_v55  ;;  %v10733_v25 = vld [vmem:[#allocation4 + $0x2d0] sm:$0xf]  ;;  %v13542_v52 = vld [vmem:[#allocation3 + $0xb4] sm:$0xf] }
 0x30e   : > { %15187 = vst [vmem:[#allocation9_spill] sm:$0xff] %v13534_v29  ;;  %v10734_v34 = vor.u32 %v11351_v11, %v10733_v25  ;;  %v11339_v21 = vld [vmem:[#allocation4 + $0x294] sm:$0xf]  ;;  %v5005_v33 = vshrl.u32 %v13542_v52, 16  ;;  %v817_v11 = vshll.u32 %v466_v62, 16 }
 0x30f   : > { %6249 = vst [vmem:[#allocation4 + $0x2e0] sm:$0xf] %v6217_v39  ;;  %v10710_v26 = vor.u32 %v11339_v21, %v10707_v1  ;;  %v13544_v17 = vld [vmem:[#allocation3 + $0xb4] sm:$0xf]  ;;  %v4569_v21 = vld [vmem:[#allocation3 + $0xb0] sm:$0x8] }
 0x310   : > { %v2292_v61 = vpop.permute.xlu2 %2291  ;;  %7272 = vst [vmem:[#allocation4 + $0x2a4] sm:$0xf] %v7240_v54  ;;  %9316 = vmatmul.bf16.gmra.mxu2 %v10734_v34  ;;  %v6007_v8 = vshrl.u32 %v13544_v17, 16  ;;  %v13554_v2 = vrot.slane %v5005_v33, 7  ;;  %v810_v54 = vor.u32 %v808_v48, %v807_v23  ;;  %v5341_v33 = vrot.slane %v5340_v56, 4 }
 0x311   : > { %2360 = vst.msk [vmem:[#allocation4 + $0x3f0] sm:$0xf] %vm2331_vm5, %v2292_v61  ;;  %v2294_v12 = vpop.permute.xlu0 %2293  ;;  %v13540_v6 = vpop.f32.mrf.mxu1  ;;  %9578 = vmatmul.bf16.gmra.mxu0 %v10710_v26  ;;  %v819_v26 = vor.u32 %v817_v11, %v816_v15  ;;  %v5176_v48 = vld [vmem:[#allocation3 + $0x18] sm:$0xf]  ;;  %v6010_v56 = vshll.u32 %v13544_v17, 16 }
 0x312   : > { %2361 = vst.msk [vmem:[#allocation4 + $0x414] sm:$0xf] %vm2331_vm5, %v2294_v12  ;;  %v5196_v43 = vld [vmem:[#allocation3 + $0xb8] sm:$0xf]  ;;  %v11344_v12 = vld [vmem:[#allocation4 + $0x2b8] sm:$0xf0]  ;;  %v811_v34 = vsel %vm11623_vm11, %v10202_v44, %v810_v54 }
 0x313   : > { %v2853_v3 = vpop.permute.xlu1 %2852  ;;  %5228 = vst [vmem:[#allocation4 + $0x340] sm:$0xf] %v5196_v43  ;;  %v4744_v42 = vld [vmem:[#allocation3 + $0xb8] sm:$0xf]  ;;  %v10714_v51 = vor.u32 %v11344_v12, %v10713_v13  ;;  %v13561_v25 = vrot.slane %v6007_v8, 7  ;;  %v5012_v37 = vrot.slane %v13554_v2, 4 }
 0x314   : > { %v6218_v10 = vld [vmem:[#allocation3 + $0xb8] sm:$0xf]  ;;  %v5014_v4 = vshrl.u32 %v4744_v42, 16  ;;  %2921 = vst.msk [vmem:[#allocation4 + $0x3f0] sm:$0xf] %vm15183_vm3, %v2853_v3  ;;  %v5017_v60 = vshll.u32 %v4744_v42, 16 }
 0x315   : > { %v5765_v58 = vld [vmem:[#allocation3 + $0xb8] sm:$0xf]  ;;  %6250 = vst [vmem:[#allocation4 + $0x304] sm:$0xf] %v6218_v10  ;;  %v5343_v3 = vshll.u32 %v13547_v36, 16  ;;  %v6014_v27 = vrot.slane %v13561_v25, 4 }
 0x316   : > { %v7241_v61 = vld [vmem:[#allocation3 + $0xb8] sm:$0xf]  ;;  %v6016_v46 = vshrl.u32 %v5765_v58, 16  ;;  %v5016_v35 = vrot.slane %v5014_v4, 7  ;;  %v6019_v43 = vshll.u32 %v5765_v58, 16  ;;  %v4570_v58 = vsel %vm11798_vm14, 0, %v4569_v21 }
 0x317   : > { %9662 = vmatmul.bf16.gmra.mxu1 %v10678_v53  ;;  %7273 = vst [vmem:[#allocation4 + $0x2c8] sm:$0xf] %v7241_v61  ;;  %v13571_v14 = vrot.slane %v5343_v3, 5  ;;  %v5347_v8 = vshrl.u32 %v13547_v36, 16  ;;  %v10749_v44 = vld [vmem:[#allocation4 + $0x2e0] sm:$0xf] }
 0x318   : > { %v2855_v28 = vpop.permute.xlu2 %2854  ;;  %v6018_v53 = vrot.slane %v6016_v46, 7  ;;  %883 = vst.msk [vmem:[#allocation4 + $0x438] sm:$0xf] %vm226_vm0, %v811_v34  ;;  %v11424_v15 = vld [vmem:[%s15110_s3 + $0xb8] sm:$0xff] }
 0x319   : > { %2922 = vst.msk [vmem:[#allocation4 + $0x414] sm:$0xf] %vm15188_vm8, %v2855_v28  ;;  %v13552_v55 = vpop.f32.mrf.mxu1  ;;  %v812_v28 = vrot.slane %v807_v23, 4  ;;  %v5346_v12 = vsel %vm11610_vm10, %v5341_v33, %v13571_v14  ;;  %9436 = vmatpush.bf16.msrb.mxu3 %v11424_v15  ;;  %vm15197_vm8 = vmmov %vm15190_vm2 }
 0x31a   : > { %15189 = vst [vmem:[#allocation10_spill] sm:$0xff] %v13552_v55  ;;  %v6021_v10 = vor.u32 %v6019_v43, %v6018_v53  ;;  %v5008_v43 = vshll.u32 %v13542_v52, 16  ;;  %v11423_v52 = vld [vmem:[%s15110_s3 + $0xb0] sm:$0xff] }
 0x31b   : > { %v3383_v38 = vpop.permute.xlu0 %3382  ;;  %v820_v4 = vsel %vm11623_vm11, %v812_v28, %v819_v26  ;;  %4571 = vst [vmem:[#allocation3 + $0xb0] sm:$0x8] %v4570_v58 }
 0x31c   : > { %3451 = vst.msk [vmem:[#allocation4 + $0x3f0] sm:$0xf] %vm15184_vm4, %v3383_v38  ;;  %v5019_v38 = vor.u32 %v5017_v60, %v5016_v35 }
 0x31d   : > { %884 = vst.msk [vmem:[#allocation4 + $0x45c] sm:$0xf] %vm226_vm0, %v820_v4  ;;  %vm15192_vm0 = vmmov %vm15186_vm6  ;;  %9437 = vmatpush.bf16.msrb.mxu3 %v11423_v52 }
 0x31e   : > { %v3385_v40 = vpop.permute.xlu1 %3384  ;;  %v5020_v22 = vsel %vm11623_vm11, %v5012_v37, %v5019_v38  ;;  %5705 = vst [vmem:[#allocation4 + $0x98] sm:$0xf] %v5346_v12  ;;  %v6012_v37 = vor.u32 %v6010_v56, %v13561_v25  ;;  %vm15195_vm6 = vmmov %vm15183_vm3 }
 0x31f   : > { %3452 = vst.msk [vmem:[#allocation4 + $0x414] sm:$0xf] %vm15190_vm2, %v3385_v40  ;;  %v6022_v40 = vsel %vm11623_vm11, %v6014_v27, %v6021_v10  ;;  %v6264_v10 = vld [vmem:[#allocation3 + $0x24] sm:$0xf] }
 0x320   : > { %v3576_v57 = vpop.permute.xlu2 %3575  ;;  %5164 = vst [vmem:[#allocation4 + $0x33c] sm:$0xf] %v5020_v22  ;;  %v6334_v22 = vshrl.u32 %v6264_v10, 16  ;;  %v6337_v33 = vshll.u32 %v6264_v10, 16 }
 0x321   : > { %3644 = vst.msk [vmem:[#allocation4 + $0x3f0] sm:$0xf] %vm3615_vm9, %v3576_v57  ;;  %v13579_v61 = vpop.f32.mrf.mxu1  ;;  %v11353_v57 = vld [vmem:[#allocation4 + $0x300] sm:$0xf0] }
 0x322   : > { %6186 = vst [vmem:[#allocation4 + $0x300] sm:$0xf] %v6022_v40  ;;  %v10750_v35 = vor.u32 %v11353_v57, %v10749_v44  ;;  %v4742_v54 = vld [vmem:[#allocation3 + $0xb0] sm:$0x8]  ;;  %v13618_v57 = vrot.slane %v6337_v33, 5 }
 0x323   : > { %v3578_v59 = vpop.permute.xlu0 %3577  ;;  %5208 = vst [vmem:[#allocation4 + $0x70] sm:$0xf] %v5176_v48  ;;  %v5763_v3 = vld [vmem:[#allocation3 + $0xb0] sm:$0x8]  ;;  %v5000_v34 = vshrl.u32 %v4742_v54, 16 }
 0x324   : > { %3645 = vst.msk [vmem:[#allocation4 + $0x414] sm:$0xf] %vm3615_vm9, %v3578_v59  ;;  %v6002_v26 = vshrl.u32 %v5763_v3, 16  ;;  %v5246_v48 = vld [vmem:[#allocation3 + $0x34] sm:$0xf] }
 0x325   : > { %v10334_v58 = vrot.slane %v5000_v34, 11 }
 0x326   : > { %v10349_v17 = vrot.slane %v6002_v26, 11 }
 0x327   : > { %9667 = vmatmul.bf16.gmra.mxu1 %v10714_v51  ;;  %v5349_v51 = vrot.slane %v5347_v8, 4  ;;  %v13616_v8 = vrot.slane %v6334_v22, 4 }
 0x328   : > { %v6013_v40 = vsel %vm11623_vm11, %v10349_v17, %v6012_v37  ;;  %v5247_v37 = vld [vmem:[#allocation3 + $0x38] sm:$0xf] }
 0x329   : > { %v13590_v60 = vpop.f32.mrf.mxu1  ;;  %v5350_v38 = vor.u32 %v5349_v51, %v13571_v14  ;;  %6185 = vst [vmem:[#allocation4 + $0x2dc] sm:$0xf] %v6013_v40  ;;  %v5367_v22 = vshll.u32 %v5247_v37, 16  ;;  %v6266_v40 = vld [vmem:[#allocation3 + $0x2c] sm:$0x1] }
 0x32a   : > { %v4462_v39 = vpop.f32.mrf.mxu3  ;;  %v4137_v59 = vpop.permute.xlu1 %4136  ;;  %15191 = vst [vmem:[#allocation11_spill] sm:$0xff] %v13590_v60 }
 0x32b   : > { %v4463_v1 = vadd.f32 %v13386_v32, %v4462_v39  ;;  %v1010_v16 = vpop.permute.xlu0 %1009  ;;  %4205 = vst.msk [vmem:[#allocation4 + $0x3f0] sm:$0xf] %vm4176_vm13, %v4137_v59  ;;  %v4139_v46 = vpop.permute.xlu2 %4138  ;;  %v5245_v39 = vld [vmem:[#allocation3 + $0x2c] sm:$0x1]  ;;  %v5351_v4 = vrot.slane %v5350_v38, 4 }
 0x32c   : > { %1076 = vst.msk [vmem:[#allocation4 + $0x438] sm:$0xf] %vm1045_vm12, %v1010_v16  ;;  %v5353_v21 = vshll.u32 %v5245_v39, 16 }
 0x32d   : > { %v4509_v42 = vmax.f32 %v4463_v1, 0.0  ;;  %4206 = vst.msk [vmem:[#allocation4 + $0x414] sm:$0xf] %vm4176_vm13, %v4139_v46  ;;  %v6265_v46 = vld [vmem:[#allocation3 + $0x28] sm:$0xf] }
 0x32e   : > { %v6347_v44 = vshrl.u32 %v6265_v46, 16 }
 0x32f   : > { %v4666_v7 = vpack.c.bf16 %v4509_v42, %v4509_v42 }
 0x330   : > { %v11348_v15 = vld [vmem:[#allocation4 + $0x2dc] sm:$0xf] }
 0x331   : > { %4699 = vst [vmem:[#allocation3 + $0xc4] sm:$0xf] %v4666_v7  ;;  %v5355_v7 = vrot.slane %v5353_v21, 5 }
 0x332   : > { %v1012_v13 = vpop.permute.xlu1 %1011  ;;  %v10293_v23 = vld [vmem:[#allocation4 + $0x3f0] sm:$0xf]  ;;  %v4464_v18 = vpop.f32.mrf.mxu3 }
 0x333   : > { %1077 = vst.msk [vmem:[#allocation4 + $0x45c] sm:$0xf] %vm1045_vm12, %v1012_v13  ;;  %v1576_v24 = vpop.permute.xlu0 %1575  ;;  %v1574_v53 = vpop.permute.xlu2 %1573  ;;  %v4465_v28 = vadd.f32 %v13386_v32, %v4464_v18  ;;  %v5010_v32 = vor.u32 %v5008_v43, %v13554_v2  ;;  %vm15193_vm12 = vmmov %vm15192_vm0  ;;  %v5356_v12 = vsel %vm11610_vm10, %v5351_v4, %v5355_v7  ;;  %v6343_v13 = vshll.u32 %v6265_v46, 16  ;;  %v11360_v18 = vld [vmem:[#allocation4 + $0x338] sm:$0xf0] }
 0x334   : > { %1641 = vst.msk [vmem:[#allocation4 + $0x45c] sm:$0xf] %vm1609_vm15, %v1576_v24  ;;  %v11253_v36 = vld [vmem:[#allocation4 + $0x410] sm:$0xf0]  ;;  %v10743_v24 = vld [vmem:[#allocation4 + $0x2fc] sm:$0xf0] }
 0x335   : > { %1640 = vst.msk [vmem:[#allocation4 + $0x438] sm:$0xf] %vm1609_vm15, %v1574_v53  ;;  %v10294_v11 = vor.u32 %v11253_v36, %v10293_v23  ;;  %v4510_v42 = vmax.f32 %v4465_v28, 0.0  ;;  %v5011_v2 = vsel %vm11623_vm11, %v10334_v58, %v5010_v32  ;;  %v5361_v23 = vshll.u32 %v5246_v48, 16  ;;  %v5178_v53 = vld [vmem:[#allocation3 + $0x28] sm:$0xf]  ;;  %vm15194_vm15 = vmmov %vm15183_vm3 }
 0x336   : > { %5163 = vst [vmem:[#allocation4 + $0x318] sm:$0xf] %v5011_v2  ;;  %v13631_v38 = vrot.slane %v6343_v13, 5  ;;  %v6349_v43 = vrot.slane %v6347_v44, 4  ;;  %v10746_v21 = vor.u32 %v11348_v15, %v10743_v24  ;;  %v11421_v32 = vld [vmem:[%s15110_s3 + $0xa0] sm:$0xff]  ;;  %v6340_v2 = vor.u32 %v13618_v57, %v13616_v8  ;;  %v11420_v8 = vld [vmem:[%s15110_s3 + $0x98] sm:$0xff] }
 0x337   : > { %9672 = vmatmul.bf16.gmra.mxu1 %v10750_v35  ;;  %10321 = vmatmul.msk.bf16.gmra.mxu3 %vm4345_vm1, %v10294_v11  ;;  %v4667_v25 = vpack.c.bf16 %v4510_v42, %v4510_v42  ;;  %5706 = vst [vmem:[#allocation4 + $0xbc] sm:$0xf] %v5356_v12  ;;  %v5358_v35 = vshrl.u32 %v5246_v48, 16  ;;  %v5363_v42 = vrot.slane %v5361_v23, 5  ;;  %v6353_v57 = vshll.u32 %v6266_v40, 16 }
 0x338   : > { %v5197_v62 = vld [vmem:[#allocation3 + $0xc4] sm:$0xf]  ;;  %5210 = vst [vmem:[#allocation4 + $0xb8] sm:$0xf] %v5178_v53  ;;  %9583 = vmatmul.bf16.gmra.mxu0 %v10746_v21  ;;  %v4572_v53 = vld [vmem:[#allocation3 + $0xc0] sm:$0x8] }
 0x339   : > { %5229 = vst [vmem:[#allocation4 + $0x364] sm:$0xf] %v5197_v62  ;;  %v6219_v1 = vld [vmem:[#allocation3 + $0xc4] sm:$0xf]  ;;  %v5360_v34 = vrot.slane %v5358_v35, 4  ;;  %v4573_v15 = vsel %vm11798_vm14, 0, %v4572_v53 }
 0x33a   : > { %6251 = vst [vmem:[#allocation4 + $0x328] sm:$0xf] %v6219_v1  ;;  %v7242_v16 = vld [vmem:[#allocation3 + $0xc4] sm:$0xf]  ;;  %v2103_v14 = vpop.permute.xlu1 %2102  ;;  %v11422_v1 = vld [vmem:[%s15110_s3 + $0xa8] sm:$0xff]  ;;  %v5371_v21 = vshrl.u32 %v5247_v37, 16 }
 0x33b   : > { %7274 = vst [vmem:[#allocation4 + $0x2ec] sm:$0xf] %v7242_v16  ;;  %v2296_v59 = vpop.permute.xlu0 %2295  ;;  %v2105_v27 = vpop.permute.xlu2 %2104  ;;  %v13620_v62 = vld [vmem:[#allocation3 + $0xc4] sm:$0xf]  ;;  %9438 = vmatpush.bf16.msrb.mxu3 %v11422_v1  ;;  %v5364_v46 = vor.u32 %v5363_v42, %v5360_v34  ;;  %v11419_v37 = vld [vmem:[%s15110_s3 + $0x90] sm:$0xff] }
 0x33c   : > { %2169 = vst.msk [vmem:[#allocation4 + $0x438] sm:$0xf] %vm15192_vm0, %v2103_v14  ;;  %v13623_v36 = vld [vmem:[#allocation3 + $0xc4] sm:$0xf]  ;;  %v5027_v3 = vshrl.u32 %v13620_v62, 16 }
 0x33d   : > { %2170 = vst.msk [vmem:[#allocation4 + $0x45c] sm:$0xf] %vm15193_vm12, %v2105_v27  ;;  %v10769_v54 = vld [vmem:[#allocation4 + $0x318] sm:$0xf]  ;;  %v6029_v56 = vshrl.u32 %v13623_v36, 16 }
 0x33e   : > { %2362 = vst.msk [vmem:[#allocation4 + $0x438] sm:$0xf] %vm2331_vm5, %v2296_v59  ;;  %v10770_v28 = vor.u32 %v11360_v18, %v10769_v54  ;;  %v13637_v10 = vrot.slane %v5027_v3, 7  ;;  %v13639_v59 = vpop.f32.mrf.mxu1 }
 0x33f   : > { %4700 = vst [vmem:[#allocation3 + $0xc8] sm:$0xf] %v4667_v25  ;;  %v6350_v25 = vor.u32 %v6349_v43, %v13631_v38  ;;  %v6031_v33 = vrot.slane %v6029_v56, 7  ;;  %9439 = vmatpush.bf16.msrb.mxu3 %v11421_v32  ;;  %v6355_v32 = vrot.slane %v6353_v57, 5 }
 0x340   : > { %9321 = vmatmul.bf16.gmra.mxu2 %v10770_v28  ;;  %v5034_v35 = vrot.slane %v13637_v10, 4  ;;  %v5365_v28 = vrot.slane %v5364_v46, 4  ;;  %4574 = vst [vmem:[#allocation3 + $0xc0] sm:$0x8] %v4573_v15  ;;  %v13684_v46 = vld [vmem:[%s15109_s2] ss:$0 sm:$0xff] }
 0x341   : > { %v6036_v24 = vrot.slane %v6031_v33, 4  ;;  %v6351_v3 = vrot.slane %v6350_v25, 4  ;;  %v10785_v1 = vld [vmem:[#allocation4 + $0x328] sm:$0xf] }
 0x342   : > { %v2298_v51 = vpop.permute.xlu1 %2297 }
 0x343   : > { %2363 = vst.msk [vmem:[#allocation4 + $0x45c] sm:$0xf] %vm2331_vm5, %v2298_v51  ;;  %v2857_v39 = vpop.permute.xlu2 %2856  ;;  %vm15196_vm5 = vmmov %vm15190_vm2  ;;  %v13649_v51 = vrot.slane %v5367_v22, 5  ;;  %9440 = vmatpush.bf16.msrb.mxu3 %v11420_v8 }
 0x344   : > { %2923 = vst.msk [vmem:[#allocation4 + $0x438] sm:$0xf] %vm15194_vm15, %v2857_v39  ;;  %v2859_v11 = vpop.permute.xlu0 %2858 }
 0x345   : > { %2924 = vst.msk [vmem:[#allocation4 + $0x45c] sm:$0xf] %vm15195_vm6, %v2859_v11  ;;  %v6341_v11 = vrot.slane %v6340_v2, 4  ;;  %v6032_v2 = vshll.u32 %v13623_v36, 16 }
 0x346   : > { %v4747_v16 = vld [vmem:[#allocation3 + $0xc8] sm:$0xf] }
 0x347   : > { %v5198_v26 = vld [vmem:[#allocation3 + $0xc8] sm:$0xf]  ;;  %v5036_v52 = vshrl.u32 %v4747_v16, 16  ;;  %v5039_v7 = vshll.u32 %v4747_v16, 16  ;;  %9441 = vmatpush.bf16.msrb.mxu3 %v11419_v37  ;;  %v5766_v40 = vld [vmem:[#allocation3 + $0xc0] sm:$0x8] }
 0x348   : > { %5230 = vst [vmem:[#allocation4 + $0x388] sm:$0xf] %v5198_v26  ;;  %v5768_v58 = vld [vmem:[#allocation3 + $0xc8] sm:$0xf]  ;;  %v4599_v26 = vld [vmem:[#allocation3 + $0x3c] sm:$0x1] }
 0x349   : > { %v6220_v14 = vld [vmem:[#allocation3 + $0xc8] sm:$0xf]  ;;  %v5038_v4 = vrot.slane %v5036_v52, 7  ;;  %v6038_v17 = vshrl.u32 %v5768_v58, 16  ;;  %v6041_v13 = vshll.u32 %v5768_v58, 16  ;;  %v4600_v42 = vsel %vm12180_vm7, 0, %v4599_v26  ;;  %v13665_v58 = vpop.f32.mrf.mxu1 }
 0x34a   : > { %6252 = vst [vmem:[#allocation4 + $0x34c] sm:$0xf] %v6220_v14  ;;  %v3387_v27 = vpop.permute.xlu1 %3386  ;;  %v7243_v44 = vld [vmem:[#allocation3 + $0xc8] sm:$0xf]  ;;  %v5370_v52 = vsel %vm11610_vm10, %v5365_v28, %v13649_v51  ;;  %v6346_v14 = vsel %vm11610_vm10, %v6341_v11, %v13631_v38  ;;  %v4745_v38 = vld [vmem:[#allocation3 + $0xc0] sm:$0x8] }
 0x34b   : > { %v5041_v12 = vor.u32 %v5039_v7, %v5038_v4  ;;  %v6040_v48 = vrot.slane %v6038_v17, 7  ;;  %7275 = vst [vmem:[#allocation4 + $0x310] sm:$0xf] %v7243_v44  ;;  %v3389_v23 = vpop.permute.xlu2 %3388  ;;  %v5373_v4 = vrot.slane %v5371_v21, 4  ;;  %v11418_v7 = vld [vmem:[%s15110_s3 + $0x88] sm:$0xff]  ;;  %v6356_v17 = vsel %vm11610_vm10, %v6351_v3, %v6355_v32 }
 0x34c   : > { %3453 = vst.msk [vmem:[#allocation4 + $0x438] sm:$0xf] %vm15196_vm5, %v3387_v27  ;;  %v3580_v39 = vpop.permute.xlu0 %3579  ;;  %v5030_v27 = vshll.u32 %v13620_v62, 16  ;;  %v5022_v62 = vshrl.u32 %v4745_v38, 16  ;;  %v6024_v44 = vshrl.u32 %v5766_v40, 16  ;;  %9442 = vmatpush.bf16.msrb.mxu3 %v11418_v7 }
 0x34d   : > { %v6043_v18 = vor.u32 %v6041_v13, %v6040_v48  ;;  %3454 = vst.msk [vmem:[#allocation4 + $0x45c] sm:$0xf] %vm15197_vm8, %v3389_v23  ;;  %v5042_v54 = vsel %vm11623_vm11, %v5034_v35, %v5041_v12  ;;  %v6034_v13 = vor.u32 %v6032_v2, %v6031_v33  ;;  %v5374_v36 = vor.u32 %v5373_v4, %v13649_v51  ;;  %v4524_v33 = vld [vmem:[#allocation3 + $0xc] sm:$0x1]  ;;  %v5237_v21 = vld [vmem:[#allocation3 + $0x4] sm:$0xf] }
 0x34e   : > { %3646 = vst.msk [vmem:[#allocation4 + $0x438] sm:$0xf] %vm3615_vm9, %v3580_v39  ;;  %v5032_v48 = vor.u32 %v5030_v27, %v13637_v10  ;;  %v10335_v23 = vrot.slane %v5022_v62, 11  ;;  %v11417_v10 = vld [vmem:[%s15110_s3 + $0x80] sm:$0xff]  ;;  %v4525_v11 = vsel %vm12180_vm7, 0, %v4524_v33  ;;  %v5286_v37 = vshrl.u32 %v5237_v21, 16 }
 0x34f   : > { %v6044_v34 = vsel %vm11623_vm11, %v6036_v24, %v6043_v18  ;;  %5166 = vst [vmem:[#allocation4 + $0x384] sm:$0xf] %v5042_v54  ;;  %v10350_v18 = vrot.slane %v6024_v44, 11  ;;  %v5375_v51 = vrot.slane %v5374_v36, 4  ;;  %v6762_v2 = vld [vmem:[#allocation3 + $0x34] sm:$0xf] }
 0x350   : > { %15198 = vst [vmem:[#allocation12_spill] sm:$0xff] %v13665_v58  ;;  %v5033_v24 = vsel %vm11623_vm11, %v10335_v23, %v5032_v48  ;;  %9443 = vmatpush.bf16.msrb.mxu3 %v11417_v10  ;;  %v6834_v44 = vshrl.u32 %v6762_v2, 16  ;;  %v6268_v23 = vld [vmem:[#allocation3 + $0x38] sm:$0xf] }
 0x351   : > { %v11362_v43 = vld [vmem:[#allocation4 + $0x348] sm:$0xf0]  ;;  %6188 = vst [vmem:[#allocation4 + $0x348] sm:$0xf] %v6044_v34  ;;  %v6035_v39 = vsel %vm11623_vm11, %v10350_v18, %v6034_v13  ;;  %v5288_v13 = vrot.slane %v5286_v37, 4 }
 0x352   : > { %v3582_v56 = vpop.permute.xlu1 %3581  ;;  %v10786_v16 = vor.u32 %v11362_v43, %v10785_v1  ;;  %4601 = vst [vmem:[#allocation3 + $0x3c] sm:$0x1] %v4600_v42  ;;  %v13707_v10 = vld [vmem:[#allocation3 + $0x38] sm:$0xf] }
 0x353   : > { %3647 = vst.msk [vmem:[#allocation4 + $0x45c] sm:$0xf] %vm3615_vm9, %v3582_v56  ;;  %v4141_v25 = vpop.permute.xlu2 %4140  ;;  %v6267_v56 = vld [vmem:[#allocation3 + $0x34] sm:$0xf]  ;;  %v7290_v33 = vld [vmem:[#allocation3 + $0x38] sm:$0xf] }
 0x354   : > { %9677 = vmatmul.bf16.gmra.mxu1 %v10786_v16  ;;  %5707 = vst [vmem:[#allocation4 + $0xe0] sm:$0xf] %v5370_v52  ;;  %v6358_v4 = vshrl.u32 %v6267_v56, 16 }
 0x355   : > { %6727 = vst [vmem:[#allocation4 + $0x5c] sm:$0xf] %v6346_v14  ;;  %v5289_v14 = vshll.u32 %v5237_v21, 16 }
 0x356   : > { %4207 = vst.msk [vmem:[#allocation4 + $0x438] sm:$0xf] %vm4176_vm13, %v4141_v25  ;;  %v11369_v34 = vld [vmem:[#allocation4 + $0x380] sm:$0xf0]  ;;  %v7289_v25 = vld [vmem:[#allocation3 + $0x34] sm:$0xf] }
 0x357   : > { %v4467_v22 = vpop.f32.mrf.mxu3  ;;  %6728 = vst [vmem:[#allocation4 + $0x80] sm:$0xf] %v6356_v17  ;;  %v5291_v62 = vrot.slane %v5289_v14, 5  ;;  %v7359_v36 = vshrl.u32 %v7289_v25, 16 }
 0x358   : > { %v4468_v12 = vadd.f32 %v13684_v46, %v4467_v22  ;;  %5165 = vst [vmem:[#allocation4 + $0x360] sm:$0xf] %v5033_v24  ;;  %v10779_v16 = vld [vmem:[#allocation4 + $0x344] sm:$0xf0]  ;;  %v5249_v22 = vld [vmem:[#allocation3 + $0x44] sm:$0xf] }
 0x359   : > { %v5248_v57 = vld [vmem:[#allocation3 + $0x3c] sm:$0x1]  ;;  %6187 = vst [vmem:[#allocation4 + $0x324] sm:$0xf] %v6035_v39  ;;  %v5382_v18 = vshrl.u32 %v5249_v22, 16  ;;  %v13703_v39 = vrot.slane %v6358_v4, 4 }
 0x35a   : > { %v4511_v35 = vmax.f32 %v4468_v12, 0.0  ;;  %v5377_v53 = vshll.u32 %v5248_v57, 16  ;;  %4526 = vst [vmem:[#allocation3 + $0xc] sm:$0x1] %v4525_v11  ;;  %v6361_v12 = vshll.u32 %v6267_v56, 16  ;;  %v7361_v11 = vrot.slane %v7359_v36, 4 }
 0x35b   : > { %v5238_v24 = vld [vmem:[#allocation3 + $0x8] sm:$0xf]  ;;  %v6837_v56 = vshll.u32 %v6762_v2, 16  ;;  %v11416_v4 = vld [vmem:[%s15110_s3 + $0x78] sm:$0xff] }
 0x35c   : > { %v4668_v8 = vpack.c.bf16 %v4511_v35, %v4511_v35  ;;  %v5379_v3 = vrot.slane %v5377_v53, 5  ;;  %v7362_v35 = vshll.u32 %v7289_v25, 16  ;;  %v13705_v53 = vrot.slane %v6361_v12, 5  ;;  %v6761_v25 = vld [vmem:[#allocation3 + $0x30] sm:$0x8]  ;;  %9347 = vmatpush.bf16.msrb.mxu2 %v11416_v4  ;;  %v13738_v4 = vpop.f32.mrf.mxu1 }
 0x35d   : > { %v10297_v7 = vld [vmem:[#allocation4 + $0x438] sm:$0xf]  ;;  %v5295_v21 = vshll.u32 %v5238_v24, 16  ;;  %v5299_v36 = vshrl.u32 %v5238_v24, 16 }
 0x35e   : > { %4701 = vst [vmem:[#allocation3 + $0xd4] sm:$0xf] %v4668_v8  ;;  %v5380_v43 = vsel %vm11610_vm10, %v5375_v51, %v5379_v3  ;;  %v5385_v8 = vshll.u32 %v5249_v22, 16  ;;  %v5292_v51 = vor.u32 %v5291_v62, %v5288_v13  ;;  %v7364_v3 = vrot.slane %v7362_v35, 5 }
 0x35f   : > { %v4469_v54 = vpop.f32.mrf.mxu3  ;;  %5708 = vst [vmem:[#allocation4 + $0x104] sm:$0xf] %v5380_v43  ;;  %v10805_v32 = vld [vmem:[#allocation4 + $0x360] sm:$0xf]  ;;  %v5384_v43 = vrot.slane %v5382_v18, 4  ;;  %v13722_v12 = vrot.slane %v5295_v21, 5 }
 0x360   : > { %v4470_v28 = vadd.f32 %v13684_v46, %v4469_v54  ;;  %v10806_v42 = vor.u32 %v11369_v34, %v10805_v32  ;;  %v11357_v52 = vld [vmem:[#allocation4 + $0x324] sm:$0xf]  ;;  %v13709_v54 = vrot.slane %v6834_v44, 7  ;;  %v5387_v34 = vrot.slane %v5385_v8, 5 }
 0x361   : > { %v4143_v15 = vpop.permute.xlu0 %4142  ;;  %v10782_v17 = vor.u32 %v11357_v52, %v10779_v16  ;;  %v6843_v16 = vshrl.u32 %v13707_v10, 16  ;;  %v7372_v32 = vshrl.u32 %v7290_v33, 16  ;;  %v5293_v14 = vrot.slane %v5292_v51, 4 }
 0x362   : > { %4208 = vst.msk [vmem:[#allocation4 + $0x45c] sm:$0xf] %vm4176_vm13, %v4143_v15  ;;  %v4512_v1 = vmax.f32 %v4470_v28, 0.0  ;;  %9326 = vmatmul.bf16.gmra.mxu2 %v10806_v42  ;;  %v6367_v28 = vshll.u32 %v6268_v23, 16  ;;  %v5250_v42 = vld [vmem:[#allocation3 + $0x48] sm:$0xf] }
 0x363   : > { %9588 = vmatmul.bf16.gmra.mxu0 %v10782_v17  ;;  %v7365_v17 = vor.u32 %v7364_v3, %v7361_v11  ;;  %v5391_v13 = vshll.u32 %v5250_v42, 16  ;;  %v7374_v35 = vrot.slane %v7372_v32, 4  ;;  %v5298_v8 = vsel %vm11610_vm10, %v5293_v14, %v13722_v12 }
 0x364   : > { %v4669_v26 = vpack.c.bf16 %v4512_v1, %v4512_v1  ;;  %v6371_v1 = vshrl.u32 %v6268_v23, 16  ;;  %v13718_v2 = vrot.slane %v6367_v28, 5  ;;  %v5395_v11 = vshrl.u32 %v5250_v42, 16  ;;  %5701 = vst [vmem:[#allocation4 + $0x8] sm:$0xf] %v5298_v8 }
 0x365   : > { %v5199_v27 = vld [vmem:[#allocation3 + $0xd4] sm:$0xf]  ;;  %v7366_v51 = vrot.slane %v7365_v17, 4  ;;  %v6845_v28 = vrot.slane %v6843_v16, 7  ;;  %v4602_v16 = vld [vmem:[#allocation3 + $0x4c] sm:$0x1] }
 0x366   : > { %4702 = vst [vmem:[#allocation3 + $0xd8] sm:$0xf] %v4669_v26  ;;  %v6221_v40 = vld [vmem:[#allocation3 + $0xd4] sm:$0xf]  ;;  %v7368_v26 = vshll.u32 %v7290_v33, 16  ;;  %v6373_v22 = vrot.slane %v6371_v1, 4 }
 0x367   : > { %5231 = vst [vmem:[#allocation4 + $0x3ac] sm:$0xf] %v5199_v27  ;;  %v7244_v57 = vld [vmem:[#allocation3 + $0xd4] sm:$0xf]  ;;  %v6841_v33 = vrot.slane %v13709_v54, 4 }
 0x368   : > { %6253 = vst [vmem:[#allocation4 + $0x370] sm:$0xf] %v6221_v40  ;;  %v13720_v40 = vld [vmem:[#allocation3 + $0xd4] sm:$0xf]  ;;  %v6374_v32 = vor.u32 %v6373_v22, %v13718_v2  ;;  %v7291_v22 = vld [vmem:[#allocation3 + $0x3c] sm:$0x1] }
 0x369   : > { %v11254_v38 = vld [vmem:[#allocation4 + $0x458] sm:$0xf0]  ;;  %7276 = vst [vmem:[#allocation4 + $0x334] sm:$0xf] %v7244_v57  ;;  %v13724_v62 = vld [vmem:[#allocation3 + $0xd4] sm:$0xf] }
 0x36a   : > { %v10298_v48 = vor.u32 %v11254_v38, %v10297_v7  ;;  %v13716_v7 = vor.u32 %v6837_v56, %v13709_v54  ;;  %v5388_v38 = vor.u32 %v5387_v34, %v5384_v43  ;;  %v6829_v57 = vshrl.u32 %v6761_v25, 16  ;;  %v4590_v43 = vld [vmem:[#allocation3 + $0xc] sm:$0x1] }
 0x36b   : > { %v5049_v3 = vshrl.u32 %v13720_v40, 16  ;;  %v6051_v24 = vshrl.u32 %v13724_v62, 16  ;;  %v13733_v34 = vrot.slane %v5391_v13, 5  ;;  %v4591_v56 = vsel %vm12180_vm7, 0, %v4590_v43  ;;  %v5180_v13 = vld [vmem:[#allocation3 + $0x38] sm:$0xf] }
 0x36c   : > { %10322 = vmatmul.msk.bf16.gmra.mxu3 %vm4345_vm1, %v10298_v48  ;;  %v7370_v48 = vrot.slane %v7368_v26, 5  ;;  %v5389_v1 = vrot.slane %v5388_v38, 4  ;;  %v5301_v26 = vrot.slane %v5299_v36, 4  ;;  %4592 = vst [vmem:[#allocation3 + $0xc] sm:$0x1] %v4591_v56  ;;  %v10356_v14 = vrot.slane %v6829_v57, 11 }
 0x36d   : > { %v5200_v15 = vld [vmem:[#allocation3 + $0xd8] sm:$0xf]  ;;  %v13740_v17 = vrot.slane %v5049_v3, 7  ;;  %v4603_v38 = vsel %vm12180_vm7, 0, %v4602_v16  ;;  %5212 = vst [vmem:[#allocation4 + $0x100] sm:$0xf] %v5180_v13 }
 0x36e   : > { %5232 = vst [vmem:[#allocation4 + $0x3d0] sm:$0xf] %v5200_v15  ;;  %v4750_v52 = vld [vmem:[#allocation3 + $0xd8] sm:$0xf]  ;;  %v6846_v15 = vshll.u32 %v13707_v10, 16  ;;  %v7375_v42 = vor.u32 %v7374_v35, %v7370_v48  ;;  %v5397_v10 = vrot.slane %v5395_v11, 4  ;;  %v7371_v35 = vsel %vm11610_vm10, %v7366_v51, %v7370_v48 }
 0x36f   : > { %v6222_v37 = vld [vmem:[#allocation3 + $0xd8] sm:$0xf]  ;;  %v5058_v44 = vshrl.u32 %v4750_v52, 16  ;;  %v5061_v25 = vshll.u32 %v4750_v52, 16  ;;  %4604 = vst [vmem:[#allocation3 + $0x4c] sm:$0x1] %v4603_v38  ;;  %v6840_v52 = vsel %vm11623_vm11, %v10356_v14, %v13716_v7 }
 0x370   : > { %v5771_v27 = vld [vmem:[#allocation3 + $0xd8] sm:$0xf]  ;;  %6254 = vst [vmem:[#allocation4 + $0x394] sm:$0xf] %v6222_v37  ;;  %v7378_v8 = vshll.u32 %v7291_v22, 16  ;;  %v7376_v48 = vrot.slane %v7375_v42, 4 }
 0x371   : > { %v6060_v23 = vshrl.u32 %v5771_v27, 16  ;;  %v7245_v18 = vld [vmem:[#allocation3 + $0xd8] sm:$0xf]  ;;  %v5060_v21 = vrot.slane %v5058_v44, 7  ;;  %v13744_v44 = vrot.slane %v6051_v24, 7  ;;  %v6063_v36 = vshll.u32 %v5771_v27, 16 }
 0x372   : > { %7277 = vst [vmem:[#allocation4 + $0x358] sm:$0xf] %v7245_v18  ;;  %v5394_v18 = vsel %vm11610_vm10, %v5389_v1, %v13733_v34  ;;  %v13754_v57 = vld [vmem:[#allocation3 + $0x44] sm:$0xf]  ;;  %v5302_v27 = vor.u32 %v5301_v26, %v13722_v12  ;;  %v6269_v3 = vld [vmem:[#allocation3 + $0x3c] sm:$0x1]  ;;  %v6364_v12 = vor.u32 %v13705_v53, %v13703_v39  ;;  %v6848_v26 = vor.u32 %v6846_v15, %v6845_v28 }
 0x373   : > { %v6062_v37 = vrot.slane %v6060_v23, 7  ;;  %v5063_v23 = vor.u32 %v5061_v25, %v5060_v21  ;;  %5709 = vst [vmem:[#allocation4 + $0x128] sm:$0xf] %v5394_v18  ;;  %v13757_v24 = vrot.slane %v6374_v32, 4  ;;  %v5056_v51 = vrot.slane %v13740_v17, 4  ;;  %v11415_v42 = vld [vmem:[%s15110_s3 + $0x70] sm:$0xff] }
 0x374   : > { %v7380_v43 = vrot.slane %v7378_v8, 5  ;;  %7752 = vst [vmem:[#allocation4 + $0x68] sm:$0xf] %v7371_v35  ;;  %v13760_v1 = vld [vmem:[#allocation3 + $0x44] sm:$0xf]  ;;  %v5398_v21 = vor.u32 %v5397_v10, %v13733_v34  ;;  %v6058_v7 = vrot.slane %v13744_v44, 4  ;;  %9348 = vmatpush.bf16.msrb.mxu2 %v11415_v42 }
 0x375   : > { %v6065_v11 = vor.u32 %v6063_v36, %v6062_v37  ;;  %7192 = vst [vmem:[#allocation4 + $0x60] sm:$0xf] %v6840_v52  ;;  %v6377_v56 = vshll.u32 %v6269_v3, 16  ;;  %v6382_v32 = vshrl.u32 %v13754_v57, 16  ;;  %v5239_v37 = vld [vmem:[#allocation3 + $0xc] sm:$0x1]  ;;  %v5064_v14 = vsel %vm11623_vm11, %v5056_v51, %v5063_v23  ;;  %v13779_v52 = vpop.f32.mrf.mxu1 }
 0x376   : > { %v10821_v16 = vld [vmem:[#allocation4 + $0x370] sm:$0xf]  ;;  %v5303_v34 = vrot.slane %v5302_v27, 4  ;;  %v5305_v10 = vshll.u32 %v5239_v37, 16  ;;  %v6856_v39 = vshrl.u32 %v13760_v1, 16  ;;  %v7381_v36 = vsel %vm11610_vm10, %v7376_v48, %v7380_v43 }
 0x377   : > { %v11371_v25 = vld [vmem:[#allocation4 + $0x390] sm:$0xf0]  ;;  %v4575_v38 = vld [vmem:[#allocation3 + $0xd0] sm:$0x8]  ;;  %v6066_v13 = vsel %vm11623_vm11, %v6058_v7, %v6065_v11  ;;  %5168 = vst [vmem:[#allocation4 + $0x3cc] sm:$0xf] %v5064_v14  ;;  %v6849_v11 = vsel %vm11623_vm11, %v6841_v33, %v6848_v26 }
 0x378   : > { %v10822_v53 = vor.u32 %v11371_v25, %v10821_v16  ;;  %v4576_v28 = vsel %vm11798_vm14, 0, %v4575_v38  ;;  %v5251_v15 = vld [vmem:[#allocation3 + $0x4c] sm:$0x1]  ;;  %v5307_v22 = vrot.slane %v5305_v10, 5  ;;  %v5399_v35 = vrot.slane %v5398_v21, 4 }
 0x379   : > { %4577 = vst [vmem:[#allocation3 + $0xd0] sm:$0x8] %v4576_v28  ;;  %v5401_v23 = vshll.u32 %v5251_v15, 16  ;;  %v6379_v18 = vrot.slane %v6377_v56, 5  ;;  %v6365_v8 = vrot.slane %v6364_v12, 4  ;;  %v6384_v51 = vrot.slane %v6382_v32, 4 }
 0x37a   : > { %9682 = vmatmul.bf16.gmra.mxu1 %v10822_v53  ;;  %6190 = vst [vmem:[#allocation4 + $0x390] sm:$0xf] %v6066_v13  ;;  %v7292_v27 = vld [vmem:[#allocation3 + $0x44] sm:$0xf]  ;;  %v5308_v3 = vsel %vm11610_vm10, %v5303_v34, %v5307_v22  ;;  %v6385_v43 = vshll.u32 %v13754_v57, 16  ;;  %v13791_v56 = vrot.slane %v6856_v39, 7 }
 0x37b   : > { %v5403_v48 = vrot.slane %v5401_v23, 5  ;;  %7753 = vst [vmem:[#allocation4 + $0x8c] sm:$0xf] %v7381_v36  ;;  %v7293_v21 = vld [vmem:[#allocation3 + $0x48] sm:$0xf]  ;;  %v6370_v7 = vsel %vm11610_vm10, %v6365_v8, %v13718_v2  ;;  %v6859_v54 = vshll.u32 %v13760_v1, 16  ;;  %v6380_v12 = vsel %vm11610_vm10, %v13757_v24, %v6379_v18 }
 0x37c   : > { %5702 = vst [vmem:[#allocation4 + $0x2c] sm:$0xf] %v5308_v3  ;;  %v7383_v26 = vshrl.u32 %v7292_v27, 16  ;;  %v7386_v57 = vshll.u32 %v7292_v27, 16  ;;  %v6766_v32 = vld [vmem:[#allocation3 + $0x48] sm:$0xf] }
 0x37d   : > { %v5404_v33 = vsel %vm11610_vm10, %v5399_v35, %v5403_v48  ;;  %7193 = vst [vmem:[#allocation4 + $0x84] sm:$0xf] %v6849_v11  ;;  %v7392_v37 = vshll.u32 %v7293_v21, 16  ;;  %v7396_v42 = vshrl.u32 %v7293_v21, 16  ;;  %v5052_v2 = vshll.u32 %v13720_v40, 16  ;;  %v11414_v48 = vld [vmem:[%s15110_s3 + $0x68] sm:$0xff] }
 0x37e   : > { %5710 = vst [vmem:[#allocation4 + $0x14c] sm:$0xf] %v5404_v33  ;;  %v6054_v16 = vshll.u32 %v13724_v62, 16  ;;  %v10381_v25 = vld [vmem:[#allocation4 + $0x8] sm:$0xf]  ;;  %v6387_v13 = vrot.slane %v6385_v43, 5  ;;  %v6861_v40 = vor.u32 %v6859_v54, %v13791_v56  ;;  %9349 = vmatpush.bf16.msrb.mxu2 %v11414_v48 }
 0x37f   : > { %6729 = vst [vmem:[#allocation4 + $0xa4] sm:$0xf] %v6370_v7  ;;  %v5054_v34 = vor.u32 %v5052_v2, %v13740_v17  ;;  %v7385_v39 = vrot.slane %v7383_v26, 4  ;;  %v7388_v53 = vrot.slane %v7386_v57, 5  ;;  %v6271_v28 = vld [vmem:[#allocation3 + $0x48] sm:$0xf]  ;;  %v13811_v7 = vpop.f32.mrf.mxu0 }
 0x380   : > { %v4748_v1 = vld [vmem:[#allocation3 + $0xd0] sm:$0x8]  ;;  %6730 = vst [vmem:[#allocation4 + $0xc8] sm:$0xf] %v6380_v12  ;;  %v6056_v10 = vor.u32 %v6054_v16, %v13744_v44  ;;  %v6865_v15 = vshrl.u32 %v6766_v32, 16  ;;  %v7394_v23 = vrot.slane %v7392_v37, 5  ;;  %v6388_v21 = vor.u32 %v6387_v13, %v6384_v51 }
 0x381   : > { %v5769_v14 = vld [vmem:[#allocation3 + $0xd0] sm:$0x8]  ;;  %v5044_v24 = vshrl.u32 %v4748_v1, 16  ;;  %v6764_v35 = vld [vmem:[#allocation3 + $0x40] sm:$0x8]  ;;  %v7398_v18 = vrot.slane %v7396_v42, 4  ;;  %v7389_v33 = vor.u32 %v7388_v53, %v7385_v39 }
 0x382   : > { %v6046_v38 = vshrl.u32 %v5769_v14, 16  ;;  %v6851_v17 = vshrl.u32 %v6764_v35, 16  ;;  %v6391_v27 = vshll.u32 %v6271_v28, 16  ;;  %v6867_v12 = vrot.slane %v6865_v15, 7  ;;  %v11378_v51 = vld [vmem:[#allocation4 + $0x3c8] sm:$0xf0] }
 0x383   : > { %v11262_v36 = vld [vmem:[#allocation4 + $0x28] sm:$0xf0]  ;;  %v10336_v62 = vrot.slane %v5044_v24, 11  ;;  %v7399_v26 = vor.u32 %v7398_v18, %v7394_v23  ;;  %v6868_v2 = vshll.u32 %v6766_v32, 16  ;;  %v6389_v16 = vrot.slane %v6388_v21, 4 }
 0x384   : > { %v10351_v22 = vrot.slane %v6046_v38, 11  ;;  %v10382_v8 = vor.u32 %v11262_v36, %v10381_v25  ;;  %v10357_v43 = vrot.slane %v6851_v17, 11  ;;  %v6393_v42 = vrot.slane %v6391_v27, 5  ;;  %v10815_v38 = vld [vmem:[#allocation4 + $0x38c] sm:$0xf0] }
 0x385   : > { %v5055_v44 = vsel %vm11623_vm11, %v10336_v62, %v5054_v34  ;;  %v6863_v1 = vrot.slane %v13791_v56, 4  ;;  %v7390_v34 = vrot.slane %v7389_v33, 4  ;;  %v6870_v25 = vor.u32 %v6868_v2, %v6867_v12  ;;  %v7294_v39 = vld [vmem:[#allocation3 + $0x4c] sm:$0x1]  ;;  %v5252_v62 = vld [vmem:[#allocation3 + $0x54] sm:$0xf] }
 0x386   : > { %v6057_v11 = vsel %vm11623_vm11, %v10351_v22, %v6056_v10  ;;  %9444 = vmatmul.bf16.vlgmr.msrb.gmra.mxu3 %v10382_v8  ;;  %5167 = vst [vmem:[#allocation4 + $0x3a8] sm:$0xf] %v5055_v44  ;;  %v6862_v57 = vsel %vm11623_vm11, %v10357_v43, %v6861_v40  ;;  %v6395_v10 = vshrl.u32 %v6271_v28, 16  ;;  %v7400_v24 = vrot.slane %v7399_v26, 4  ;;  %v11271_v44 = vld [vmem:[#allocation4 + $0x70] sm:$0xf0] }
 0x387   : > { %v4472_v3 = vpop.f32.mrf.mxu3  ;;  %6189 = vst [vmem:[#allocation4 + $0x36c] sm:$0xf] %v6057_v11  ;;  %v7395_v32 = vsel %vm11610_vm10, %v7390_v34, %v7394_v23  ;;  %v7402_v36 = vshll.u32 %v7294_v39, 16  ;;  %v6394_v56 = vsel %vm11610_vm10, %v6389_v16, %v6393_v42  ;;  %v6871_v8 = vsel %vm11623_vm11, %v6863_v1, %v6870_v25  ;;  %v13824_v17 = vpop.f32.mrf.mxu0  ;;  %v6272_v23 = vld [vmem:[#allocation3 + $0x4c] sm:$0x1] }
 0x388   : > { %v4473_v54 = vadd.f32 %v13684_v46, %v4472_v3  ;;  %7194 = vst [vmem:[#allocation4 + $0xa8] sm:$0xf] %v6862_v57  ;;  %v6397_v35 = vrot.slane %v6395_v10, 4  ;;  %v5406_v11 = vshrl.u32 %v5252_v62, 16  ;;  %v5409_v27 = vshll.u32 %v5252_v62, 16 }
 0x389   : > { %7754 = vst [vmem:[#allocation4 + $0xb0] sm:$0xf] %v7395_v32  ;;  %v7404_v18 = vrot.slane %v7402_v36, 5  ;;  %v10417_v48 = vld [vmem:[#allocation4 + $0x50] sm:$0xf]  ;;  %v6401_v12 = vshll.u32 %v6272_v23, 16 }
 0x38a   : > { %v4513_v37 = vmax.f32 %v4473_v54, 0.0  ;;  %6731 = vst [vmem:[#allocation4 + $0xec] sm:$0xf] %v6394_v56  ;;  %v6398_v21 = vor.u32 %v6397_v35, %v6393_v42  ;;  %v10418_v54 = vor.u32 %v11271_v44, %v10417_v48  ;;  %v5253_v26 = vld [vmem:[#allocation3 + $0x58] sm:$0xf]  ;;  %v5408_v57 = vrot.slane %v5406_v11, 4 }
 0x38b   : > { %v7405_v3 = vsel %vm11610_vm10, %v7400_v24, %v7404_v18  ;;  %7195 = vst [vmem:[#allocation4 + $0xcc] sm:$0xf] %v6871_v8  ;;  %v6403_v34 = vrot.slane %v6401_v12, 5  ;;  %v4605_v24 = vld [vmem:[#allocation3 + $0x5c] sm:$0x1] }
 0x38c   : > { %v4670_v14 = vpack.c.bf16 %v4513_v37, %v4513_v37  ;;  %7755 = vst [vmem:[#allocation4 + $0xd4] sm:$0xf] %v7405_v3  ;;  %v5411_v37 = vrot.slane %v5409_v27, 5  ;;  %v6399_v1 = vrot.slane %v6398_v21, 4  ;;  %v4606_v39 = vsel %vm12180_vm7, 0, %v4605_v24  ;;  %v13843_v3 = vpop.f32.mrf.mxu1 }
 0x38d   : > { %v10841_v13 = vld [vmem:[#allocation4 + $0x3a8] sm:$0xf]  ;;  %4607 = vst [vmem:[#allocation3 + $0x5c] sm:$0x1] %v4606_v39  ;;  %v11280_v56 = vld [vmem:[#allocation4 + $0xb8] sm:$0xf0] }
 0x38e   : > { %4703 = vst [vmem:[#allocation3 + $0xe4] sm:$0xf] %v4670_v14  ;;  %v10842_v53 = vor.u32 %v11378_v51, %v10841_v13  ;;  %v11366_v15 = vld [vmem:[#allocation4 + $0x36c] sm:$0xf]  ;;  %v5415_v51 = vshll.u32 %v5253_v26, 16  ;;  %v11413_v14 = vld [vmem:[%s15110_s3 + $0x60] sm:$0xff]  ;;  %v5412_v42 = vor.u32 %v5411_v37, %v5408_v57 }
 0x38f   : > { %v4474_v40 = vpop.f32.mrf.mxu3  ;;  %v10818_v22 = vor.u32 %v11366_v15, %v10815_v38  ;;  %9350 = vmatpush.bf16.msrb.mxu2 %v11413_v14  ;;  %v6404_v38 = vsel %vm11610_vm10, %v6399_v1, %v6403_v34  ;;  %v10453_v35 = vld [vmem:[#allocation4 + $0x98] sm:$0xf]  ;;  %15199 = vst [vmem:[#allocation13_spill] sm:$0xff] %v13843_v3 }
 0x390   : > { %v4475_v28 = vadd.f32 %v13684_v46, %v4474_v40  ;;  %9331 = vmatmul.bf16.gmra.mxu2 %v10842_v53  ;;  %v5417_v25 = vrot.slane %v5415_v51, 5  ;;  %v5413_v53 = vrot.slane %v5412_v42, 4  ;;  %6732 = vst [vmem:[#allocation4 + $0x110] sm:$0xf] %v6404_v38  ;;  %v5419_v40 = vshrl.u32 %v5253_v26, 16 }
 0x391   : > { %9593 = vmatmul.bf16.gmra.mxu0 %v10818_v22  ;;  %v10454_v44 = vor.u32 %v11280_v56, %v10453_v35  ;;  %v4578_v42 = vld [vmem:[#allocation3 + $0xe0] sm:$0x8]  ;;  %v10477_v49 = vld [vmem:[#allocation4 + $0xb0] sm:$0xf] }
 0x392   : > { %v4514_v43 = vmax.f32 %v4475_v28, 0.0  ;;  %v5418_v36 = vsel %vm11610_vm10, %v5413_v53, %v5417_v25  ;;  %v5421_v8 = vrot.slane %v5419_v40, 4  ;;  %v4579_v38 = vsel %vm11798_vm14, 0, %v4578_v42 }
 0x393   : > { %5711 = vst [vmem:[#allocation4 + $0x170] sm:$0xf] %v5418_v36 }
 0x394   : > { %v4671_v16 = vpack.c.bf16 %v4514_v43, %v4514_v43  ;;  %v5254_v53 = vld [vmem:[#allocation3 + $0x5c] sm:$0x1]  ;;  %4580 = vst [vmem:[#allocation3 + $0xe0] sm:$0x8] %v4579_v38  ;;  %v13856_v35 = vpop.f32.mrf.mxu1 }
 0x395   : > { %v5201_v33 = vld [vmem:[#allocation3 + $0xe4] sm:$0xf]  ;;  %15200 = vst [vmem:[#allocation14_spill] sm:$0xff] %v13856_v35 }
 0x396   : > { %5233 = vst [vmem:[#allocation4 + $0x3f4] sm:$0xf] %v5201_v33  ;;  %9449 = vmatmul.bf16.gmra.mxu3 %v10418_v54  ;;  %v6223_v2 = vld [vmem:[#allocation3 + $0xe4] sm:$0xf]  ;;  %v6768_v33 = vld [vmem:[#allocation3 + $0x54] sm:$0xf] }
 0x397   : > { %6255 = vst [vmem:[#allocation4 + $0x3b8] sm:$0xf] %v6223_v2  ;;  %v7246_v10 = vld [vmem:[#allocation3 + $0xe4] sm:$0xf]  ;;  %v11412_v2 = vld [vmem:[%s15110_s3 + $0x58] sm:$0xff]  ;;  %v6878_v34 = vshrl.u32 %v6768_v33, 16 }
 0x398   : > { %7278 = vst [vmem:[#allocation4 + $0x37c] sm:$0xf] %v7246_v10  ;;  %v13833_v13 = vld [vmem:[#allocation3 + $0xe4] sm:$0xf]  ;;  %9351 = vmatpush.bf16.msrb.mxu2 %v11412_v2  ;;  %v10489_v2 = vld [vmem:[#allocation4 + $0xe0] sm:$0xf] }
 0x399   : > { %4704 = vst [vmem:[#allocation3 + $0xe8] sm:$0xf] %v4671_v16  ;;  %v13837_v15 = vld [vmem:[#allocation3 + $0xe4] sm:$0xf]  ;;  %v5071_v32 = vshrl.u32 %v13833_v13, 16  ;;  %v5422_v16 = vor.u32 %v5421_v8, %v5417_v25  ;;  %v13854_v56 = vrot.slane %v6878_v34, 7 }
 0x39a   : > { %v6073_v62 = vshrl.u32 %v13837_v15, 16  ;;  %v6273_v8 = vld [vmem:[#allocation3 + $0x54] sm:$0xf]  ;;  %v10561_v29 = vld [vmem:[#allocation4 + $0x170] sm:$0xf] }
 0x39b   : > { %v5073_v23 = vrot.slane %v5071_v32, 7  ;;  %v5423_v25 = vrot.slane %v5422_v16, 4  ;;  %v5425_v32 = vshll.u32 %v5254_v53, 16  ;;  %v4751_v34 = vld [vmem:[#allocation3 + $0xe0] sm:$0x8]  ;;  %v6409_v53 = vshll.u32 %v6273_v8, 16 }
 0x39c   : > { %v6075_v48 = vrot.slane %v6073_v62, 7 }
 0x39d   : > { %v5078_v1 = vrot.slane %v5073_v23, 4 }
 0x39e   : > { %v6080_v51 = vrot.slane %v6075_v48, 4  ;;  %v10857_v10 = vld [vmem:[#allocation4 + $0x3b8] sm:$0xf] }
 0x3a0   : > { %v4753_v22 = vld [vmem:[#allocation3 + $0xe8] sm:$0xf] }
 0x3a1   : > { %v5202_v28 = vld [vmem:[#allocation3 + $0xe8] sm:$0xf]  ;;  %v5080_v18 = vshrl.u32 %v4753_v22, 16  ;;  %v5083_v21 = vshll.u32 %v4753_v22, 16  ;;  %v5427_v22 = vrot.slane %v5425_v32, 5 }
 0x3a2   : > { %5234 = vst [vmem:[#allocation4 + $0x418] sm:$0xf] %v5202_v28  ;;  %v5774_v11 = vld [vmem:[#allocation3 + $0xe8] sm:$0xf]  ;;  %v5255_v28 = vld [vmem:[#allocation3 + $0x64] sm:$0xf] }
 0x3a3   : > { %v6224_v27 = vld [vmem:[#allocation3 + $0xe8] sm:$0xf]  ;;  %v5082_v43 = vrot.slane %v5080_v18, 7  ;;  %v6082_v54 = vshrl.u32 %v5774_v11, 16  ;;  %v6085_v57 = vshll.u32 %v5774_v11, 16 }
 0x3a4   : > { %6256 = vst [vmem:[#allocation4 + $0x3dc] sm:$0xf] %v6224_v27  ;;  %v7247_v37 = vld [vmem:[#allocation3 + $0xe8] sm:$0xf]  ;;  %v11289_v11 = vld [vmem:[#allocation4 + $0x100] sm:$0xf0]  ;;  %v5428_v27 = vsel %vm11610_vm10, %v5423_v25, %v5427_v22 }
 0x3a5   : > { %v5085_v12 = vor.u32 %v5083_v21, %v5082_v43  ;;  %v6084_v26 = vrot.slane %v6082_v54, 7  ;;  %7279 = vst [vmem:[#allocation4 + $0x3a0] sm:$0xf] %v7247_v37  ;;  %v7295_v43 = vld [vmem:[#allocation3 + $0x54] sm:$0xf]  ;;  %v5074_v21 = vshll.u32 %v13833_v13, 16 }
 0x3a6   : > { %9454 = vmatmul.bf16.gmra.mxu3 %v10454_v44  ;;  %v6881_v44 = vshll.u32 %v6768_v33, 16  ;;  %5712 = vst [vmem:[#allocation4 + $0x194] sm:$0xf] %v5428_v27  ;;  %v6076_v37 = vshll.u32 %v13837_v15, 16  ;;  %v10490_v33 = vor.u32 %v11289_v11, %v10489_v2  ;;  %v7407_v25 = vshrl.u32 %v7295_v43, 16  ;;  %v11411_v27 = vld [vmem:[%s15110_s3 + $0x50] sm:$0xff] }
 0x3a7   : > { %v6087_v14 = vor.u32 %v6085_v57, %v6084_v26  ;;  %v5086_v24 = vsel %vm11623_vm11, %v5078_v1, %v5085_v12  ;;  %v6767_v12 = vld [vmem:[#allocation3 + $0x50] sm:$0x8]  ;;  %v5430_v57 = vshrl.u32 %v5255_v28, 16  ;;  %v5433_v1 = vshll.u32 %v5255_v28, 16  ;;  %v5256_v28 = vld [vmem:[#allocation3 + $0x68] sm:$0xf]  ;;  %9352 = vmatpush.bf16.msrb.mxu2 %v11411_v27 }
 0x3a8   : > { %5170 = vst [vmem:[#allocation4 + $0x414] sm:$0xf] %v5086_v24  ;;  %v6883_v26 = vor.u32 %v6881_v44, %v13854_v56  ;;  %v6873_v16 = vshrl.u32 %v6767_v12, 16  ;;  %v6078_v42 = vor.u32 %v6076_v37, %v6075_v48  ;;  %v5066_v24 = vshrl.u32 %v4751_v34, 16  ;;  %v7296_v48 = vld [vmem:[#allocation3 + $0x58] sm:$0xf] }
 0x3a9   : > { %v6088_v39 = vsel %vm11623_vm11, %v6080_v51, %v6087_v14  ;;  %v5076_v51 = vor.u32 %v5074_v21, %v5073_v23  ;;  %v5432_v22 = vrot.slane %v5430_v57, 4  ;;  %v4608_v21 = vld [vmem:[#allocation3 + $0x6c] sm:$0x1]  ;;  %v6411_v57 = vrot.slane %v6409_v53, 5 }
 0x3aa   : > { %6192 = vst [vmem:[#allocation4 + $0x3d8] sm:$0xf] %v6088_v39  ;;  %v10358_v13 = vrot.slane %v6873_v16, 11  ;;  %v6406_v39 = vshrl.u32 %v6273_v8, 16  ;;  %v10337_v32 = vrot.slane %v5066_v24, 11  ;;  %v4609_v12 = vsel %vm12180_vm7, 0, %v4608_v21 }
 0x3ab   : > { %v11380_v40 = vld [vmem:[#allocation4 + $0x3d8] sm:$0xf0]  ;;  %v5439_v37 = vshll.u32 %v5256_v28, 16  ;;  %v7409_v2 = vrot.slane %v7407_v25, 4  ;;  %4610 = vst [vmem:[#allocation3 + $0x6c] sm:$0x1] %v4609_v12 }
 0x3ac   : > { %v10858_v36 = vor.u32 %v11380_v40, %v10857_v10  ;;  %v5772_v10 = vld [vmem:[#allocation3 + $0xe0] sm:$0x8]  ;;  %v5258_v40 = vld [vmem:[#allocation3 + $0x74] sm:$0xf]  ;;  %v6884_v23 = vsel %vm11623_vm11, %v10358_v13, %v6883_v26  ;;  %v5077_v44 = vsel %vm11623_vm11, %v10337_v32, %v5076_v51  ;;  %v6408_v26 = vrot.slane %v6406_v39, 4 }
 0x3ad   : > { %v6068_v38 = vshrl.u32 %v5772_v10, 16  ;;  %7196 = vst [vmem:[#allocation4 + $0xf0] sm:$0xf] %v6884_v23  ;;  %v7420_v13 = vshrl.u32 %v7296_v48, 16  ;;  %v13882_v39 = vrot.slane %v5439_v37, 5  ;;  %v5443_v53 = vshrl.u32 %v5256_v28, 16 }
 0x3ae   : > { %9687 = vmatmul.bf16.gmra.mxu1 %v10858_v36  ;;  %5169 = vst [vmem:[#allocation4 + $0x3f0] sm:$0xf] %v5077_v44 }
 0x3af   : > { %v10352_v15 = vrot.slane %v6068_v38, 11  ;;  %v13880_v38 = vpop.f32.mrf.mxu1  ;;  %v7422_v21 = vrot.slane %v7420_v13, 4 }
 0x3b0   : > { %15201 = vst [vmem:[#allocation15_spill] sm:$0xff] %v13880_v38  ;;  %v5279_v38 = vld [vmem:[#allocation3 + $0xe4] sm:$0xf] }
 0x3b1   : > { %v6079_v8 = vsel %vm11623_vm11, %v10352_v15, %v6078_v42  ;;  %v10851_v28 = vld [vmem:[#allocation4 + $0x3d4] sm:$0xf0] }
 0x3b2   : > { %6191 = vst [vmem:[#allocation4 + $0x3b4] sm:$0xf] %v6079_v8 }
 0x3b5   : > { %v10877_v37 = vld [vmem:[#allocation4 + $0x3f0] sm:$0xf] }
 0x3b6   : > { %9459 = vmatmul.bf16.gmra.mxu3 %v10490_v33  ;;  %v13876_v33 = vld [vmem:[#allocation3 + $0x78] sm:$0xf] }
 0x3ba   : > { %v4477_v62 = vpop.f32.mrf.mxu3 }
 0x3bb   : > { %v4478_v18 = vadd.f32 %v13684_v46, %v4477_v62  ;;  %v7410_v62 = vshll.u32 %v7295_v43, 16  ;;  %v5457_v43 = vshll.u32 %v5258_v40, 16 }
 0x3bd   : > { %v4515_v54 = vmax.f32 %v4478_v18, 0.0  ;;  %v5435_v18 = vrot.slane %v5433_v1, 5  ;;  %v7412_v16 = vrot.slane %v7410_v62, 5  ;;  %v6274_v1 = vld [vmem:[#allocation3 + $0x58] sm:$0xf]  ;;  %v5459_v24 = vrot.slane %v5457_v43, 5 }
 0x3be   : > { %v6415_v15 = vshll.u32 %v6274_v1, 16  ;;  %v6419_v23 = vshrl.u32 %v6274_v1, 16  ;;  %v13885_v62 = vld [vmem:[#allocation3 + $0x58] sm:$0xf] }
 0x3bf   : > { %v4672_v14 = vpack.c.bf16 %v4515_v54, %v4515_v54  ;;  %v5454_v54 = vshrl.u32 %v5258_v40, 16  ;;  %v5436_v51 = vor.u32 %v5435_v18, %v5432_v22  ;;  %v6412_v40 = vor.u32 %v6411_v57, %v6408_v26  ;;  %v10525_v57 = vld [vmem:[#allocation4 + $0x128] sm:$0xf] }
 0x3c0   : > { %v7413_v32 = vor.u32 %v7412_v16, %v7409_v2  ;;  %v13896_v13 = vrot.slane %v6415_v15, 5 }
 0x3c1   : > { %4705 = vst [vmem:[#allocation3 + $0xf4] sm:$0xf] %v4672_v14  ;;  %v13878_v14 = vpop.f32.mrf.mxu0  ;;  %v5456_v42 = vrot.slane %v5454_v54, 4  ;;  %v5437_v18 = vrot.slane %v5436_v51, 4  ;;  %v5445_v54 = vrot.slane %v5443_v53, 4  ;;  %v13890_v12 = vrot.slane %v6412_v40, 4 }
 0x3c2   : > { %v4479_v36 = vpop.f32.mrf.mxu3  ;;  %v7414_v16 = vrot.slane %v7413_v32, 4  ;;  %v11375_v51 = vld [vmem:[#allocation4 + $0x3b4] sm:$0xf]  ;;  %v6421_v53 = vrot.slane %v6419_v23, 4  ;;  %v11410_v32 = vld [vmem:[%s15110_s3 + $0x48] sm:$0xff] }
 0x3c3   : > { %v4480_v11 = vadd.f32 %v13684_v46, %v4479_v36  ;;  %v7416_v46 = vshll.u32 %v7296_v48, 16  ;;  %v5463_v36 = vshll.u32 %v13876_v33, 16  ;;  %v5460_v8 = vor.u32 %v5459_v24, %v5456_v42  ;;  %v11387_v48 = vld [vmem:[#allocation4 + $0x410] sm:$0xf0]  ;;  %v5257_v24 = vld [vmem:[#allocation3 + $0x6c] sm:$0x1]  ;;  %9353 = vmatpush.bf16.msrb.mxu2 %v11410_v32 }
 0x3c4   : > { %v5442_v43 = vsel %vm11610_vm10, %v5437_v18, %v13882_v39  ;;  %v10854_v42 = vor.u32 %v11375_v51, %v10851_v28  ;;  %v5446_v40 = vor.u32 %v5445_v54, %v13882_v39  ;;  %v7297_v18 = vld [vmem:[#allocation3 + $0x5c] sm:$0x1]  ;;  %v5449_v15 = vshll.u32 %v5257_v24, 16 }
 0x3c5   : > { %v4516_v10 = vmax.f32 %v4480_v11, 0.0  ;;  %v7418_v22 = vrot.slane %v7416_v46, 5  ;;  %v11298_v11 = vld [vmem:[#allocation4 + $0x148] sm:$0xf0]  ;;  %v13892_v26 = vrot.slane %v5463_v36, 5  ;;  %v10878_v46 = vor.u32 %v11387_v48, %v10877_v37 }
 0x3c6   : > { %v10526_v1 = vor.u32 %v11298_v11, %v10525_v57  ;;  %5713 = vst [vmem:[#allocation4 + $0x1b8] sm:$0xf] %v5442_v43  ;;  %v4611_v11 = vld [vmem:[#allocation3 + $0x7c] sm:$0x1]  ;;  %v6276_v48 = vld [vmem:[#allocation3 + $0x64] sm:$0xf] }
 0x3c7   : > { %v4673_v44 = vpack.c.bf16 %v4516_v10, %v4516_v10  ;;  %v5461_v10 = vrot.slane %v5460_v8, 4  ;;  %9336 = vmatmul.bf16.gmra.mxu2 %v10878_v46  ;;  %v13905_v8 = vpop.f32.mrf.mxu1  ;;  %v7419_v23 = vsel %vm11610_vm10, %v7414_v16, %v7418_v22  ;;  %v7426_v28 = vshll.u32 %v7297_v18, 16  ;;  %v13917_v57 = vld [vmem:[#allocation3 + $0x64] sm:$0xf] }
 0x3c8   : > { %v5203_v34 = vld [vmem:[#allocation3 + $0xf4] sm:$0xf]  ;;  %9464 = vmatmul.bf16.gmra.mxu3 %v10526_v1  ;;  %15203 = vst [vmem:[#allocation17_spill] sm:$0xff] %v13905_v8  ;;  %v5447_v37 = vrot.slane %v5446_v40, 4  ;;  %v5451_v51 = vrot.slane %v5449_v15, 5 }
 0x3c9   : > { %5235 = vst [vmem:[#allocation4 + $0x43c] sm:$0xf] %v5203_v34  ;;  %v6225_v25 = vld [vmem:[#allocation3 + $0xf4] sm:$0xf]  ;;  %v6887_v34 = vshrl.u32 %v13885_v62, 16  ;;  %v13899_v36 = vpop.f32.mrf.mxu0  ;;  %9598 = vmatmul.bf16.gmra.mxu0 %v10854_v42  ;;  %v5466_v39 = vsel %vm11610_vm10, %v5461_v10, %v13892_v26  ;;  %v6430_v10 = vshrl.u32 %v6276_v48, 16 }
 0x3ca   : > { %6257 = vst [vmem:[#allocation4 + $0x400] sm:$0xf] %v6225_v25  ;;  %v7248_v27 = vld [vmem:[#allocation3 + $0xf4] sm:$0xf]  ;;  %v7423_v25 = vor.u32 %v7422_v21, %v7418_v22  ;;  %v4612_v21 = vsel %vm12180_vm7, 0, %v4611_v11  ;;  %v6433_v42 = vshll.u32 %v6276_v48, 16  ;;  %v5452_v48 = vsel %vm11610_vm10, %v5447_v37, %v5451_v51 }
 0x3cb   : > { %7280 = vst [vmem:[#allocation4 + $0x3c4] sm:$0xf] %v7248_v27  ;;  %v6890_v27 = vshll.u32 %v13885_v62, 16  ;;  %v13915_v54 = vld [vmem:[#allocation3 + $0xf4] sm:$0xf]  ;;  %v6422_v62 = vor.u32 %v6421_v53, %v13896_v13  ;;  %v7428_v40 = vrot.slane %v7426_v28, 5 }
 0x3cc   : > { %4706 = vst [vmem:[#allocation3 + $0xf8] sm:$0xf] %v4673_v44  ;;  %v5467_v44 = vshrl.u32 %v13876_v33, 16  ;;  %v6889_v33 = vrot.slane %v6887_v34, 7  ;;  %v7424_v43 = vrot.slane %v7423_v25, 4  ;;  %v5093_v34 = vshrl.u32 %v13915_v54, 16 }
 0x3cd   : > { %15202 = vst [vmem:[#allocation16_spill] sm:$0xff] %v13899_v36  ;;  %v13919_v1 = vld [vmem:[#allocation3 + $0xf4] sm:$0xf]  ;;  %v13928_v2 = vrot.slane %v6422_v62, 4  ;;  %v13940_v37 = vrot.slane %v6430_v10, 4  ;;  %v13942_v62 = vrot.slane %v6433_v42, 5 }
 0x3ce   : > { %5715 = vst [vmem:[#allocation4 + $0x200] sm:$0xf] %v5466_v39  ;;  %v5469_v22 = vrot.slane %v5467_v44, 4  ;;  %v6095_v25 = vshrl.u32 %v13919_v1, 16  ;;  %v6892_v53 = vor.u32 %v6890_v27, %v6889_v33  ;;  %v6900_v44 = vshrl.u32 %v13917_v57, 16 }
 0x3cf   : > { %4613 = vst [vmem:[#allocation3 + $0x7c] sm:$0x1] %v4612_v21  ;;  %v11307_v21 = vld [vmem:[#allocation4 + $0x190] sm:$0xf0]  ;;  %v13932_v58 = vrot.slane %v5093_v34, 7 }
 0x3d0   : > { %7756 = vst [vmem:[#allocation4 + $0xf8] sm:$0xf] %v7419_v23  ;;  %v6275_v23 = vld [vmem:[#allocation3 + $0x5c] sm:$0x1]  ;;  %v5470_v15 = vor.u32 %v5469_v22, %v13892_v26  ;;  %v13936_v27 = vrot.slane %v6095_v25, 7  ;;  %v7429_v26 = vsel %vm11610_vm10, %v7424_v43, %v7428_v40  ;;  %v10562_v42 = vor.u32 %v11307_v21, %v10561_v29 }
 0x3d1   : > { %v6425_v22 = vshll.u32 %v6275_v23, 16  ;;  %v7298_v51 = vld [vmem:[#allocation3 + $0x64] sm:$0xf]  ;;  %5714 = vst [vmem:[#allocation4 + $0x1dc] sm:$0xf] %v5452_v48  ;;  %v5100_v10 = vrot.slane %v13932_v58, 4 }
 0x3d2   : > { %v5471_v55 = vrot.slane %v5470_v15, 4  ;;  %7757 = vst [vmem:[#allocation4 + $0x11c] sm:$0xf] %v7429_v26  ;;  %v10893_v23 = vld [vmem:[#allocation4 + $0x400] sm:$0xf]  ;;  %v7431_v29 = vshrl.u32 %v7298_v51, 16 }
 0x3d3   : > { %v4756_v16 = vld [vmem:[#allocation3 + $0xf8] sm:$0xf]  ;;  %v6427_v48 = vrot.slane %v6425_v22, 5  ;;  %v7434_v21 = vshll.u32 %v7298_v51, 16  ;;  %v6903_v26 = vshll.u32 %v13917_v57, 16  ;;  %v6418_v51 = vsel %vm11610_vm10, %v13890_v12, %v13896_v13 }
 0x3d4   : > { %v5204_v46 = vld [vmem:[#allocation3 + $0xf8] sm:$0xf]  ;;  %v5102_v24 = vshrl.u32 %v4756_v16, 16  ;;  %v5105_v28 = vshll.u32 %v4756_v16, 16  ;;  %v13944_v16 = vrot.slane %v6900_v44, 7 }
 0x3d5   : > { %5236 = vst [vmem:[#allocation4 + $0x460] sm:$0xf] %v5204_v46  ;;  %v5777_v32 = vld [vmem:[#allocation3 + $0xf8] sm:$0xf]  ;;  %v13930_v46 = vpop.f32.mrf.mxu0  ;;  %v6277_v22 = vld [vmem:[#allocation3 + $0x68] sm:$0xf]  ;;  %v6428_v57 = vsel %vm11610_vm10, %v13928_v2, %v6427_v48 }
 0x3d6   : > { %v6226_v18 = vld [vmem:[#allocation3 + $0xf8] sm:$0xf]  ;;  %v5104_v11 = vrot.slane %v5102_v24, 7  ;;  %v6104_v39 = vshrl.u32 %v5777_v32, 16  ;;  %15204 = vst [vmem:[#allocation18_spill] sm:$0xff] %v13930_v46  ;;  %v6107_v33 = vshll.u32 %v5777_v32, 16 }
 0x3d7   : > { %6258 = vst [vmem:[#allocation4 + $0x424] sm:$0xf] %v6226_v18  ;;  %v7249_v60 = vld [vmem:[#allocation3 + $0xf8] sm:$0xf]  ;;  %v13934_v18 = vpop.f32.mrf.mxu1  ;;  %v5261_v32 = vld [vmem:[#allocation3 + $0x84] sm:$0xf] }
 0x3d8   : > { %v6106_v24 = vrot.slane %v6104_v39, 7  ;;  %15205 = vst [vmem:[#allocation19_spill] sm:$0xff] %v13934_v18  ;;  %v5107_v34 = vor.u32 %v5105_v28, %v5104_v11  ;;  %v7299_v39 = vld [vmem:[#allocation3 + $0x68] sm:$0xf]  ;;  %v5260_v18 = vld [vmem:[#allocation3 + $0x7c] sm:$0x1]  ;;  %9469 = vmatmul.bf16.gmra.mxu3 %v10562_v42 }
 0x3d9   : > { %7281 = vst [vmem:[#allocation4 + $0x3e8] sm:$0xf] %v7249_v60  ;;  %v15206_v60 = vrot.slane %v13854_v56, 4  ;;  %v5473_v40 = vshll.u32 %v5260_v18, 16  ;;  %v6102_v11 = vrot.slane %v13936_v27, 4  ;;  %v6443_v2 = vshrl.u32 %v6277_v22, 16 }
 0x3da   : > { %v6109_v25 = vor.u32 %v6107_v33, %v6106_v24  ;;  %v4581_v24 = vld [vmem:[#allocation3 + $0xf0] sm:$0x8]  ;;  %v5108_v56 = vsel %vm11623_vm11, %v5100_v10, %v5107_v34  ;;  %v5481_v10 = vshll.u32 %v5261_v32, 16  ;;  %v6770_v42 = vld [vmem:[#allocation3 + $0x60] sm:$0x8] }
 0x3db   : > { %v6893_v43 = vsel %vm11623_vm11, %v15206_v60, %v6892_v53  ;;  %v5475_v28 = vrot.slane %v5473_v40, 5  ;;  %v11409_v53 = vld [vmem:[%s15110_s3 + $0x40] sm:$0xff]  ;;  %v4582_v18 = vsel %vm11798_vm14, 0, %v4581_v24  ;;  %5172 = vst [vmem:[#allocation4 + $0x45c] sm:$0xf] %v5108_v56  ;;  %v7440_v60 = vshll.u32 %v7299_v39, 16 }
 0x3dc   : > { %7197 = vst [vmem:[#allocation4 + $0x114] sm:$0xf] %v6893_v43  ;;  %v6110_v33 = vsel %vm11623_vm11, %v6102_v11, %v6109_v25  ;;  %9354 = vmatpush.bf16.msrb.mxu2 %v11409_v53  ;;  %v5478_v43 = vshrl.u32 %v5261_v32, 16  ;;  %v6436_v25 = vor.u32 %v13942_v62, %v13940_v37  ;;  %v13974_v40 = vld [vmem:[#allocation3 + $0x68] sm:$0xf]  ;;  %v7444_v11 = vshrl.u32 %v7299_v39, 16 }
 0x3dd   : > { %v5476_v34 = vsel %vm11610_vm10, %v5471_v55, %v5475_v28  ;;  %4583 = vst [vmem:[#allocation3 + $0xf0] sm:$0x8] %v4582_v18  ;;  %v6905_v55 = vor.u32 %v6903_v26, %v13944_v16  ;;  %v6895_v12 = vshrl.u32 %v6770_v42, 16  ;;  %v7433_v32 = vrot.slane %v7431_v29, 4  ;;  %v13981_v48 = vld [vmem:[#allocation3 + $0x88] sm:$0xf] }
 0x3de   : > { %v11389_v44 = vld [vmem:[#allocation4 + $0x420] sm:$0xf0]  ;;  %5716 = vst [vmem:[#allocation4 + $0x224] sm:$0xf] %v5476_v34  ;;  %v6909_v62 = vshrl.u32 %v13974_v40, 16  ;;  %v13984_v39 = vrot.slane %v7440_v60, 5 }
 0x3df   : > { %v10894_v15 = vor.u32 %v11389_v44, %v10893_v23  ;;  %v13976_v23 = vpop.f32.mrf.mxu0  ;;  %6194 = vst [vmem:[#allocation4 + $0x420] sm:$0xf] %v6110_v33  ;;  %v7436_v44 = vrot.slane %v7434_v21, 5  ;;  %v13979_v28 = vpop.f32.mrf.mxu1  ;;  %v10359_v37 = vrot.slane %v6895_v12, 11  ;;  %v5480_v24 = vrot.slane %v5478_v43, 4 }
 0x3e0   : > { %15207 = vst [vmem:[#allocation20_spill] sm:$0xff] %v13976_v23  ;;  %v5483_v56 = vrot.slane %v5481_v10, 5  ;;  %v7446_v53 = vrot.slane %v7444_v11, 4  ;;  %v5096_v18 = vshll.u32 %v13915_v54, 16  ;;  %v6098_v29 = vshll.u32 %v13919_v1, 16 }
 0x3e1   : > { %9692 = vmatmul.bf16.gmra.mxu1 %v10894_v15  ;;  %v6439_v15 = vshll.u32 %v6277_v22, 16  ;;  %15208 = vst [vmem:[#allocation21_spill] sm:$0xff] %v13979_v28  ;;  %v6906_v21 = vsel %vm11623_vm11, %v10359_v37, %v6905_v55  ;;  %v13990_v33 = vrot.slane %v6436_v25, 4  ;;  %v5487_v26 = vshll.u32 %v13981_v48, 16  ;;  %v11316_v25 = vld [vmem:[#allocation4 + $0x1d8] sm:$0xf0] }
 0x3e2   : > { %6733 = vst [vmem:[#allocation4 + $0x134] sm:$0xf] %v6418_v51  ;;  %v13993_v51 = vld [vmem:[#allocation3 + $0x94] sm:$0xf]  ;;  %v5098_v60 = vor.u32 %v5096_v18, %v13932_v58  ;;  %v6100_v43 = vor.u32 %v6098_v29, %v13936_v27  ;;  %v7437_v54 = vor.u32 %v7436_v44, %v7433_v32  ;;  %v13999_v1 = vrot.slane %v6443_v2, 4 }
 0x3e3   : > { %6734 = vst [vmem:[#allocation4 + $0x158] sm:$0xf] %v6428_v57  ;;  %v13997_v57 = vrot.slane %v6439_v15, 5  ;;  %v5484_v55 = vor.u32 %v5483_v56, %v5480_v24  ;;  %v6911_v11 = vrot.slane %v6909_v62, 7  ;;  %v7447_v12 = vor.u32 %v7446_v53, %v13984_v39  ;;  %v14002_v37 = vld [vmem:[#allocation3 + $0x74] sm:$0xf] }
 0x3e4   : > { %v4754_v22 = vld [vmem:[#allocation3 + $0xf0] sm:$0x8]  ;;  %7198 = vst [vmem:[#allocation4 + $0x138] sm:$0xf] %v6906_v21  ;;  %v14004_v58 = vrot.slane %v5487_v26, 5  ;;  %v5502_v27 = vshrl.u32 %v13993_v51, 16 }
 0x3e5   : > { %v5775_v34 = vld [vmem:[#allocation3 + $0xf0] sm:$0x8]  ;;  %v5088_v10 = vshrl.u32 %v4754_v22, 16  ;;  %v10597_v18 = vld [vmem:[#allocation4 + $0x1b8] sm:$0xf]  ;;  %v7438_v53 = vrot.slane %v7437_v54, 4 }
 0x3e6   : > { %v6090_v42 = vshrl.u32 %v5775_v34, 16  ;;  %v7300_v32 = vld [vmem:[#allocation3 + $0x6c] sm:$0x1]  ;;  %v10598_v15 = vor.u32 %v11316_v25, %v10597_v18  ;;  %v6912_v29 = vshll.u32 %v13974_v40, 16  ;;  %v5485_v21 = vrot.slane %v5484_v55, 4 }
 0x3e7   : > { %v10338_v13 = vrot.slane %v5088_v10, 11  ;;  %v14007_v44 = vpop.f32.mrf.mxu0  ;;  %v7450_v56 = vshll.u32 %v7300_v32, 16  ;;  %v14014_v26 = vpop.f32.mrf.mxu1  ;;  %v11508_v22 = vld [vmem:[%s15109_s2] ss:$0 sm:$0xff]  ;;  %v7448_v10 = vrot.slane %v7447_v12, 4  ;;  %v6446_v40 = vor.u32 %v13999_v1, %v13997_v57  ;;  %v11448_v12 = vld [vmem:[%s15110_s3 + $0x178] sm:$0xff] }
 0x3e8   : > { %v10353_v28 = vrot.slane %v6090_v42, 11  ;;  %15209 = vst [vmem:[#allocation22_spill] sm:$0xff] %v14007_v44  ;;  %9474 = vmatmul.bf16.gmra.mxu3 %v10598_v15  ;;  %v4614_v54 = vld [vmem:[#allocation3 + $0x8c] sm:$0x1]  ;;  %v5490_v55 = vsel %vm11610_vm10, %v5485_v21, %v14004_v58  ;;  %v5173_v25 = vld [vmem:[#allocation3 + $0x4] sm:$0xf]  ;;  %9703 = vmatpush.bf16.msra.mxu2 %v11448_v12 }
 0x3e9   : > { %v5099_v2 = vsel %vm11623_vm11, %v10338_v13, %v5098_v60  ;;  %15210 = vst [vmem:[#allocation23_spill] sm:$0xff] %v14014_v26  ;;  %v6454_v13 = vshrl.u32 %v14002_v37, 16  ;;  %v5505_v60 = vshll.u32 %v13993_v51, 16  ;;  %v6457_v51 = vshll.u32 %v14002_v37, 16  ;;  %v14043_v37 = vld [vmem:[#allocation3 + $0x98] sm:$0xf] }
 0x3ea   : > { %v6101_v62 = vsel %vm11623_vm11, %v10353_v28, %v6100_v43  ;;  %5171 = vst [vmem:[#allocation4 + $0x438] sm:$0xf] %v5099_v2  ;;  %v7452_v28 = vrot.slane %v7450_v56, 5  ;;  %v6914_v43 = vor.u32 %v6912_v29, %v6911_v11  ;;  %v5491_v18 = vshrl.u32 %v13981_v48, 16  ;;  %v14035_v11 = vld [vmem:[#allocation3 + $0x74] sm:$0xf] }
 0x3eb   : > { %6193 = vst [vmem:[#allocation4 + $0x3fc] sm:$0xf] %v6101_v62  ;;  %v14031_v32 = vrot.slane %v5502_v27, 4  ;;  %v4615_v1 = vsel %vm12180_vm7, 0, %v4614_v54  ;;  %v5174_v2 = vld [vmem:[#allocation3 + $0x8] sm:$0xf] }
 0x3ec   : > { %5717 = vst [vmem:[#allocation4 + $0x248] sm:$0xf] %v5490_v55  ;;  %v11456_v62 = vld [vmem:[%s15110_s3 + $0x1b8] sm:$0xff]  ;;  %v14048_v56 = vld [vmem:[#allocation3 + $0x74] sm:$0xf]  ;;  %v5507_v29 = vrot.slane %v5505_v60, 5 }
 0x3ed   : > { %4616 = vst [vmem:[#allocation3 + $0x8c] sm:$0x1] %v4615_v1  ;;  %v11472_v48 = vld [vmem:[%s15110_s3 + $0x238] sm:$0xff]  ;;  %v10887_v21 = vld [vmem:[#allocation4 + $0x41c] sm:$0xf0]  ;;  %9792 = vmatpush.bf16.msra.mxu3 %v11456_v62  ;;  %v14055_v54 = vrot.slane %v6446_v40, 4 }
 0x3ee   : > { %v11396_v27 = vld [vmem:[#allocation4 + $0x458] sm:$0xf0]  ;;  %5205 = vst [vmem:[#allocation4 + $0x4] sm:$0xf] %v5173_v25  ;;  %9970 = vmatpush.bf16.msra.mxu1 %v11472_v48  ;;  %v5493_v55 = vrot.slane %v5491_v18, 4  ;;  %v5511_v60 = vshll.u32 %v14043_v37, 16  ;;  %v5508_v48 = vor.u32 %v5507_v29, %v14031_v32 }
 0x3ef   : > { %v4482_v24 = vpop.f32.mrf.mxu3  ;;  %5206 = vst [vmem:[#allocation4 + $0x28] sm:$0xf] %v5174_v2  ;;  %v6922_v40 = vshrl.u32 %v14035_v11, 16  ;;  %v14069_v18 = vpop.f32.mrf.mxu0  ;;  %v14071_v2 = vrot.slane %v6457_v51, 5  ;;  %v11464_v32 = vld [vmem:[%s15110_s3 + $0x1f8] sm:$0xff]  ;;  %v11470_v29 = vld [vmem:[%s15110_s3 + $0x228] sm:$0xff] }
 0x3f0   : > { %v4483_v34 = vadd.f32 %v11508_v22, %v4482_v24  ;;  %v7443_v24 = vsel %vm11610_vm10, %v7438_v53, %v13984_v39  ;;  %v15211_v39 = vrot.slane %v13944_v16, 4  ;;  %15212 = vst [vmem:[#allocation24_spill] sm:$0xff] %v14069_v18  ;;  %v14079_v51 = vrot.slane %v5511_v60, 5  ;;  %v10633_v60 = vld [vmem:[#allocation4 + $0x200] sm:$0xf]  ;;  %9881 = vmatpush.bf16.msra.mxu0 %v11464_v32 }
 0x3f1   : > { %v10913_v25 = vld [vmem:[#allocation4 + $0x438] sm:$0xf]  ;;  %7758 = vst [vmem:[#allocation4 + $0x140] sm:$0xf] %v7443_v24 }
 0x3f2   : > { %v4517_v42 = vmax.f32 %v4483_v34, 0.0  ;;  %v11471_v34 = vld [vmem:[%s15110_s3 + $0x230] sm:$0xff]  ;;  %v6915_v53 = vsel %vm11623_vm11, %v15211_v39, %v6914_v43  ;;  %v10914_v1 = vor.u32 %v11396_v27, %v10913_v25  ;;  %v6278_v43 = vld [vmem:[#allocation3 + $0x6c] sm:$0x1]  ;;  %v14074_v27 = vpop.f32.mrf.mxu1  ;;  %v14087_v25 = vrot.slane %v6922_v40, 7 }
 0x3f3   : > { %15213 = vst [vmem:[#allocation25_spill] sm:$0xff] %v14074_v27  ;;  %9971 = vmatpush.bf16.msra.mxu1 %v11471_v34  ;;  %v6449_v34 = vshll.u32 %v6278_v43, 16 }
 0x3f4   : > { %v4674_v15 = vpack.c.bf16 %v4517_v42, %v4517_v42  ;;  %v7453_v42 = vsel %vm11610_vm10, %v7448_v10, %v7452_v28  ;;  %v6442_v10 = vsel %vm11610_vm10, %v13990_v33, %v13997_v57  ;;  %v14066_v28 = vrot.slane %v6454_v13, 4  ;;  %9341 = vmatmul.bf16.gmra.mxu2 %v10914_v1  ;;  %7199 = vst [vmem:[#allocation4 + $0x15c] sm:$0xf] %v6915_v53 }
 0x3f5   : > { %7759 = vst [vmem:[#allocation4 + $0x164] sm:$0xf] %v7453_v42  ;;  %v7455_v57 = vshrl.u32 %v14048_v56, 16  ;;  %v5494_v13 = vor.u32 %v5493_v55, %v14004_v58  ;;  %v11325_v42 = vld [vmem:[#allocation4 + $0x220] sm:$0xf0]  ;;  %v5509_v53 = vrot.slane %v5508_v48, 4 }
 0x3f6   : > { %4707 = vst [vmem:[#allocation3 + $0x104] sm:$0xf] %v4674_v15  ;;  %v11384_v15 = vld [vmem:[#allocation4 + $0x3fc] sm:$0xf] }
 0x3f7   : > { %v4484_v12 = vpop.f32.mrf.mxu3  ;;  %v10890_v16 = vor.u32 %v11384_v15, %v10887_v21  ;;  %v5263_v21 = vld [vmem:[#allocation3 + $0x8c] sm:$0x1]  ;;  %6735 = vst [vmem:[#allocation4 + $0x17c] sm:$0xf] %v6442_v10  ;;  %9972 = vmatpush.bf16.msra.mxu1 %v11470_v29  ;;  %v7458_v15 = vshll.u32 %v14048_v56, 16  ;;  %v14090_v10 = vpop.f32.mrf.mxu2  ;;  %v14094_v43 = vrot.slane %v7455_v57, 4  ;;  %v5514_v48 = vsel %vm11610_vm10, %v5509_v53, %v14079_v51 }
 0x3f8   : > { %v4485_v62 = vadd.f32 %v11508_v22, %v4484_v12  ;;  %v5267_v22 = vld [vmem:[#allocation3 + $0xa4] sm:$0xf]  ;;  %v5497_v55 = vshll.u32 %v5263_v21, 16  ;;  %v6280_v21 = vld [vmem:[#allocation3 + $0x78] sm:$0xf]  ;;  %v14101_v27 = vpop.f32.mrf.mxu0 }
 0x3f9   : > { %9603 = vmatmul.bf16.gmra.mxu0 %v10890_v16  ;;  %v5526_v12 = vshrl.u32 %v5267_v22, 16  ;;  %v5529_v1 = vshll.u32 %v5267_v22, 16  ;;  %v10634_v16 = vor.u32 %v11325_v42, %v10633_v60  ;;  %v6451_v22 = vrot.slane %v6449_v34, 5  ;;  %v5268_v56 = vld [vmem:[#allocation3 + $0xa8] sm:$0xf]  ;;  %15214 = vst [vmem:[#allocation26_spill] sm:$0xff] %v14101_v27 }
 0x3fa   : > { %v4518_v24 = vmax.f32 %v4485_v62, 0.0  ;;  %v5495_v62 = vrot.slane %v5494_v13, 4  ;;  %v5499_v13 = vrot.slane %v5497_v55, 5  ;;  %v7302_v42 = vld [vmem:[#allocation3 + $0x78] sm:$0xf]  ;;  %v11463_v34 = vld [vmem:[%s15110_s3 + $0x1f0] sm:$0xff]  ;;  %v14111_v53 = vpop.f32.mrf.mxu1 }
 0x3fb   : > { %v5528_v32 = vrot.slane %v5526_v12, 4  ;;  %9479 = vmatmul.bf16.gmra.mxu3 %v10634_v16  ;;  %v5531_v29 = vrot.slane %v5529_v1, 5  ;;  %v11257_v57 = vld [vmem:[#allocation4 + $0x4] sm:$0xf]  ;;  %v4617_v60 = vld [vmem:[#allocation3 + $0x9c] sm:$0x1]  ;;  %9882 = vmatpush.bf16.msra.mxu0 %v11463_v34 }
 0x3fc   : > { %v4675_v58 = vpack.c.bf16 %v4518_v24, %v4518_v24  ;;  %v5515_v24 = vshrl.u32 %v14043_v37, 16  ;;  %v5500_v37 = vsel %vm11610_vm10, %v5495_v62, %v5499_v13  ;;  %5719 = vst [vmem:[#allocation4 + $0x290] sm:$0xf] %v5514_v48  ;;  %v11469_v12 = vld [vmem:[%s15110_s3 + $0x220] sm:$0xff]  ;;  %v5535_v55 = vshll.u32 %v5268_v56, 16  ;;  %v11462_v48 = vld [vmem:[%s15110_s3 + $0x1e8] sm:$0xff] }
 0x3fd   : > { %v6227_v39 = vld [vmem:[#allocation3 + $0x104] sm:$0xf]  ;;  %15215 = vst [vmem:[#allocation27_spill] sm:$0xff] %v14111_v53  ;;  %v4618_v1 = vsel %vm12180_vm7, 0, %v4617_v60  ;;  %v6452_v62 = vsel %vm11610_vm10, %v14055_v54, %v6451_v22  ;;  %v5270_v16 = vld [vmem:[#allocation3 + $0xb4] sm:$0xf]  ;;  %9973 = vmatpush.bf16.msra.mxu1 %v11469_v12  ;;  %v5532_v53 = vor.u32 %v5531_v29, %v5528_v32 }
 0x3fe   : > { %6259 = vst [vmem:[#allocation4 + $0x448] sm:$0xf] %v6227_v39  ;;  %v14092_v33 = vld [vmem:[#allocation3 + $0x104] sm:$0xf]  ;;  %v6463_v13 = vshll.u32 %v6280_v21, 16  ;;  %v7464_v26 = vshll.u32 %v7302_v42, 16 }
 0x3ff   : > { %v7250_v40 = vld [vmem:[#allocation3 + $0x104] sm:$0xf]  ;;  %4708 = vst [vmem:[#allocation3 + $0x108] sm:$0xf] %v4675_v58  ;;  %v6117_v39 = vshrl.u32 %v14092_v33, 16  ;;  %v5517_v58 = vrot.slane %v5515_v24, 4  ;;  %v14129_v0 = vpop.f32.mrf.mxu2  ;;  %9883 = vmatpush.bf16.msra.mxu0 %v11462_v48 }
 0x400   : > { %7282 = vst [vmem:[#allocation4 + $0x40c] sm:$0xf] %v7250_v40  ;;  %v10375_v40 = vld [vmem:[#allocation4 + $0x24] sm:$0xf0]  ;;  %v11468_v24 = vld [vmem:[%s15110_s3 + $0x218] sm:$0xff]  ;;  %v7468_v27 = vshrl.u32 %v7302_v42, 16 }
 0x401   : > { %5718 = vst [vmem:[#allocation4 + $0x26c] sm:$0xf] %v5500_v37  ;;  %v6467_v37 = vshrl.u32 %v6280_v21, 16  ;;  %v10378_v60 = vor.u32 %v11257_v57, %v10375_v40  ;;  %v5539_v18 = vshrl.u32 %v5268_v56, 16  ;;  %v14124_v54 = vrot.slane %v6117_v39, 7  ;;  %9974 = vmatpush.bf16.msra.mxu1 %v11468_v24  ;;  %v11461_v21 = vld [vmem:[%s15110_s3 + $0x1e0] sm:$0xff] }
 0x402   : > { %4619 = vst [vmem:[#allocation3 + $0x9c] sm:$0x1] %v4618_v1  ;;  %v5518_v22 = vor.u32 %v5517_v58, %v14079_v51  ;;  %v14127_v34 = vrot.slane %v5535_v55, 5  ;;  %v5550_v12 = vshrl.u32 %v5270_v16, 16  ;;  %v11467_v51 = vld [vmem:[%s15110_s3 + $0x210] sm:$0xff]  ;;  %v14137_v32 = vrot.slane %v7458_v15, 5 }
 0x403   : > { %6736 = vst [vmem:[#allocation4 + $0x1a0] sm:$0xf] %v6452_v62  ;;  %v14139_v56 = vrot.slane %v6463_v13, 5  ;;  %v14141_v42 = vrot.slane %v6467_v37, 4  ;;  %v5533_v29 = vrot.slane %v5532_v53, 4  ;;  %v5553_v57 = vshll.u32 %v5270_v16, 16  ;;  %v14155_v13 = vpop.f32.mrf.mxu0  ;;  %9884 = vmatpush.bf16.msra.mxu0 %v11461_v21 }
 0x404   : > { %15216 = vst [vmem:[#allocation28_spill] sm:$0xff] %v14129_v0  ;;  %9355 = vmatmul.bf16.vlgmr.msrb.gmra.mxu2 %v10378_v60  ;;  %v6124_v40 = vrot.slane %v14124_v54, 4  ;;  %v14146_v55 = vrot.slane %v7468_v27, 4  ;;  %v5519_v62 = vrot.slane %v5518_v22, 4  ;;  %v14148_v48 = vrot.slane %v5539_v18, 4  ;;  %v11460_v18 = vld [vmem:[%s15110_s3 + $0x1d8] sm:$0xff]  ;;  %v14162_v27 = vpop.f32.mrf.mxu1 }
 0x405   : > { %v5538_v24 = vsel %vm11610_vm10, %v5533_v29, %v14127_v34  ;;  %v14153_v53 = vld [vmem:[#allocation3 + $0x78] sm:$0xf]  ;;  %15217 = vst [vmem:[#allocation29_spill] sm:$0xff] %v14155_v13  ;;  %v10669_v37 = vld [vmem:[#allocation4 + $0x248] sm:$0xf]  ;;  %9975 = vmatpush.bf16.msra.mxu1 %v11467_v51 }
 0x406   : > { %v5780_v1 = vld [vmem:[#allocation3 + $0x108] sm:$0xf]  ;;  %15218 = vst [vmem:[#allocation30_spill] sm:$0xff] %v14162_v27  ;;  %v4620_v51 = vld [vmem:[#allocation3 + $0xac] sm:$0x1] }
 0x407   : > { %v6228_v44 = vld [vmem:[#allocation3 + $0x108] sm:$0xf]  ;;  %v6126_v8 = vshrl.u32 %v5780_v1, 16  ;;  %v6129_v23 = vshll.u32 %v5780_v1, 16  ;;  %v4584_v1 = vld [vmem:[#allocation3 + $0x100] sm:$0x8]  ;;  %9885 = vmatpush.bf16.msra.mxu0 %v11460_v18 }
 0x408   : > { %6260 = vst [vmem:[#allocation4 + $0x46c] sm:$0xf] %v6228_v44  ;;  %v7251_v39 = vld [vmem:[#allocation3 + $0x108] sm:$0xf]  ;;  %v14143_v44 = vrot.slane %v7464_v26, 5  ;;  %v14157_v26 = vrot.slane %v5550_v12, 4 }
 0x409   : > { %v6128_v58 = vrot.slane %v6126_v8, 7  ;;  %7283 = vst [vmem:[#allocation4 + $0x430] sm:$0xf] %v7251_v39  ;;  %v11334_v15 = vld [vmem:[#allocation4 + $0x268] sm:$0xf0]  ;;  %v5555_v12 = vrot.slane %v5553_v57, 5  ;;  %v7461_v57 = vor.u32 %v14137_v32, %v14094_v43 }
 0x40a   : > { %v5266_v8 = vld [vmem:[#allocation3 + $0x9c] sm:$0x1]  ;;  %v10929_v22 = vld [vmem:[#allocation4 + $0x448] sm:$0xf]  ;;  %v10670_v39 = vor.u32 %v11334_v15, %v10669_v37  ;;  %5721 = vst [vmem:[#allocation4 + $0x2d8] sm:$0xf] %v5538_v24  ;;  %v6470_v15 = vor.u32 %v14141_v42, %v14139_v56  ;;  %v7471_v32 = vor.u32 %v14146_v55, %v14143_v44  ;;  %v5542_v42 = vor.u32 %v14148_v48, %v14127_v34 }
 0x40b   : > { %v6131_v16 = vor.u32 %v6129_v23, %v6128_v58  ;;  %v5521_v60 = vshll.u32 %v5266_v8, 16  ;;  %v11466_v29 = vld [vmem:[%s15110_s3 + $0x208] sm:$0xff]  ;;  %v4585_v23 = vsel %vm11798_vm14, 0, %v4584_v1  ;;  %v6460_v58 = vor.u32 %v14071_v2, %v14066_v28  ;;  %v14179_v37 = vld [vmem:[#allocation3 + $0xb8] sm:$0xf]  ;;  %v11459_v28 = vld [vmem:[%s15110_s3 + $0x1d0] sm:$0xff] }
 0x40c   : > { %4586 = vst [vmem:[#allocation3 + $0x100] sm:$0x8] %v4585_v23  ;;  %v4621_v27 = vsel %vm12180_vm7, 0, %v4620_v51  ;;  %9484 = vmatmul.bf16.gmra.mxu3 %v10670_v39  ;;  %v11447_v2 = vld [vmem:[%s15110_s3 + $0x170] sm:$0xff]  ;;  %v6931_v43 = vshrl.u32 %v14153_v53, 16  ;;  %9976 = vmatpush.bf16.msra.mxu1 %v11466_v29  ;;  %v5556_v1 = vor.u32 %v5555_v12, %v14157_v26  ;;  %v5559_v48 = vshll.u32 %v14179_v37, 16  ;;  %v14206_v29 = vpop.f32.mrf.mxu3 }
 0x40d   : > { %v6132_v21 = vsel %vm11623_vm11, %v6124_v40, %v6131_v16  ;;  %v5523_v8 = vrot.slane %v5521_v60, 5  ;;  %v14181_v40 = vpop.f32.mrf.mxu2  ;;  %4622 = vst [vmem:[#allocation3 + $0xac] sm:$0x1] %v4621_v27  ;;  %v11465_v16 = vld [vmem:[%s15110_s3 + $0x200] sm:$0xff]  ;;  %v6773_v18 = vld [vmem:[#allocation3 + $0x70] sm:$0x8]  ;;  %9704 = vmatpush.bf16.msra.mxu2 %v11447_v2  ;;  %9886 = vmatpush.bf16.msra.mxu0 %v11459_v28  ;;  %v14217_v2 = vpop.f32.mrf.mxu0 }
 0x40e   : > { %6196 = vst [vmem:[#allocation4 + $0x468] sm:$0xf] %v6132_v21  ;;  %v15219_v60 = vshll.u32 %v14035_v11, 16  ;;  %v6917_v34 = vshrl.u32 %v6773_v18, 16  ;;  %v6461_v55 = vrot.slane %v6460_v58, 4  ;;  %v6120_v27 = vshll.u32 %v14092_v33, 16 }
 0x40f   : > { %v11398_v0 = vld [vmem:[#allocation4 + $0x468] sm:$0xf0]  ;;  %v11455_v11 = vld [vmem:[%s15110_s3 + $0x1b0] sm:$0xff]  ;;  %v7462_v39 = vrot.slane %v7461_v57, 4  ;;  %v6934_v26 = vshll.u32 %v14153_v53, 16  ;;  %v14215_v51 = vrot.slane %v6470_v15, 4 }
 0x410   : > { %v10930_v24 = vor.u32 %v11398_v0, %v10929_v22  ;;  %v5524_v0 = vsel %vm11610_vm10, %v5519_v62, %v5523_v8  ;;  %v6927_v22 = vor.u32 %v15219_v60, %v14087_v25  ;;  %v6929_v62 = vrot.slane %v14087_v25, 4  ;;  %v10411_v12 = vld [vmem:[#allocation4 + $0x6c] sm:$0xf0]  ;;  %v11458_v23 = vld [vmem:[%s15110_s3 + $0x1c8] sm:$0xff]  ;;  %9977 = vmatpush.bf16.msra.mxu1 %v11465_v16  ;;  %9793 = vmatpush.bf16.msra.mxu3 %v11455_v11  ;;  %v14224_v60 = vpop.f32.mrf.mxu1 }
 0x411   : > { %5720 = vst [vmem:[#allocation4 + $0x2b4] sm:$0xf] %v5524_v0  ;;  %v10360_v21 = vrot.slane %v6917_v34, 11  ;;  %v6933_v58 = vrot.slane %v6931_v43, 7  ;;  %v7472_v33 = vrot.slane %v7471_v32, 4  ;;  %v5543_v8 = vrot.slane %v5542_v42, 4  ;;  %9887 = vmatpush.bf16.msra.mxu0 %v11458_v23 }
 0x412   : > { %9697 = vmatmul.bf16.gmra.mxu1 %v10930_v24  ;;  %v5557_v24 = vrot.slane %v5556_v1, 4  ;;  %15220 = vst [vmem:[#allocation31_spill] sm:$0xff] %v14217_v2  ;;  %v5563_v57 = vshrl.u32 %v14179_v37, 16  ;;  %v11266_v53 = vld [vmem:[#allocation4 + $0x4c] sm:$0xf]  ;;  %v14222_v18 = vrot.slane %v5559_v48, 5  ;;  %v6122_v15 = vor.u32 %v6120_v27, %v14124_v54 }
 0x413   : > { %v5778_v0 = vld [vmem:[#allocation3 + $0x100] sm:$0x8]  ;;  %v6928_v28 = vsel %vm11623_vm11, %v10360_v21, %v6927_v22  ;;  %15221 = vst [vmem:[#allocation32_spill] sm:$0xff] %v14224_v60  ;;  %v10414_v43 = vor.u32 %v11266_v53, %v10411_v12  ;;  %v7303_v42 = vld [vmem:[#allocation3 + $0x7c] sm:$0x1]  ;;  %v7467_v1 = vsel %vm11610_vm10, %v7462_v39, %v14143_v44  ;;  %v6466_v34 = vsel %vm11610_vm10, %v6461_v55, %v14139_v56 }
 0x414   : > { %v6112_v32 = vshrl.u32 %v5778_v0, 16  ;;  %v5269_v16 = vld [vmem:[#allocation3 + $0xac] sm:$0x1]  ;;  %v11457_v37 = vld [vmem:[%s15110_s3 + $0x1c0] sm:$0xff]  ;;  %v7474_v22 = vshll.u32 %v7303_v42, 16  ;;  %v6936_v11 = vor.u32 %v6934_v26, %v6933_v58  ;;  %v5565_v12 = vrot.slane %v5563_v57, 4  ;;  %v14238_v0 = vpop.f32.mrf.mxu3 }
 0x415   : > { %7200 = vst [vmem:[#allocation4 + $0x180] sm:$0xf] %v6928_v28  ;;  %v5273_v54 = vld [vmem:[#allocation3 + $0xc4] sm:$0xf]  ;;  %9360 = vmatmul.bf16.gmra.mxu2 %v10414_v43  ;;  %v5545_v27 = vshll.u32 %v5269_v16, 16  ;;  %v14236_v23 = vpop.f32.mrf.mxu2  ;;  %9888 = vmatpush.bf16.msra.mxu0 %v11457_v37  ;;  %v5562_v58 = vsel %vm11610_vm10, %v5557_v24, %v14222_v18 }
 0x416   : > { %v10354_v48 = vrot.slane %v6112_v32, 11  ;;  %7760 = vst [vmem:[#allocation4 + $0x188] sm:$0xf] %v7467_v1  ;;  %v7476_v21 = vrot.slane %v7474_v22, 5  ;;  %v6281_v53 = vld [vmem:[#allocation3 + $0x7c] sm:$0x1]  ;;  %v6937_v37 = vsel %vm11623_vm11, %v6929_v62, %v6936_v11 }
 0x417   : > { %15222 = vst [vmem:[#allocation33_spill] sm:$0xff] %v14236_v23  ;;  %v5547_v28 = vrot.slane %v5545_v27, 5  ;;  %v4623_v56 = vld [vmem:[#allocation3 + $0xbc] sm:$0x1]  ;;  %v6473_v55 = vshll.u32 %v6281_v53, 16  ;;  %v5574_v43 = vshrl.u32 %v5273_v54, 16 }
 0x418   : > { %6737 = vst [vmem:[#allocation4 + $0x1c4] sm:$0xf] %v6466_v34  ;;  %v11343_v44 = vld [vmem:[#allocation4 + $0x2b0] sm:$0xf0]  ;;  %v6123_v39 = vsel %vm11623_vm11, %v10354_v48, %v6122_v15  ;;  %v11265_v32 = vld [vmem:[#allocation4 + $0x40] sm:$0xf0]  ;;  %v7477_v15 = vsel %vm11610_vm10, %v7472_v33, %v7476_v21  ;;  %v5566_v33 = vor.u32 %v5565_v12, %v14222_v18  ;;  %v14261_v25 = vpop.f32.mrf.mxu1 }
 0x419   : > { %6195 = vst [vmem:[#allocation4 + $0x444] sm:$0xf] %v6123_v39  ;;  %v4624_v26 = vsel %vm12180_vm7, 0, %v4623_v56  ;;  %v5577_v57 = vshll.u32 %v5273_v54, 16  ;;  %v10705_v42 = vld [vmem:[#allocation4 + $0x290] sm:$0xf]  ;;  %v5548_v16 = vsel %vm11610_vm10, %v5543_v8, %v5547_v28  ;;  %v14258_v54 = vpop.f32.mrf.mxu0 }
 0x41a   : > { %4625 = vst [vmem:[#allocation3 + $0xbc] sm:$0x1] %v4624_v26  ;;  %v6475_v1 = vrot.slane %v6473_v55, 5  ;;  %v10706_v22 = vor.u32 %v11343_v44, %v10705_v42  ;;  %v10405_v34 = vld [vmem:[#allocation4 + $0x20] sm:$0xf]  ;;  %v5576_v27 = vrot.slane %v5574_v43, 4 }
 0x41b   : > { %5722 = vst [vmem:[#allocation4 + $0x2fc] sm:$0xf] %v5548_v16  ;;  %v5274_v8 = vld [vmem:[#allocation3 + $0xc8] sm:$0xf]  ;;  %v10406_v48 = vor.u32 %v11265_v32, %v10405_v34  ;;  %v5579_v21 = vrot.slane %v5577_v57, 5  ;;  %v5567_v55 = vrot.slane %v5566_v33, 4 }
 0x41c   : > { %5723 = vst [vmem:[#allocation4 + $0x320] sm:$0xf] %v5562_v58  ;;  %v6476_v24 = vsel %vm11610_vm10, %v14215_v51, %v6475_v1  ;;  %9489 = vmatmul.bf16.gmra.mxu3 %v10706_v22  ;;  %v10923_v53 = vld [vmem:[#allocation4 + $0x464] sm:$0xf0]  ;;  %v5583_v11 = vshll.u32 %v5274_v8, 16  ;;  %v14265_v51 = vpop.f32.mrf.mxu3  ;;  %v5587_v57 = vshrl.u32 %v5274_v8, 16 }
 0x41d   : > { %15223 = vst [vmem:[#allocation34_spill] sm:$0xff] %v14258_v54  ;;  %v14263_v62 = vpop.f32.mrf.mxu2  ;;  %v10447_v28 = vld [vmem:[#allocation4 + $0xb4] sm:$0xf0]  ;;  %v5580_v32 = vor.u32 %v5579_v21, %v5576_v27  ;;  %v11275_v12 = vld [vmem:[#allocation4 + $0x94] sm:$0xf] }
 0x41e   : > { %7761 = vst [vmem:[#allocation4 + $0x1ac] sm:$0xf] %v7477_v15  ;;  %v5585_v43 = vrot.slane %v5583_v11, 5  ;;  %v10450_v26 = vor.u32 %v11275_v12, %v10447_v28  ;;  %v5276_v16 = vld [vmem:[#allocation3 + $0xd4] sm:$0xf]  ;;  %v5589_v33 = vrot.slane %v5587_v57, 4 }
 0x41f   : > { %15224 = vst [vmem:[#allocation35_spill] sm:$0xff] %v14261_v25  ;;  %v5581_v42 = vrot.slane %v5580_v32, 4  ;;  %v5598_v8 = vshrl.u32 %v5276_v16, 16  ;;  %v5601_v27 = vshll.u32 %v5276_v16, 16  ;;  %v10741_v11 = vld [vmem:[#allocation4 + $0x2d8] sm:$0xf] }
 0x420   : > { %7201 = vst [vmem:[#allocation4 + $0x1a4] sm:$0xf] %v6937_v37  ;;  %v11393_v44 = vld [vmem:[#allocation4 + $0x444] sm:$0xf]  ;;  %v14271_v22 = vpop.f32.mrf.mxu1  ;;  %v5277_v32 = vld [vmem:[#allocation3 + $0xd8] sm:$0xf] }
 0x421   : > { %6738 = vst [vmem:[#allocation4 + $0x1e8] sm:$0xf] %v6476_v24  ;;  %v10926_v39 = vor.u32 %v11393_v44, %v10923_v53  ;;  %v5272_v56 = vld [vmem:[#allocation3 + $0xbc] sm:$0x1]  ;;  %v14269_v1 = vpop.f32.mrf.mxu0  ;;  %v4626_v24 = vld [vmem:[#allocation3 + $0xcc] sm:$0x1] }
 0x422   : > { %9978 = vmatmul.bf16.vlgmr.msra.gmra.mxu1 %v10406_v48  ;;  %v5569_v18 = vshll.u32 %v5272_v56, 16  ;;  %15225 = vst [vmem:[#allocation36_spill] sm:$0xff] %v14269_v1  ;;  %v11352_v34 = vld [vmem:[#allocation4 + $0x2f8] sm:$0xf0]  ;;  %v5586_v48 = vsel %vm11610_vm10, %v5581_v42, %v5585_v43  ;;  %v4627_v53 = vsel %vm12180_vm7, 0, %v4626_v24  ;;  %v11446_v12 = vld [vmem:[%s15110_s3 + $0x168] sm:$0xff] }
 0x423   : > { %9608 = vmatmul.bf16.gmra.mxu0 %v10926_v39  ;;  %15226 = vst [vmem:[#allocation37_spill] sm:$0xff] %v14271_v22  ;;  %v11274_v44 = vld [vmem:[#allocation4 + $0x88] sm:$0xf0]  ;;  %v10742_v39 = vor.u32 %v11352_v34, %v10741_v11  ;;  %v6282_v28 = vld [vmem:[#allocation3 + $0x84] sm:$0xf]  ;;  %v5600_v57 = vrot.slane %v5598_v8, 4  ;;  %9705 = vmatpush.bf16.msra.mxu2 %v11446_v12 }
 0x424   : > { %v5571_v58 = vrot.slane %v5569_v18, 5  ;;  %v14273_v37 = vpop.f32.mrf.mxu3  ;;  %5725 = vst [vmem:[#allocation4 + $0x368] sm:$0xf] %v5586_v48  ;;  %v6777_v56 = vld [vmem:[#allocation3 + $0x84] sm:$0xf]  ;;  %v5603_v42 = vrot.slane %v5601_v27, 5 }
 0x425   : > { %9365 = vmatmul.bf16.gmra.mxu2 %v10450_v26  ;;  %v14277_v21 = vpop.f32.mrf.mxu2  ;;  %4628 = vst [vmem:[#allocation3 + $0xcc] sm:$0x1] %v4627_v53  ;;  %v7304_v26 = vld [vmem:[#allocation3 + $0x84] sm:$0xf]  ;;  %v10399_v16 = vld [vmem:[#allocation4 + $0x3c] sm:$0xf0] }
 0x426   : > { %v5572_v15 = vsel %vm11610_vm10, %v5567_v55, %v5571_v58  ;;  %15227 = vst [vmem:[#allocation38_spill] sm:$0xff] %v14277_v21  ;;  %v10441_v55 = vld [vmem:[#allocation4 + $0x68] sm:$0xf]  ;;  %v5590_v58 = vor.u32 %v5589_v33, %v5585_v43  ;;  %v6481_v24 = vshll.u32 %v6282_v28, 16  ;;  %v6944_v48 = vshrl.u32 %v6777_v56, 16 }
 0x427   : > { %5724 = vst [vmem:[#allocation4 + $0x344] sm:$0xf] %v5572_v15  ;;  %v10442_v18 = vor.u32 %v11274_v44, %v10441_v55  ;;  %v6478_v15 = vshrl.u32 %v6282_v28, 16  ;;  %v7305_v34 = vld [vmem:[#allocation3 + $0x88] sm:$0xf]  ;;  %v5607_v53 = vshll.u32 %v5277_v32, 16  ;;  %v5604_v12 = vor.u32 %v5603_v42, %v5600_v57 }
 0x428   : > { %v11454_v44 = vld [vmem:[%s15110_s3 + $0x1a8] sm:$0xff]  ;;  %v7479_v55 = vshrl.u32 %v7304_v26, 16  ;;  %v7482_v21 = vshll.u32 %v7304_v26, 16  ;;  %v10483_v8 = vld [vmem:[#allocation4 + $0xfc] sm:$0xf0]  ;;  %v14293_v22 = vpop.f32.mrf.mxu1  ;;  %v7488_v1 = vshll.u32 %v7305_v34, 16 }
 0x429   : > { %v6283_v28 = vld [vmem:[#allocation3 + $0x88] sm:$0xf]  ;;  %v14291_v23 = vpop.f32.mrf.mxu0  ;;  %15230 = vst [vmem:[#allocation41_spill] sm:$0xff] %v14293_v22  ;;  %9794 = vmatpush.bf16.msra.mxu3 %v11454_v44  ;;  %v14295_v60 = vrot.slane %v6478_v15, 4  ;;  %v7492_v54 = vshrl.u32 %v7305_v34, 16  ;;  %v5611_v47 = vshrl.u32 %v5277_v32, 16 }
 0x42a   : > { %15229 = vst [vmem:[#allocation40_spill] sm:$0xff] %v14291_v23  ;;  %v11284_v26 = vld [vmem:[#allocation4 + $0xdc] sm:$0xf]  ;;  %v14297_v2 = vrot.slane %v6944_v48, 7  ;;  %v6483_v57 = vrot.slane %v6481_v24, 5  ;;  %v6947_v42 = vshll.u32 %v6777_v56, 16 }
 0x42b   : > { %v10486_v23 = vor.u32 %v11284_v26, %v10483_v8  ;;  %v7481_v22 = vrot.slane %v7479_v55, 4  ;;  %v6487_v44 = vshll.u32 %v6283_v28, 16  ;;  %v6491_v15 = vshrl.u32 %v6283_v28, 16  ;;  %v4629_v24 = vld [vmem:[#allocation3 + $0xdc] sm:$0x1] }
 0x42c   : > { %9494 = vmatmul.bf16.gmra.mxu3 %v10742_v39  ;;  %v14284_v11 = vpop.f32.mrf.mxu3  ;;  %v11260_v39 = vld [vmem:[#allocation4 + $0x1c] sm:$0xf]  ;;  %v5275_v27 = vld [vmem:[#allocation3 + $0xcc] sm:$0x1]  ;;  %v5605_v13 = vrot.slane %v5604_v12, 4  ;;  %v14306_v34 = vrot.slane %v7488_v1, 5 }
 0x42d   : > { %15228 = vst [vmem:[#allocation39_spill] sm:$0xff] %v14284_v11  ;;  %v14289_v43 = vpop.f32.mrf.mxu2  ;;  %v10402_v33 = vor.u32 %v11260_v39, %v10399_v16  ;;  %v5593_v25 = vshll.u32 %v5275_v27, 16  ;;  %v14299_v16 = vld [vmem:[#allocation3 + $0x88] sm:$0xf]  ;;  %v14301_v39 = vrot.slane %v5607_v53, 5  ;;  %v7484_v27 = vrot.slane %v7482_v21, 5 }
 0x42e   : > { %v6953_v48 = vshrl.u32 %v14299_v16, 16  ;;  %v7494_v53 = vrot.slane %v7492_v54, 4  ;;  %v11361_v21 = vld [vmem:[#allocation4 + $0x340] sm:$0xf0]  ;;  %v6776_v55 = vld [vmem:[#allocation3 + $0x80] sm:$0x8] }
 0x42f   : > { %v5622_v8 = vshrl.u32 %v5279_v38, 16  ;;  %v5625_v28 = vshll.u32 %v5279_v38, 16  ;;  %v4630_v1 = vsel %vm12180_vm7, 0, %v4629_v24  ;;  %v6939_v54 = vshrl.u32 %v6776_v55, 16  ;;  %v5280_v55 = vld [vmem:[#allocation3 + $0xe8] sm:$0xf] }
 0x430   : > { %4631 = vst [vmem:[#allocation3 + $0xdc] sm:$0x1] %v4630_v1  ;;  %v14321_v38 = vpop.f32.mrf.mxu1  ;;  %v6955_v24 = vrot.slane %v6953_v48, 7 }
 0x431   : > { %v14319_v46 = vpop.f32.mrf.mxu0  ;;  %15234 = vst [vmem:[#allocation45_spill] sm:$0xff] %v14321_v38  ;;  %v6781_v38 = vld [vmem:[#allocation3 + $0x98] sm:$0xf] }
 0x432   : > { %9983 = vmatmul.bf16.gmra.mxu1 %v10442_v18  ;;  %v5591_v18 = vrot.slane %v5590_v58, 4  ;;  %v5595_v58 = vrot.slane %v5593_v25, 5  ;;  %v6949_v25 = vor.u32 %v6947_v42, %v14297_v2  ;;  %v6484_v42 = vor.u32 %v6483_v57, %v14295_v60  ;;  %15233 = vst [vmem:[#allocation44_spill] sm:$0xff] %v14319_v46  ;;  %v10435_v57 = vld [vmem:[#allocation4 + $0x84] sm:$0xf0] }
 0x433   : > { %9889 = vmatmul.bf16.vlgmr.msra.gmra.mxu0 %v10402_v33  ;;  %v5613_v33 = vrot.slane %v5611_v47, 4  ;;  %v10777_v47 = vld [vmem:[#allocation4 + $0x320] sm:$0xf]  ;;  %v5624_v60 = vrot.slane %v5622_v8, 4 }
 0x434   : > { %v5596_v32 = vsel %vm11610_vm10, %v5591_v18, %v5595_v58  ;;  %v14309_v56 = vpop.f32.mrf.mxu3  ;;  %v11283_v18 = vld [vmem:[#allocation4 + $0xd0] sm:$0xf0]  ;;  %v10778_v26 = vor.u32 %v11361_v21, %v10777_v47  ;;  %v10361_v58 = vrot.slane %v6939_v54, 11 }
 0x435   : > { %9370 = vmatmul.bf16.gmra.mxu2 %v10486_v23  ;;  %5726 = vst [vmem:[#allocation4 + $0x38c] sm:$0xf] %v5596_v32  ;;  %v5610_v23 = vsel %vm11610_vm10, %v5605_v13, %v14301_v39  ;;  %v14316_v12 = vpop.f32.mrf.mxu2  ;;  %v7485_v32 = vor.u32 %v7484_v27, %v7481_v22  ;;  %v6493_v13 = vrot.slane %v6491_v15, 4  ;;  %v10478_v1 = vor.u32 %v11283_v18, %v10477_v49  ;;  %v11269_v49 = vld [vmem:[#allocation4 + $0x64] sm:$0xf] }
 0x436   : > { %15231 = vst [vmem:[#allocation42_spill] sm:$0xff] %v14309_v56  ;;  %v6489_v56 = vrot.slane %v6487_v44, 5  ;;  %v6950_v21 = vsel %vm11623_vm11, %v10361_v58, %v6949_v25  ;;  %v5614_v54 = vor.u32 %v5613_v33, %v14301_v39  ;;  %v5627_v22 = vrot.slane %v5625_v28, 5  ;;  %v10519_v39 = vld [vmem:[#allocation4 + $0x144] sm:$0xf0] }
 0x437   : > { %5727 = vst [vmem:[#allocation4 + $0x3b0] sm:$0xf] %v5610_v23  ;;  %v7495_v23 = vor.u32 %v7494_v53, %v14306_v34  ;;  %v6956_v27 = vshll.u32 %v14299_v16, 16  ;;  %v6485_v44 = vrot.slane %v6484_v42, 4  ;;  %v6951_v15 = vrot.slane %v14297_v2, 4 }
 0x438   : > { %15232 = vst [vmem:[#allocation43_spill] sm:$0xff] %v14316_v12  ;;  %v6494_v48 = vor.u32 %v6493_v13, %v6489_v56  ;;  %v5631_v53 = vshll.u32 %v5280_v55, 16  ;;  %v7486_v18 = vrot.slane %v7485_v32, 4  ;;  %v10438_v58 = vor.u32 %v11269_v49, %v10435_v57  ;;  %v5278_v33 = vld [vmem:[#allocation3 + $0xdc] sm:$0x1] }
 0x439   : > { %7202 = vst [vmem:[#allocation4 + $0x1c8] sm:$0xf] %v6950_v21  ;;  %v7496_v25 = vrot.slane %v7495_v23, 4  ;;  %v5615_v8 = vrot.slane %v5614_v54, 4  ;;  %v5628_v28 = vor.u32 %v5627_v22, %v5624_v60  ;;  %v5617_v12 = vshll.u32 %v5278_v33, 16  ;;  %v14340_v33 = vpop.f32.mrf.mxu0 }
 0x43a   : > { %v7306_v16 = vld [vmem:[#allocation3 + $0x8c] sm:$0x1]  ;;  %v11293_v2 = vld [vmem:[#allocation4 + $0x124] sm:$0xf]  ;;  %v7491_v42 = vsel %vm11610_vm10, %v7486_v18, %v14306_v34  ;;  %v6490_v32 = vsel %vm11610_vm10, %v6485_v44, %v6489_v56  ;;  %v6495_v23 = vrot.slane %v6494_v48, 4  ;;  %v5633_v57 = vrot.slane %v5631_v53, 5  ;;  %v14342_v18 = vpop.f32.mrf.mxu1 }
 0x43b   : > { %v7498_v13 = vshll.u32 %v7306_v16, 16  ;;  %v10522_v54 = vor.u32 %v11293_v2, %v10519_v39  ;;  %v5619_v60 = vrot.slane %v5617_v12, 5  ;;  %7762 = vst [vmem:[#allocation4 + $0x1d0] sm:$0xf] %v7491_v42  ;;  %v5635_v22 = vshrl.u32 %v5280_v55, 16 }
 0x43c   : > { %9499 = vmatmul.bf16.gmra.mxu3 %v10778_v26  ;;  %v14329_v47 = vpop.f32.mrf.mxu3  ;;  %v6958_v26 = vor.u32 %v6956_v27, %v6955_v24  ;;  %6739 = vst [vmem:[#allocation4 + $0x20c] sm:$0xf] %v6490_v32  ;;  %v5629_v34 = vrot.slane %v5628_v28, 4  ;;  %v5282_v16 = vld [vmem:[#allocation3 + $0xf4] sm:$0xf] }
 0x43d   : > { %15235 = vst [vmem:[#allocation46_spill] sm:$0xff] %v14329_v47  ;;  %v14331_v21 = vpop.f32.mrf.mxu2  ;;  %v7500_v27 = vrot.slane %v7498_v13, 5  ;;  %v5620_v56 = vsel %vm11610_vm10, %v5615_v8, %v5619_v60  ;;  %v11370_v44 = vld [vmem:[#allocation4 + $0x388] sm:$0xf0]  ;;  %v5646_v39 = vshrl.u32 %v5282_v16, 16  ;;  %v5649_v28 = vshll.u32 %v5282_v16, 16 }
 0x43e   : > { %v6959_v49 = vsel %vm11623_vm11, %v6951_v15, %v6958_v26  ;;  %15236 = vst [vmem:[#allocation47_spill] sm:$0xff] %v14340_v33  ;;  %v4632_v15 = vld [vmem:[#allocation3 + $0xec] sm:$0x1]  ;;  %v5634_v48 = vsel %vm11610_vm10, %v5629_v34, %v5633_v57  ;;  %v5637_v26 = vrot.slane %v5635_v22, 4  ;;  %v10513_v42 = vld [vmem:[#allocation4 + $0xf8] sm:$0xf] }
 0x43f   : > { %15237 = vst [vmem:[#allocation48_spill] sm:$0xff] %v14342_v18  ;;  %v7501_v12 = vsel %vm11610_vm10, %v7496_v25, %v7500_v27  ;;  %v4633_v8 = vsel %vm12180_vm7, 0, %v4632_v15  ;;  %v11292_v25 = vld [vmem:[#allocation4 + $0x118] sm:$0xf0]  ;;  %v5283_v13 = vld [vmem:[#allocation3 + $0xf8] sm:$0xf] }
 0x440   : > { %7203 = vst [vmem:[#allocation4 + $0x1ec] sm:$0xf] %v6959_v49  ;;  %v5638_v60 = vor.u32 %v5637_v26, %v5633_v57  ;;  %v5648_v22 = vrot.slane %v5646_v39, 4  ;;  %v5651_v27 = vrot.slane %v5649_v28, 5  ;;  %v10471_v49 = vld [vmem:[#allocation4 + $0xcc] sm:$0xf0] }
 0x441   : > { %5728 = vst [vmem:[#allocation4 + $0x3d4] sm:$0xf] %v5620_v56  ;;  %v5655_v34 = vshll.u32 %v5283_v13, 16  ;;  %v11278_v56 = vld [vmem:[#allocation4 + $0xac] sm:$0xf] }
 0x442   : > { %9988 = vmatmul.bf16.gmra.mxu1 %v10478_v1  ;;  %v6284_v1 = vld [vmem:[#allocation3 + $0x8c] sm:$0x1]  ;;  %7763 = vst [vmem:[#allocation4 + $0x1f4] sm:$0xf] %v7501_v12  ;;  %v11453_v12 = vld [vmem:[%s15110_s3 + $0x1a0] sm:$0xff]  ;;  %v5652_v57 = vor.u32 %v5651_v27, %v5648_v22 }
 0x443   : > { %9894 = vmatmul.bf16.gmra.mxu0 %v10438_v58  ;;  %v6497_v24 = vshll.u32 %v6284_v1, 16  ;;  %5729 = vst [vmem:[#allocation4 + $0x3f8] sm:$0xf] %v5634_v48  ;;  %v10813_v1 = vld [vmem:[#allocation4 + $0x368] sm:$0xf]  ;;  %9795 = vmatpush.bf16.msra.mxu3 %v11453_v12 }
 0x444   : > { %v14348_v55 = vpop.f32.mrf.mxu3  ;;  %4634 = vst [vmem:[#allocation3 + $0xec] sm:$0x1] %v4633_v8  ;;  %v10814_v2 = vor.u32 %v11370_v44, %v10813_v1  ;;  %v10474_v44 = vor.u32 %v11278_v56, %v10471_v49  ;;  %v10555_v15 = vld [vmem:[#allocation4 + $0x18c] sm:$0xf0]  ;;  %v11302_v39 = vld [vmem:[#allocation4 + $0x16c] sm:$0xf] }
 0x445   : > { %v6499_v58 = vrot.slane %v6497_v24, 5  ;;  %9375 = vmatmul.bf16.gmra.mxu2 %v10522_v54  ;;  %15238 = vst [vmem:[#allocation49_spill] sm:$0xff] %v14348_v55  ;;  %v14356_v32 = vpop.f32.mrf.mxu2  ;;  %v10514_v24 = vor.u32 %v11292_v25, %v10513_v42  ;;  %v14361_v54 = vpop.f32.mrf.mxu0  ;;  %v6285_v28 = vld [vmem:[#allocation3 + $0x94] sm:$0xf]  ;;  %v5657_v1 = vrot.slane %v5655_v34, 5  ;;  %v10558_v25 = vor.u32 %v11302_v39, %v10555_v15 }
 0x446   : > { %15239 = vst [vmem:[#allocation50_spill] sm:$0xff] %v14356_v32  ;;  %v14370_v8 = vld [vmem:[#allocation3 + $0x94] sm:$0xf]  ;;  %v5659_v42 = vshrl.u32 %v5283_v13, 16  ;;  %v6505_v22 = vshll.u32 %v6285_v28, 16 }
 0x447   : > { %v6500_v53 = vsel %vm11610_vm10, %v6495_v23, %v6499_v58  ;;  %v11445_v23 = vld [vmem:[%s15110_s3 + $0x160] sm:$0xff]  ;;  %15240 = vst [vmem:[#allocation51_spill] sm:$0xff] %v14361_v54  ;;  %v14363_v58 = vpop.f32.mrf.mxu1  ;;  %v6966_v27 = vshrl.u32 %v14370_v8, 16  ;;  %v7307_v56 = vld [vmem:[#allocation3 + $0x94] sm:$0xf] }
 0x448   : > { %6740 = vst [vmem:[#allocation4 + $0x230] sm:$0xf] %v6500_v53  ;;  %9706 = vmatpush.bf16.msra.mxu2 %v11445_v23  ;;  %v5639_v53 = vrot.slane %v5638_v60, 4  ;;  %v5653_v23 = vrot.slane %v5652_v57, 4  ;;  %v6502_v60 = vshrl.u32 %v6285_v28, 16  ;;  %v5661_v57 = vrot.slane %v5659_v42, 4 }
 0x449   : > { %15241 = vst [vmem:[#allocation52_spill] sm:$0xff] %v14363_v58  ;;  %v11379_v34 = vld [vmem:[#allocation4 + $0x3d0] sm:$0xf0]  ;;  %v4635_v15 = vld [vmem:[#allocation3 + $0xfc] sm:$0x1]  ;;  %v14391_v54 = vrot.slane %v6966_v27, 7 }
 0x44a   : > { %v5658_v13 = vsel %vm11610_vm10, %v5653_v23, %v5657_v1  ;;  %v10849_v39 = vld [vmem:[#allocation4 + $0x3b0] sm:$0xf]  ;;  %v11301_v28 = vld [vmem:[#allocation4 + $0x160] sm:$0xf0]  ;;  %v6286_v32 = vld [vmem:[#allocation3 + $0x98] sm:$0xf] }
 0x44b   : > { %v5281_v48 = vld [vmem:[#allocation3 + $0xec] sm:$0x1]  ;;  %5731 = vst [vmem:[#allocation4 + $0x440] sm:$0xf] %v5658_v13  ;;  %v6969_v23 = vshll.u32 %v14370_v8, 16  ;;  %v6504_v13 = vrot.slane %v6502_v60, 4 }
 0x44c   : > { %9504 = vmatmul.bf16.gmra.mxu3 %v10814_v2  ;;  %v14365_v16 = vpop.f32.mrf.mxu3  ;;  %v5641_v26 = vshll.u32 %v5281_v48, 16  ;;  %v7308_v48 = vld [vmem:[#allocation3 + $0x98] sm:$0xf]  ;;  %v6511_v33 = vshll.u32 %v6286_v32, 16  ;;  %v6975_v8 = vshrl.u32 %v6781_v38, 16 }
 0x44d   : > { %15242 = vst [vmem:[#allocation53_spill] sm:$0xff] %v14365_v16  ;;  %v14377_v12 = vpop.f32.mrf.mxu0  ;;  %v7512_v58 = vshll.u32 %v7308_v48, 16  ;;  %v7516_v18 = vshrl.u32 %v7308_v48, 16  ;;  %v6515_v48 = vshrl.u32 %v6286_v32, 16  ;;  %v11287_v60 = vld [vmem:[#allocation4 + $0xf4] sm:$0xf] }
 0x44e   : > { %v5643_v2 = vrot.slane %v5641_v26, 5  ;;  %15243 = vst [vmem:[#allocation54_spill] sm:$0xff] %v14377_v12  ;;  %v10549_v12 = vld [vmem:[#allocation4 + $0x140] sm:$0xf]  ;;  %v10591_v27 = vld [vmem:[#allocation4 + $0x1d4] sm:$0xf0] }
 0x44f   : > { %v14385_v26 = vpop.f32.mrf.mxu1  ;;  %v10550_v42 = vor.u32 %v11301_v28, %v10549_v12  ;;  %v7514_v12 = vrot.slane %v7512_v58, 5  ;;  %v7518_v28 = vrot.slane %v7516_v18, 4  ;;  %v6779_v32 = vld [vmem:[#allocation3 + $0x90] sm:$0x8]  ;;  %v6513_v58 = vrot.slane %v6511_v33, 5 }
 0x450   : > { %v5644_v49 = vsel %vm11610_vm10, %v5639_v53, %v5643_v2  ;;  %v4636_v53 = vsel %vm12180_vm7, 0, %v4635_v15  ;;  %15245 = vst [vmem:[#allocation56_spill] sm:$0xff] %v14385_v26  ;;  %v7506_v2 = vshll.u32 %v7307_v56, 16  ;;  %v11452_v15 = vld [vmem:[%s15110_s3 + $0x198] sm:$0xff]  ;;  %v6507_v26 = vrot.slane %v6505_v22, 5 }
 0x451   : > { %5730 = vst [vmem:[#allocation4 + $0x41c] sm:$0xf] %v5644_v49  ;;  %v10850_v49 = vor.u32 %v11379_v34, %v10849_v39  ;;  %9796 = vmatpush.bf16.msra.mxu3 %v11452_v15  ;;  %v6961_v15 = vshrl.u32 %v6779_v32, 16  ;;  %v11311_v18 = vld [vmem:[#allocation4 + $0x1b4] sm:$0xf] }
 0x452   : > { %9993 = vmatmul.bf16.gmra.mxu1 %v10514_v24  ;;  %v14372_v24 = vpop.f32.mrf.mxu2  ;;  %4637 = vst [vmem:[#allocation3 + $0xfc] sm:$0x1] %v4636_v53  ;;  %v5662_v53 = vor.u32 %v5661_v57, %v5657_v1  ;;  %v7508_v39 = vrot.slane %v7506_v2, 5  ;;  %v11451_v1 = vld [vmem:[%s15110_s3 + $0x190] sm:$0xff]  ;;  %v6508_v55 = vor.u32 %v6507_v26, %v6504_v13  ;;  %v11449_v26 = vld [vmem:[%s15110_s3 + $0x180] sm:$0xff] }
 0x453   : > { %9899 = vmatmul.bf16.gmra.mxu0 %v10474_v44  ;;  %v10362_v16 = vrot.slane %v6961_v15, 11 }
 0x454   : > { %v14379_v44 = vpop.f32.mrf.mxu3  ;;  %v5663_v2 = vrot.slane %v5662_v53, 4  ;;  %v7519_v53 = vor.u32 %v7518_v28, %v7514_v12  ;;  %v6509_v13 = vrot.slane %v6508_v55, 4 }
 0x455   : > { %9380 = vmatmul.bf16.gmra.mxu2 %v10558_v25  ;;  %15244 = vst [vmem:[#allocation55_spill] sm:$0xff] %v14379_v44  ;;  %v7503_v25 = vshrl.u32 %v7307_v56, 16  ;;  %v10507_v56 = vld [vmem:[#allocation4 + $0x114] sm:$0xf0]  ;;  %9797 = vmatpush.bf16.msra.mxu3 %v11451_v1 }
 0x456   : > { %v10510_v22 = vor.u32 %v11287_v60, %v10507_v56  ;;  %v10594_v56 = vor.u32 %v11311_v18, %v10591_v27  ;;  %v6973_v27 = vrot.slane %v14391_v54, 4  ;;  %v6514_v55 = vsel %vm11610_vm10, %v6509_v13, %v6513_v58  ;;  %v10585_v18 = vld [vmem:[#allocation4 + $0x188] sm:$0xf] }
 0x457   : > { %v7505_v34 = vrot.slane %v7503_v25, 4  ;;  %v6971_v25 = vor.u32 %v6969_v23, %v14391_v54  ;;  %v6977_v23 = vrot.slane %v6975_v8, 7  ;;  %v7520_v8 = vrot.slane %v7519_v53, 4  ;;  %6741 = vst [vmem:[#allocation4 + $0x254] sm:$0xf] %v6514_v55 }
 0x458   : > { %v10621_v55 = vld [vmem:[#allocation4 + $0x1d0] sm:$0xf] }
 0x459   : > { %v5284_v57 = vld [vmem:[#allocation3 + $0xfc] sm:$0x1]  ;;  %v7509_v47 = vor.u32 %v7508_v39, %v7505_v34  ;;  %v6972_v1 = vsel %vm11623_vm11, %v10362_v16, %v6971_v25 }
 0x45a   : > { %v14393_v46 = vpop.f32.mrf.mxu2  ;;  %7204 = vst [vmem:[#allocation4 + $0x210] sm:$0xf] %v6972_v1  ;;  %v10543_v1 = vld [vmem:[#allocation4 + $0x15c] sm:$0xf0] }
 0x45b   : > { %15246 = vst [vmem:[#allocation57_spill] sm:$0xff] %v14393_v46  ;;  %v11450_v46 = vld [vmem:[%s15110_s3 + $0x188] sm:$0xff]  ;;  %v7510_v34 = vrot.slane %v7509_v47, 4 }
 0x45c   : > { %9509 = vmatmul.bf16.gmra.mxu3 %v10850_v49  ;;  %v14395_v49 = vpop.f32.mrf.mxu0  ;;  %v14397_v44 = vpop.f32.mrf.mxu3 }
 0x45d   : > { %15247 = vst [vmem:[#allocation58_spill] sm:$0xff] %v14395_v49  ;;  %v6517_v49 = vrot.slane %v6515_v48, 4  ;;  %v11388_v48 = vld [vmem:[#allocation4 + $0x418] sm:$0xf0]  ;;  %9798 = vmatpush.bf16.msra.mxu3 %v11450_v46  ;;  %v7515_v54 = vsel %vm11610_vm10, %v7510_v34, %v7514_v12 }
 0x45e   : > { %15248 = vst [vmem:[#allocation59_spill] sm:$0xff] %v14397_v44  ;;  %v14406_v44 = vpop.f32.mrf.mxu1  ;;  %v7309_v46 = vld [vmem:[#allocation3 + $0x9c] sm:$0x1] }
 0x45f   : > { %15249 = vst [vmem:[#allocation60_spill] sm:$0xff] %v14406_v44  ;;  %v6518_v32 = vor.u32 %v6517_v49, %v6513_v58  ;;  %v7522_v49 = vshll.u32 %v7309_v46, 16  ;;  %v10921_v46 = vld [vmem:[#allocation4 + $0x440] sm:$0xf] }
 0x460   : > { %7764 = vst [vmem:[#allocation4 + $0x218] sm:$0xf] %v7515_v54 }
 0x461   : > { %9799 = vmatpush.bf16.msra.mxu3 %v11449_v26  ;;  %v6519_v15 = vrot.slane %v6518_v32, 4 }
 0x462   : > { %9998 = vmatmul.bf16.gmra.mxu1 %v10550_v42  ;;  %v5665_v42 = vshll.u32 %v5284_v57, 16  ;;  %v14412_v57 = vpop.f32.mrf.mxu2 }
 0x463   : > { %9904 = vmatmul.bf16.gmra.mxu0 %v10510_v22  ;;  %v6978_v22 = vshll.u32 %v6781_v38, 16  ;;  %v10885_v38 = vld [vmem:[#allocation4 + $0x3f8] sm:$0xf] }
 0x464   : > { %v5667_v60 = vrot.slane %v5665_v42, 5  ;;  %v14418_v28 = vpop.f32.mrf.mxu3  ;;  %v14420_v16 = vpop.f32.mrf.mxu0  ;;  %v10886_v25 = vor.u32 %v11388_v48, %v10885_v38  ;;  %v6287_v42 = vld [vmem:[#allocation3 + $0x9c] sm:$0x1] }
 0x465   : > { %9385 = vmatmul.bf16.gmra.mxu2 %v10594_v56  ;;  %v6980_v39 = vor.u32 %v6978_v22, %v6977_v23  ;;  %15250 = vst [vmem:[#allocation61_spill] sm:$0xff] %v14418_v28  ;;  %v6521_v47 = vshll.u32 %v6287_v42, 16  ;;  %v7524_v23 = vrot.slane %v7522_v49, 5  ;;  %v11296_v22 = vld [vmem:[#allocation4 + $0x13c] sm:$0xf] }
 0x466   : > { %v5668_v33 = vsel %vm11610_vm10, %v5663_v2, %v5667_v60  ;;  %15251 = vst [vmem:[#allocation62_spill] sm:$0xff] %v14420_v16  ;;  %v11310_v2 = vld [vmem:[#allocation4 + $0x1a8] sm:$0xf0]  ;;  %v11444_v60 = vld [vmem:[%s15110_s3 + $0x158] sm:$0xff]  ;;  %v14431_v12 = vpop.f32.mrf.mxu1  ;;  %v10546_v26 = vor.u32 %v11296_v22, %v10543_v1  ;;  %v11319_v42 = vld [vmem:[#allocation4 + $0x1f0] sm:$0xf0] }
 0x467   : > { %5732 = vst [vmem:[#allocation4 + $0x464] sm:$0xf] %v5668_v33  ;;  %v10586_v56 = vor.u32 %v11310_v2, %v10585_v18  ;;  %v6981_v53 = vsel %vm11623_vm11, %v6973_v27, %v6980_v39  ;;  %v6523_v33 = vrot.slane %v6521_v47, 5  ;;  %9707 = vmatpush.bf16.msra.mxu2 %v11444_v60  ;;  %v7525_v58 = vsel %vm11610_vm10, %v7520_v8, %v7524_v23  ;;  %v10627_v27 = vld [vmem:[#allocation4 + $0x21c] sm:$0xf0] }
 0x468   : > { %15252 = vst [vmem:[#allocation63_spill] sm:$0xff] %v14431_v12  ;;  %v11320_v39 = vld [vmem:[#allocation4 + $0x1fc] sm:$0xf]  ;;  %v10579_v18 = vld [vmem:[#allocation4 + $0x1a4] sm:$0xf0] }
 0x469   : > { %7205 = vst [vmem:[#allocation4 + $0x234] sm:$0xf] %v6981_v53  ;;  %v6524_v48 = vsel %vm11610_vm10, %v6519_v15, %v6523_v33  ;;  %v10630_v38 = vor.u32 %v11320_v39, %v10627_v27  ;;  %v10622_v15 = vor.u32 %v11319_v42, %v10621_v55  ;;  %v7311_v60 = vld [vmem:[#allocation3 + $0xa8] sm:$0xf]  ;;  %v11305_v53 = vld [vmem:[#allocation4 + $0x184] sm:$0xf] }
 0x46a   : > { %7765 = vst [vmem:[#allocation4 + $0x23c] sm:$0xf] %v7525_v58  ;;  %v14437_v32 = vpop.f32.mrf.mxu2  ;;  %v10582_v33 = vor.u32 %v11305_v53, %v10579_v18  ;;  %v10663_v58 = vld [vmem:[#allocation4 + $0x264] sm:$0xf0]  ;;  %v7540_v27 = vshrl.u32 %v7311_v60, 16 }
 0x46b   : > { %15253 = vst [vmem:[#allocation64_spill] sm:$0xff] %v14437_v32  ;;  %v11329_v39 = vld [vmem:[#allocation4 + $0x244] sm:$0xf]  ;;  %v10397_v12 = vld [vmem:[#allocation4 + $0x18] sm:$0xf] }
 0x46c   : > { %9514 = vmatmul.bf16.gmra.mxu3 %v10886_v25  ;;  %6742 = vst [vmem:[#allocation4 + $0x278] sm:$0xf] %v6524_v48  ;;  %v14439_v13 = vpop.f32.mrf.mxu0  ;;  %v14441_v34 = vpop.f32.mrf.mxu3  ;;  %v6783_v42 = vld [vmem:[#allocation3 + $0xa4] sm:$0xf]  ;;  %v7542_v53 = vrot.slane %v7540_v27, 4 }
 0x46d   : > { %15254 = vst [vmem:[#allocation65_spill] sm:$0xff] %v14439_v13  ;;  %v6289_v27 = vld [vmem:[#allocation3 + $0xa8] sm:$0xf]  ;;  %v10657_v44 = vld [vmem:[#allocation4 + $0x218] sm:$0xf] }
 0x46e   : > { %15255 = vst [vmem:[#allocation66_spill] sm:$0xff] %v14441_v34  ;;  %v14443_v25 = vpop.f32.mrf.mxu1  ;;  %v11397_v8 = vld [vmem:[#allocation4 + $0x460] sm:$0xf0] }
 0x46f   : > { %15256 = vst [vmem:[#allocation67_spill] sm:$0xff] %v14443_v25  ;;  %v10922_v54 = vor.u32 %v11397_v8, %v10921_v46  ;;  %v10666_v8 = vor.u32 %v11329_v39, %v10663_v58  ;;  %v14460_v46 = vld [vmem:[%s15111_s4] ss:$0 sm:$0xff]  ;;  %v11264_v58 = vld [vmem:[#allocation4 + $0x38] sm:$0xf0]  ;;  %v6988_v39 = vshrl.u32 %v6783_v42, 16 }
 0x471   : > { %v14470_v13 = vrot.slane %v6988_v39, 7  ;;  %v11314_v39 = vld [vmem:[#allocation4 + $0x1cc] sm:$0xf] }
 0x472   : > { %10003 = vmatmul.bf16.gmra.mxu1 %v10586_v56  ;;  %v7310_v56 = vld [vmem:[#allocation3 + $0xa4] sm:$0xf] }
 0x473   : > { %9909 = vmatmul.bf16.gmra.mxu0 %v10546_v26  ;;  %v7527_v22 = vshrl.u32 %v7310_v56, 16  ;;  %v7530_v48 = vshll.u32 %v7310_v56, 16  ;;  %v7536_v26 = vshll.u32 %v7311_v60, 16  ;;  %v9268_v60 = vadd.f32 %v14460_v46, %v13316_v41 }
 0x474   : > { %v14447_v49 = vpop.f32.mrf.mxu0  ;;  %v14449_v47 = vpop.f32.mrf.mxu3 }
 0x475   : > { %9390 = vmatmul.bf16.gmra.mxu2 %v10630_v38  ;;  %15257 = vst [vmem:[#allocation68_spill] sm:$0xff] %v14447_v49  ;;  %v7532_v55 = vrot.slane %v7530_v48, 5  ;;  %v7538_v18 = vrot.slane %v7536_v26, 5  ;;  %v11328_v48 = vld [vmem:[#allocation4 + $0x238] sm:$0xf0]  ;;  %v10398_v26 = vor.u32 %v11264_v58, %v10397_v12  ;;  %v6539_v12 = vshrl.u32 %v6289_v27, 16 }
 0x476   : > { %15258 = vst [vmem:[#allocation69_spill] sm:$0xff] %v14449_v47  ;;  %v14451_v23 = vpop.f32.mrf.mxu1  ;;  %v6784_v49 = vld [vmem:[#allocation3 + $0xa8] sm:$0xf]  ;;  %v10658_v41 = vor.u32 %v11328_v48, %v10657_v44  ;;  %v7313_v47 = vld [vmem:[#allocation3 + $0xb4] sm:$0xf] }
 0x477   : > { %v14445_v2 = vpop.f32.mrf.mxu2  ;;  %15259 = vst [vmem:[#allocation70_spill] sm:$0xff] %v14451_v23  ;;  %v6997_v58 = vshrl.u32 %v6784_v49, 16  ;;  %v7312_v44 = vld [vmem:[#allocation3 + $0xac] sm:$0x1]  ;;  %v7551_v34 = vshrl.u32 %v7313_v47, 16  ;;  %v6541_v36 = vrot.slane %v6539_v12, 4 }
 0x47c   : > { %9519 = vmatmul.bf16.gmra.mxu3 %v10922_v54  ;;  %v14455_v38 = vpop.f32.mrf.mxu0  ;;  %v7529_v54 = vrot.slane %v7527_v22, 4 }
 0x47d   : > { %15260 = vst [vmem:[#allocation71_spill] sm:$0xff] %v14455_v38 }
 0x47e   : > { %v14462_v56 = vpop.f32.mrf.mxu3  ;;  %v7533_v38 = vor.u32 %v7532_v55, %v7529_v54  ;;  %v6991_v54 = vshll.u32 %v6783_v42, 16 }
 0x47f   : > { %v14453_v1 = vpop.f32.mrf.mxu2  ;;  %15261 = vst [vmem:[#allocation72_spill] sm:$0xff] %v14462_v56 }
 0x480   : > { %v7534_v55 = vrot.slane %v7533_v38, 4 }
 0x482   : > { %10008 = vmatmul.bf16.gmra.mxu1 %v10622_v15  ;;  %v6288_v15 = vld [vmem:[#allocation3 + $0xa4] sm:$0xf]  ;;  %v7539_v48 = vsel %vm11610_vm10, %v7534_v55, %v7538_v18 }
 0x483   : > { %9914 = vmatmul.bf16.gmra.mxu0 %v10582_v33  ;;  %v14466_v33 = vpop.f32.mrf.mxu1  ;;  %v6526_v23 = vshrl.u32 %v6288_v15, 16  ;;  %v6529_v25 = vshll.u32 %v6288_v15, 16  ;;  %7766 = vst [vmem:[#allocation4 + $0x260] sm:$0xf] %v7539_v48  ;;  %v7553_v48 = vrot.slane %v7551_v34, 4 }
 0x484   : > { %15262 = vst [vmem:[#allocation73_spill] sm:$0xff] %v14466_v33  ;;  %v11443_v33 = vld [vmem:[%s15110_s3 + $0x150] sm:$0xff]  ;;  %v10433_v34 = vld [vmem:[#allocation4 + $0x60] sm:$0xf] }
 0x485   : > { %9395 = vmatmul.bf16.gmra.mxu2 %v10666_v8  ;;  %v7543_v8 = vor.u32 %v7542_v53, %v7538_v18  ;;  %v6528_v16 = vrot.slane %v6526_v23, 4  ;;  %v6531_v15 = vrot.slane %v6529_v25, 5  ;;  %v6535_v53 = vshll.u32 %v6289_v27, 16  ;;  %v11338_v18 = vld [vmem:[#allocation4 + $0x28c] sm:$0xf] }
 0x486   : > { %9708 = vmatpush.bf16.msra.mxu2 %v11443_v33  ;;  %v6993_v25 = vor.u32 %v6991_v54, %v14470_v13  ;;  %v14480_v23 = vpop.f32.mrf.mxu3  ;;  %v7546_v27 = vshll.u32 %v7312_v44, 16  ;;  %v7314_v33 = vld [vmem:[#allocation3 + $0xb8] sm:$0xf] }
 0x487   : > { %v9356_v32 = vpop.f32.mrf.mxu2  ;;  %v7544_v56 = vrot.slane %v7543_v8, 4  ;;  %15264 = vst [vmem:[#allocation75_spill] sm:$0xff] %v14480_v23  ;;  %v6532_v35 = vor.u32 %v6531_v15, %v6528_v16  ;;  %v6537_v54 = vrot.slane %v6535_v53, 5  ;;  %v6999_v23 = vrot.slane %v6997_v58, 7  ;;  %v11273_v53 = vld [vmem:[#allocation4 + $0x80] sm:$0xf0] }
 0x488   : > { %v14468_v22 = vadd.f32 %v9356_v32, %v9268_v60  ;;  %v14475_v32 = vpop.f32.mrf.mxu0  ;;  %v10615_v60 = vld [vmem:[#allocation4 + $0x1ec] sm:$0xf0]  ;;  %v7548_v55 = vrot.slane %v7546_v27, 5  ;;  %v7564_v3 = vshrl.u32 %v7314_v33, 16  ;;  %v7000_v16 = vshll.u32 %v6784_v49, 16 }
 0x489   : > { %15263 = vst [vmem:[#allocation74_spill] sm:$0xff] %v14475_v32  ;;  %v10618_v38 = vor.u32 %v11314_v39, %v10615_v60  ;;  %v10699_v32 = vld [vmem:[#allocation4 + $0x2ac] sm:$0xf0]  ;;  %v7560_v39 = vshll.u32 %v7314_v33, 16  ;;  %v9273_v15 = vadd.f32 %v14460_v46, %v13372_v63  ;;  %v6533_v12 = vrot.slane %v6532_v35, 4 }
 0x48a   : > { %v10702_v60 = vor.u32 %v11338_v18, %v10699_v32  ;;  %v7549_v44 = vsel %vm11610_vm10, %v7544_v56, %v7548_v55  ;;  %v6542_v32 = vor.u32 %v6541_v36, %v6537_v54  ;;  %v7002_v58 = vor.u32 %v7000_v16, %v6999_v23  ;;  %v10693_v23 = vld [vmem:[#allocation4 + $0x260] sm:$0xf]  ;;  %v11323_v16 = vld [vmem:[#allocation4 + $0x214] sm:$0xf] }
 0x48b   : > { %v14484_v28 = vpop.f32.mrf.mxu1  ;;  %7767 = vst [vmem:[#allocation4 + $0x284] sm:$0xf] %v7549_v44  ;;  %v7566_v56 = vrot.slane %v7564_v3, 4  ;;  %v6995_v49 = vrot.slane %v14470_v13, 4  ;;  %v10434_v18 = vor.u32 %v11273_v53, %v10433_v34  ;;  %v6538_v63 = vsel %vm11610_vm10, %v6533_v12, %v6537_v54  ;;  %v10651_v44 = vld [vmem:[#allocation4 + $0x234] sm:$0xf0] }
 0x48c   : > { %9800 = vmatmul.bf16.vlgmr.msra.gmra.mxu3 %v10398_v26  ;;  %v6782_v26 = vld [vmem:[#allocation3 + $0xa0] sm:$0x8]  ;;  %15265 = vst [vmem:[#allocation76_spill] sm:$0xff] %v14484_v28  ;;  %v6543_v36 = vrot.slane %v6542_v32, 4  ;;  %v7315_v54 = vld [vmem:[#allocation3 + $0xbc] sm:$0x1]  ;;  %v10654_v12 = vor.u32 %v11323_v16, %v10651_v44 }
 0x48d   : > { %v6983_v8 = vshrl.u32 %v6782_v26, 16  ;;  %6743 = vst [vmem:[#allocation4 + $0x29c] sm:$0xf] %v6538_v63 }
 0x48f   : > { %v14482_v42 = vpop.f32.mrf.mxu2  ;;  %v10363_v11 = vrot.slane %v6983_v8, 11  ;;  %v14499_v33 = vpop.f32.mrf.mxu3 }
 0x490   : > { %v14490_v28 = vpop.f32.mrf.mxu0  ;;  %15268 = vst [vmem:[#allocation79_spill] sm:$0xff] %v14499_v33 }
 0x491   : > { %15266 = vst [vmem:[#allocation77_spill] sm:$0xff] %v14490_v28 }
 0x492   : > { %10013 = vmatmul.bf16.gmra.mxu1 %v10658_v41  ;;  %v7554_v41 = vshll.u32 %v7313_v47, 16  ;;  %v6994_v47 = vsel %vm11623_vm11, %v10363_v11, %v6993_v25  ;;  %v11337_v55 = vld [vmem:[#allocation4 + $0x280] sm:$0xf0] }
 0x493   : > { %9919 = vmatmul.bf16.gmra.mxu0 %v10618_v38  ;;  %7206 = vst [vmem:[#allocation4 + $0x258] sm:$0xf] %v6994_v47  ;;  %v7562_v38 = vrot.slane %v7560_v39, 5  ;;  %v14494_v11 = vpop.f32.mrf.mxu1  ;;  %v10694_v47 = vor.u32 %v11337_v55, %v10693_v23 }
 0x494   : > { %v7556_v26 = vrot.slane %v7554_v41, 5  ;;  %15267 = vst [vmem:[#allocation78_spill] sm:$0xff] %v14494_v11  ;;  %v6290_v41 = vld [vmem:[#allocation3 + $0xac] sm:$0x1]  ;;  %v6291_v11 = vld [vmem:[#allocation3 + $0xb4] sm:$0xf] }
 0x495   : > { %9400 = vmatmul.bf16.gmra.mxu2 %v10702_v60  ;;  %v6545_v35 = vshll.u32 %v6290_v41, 16  ;;  %v7567_v3 = vor.u32 %v7566_v56, %v7562_v38  ;;  %v7003_v60 = vsel %vm11623_vm11, %v6995_v49, %v7002_v58  ;;  %v10735_v56 = vld [vmem:[#allocation4 + $0x2f4] sm:$0xf0]  ;;  %v7317_v41 = vld [vmem:[#allocation3 + $0xc8] sm:$0xf] }
 0x496   : > { %v7557_v8 = vor.u32 %v7556_v26, %v7553_v48  ;;  %7207 = vst [vmem:[#allocation4 + $0x27c] sm:$0xf] %v7003_v60  ;;  %v7316_v48 = vld [vmem:[#allocation3 + $0xc4] sm:$0xf]  ;;  %v11347_v49 = vld [vmem:[#allocation4 + $0x2d4] sm:$0xf] }
 0x497   : > { %v6547_v13 = vrot.slane %v6545_v35, 5  ;;  %v7568_v53 = vrot.slane %v7567_v3, 4  ;;  %v7578_v34 = vshll.u32 %v7316_v48, 16  ;;  %v7584_v35 = vshll.u32 %v7317_v41, 16 }
 0x498   : > { %v9361_v27 = vpop.f32.mrf.mxu2  ;;  %v7558_v39 = vrot.slane %v7557_v8, 4  ;;  %v14505_v26 = vpop.f32.mrf.mxu0  ;;  %v7575_v8 = vshrl.u32 %v7316_v48, 16  ;;  %v7588_v23 = vshrl.u32 %v7317_v41, 16  ;;  %v10687_v41 = vld [vmem:[#allocation4 + $0x27c] sm:$0xf0] }
 0x499   : > { %v14496_v25 = vadd.f32 %v9361_v27, %v9273_v15  ;;  %15269 = vst [vmem:[#allocation80_spill] sm:$0xff] %v14505_v26  ;;  %v6548_v32 = vsel %vm11610_vm10, %v6543_v36, %v6547_v13  ;;  %v7570_v27 = vshll.u32 %v7315_v54, 16  ;;  %v14515_v36 = vpop.f32.mrf.mxu3  ;;  %v7580_v60 = vrot.slane %v7578_v34, 5 }
 0x49a   : > { %v7563_v15 = vsel %vm11610_vm10, %v7558_v39, %v7562_v38  ;;  %6744 = vst [vmem:[#allocation4 + $0x2c0] sm:$0xf] %v6548_v32  ;;  %v10738_v38 = vor.u32 %v11347_v49, %v10735_v56  ;;  %v7577_v55 = vrot.slane %v7575_v8, 4  ;;  %v9278_v39 = vadd.f32 %v14460_v46, %v13436_v45  ;;  %v11442_v49 = vld [vmem:[%s15110_s3 + $0x148] sm:$0xff] }
 0x49b   : > { %7768 = vst [vmem:[#allocation4 + $0x2a8] sm:$0xf] %v7563_v15  ;;  %v14513_v63 = vpop.f32.mrf.mxu1  ;;  %v7586_v13 = vrot.slane %v7584_v35, 5  ;;  %v7590_v48 = vrot.slane %v7588_v23, 4  ;;  %v10469_v15 = vld [vmem:[#allocation4 + $0xa8] sm:$0xf]  ;;  %9709 = vmatpush.bf16.msra.mxu2 %v11442_v49 }
 0x49c   : > { %9805 = vmatmul.bf16.gmra.mxu3 %v10434_v18  ;;  %v7572_v18 = vrot.slane %v7570_v27, 5  ;;  %15270 = vst [vmem:[#allocation81_spill] sm:$0xff] %v14513_v63  ;;  %v7581_v54 = vor.u32 %v7580_v60, %v7577_v55  ;;  %v7320_v35 = vld [vmem:[#allocation3 + $0xd8] sm:$0xf]  ;;  %v11332_v23 = vld [vmem:[#allocation4 + $0x25c] sm:$0xf] }
 0x49d   : > { %15271 = vst [vmem:[#allocation82_spill] sm:$0xff] %v14515_v36  ;;  %v7608_v49 = vshll.u32 %v7320_v35, 16 }
 0x49e   : > { %v7573_v3 = vsel %vm11610_vm10, %v7568_v53, %v7572_v18  ;;  %v7591_v53 = vor.u32 %v7590_v48, %v7586_v13  ;;  %v7582_v34 = vrot.slane %v7581_v54, 4  ;;  %v7319_v18 = vld [vmem:[#allocation3 + $0xd4] sm:$0xf]  ;;  %v10771_v48 = vld [vmem:[#allocation4 + $0x33c] sm:$0xf0] }
 0x49f   : > { %7769 = vst [vmem:[#allocation4 + $0x2cc] sm:$0xf] %v7573_v3  ;;  %v7318_v3 = vld [vmem:[#allocation3 + $0xcc] sm:$0x1]  ;;  %v7599_v54 = vshrl.u32 %v7319_v18, 16 }
 0x4a0   : > { %v14511_v58 = vpop.f32.mrf.mxu2  ;;  %v14521_v44 = vpop.f32.mrf.mxu0  ;;  %v7587_v55 = vsel %vm11610_vm10, %v7582_v34, %v7586_v13  ;;  %v7592_v60 = vrot.slane %v7591_v53, 4 }
 0x4a1   : > { %15272 = vst [vmem:[#allocation83_spill] sm:$0xff] %v14521_v44  ;;  %v7601_v53 = vrot.slane %v7599_v54, 4  ;;  %v10505_v54 = vld [vmem:[#allocation4 + $0xf0] sm:$0xf] }
 0x4a2   : > { %10018 = vmatmul.bf16.gmra.mxu1 %v10694_v47  ;;  %v11282_v47 = vld [vmem:[#allocation4 + $0xc8] sm:$0xf0]  ;;  %v10729_v27 = vld [vmem:[#allocation4 + $0x2a8] sm:$0xf]  ;;  %7770 = vst [vmem:[#allocation4 + $0x2f0] sm:$0xf] %v7587_v55 }
 0x4a3   : > { %9924 = vmatmul.bf16.gmra.mxu0 %v10654_v12  ;;  %v10470_v12 = vor.u32 %v11282_v47, %v10469_v15  ;;  %v14525_v56 = vpop.f32.mrf.mxu1  ;;  %v7602_v15 = vshll.u32 %v7319_v18, 16  ;;  %v7610_v55 = vrot.slane %v7608_v49, 5 }
 0x4a4   : > { %15274 = vst [vmem:[#allocation85_spill] sm:$0xff] %v14525_v56  ;;  %v7612_v56 = vshrl.u32 %v7320_v35, 16 }
 0x4a5   : > { %9405 = vmatmul.bf16.gmra.mxu2 %v10738_v38  ;;  %v14530_v38 = vpop.f32.mrf.mxu3  ;;  %v7604_v34 = vrot.slane %v7602_v15, 5 }
 0x4a6   : > { %v11346_v8 = vld [vmem:[#allocation4 + $0x2c8] sm:$0xf0]  ;;  %15275 = vst [vmem:[#allocation86_spill] sm:$0xff] %v14530_v38 }
 0x4a7   : > { %v10730_v45 = vor.u32 %v11346_v8, %v10729_v27  ;;  %v11356_v27 = vld [vmem:[#allocation4 + $0x31c] sm:$0xf] }
 0x4a8   : > { %v9366_v16 = vpop.f32.mrf.mxu2  ;;  %v10774_v63 = vor.u32 %v11356_v27, %v10771_v48  ;;  %v6292_v27 = vld [vmem:[#allocation3 + $0xb8] sm:$0xf] }
 0x4a9   : > { %v14523_v32 = vadd.f32 %v9366_v16, %v9278_v39  ;;  %v10690_v39 = vor.u32 %v11332_v23, %v10687_v41  ;;  %v7594_v16 = vshll.u32 %v7318_v3, 16  ;;  %v9283_v23 = vadd.f32 %v14460_v46, %v13470_v20  ;;  %v6787_v20 = vld [vmem:[#allocation3 + $0xb8] sm:$0xf]  ;;  %v10765_v26 = vld [vmem:[#allocation4 + $0x2f0] sm:$0xf] }
 0x4aa   : > { %v6550_v3 = vshrl.u32 %v6291_v11, 16 }
 0x4ab   : > { %15273 = vst [vmem:[#allocation84_spill] sm:$0xff] %v14523_v32  ;;  %v7596_v8 = vrot.slane %v7594_v16, 5  ;;  %v14540_v41 = vpop.f32.mrf.mxu1  ;;  %v11291_v16 = vld [vmem:[#allocation4 + $0x110] sm:$0xf0] }
 0x4ac   : > { %9810 = vmatmul.bf16.gmra.mxu3 %v10470_v12  ;;  %v14536_v12 = vpop.f32.mrf.mxu0  ;;  %15278 = vst [vmem:[#allocation89_spill] sm:$0xff] %v14540_v41  ;;  %v6552_v41 = vrot.slane %v6550_v3, 4 }
 0x4ad   : > { %15277 = vst [vmem:[#allocation88_spill] sm:$0xff] %v14536_v12  ;;  %v7597_v13 = vsel %vm11610_vm10, %v7592_v60, %v7596_v8  ;;  %v14544_v35 = vpop.f32.mrf.mxu3  ;;  %v7605_v12 = vor.u32 %v7604_v34, %v7601_v53  ;;  %v10723_v34 = vld [vmem:[#allocation4 + $0x2c4] sm:$0xf0] }
 0x4ae   : > { %7771 = vst [vmem:[#allocation4 + $0x314] sm:$0xf] %v7597_v13  ;;  %v10506_v13 = vor.u32 %v11291_v16, %v10505_v54  ;;  %v7322_v16 = vld [vmem:[#allocation3 + $0xe4] sm:$0xf] }
 0x4af   : > { %15279 = vst [vmem:[#allocation90_spill] sm:$0xff] %v14544_v35  ;;  %v6563_v35 = vshrl.u32 %v6292_v27, 16  ;;  %v7606_v38 = vrot.slane %v7605_v12, 4  ;;  %v7626_v33 = vshll.u32 %v7322_v16, 16 }
 0x4b0   : > { %v14534_v47 = vpop.f32.mrf.mxu2 }
 0x4b1   : > { %15276 = vst [vmem:[#allocation87_spill] sm:$0xff] %v14534_v47 }
 0x4b2   : > { %10023 = vmatmul.bf16.gmra.mxu1 %v10730_v45  ;;  %v6786_v45 = vld [vmem:[#allocation3 + $0xb4] sm:$0xf] }
 0x4b3   : > { %9929 = vmatmul.bf16.gmra.mxu0 %v10690_v39  ;;  %v7010_v18 = vshrl.u32 %v6786_v45, 16  ;;  %v7614_v39 = vrot.slane %v7612_v56, 4  ;;  %v7013_v49 = vshll.u32 %v6786_v45, 16  ;;  %v6559_v56 = vshll.u32 %v6292_v27, 16  ;;  %v14552_v53 = vpop.f32.mrf.mxu1  ;;  %v7321_v45 = vld [vmem:[#allocation3 + $0xdc] sm:$0x1] }
 0x4b4   : > { %v14546_v60 = vpop.f32.mrf.mxu0  ;;  %15282 = vst [vmem:[#allocation93_spill] sm:$0xff] %v14552_v53  ;;  %v10807_v53 = vld [vmem:[#allocation4 + $0x384] sm:$0xf0]  ;;  %v7618_v36 = vshll.u32 %v7321_v45, 16 }
 0x4b5   : > { %9410 = vmatmul.bf16.gmra.mxu2 %v10774_v63  ;;  %15280 = vst [vmem:[#allocation91_spill] sm:$0xff] %v14546_v60  ;;  %v6553_v63 = vshll.u32 %v6291_v11, 16  ;;  %v14550_v8 = vrot.slane %v7010_v18, 7  ;;  %v7615_v44 = vor.u32 %v7614_v39, %v7610_v55  ;;  %v11355_v28 = vld [vmem:[#allocation4 + $0x310] sm:$0xf0]  ;;  %v7019_v18 = vshrl.u32 %v6787_v20, 16  ;;  %v14559_v47 = vpop.f32.mrf.mxu3 }
 0x4b6   : > { %v10766_v60 = vor.u32 %v11355_v28, %v10765_v26  ;;  %v11341_v39 = vld [vmem:[#allocation4 + $0x2a4] sm:$0xf]  ;;  %v6561_v26 = vrot.slane %v6559_v56, 5  ;;  %15283 = vst [vmem:[#allocation94_spill] sm:$0xff] %v14559_v47  ;;  %v7620_v32 = vrot.slane %v7618_v36, 5 }
 0x4b7   : > { %v7015_v11 = vor.u32 %v7013_v49, %v14550_v8  ;;  %v7616_v54 = vrot.slane %v7615_v44, 4  ;;  %v10726_v27 = vor.u32 %v11341_v39, %v10723_v34  ;;  %v7623_v49 = vshrl.u32 %v7322_v16, 16 }
 0x4b8   : > { %v9371_v48 = vpop.f32.mrf.mxu2  ;;  %v7021_v44 = vrot.slane %v7019_v18, 7  ;;  %v7628_v18 = vrot.slane %v7626_v33, 5 }
 0x4b9   : > { %v14548_v15 = vadd.f32 %v9371_v48, %v9283_v23  ;;  %v6785_v23 = vld [vmem:[#allocation3 + $0xb0] sm:$0x8]  ;;  %v6555_v48 = vrot.slane %v6553_v63, 5  ;;  %v6565_v63 = vrot.slane %v6563_v35, 4  ;;  %v7621_v16 = vsel %vm11610_vm10, %v7616_v54, %v7620_v32 }
 0x4ba   : > { %v7005_v3 = vshrl.u32 %v6785_v23, 16  ;;  %7773 = vst [vmem:[#allocation4 + $0x35c] sm:$0xf] %v7621_v16 }
 0x4bb   : > { %15281 = vst [vmem:[#allocation92_spill] sm:$0xff] %v14548_v15  ;;  %v7323_v15 = vld [vmem:[#allocation3 + $0xe8] sm:$0xf]  ;;  %v6556_v23 = vor.u32 %v6555_v48, %v6552_v41  ;;  %v6566_v41 = vor.u32 %v6565_v63, %v6561_v26  ;;  %v7625_v48 = vrot.slane %v7623_v49, 4  ;;  %v14569_v45 = vpop.f32.mrf.mxu1  ;;  %v10541_v63 = vld [vmem:[#allocation4 + $0x138] sm:$0xf] }
 0x4bc   : > { %9815 = vmatmul.bf16.gmra.mxu3 %v10506_v13  ;;  %v7611_v13 = vsel %vm11610_vm10, %v7606_v38, %v7610_v55  ;;  %v10364_v28 = vrot.slane %v7005_v3, 11  ;;  %v14563_v55 = vpop.f32.mrf.mxu0  ;;  %v7022_v3 = vshll.u32 %v6787_v20, 16  ;;  %v7632_v56 = vshll.u32 %v7323_v15, 16  ;;  %15285 = vst [vmem:[#allocation96_spill] sm:$0xff] %v14569_v45 }
 0x4bd   : > { %7772 = vst [vmem:[#allocation4 + $0x338] sm:$0xf] %v7611_v13  ;;  %v7636_v35 = vshrl.u32 %v7323_v15, 16  ;;  %v6557_v39 = vrot.slane %v6556_v23, 4  ;;  %v7017_v20 = vrot.slane %v14550_v8, 4  ;;  %v6567_v33 = vrot.slane %v6566_v41, 4 }
 0x4be   : > { %v7016_v38 = vsel %vm11623_vm11, %v10364_v28, %v7015_v11  ;;  %15284 = vst [vmem:[#allocation95_spill] sm:$0xff] %v14563_v55  ;;  %v7024_v36 = vor.u32 %v7022_v3, %v7021_v44  ;;  %v9288_v11 = vadd.f32 %v14460_v46, %v13519_v9  ;;  %v7634_v13 = vrot.slane %v7632_v56, 5  ;;  %v6293_v28 = vld [vmem:[#allocation3 + $0xbc] sm:$0x1]  ;;  %v11441_v41 = vld [vmem:[%s15110_s3 + $0x140] sm:$0xff] }
 0x4bf   : > { %7208 = vst [vmem:[#allocation4 + $0x2a0] sm:$0xf] %v7016_v38  ;;  %v7638_v15 = vrot.slane %v7636_v35, 4  ;;  %v6562_v32 = vsel %vm11610_vm10, %v6557_v39, %v6561_v26  ;;  %v7629_v54 = vor.u32 %v7628_v18, %v7625_v48  ;;  %v6569_v23 = vshll.u32 %v6293_v28, 16  ;;  %v10759_v35 = vld [vmem:[#allocation4 + $0x30c] sm:$0xf0]  ;;  %9710 = vmatpush.bf16.msra.mxu2 %v11441_v41 }
 0x4c0   : > { %v14557_v12 = vpop.f32.mrf.mxu2  ;;  %6745 = vst [vmem:[#allocation4 + $0x2e4] sm:$0xf] %v6562_v32  ;;  %v7025_v44 = vsel %vm11623_vm11, %v7017_v20, %v7024_v36  ;;  %v7325_v18 = vld [vmem:[#allocation3 + $0xf4] sm:$0xf]  ;;  %v11350_v39 = vld [vmem:[#allocation4 + $0x2ec] sm:$0xf] }
 0x4c1   : > { %7209 = vst [vmem:[#allocation4 + $0x2c4] sm:$0xf] %v7025_v44  ;;  %v6571_v8 = vrot.slane %v6569_v23, 5  ;;  %v7639_v38 = vor.u32 %v7638_v15, %v7634_v13  ;;  %v11364_v3 = vld [vmem:[#allocation4 + $0x358] sm:$0xf0]  ;;  %v7630_v56 = vrot.slane %v7629_v54, 4  ;;  %v10762_v20 = vor.u32 %v11350_v39, %v10759_v35 }
 0x4c2   : > { %10028 = vmatmul.bf16.gmra.mxu1 %v10766_v60  ;;  %v11365_v60 = vld [vmem:[#allocation4 + $0x364] sm:$0xf]  ;;  %v7324_v36 = vld [vmem:[#allocation3 + $0xec] sm:$0x1]  ;;  %v7647_v32 = vshrl.u32 %v7325_v18, 16  ;;  %v7650_v54 = vshll.u32 %v7325_v18, 16 }
 0x4c3   : > { %9934 = vmatmul.bf16.gmra.mxu0 %v10726_v27  ;;  %v10810_v34 = vor.u32 %v11365_v60, %v10807_v53  ;;  %v11300_v53 = vld [vmem:[#allocation4 + $0x158] sm:$0xf0]  ;;  %v6572_v48 = vsel %vm11610_vm10, %v6567_v33, %v6571_v8  ;;  %v7642_v28 = vshll.u32 %v7324_v36, 16  ;;  %v14591_v33 = vpop.f32.mrf.mxu1  ;;  %v11374_v23 = vld [vmem:[#allocation4 + $0x3ac] sm:$0xf] }
 0x4c4   : > { %v10542_v9 = vor.u32 %v11300_v53, %v10541_v63  ;;  %v14578_v60 = vpop.f32.mrf.mxu0  ;;  %v10801_v26 = vld [vmem:[#allocation4 + $0x338] sm:$0xf]  ;;  %6746 = vst [vmem:[#allocation4 + $0x308] sm:$0xf] %v6572_v48  ;;  %v7640_v53 = vrot.slane %v7639_v38, 4  ;;  %v7649_v38 = vrot.slane %v7647_v32, 4 }
 0x4c5   : > { %9415 = vmatmul.bf16.gmra.mxu2 %v10810_v34  ;;  %15287 = vst [vmem:[#allocation98_spill] sm:$0xff] %v14578_v60  ;;  %v14580_v34 = vpop.f32.mrf.mxu3  ;;  %v10802_v16 = vor.u32 %v11364_v3, %v10801_v26  ;;  %v7326_v63 = vld [vmem:[#allocation3 + $0xf8] sm:$0xf]  ;;  %v7652_v3 = vrot.slane %v7650_v54, 5  ;;  %v11309_v41 = vld [vmem:[#allocation4 + $0x1a0] sm:$0xf0] }
 0x4c6   : > { %15288 = vst [vmem:[#allocation99_spill] sm:$0xff] %v14580_v34  ;;  %v7656_v8 = vshll.u32 %v7326_v63, 16  ;;  %v7660_v26 = vshrl.u32 %v7326_v63, 16  ;;  %v7328_v54 = vld [vmem:[#allocation3 + $0x104] sm:$0xf] }
 0x4c7   : > { %v7653_v36 = vor.u32 %v7652_v3, %v7649_v38  ;;  %v7671_v45 = vshrl.u32 %v7328_v54, 16  ;;  %v7674_v38 = vshll.u32 %v7328_v54, 16 }
 0x4c8   : > { %v9376_v27 = vpop.f32.mrf.mxu2  ;;  %v7658_v48 = vrot.slane %v7656_v8, 5  ;;  %v7662_v18 = vrot.slane %v7660_v26, 4  ;;  %v6294_v8 = vld [vmem:[#allocation3 + $0xc4] sm:$0xf]  ;;  %v6295_v26 = vld [vmem:[#allocation3 + $0xc8] sm:$0xf] }
 0x4c9   : > { %v14574_v49 = vadd.f32 %v9376_v27, %v9288_v11  ;;  %v7635_v11 = vsel %vm11610_vm10, %v7630_v56, %v7634_v13  ;;  %v10843_v27 = vld [vmem:[#allocation4 + $0x3cc] sm:$0xf0]  ;;  %v6577_v60 = vshll.u32 %v6294_v8, 16  ;;  %v6583_v55 = vshll.u32 %v6295_v26, 16 }
 0x4ca   : > { %7774 = vst [vmem:[#allocation4 + $0x380] sm:$0xf] %v7635_v11  ;;  %v10846_v44 = vor.u32 %v11374_v23, %v10843_v27  ;;  %v10577_v11 = vld [vmem:[#allocation4 + $0x180] sm:$0xf]  ;;  %v7663_v32 = vor.u32 %v7662_v18, %v7658_v48 }
 0x4cb   : > { %15286 = vst [vmem:[#allocation97_spill] sm:$0xff] %v14574_v49  ;;  %v10578_v27 = vor.u32 %v11309_v41, %v10577_v11  ;;  %v7327_v41 = vld [vmem:[#allocation3 + $0xfc] sm:$0x1] }
 0x4cc   : > { %9820 = vmatmul.bf16.gmra.mxu3 %v10542_v9  ;;  %v7644_v9 = vrot.slane %v7642_v28, 5  ;;  %v14595_v56 = vpop.f32.mrf.mxu0  ;;  %v14603_v28 = vpop.f32.mrf.mxu1 }
 0x4cd   : > { %15290 = vst [vmem:[#allocation101_spill] sm:$0xff] %v14595_v56  ;;  %v14597_v35 = vpop.f32.mrf.mxu3 }
 0x4ce   : > { %v7645_v13 = vsel %vm11610_vm10, %v7640_v53, %v7644_v9  ;;  %15291 = vst [vmem:[#allocation102_spill] sm:$0xff] %v14597_v35  ;;  %v6789_v53 = vld [vmem:[#allocation3 + $0xc4] sm:$0xf]  ;;  %v6587_v35 = vshrl.u32 %v6295_v26, 16  ;;  %v6585_v26 = vrot.slane %v6583_v55, 5 }
 0x4cf   : > { %7775 = vst [vmem:[#allocation4 + $0x3a4] sm:$0xf] %v7645_v13  ;;  %v7032_v9 = vshrl.u32 %v6789_v53, 16  ;;  %v7035_v47 = vshll.u32 %v6789_v53, 16  ;;  %v7329_v53 = vld [vmem:[#allocation3 + $0x108] sm:$0xf] }
 0x4d0   : > { %v14589_v15 = vpop.f32.mrf.mxu2 }
 0x4d1   : > { %15289 = vst [vmem:[#allocation100_spill] sm:$0xff] %v14589_v15  ;;  %v10837_v63 = vld [vmem:[#allocation4 + $0x380] sm:$0xf]  ;;  %v14613_v54 = vrot.slane %v7032_v9, 7 }
 0x4d2   : > { %10033 = vmatmul.bf16.gmra.mxu1 %v10802_v16  ;;  %v9293_v16 = vadd.f32 %v14460_v46, %v13540_v6  ;;  %v10795_v6 = vld [vmem:[#allocation4 + $0x354] sm:$0xf0]  ;;  %v6788_v9 = vld [vmem:[#allocation3 + $0xc0] sm:$0x8] }
 0x4d3   : > { %9939 = vmatmul.bf16.gmra.mxu0 %v10762_v20  ;;  %v10831_v15 = vld [vmem:[#allocation4 + $0x39c] sm:$0xf0] }
 0x4d4   : > { %v14605_v3 = vpop.f32.mrf.mxu0 }
 0x4d5   : > { %9420 = vmatmul.bf16.gmra.mxu2 %v10846_v44  ;;  %v7654_v44 = vrot.slane %v7653_v36, 4  ;;  %v14609_v11 = vpop.f32.mrf.mxu3  ;;  %v10879_v36 = vld [vmem:[#allocation4 + $0x414] sm:$0xf0] }
 0x4d6   : > { %v11373_v23 = vld [vmem:[#allocation4 + $0x3a0] sm:$0xf0]  ;;  %15293 = vst [vmem:[#allocation104_spill] sm:$0xff] %v14609_v11 }
 0x4d7   : > { %v10838_v13 = vor.u32 %v11373_v23, %v10837_v63  ;;  %v7659_v18 = vsel %vm11610_vm10, %v7654_v44, %v7658_v48  ;;  %v7666_v63 = vshll.u32 %v7327_v41, 16  ;;  %v6574_v23 = vshrl.u32 %v6294_v8, 16  ;;  %v6790_v48 = vld [vmem:[#allocation3 + $0xc8] sm:$0xf]  ;;  %v14618_v8 = vpop.f32.mrf.mxu1 }
 0x4d8   : > { %v9381_v39 = vpop.f32.mrf.mxu2  ;;  %7776 = vst [vmem:[#allocation4 + $0x3c8] sm:$0xf] %v7659_v18  ;;  %v7676_v44 = vrot.slane %v7674_v38, 5  ;;  %v6579_v41 = vrot.slane %v6577_v60, 5  ;;  %v7037_v18 = vor.u32 %v7035_v47, %v14613_v54 }
 0x4d9   : > { %v14601_v20 = vadd.f32 %v9381_v39, %v9293_v16  ;;  %v11359_v16 = vld [vmem:[#allocation4 + $0x334] sm:$0xf]  ;;  %v7664_v39 = vrot.slane %v7663_v32, 4  ;;  %v7668_v34 = vrot.slane %v7666_v63, 5  ;;  %v7673_v32 = vrot.slane %v7671_v45, 4 }
 0x4da   : > { %v7041_v63 = vshrl.u32 %v6790_v48, 16  ;;  %v9298_v45 = vadd.f32 %v14460_v46, %v13579_v61 }
 0x4db   : > { %15292 = vst [vmem:[#allocation103_spill] sm:$0xff] %v14601_v20  ;;  %v7677_v38 = vor.u32 %v7676_v44, %v7673_v32  ;;  %v7044_v32 = vshll.u32 %v6790_v48, 16 }
 0x4dc   : > { %9825 = vmatmul.bf16.gmra.mxu3 %v10578_v27  ;;  %v10798_v27 = vor.u32 %v11359_v16, %v10795_v6  ;;  %v7669_v6 = vsel %vm11610_vm10, %v7664_v39, %v7668_v34  ;;  %v6576_v16 = vrot.slane %v6574_v23, 4  ;;  %v7680_v23 = vshll.u32 %v7329_v53, 16  ;;  %v14622_v47 = vpop.f32.mrf.mxu0 }
 0x4dd   : > { %7777 = vst [vmem:[#allocation4 + $0x3ec] sm:$0xf] %v7669_v6  ;;  %v7043_v55 = vrot.slane %v7041_v63, 7  ;;  %v7678_v61 = vrot.slane %v7677_v38, 4 }
 0x4de   : > { %v6580_v60 = vor.u32 %v6579_v41, %v6576_v16  ;;  %v7682_v16 = vrot.slane %v7680_v23, 5  ;;  %v7684_v41 = vshrl.u32 %v7329_v53, 16  ;;  %v10915_v53 = vld [vmem:[#allocation4 + $0x45c] sm:$0xf0] }
 0x4e0   : > { %v14611_v56 = vpop.f32.mrf.mxu2  ;;  %v7683_v48 = vsel %vm11610_vm10, %v7678_v61, %v7682_v16 }
 0x4e1   : > { %15294 = vst [vmem:[#allocation105_spill] sm:$0xff] %v14611_v56  ;;  %v7027_v56 = vshrl.u32 %v6788_v9, 16 }
 0x4e2   : > { %10038 = vmatmul.bf16.gmra.mxu1 %v10838_v13  ;;  %v11383_v13 = vld [vmem:[#allocation4 + $0x3f4] sm:$0xf]  ;;  %7778 = vst [vmem:[#allocation4 + $0x410] sm:$0xf] %v7683_v48 }
 0x4e3   : > { %9944 = vmatmul.bf16.gmra.mxu0 %v10798_v27  ;;  %v10882_v11 = vor.u32 %v11383_v13, %v10879_v36  ;;  %v6589_v27 = vrot.slane %v6587_v35, 4  ;;  %v11318_v36 = vld [vmem:[#allocation4 + $0x1e8] sm:$0xf0]  ;;  %v10365_v39 = vrot.slane %v7027_v56, 11  ;;  %v10613_v13 = vld [vmem:[#allocation4 + $0x1c8] sm:$0xf]  ;;  %v14626_v35 = vpop.f32.mrf.mxu3 }
 0x4e4   : > { %15296 = vst [vmem:[#allocation107_spill] sm:$0xff] %v14626_v35  ;;  %v10614_v20 = vor.u32 %v11318_v36, %v10613_v13  ;;  %v10873_v56 = vld [vmem:[#allocation4 + $0x3c8] sm:$0xf]  ;;  %v11382_v44 = vld [vmem:[#allocation4 + $0x3e8] sm:$0xf0]  ;;  %v14631_v35 = vpop.f32.mrf.mxu1  ;;  %v7686_v13 = vrot.slane %v7684_v41, 4 }
 0x4e5   : > { %9425 = vmatmul.bf16.gmra.mxu2 %v10882_v11  ;;  %v6590_v6 = vor.u32 %v6589_v27, %v6585_v26  ;;  %v7038_v9 = vsel %vm11623_vm11, %v10365_v39, %v7037_v18  ;;  %v10874_v49 = vor.u32 %v11382_v44, %v10873_v56  ;;  %v7039_v27 = vrot.slane %v14613_v54, 4  ;;  %v11368_v36 = vld [vmem:[#allocation4 + $0x37c] sm:$0xf]  ;;  %v4638_v18 = vld [vmem:[#allocation3 + $0x10c] sm:$0x1] }
 0x4e6   : > { %7210 = vst [vmem:[#allocation4 + $0x2e8] sm:$0xf] %v7038_v9  ;;  %v10834_v38 = vor.u32 %v11368_v36, %v10831_v15  ;;  %v14643_v15 = vpop.f32.mrf.mxu0  ;;  %v9303_v56 = vadd.f32 %v14460_v46, %v13639_v59  ;;  %v11327_v44 = vld [vmem:[#allocation4 + $0x230] sm:$0xf0] }
 0x4e7   : > { %v6591_v63 = vrot.slane %v6590_v6, 4 }
 0x4e8   : > { %v9386_v34 = vpop.f32.mrf.mxu2 }
 0x4e9   : > { %v14624_v11 = vadd.f32 %v9386_v34, %v9298_v45  ;;  %v6581_v45 = vrot.slane %v6580_v60, 4  ;;  %v7046_v34 = vor.u32 %v7044_v32, %v7043_v55  ;;  %v4639_v60 = vsel %vm12180_vm7, 0, %v4638_v18 }
 0x4ea   : > { %4640 = vst [vmem:[#allocation3 + $0x10c] sm:$0x1] %v4639_v60  ;;  %v11377_v60 = vld [vmem:[#allocation4 + $0x3c4] sm:$0xf] }
 0x4eb   : > { %15295 = vst [vmem:[#allocation106_spill] sm:$0xff] %v14624_v11  ;;  %v6586_v54 = vsel %vm11610_vm10, %v6581_v45, %v6585_v26  ;;  %v7047_v6 = vsel %vm11623_vm11, %v7039_v27, %v7046_v34  ;;  %v14645_v61 = vpop.f32.mrf.mxu3  ;;  %v7687_v26 = vor.u32 %v7686_v13, %v7682_v16  ;;  %v10649_v34 = vld [vmem:[#allocation4 + $0x210] sm:$0xf]  ;;  %v10867_v16 = vld [vmem:[#allocation4 + $0x3e4] sm:$0xf0] }
 0x4ec   : > { %9830 = vmatmul.bf16.gmra.mxu3 %v10614_v20  ;;  %v6296_v20 = vld [vmem:[#allocation3 + $0xcc] sm:$0x1]  ;;  %6747 = vst [vmem:[#allocation4 + $0x32c] sm:$0xf] %v6586_v54  ;;  %v10650_v48 = vor.u32 %v11327_v44, %v10649_v34  ;;  %v10870_v54 = vor.u32 %v11377_v60, %v10867_v16  ;;  %v10391_v13 = vld [vmem:[#allocation4 + $0x34] sm:$0xf0] }
 0x4ed   : > { %v6593_v23 = vshll.u32 %v6296_v20, 16  ;;  %7211 = vst [vmem:[#allocation4 + $0x30c] sm:$0xf] %v7047_v6  ;;  %v7688_v27 = vrot.slane %v7687_v26, 4  ;;  %v10685_v16 = vld [vmem:[#allocation4 + $0x258] sm:$0xf] }
 0x4ee   : > { %15298 = vst [vmem:[#allocation109_spill] sm:$0xff] %v14645_v61 }
 0x4ef   : > { %v6595_v55 = vrot.slane %v6593_v23, 5 }
 0x4f0   : > { %v14635_v39 = vpop.f32.mrf.mxu2 }
 0x4f1   : > { %15297 = vst [vmem:[#allocation108_spill] sm:$0xff] %v14635_v39  ;;  %v6596_v32 = vsel %vm11610_vm10, %v6591_v63, %v6595_v55  ;;  %v7330_v45 = vld [vmem:[#allocation3 + $0x10c] sm:$0x1]  ;;  %v14655_v63 = vpop.f32.mrf.mxu1  ;;  %v10909_v55 = vld [vmem:[#allocation4 + $0x410] sm:$0xf] }
 0x4f2   : > { %10043 = vmatmul.bf16.gmra.mxu1 %v10874_v49  ;;  %v11392_v49 = vld [vmem:[#allocation4 + $0x43c] sm:$0xf]  ;;  %6748 = vst [vmem:[#allocation4 + $0x350] sm:$0xf] %v6596_v32  ;;  %v7690_v18 = vshll.u32 %v7330_v45, 16 }
 0x4f3   : > { %9949 = vmatmul.bf16.gmra.mxu0 %v10834_v38  ;;  %v10918_v9 = vor.u32 %v11392_v49, %v10915_v53  ;;  %v14653_v38 = vpop.f32.mrf.mxu0  ;;  %v14659_v59 = vpop.f32.mrf.mxu3  ;;  %v11259_v49 = vld [vmem:[#allocation4 + $0x14] sm:$0xf]  ;;  %v11336_v45 = vld [vmem:[#allocation4 + $0x278] sm:$0xf0] }
 0x4f4   : > { %v7692_v20 = vrot.slane %v7690_v18, 5  ;;  %15300 = vst [vmem:[#allocation111_spill] sm:$0xff] %v14659_v59  ;;  %v10394_v6 = vor.u32 %v11259_v49, %v10391_v13  ;;  %v6793_v18 = vld [vmem:[#allocation3 + $0xd8] sm:$0xf]  ;;  %v10686_v60 = vor.u32 %v11336_v45, %v10685_v16  ;;  %v10427_v45 = vld [vmem:[#allocation4 + $0x7c] sm:$0xf0] }
 0x4f5   : > { %9430 = vmatmul.bf16.gmra.mxu2 %v10918_v9  ;;  %v6792_v9 = vld [vmem:[#allocation3 + $0xd4] sm:$0xf]  ;;  %v6298_v13 = vld [vmem:[#allocation3 + $0xd8] sm:$0xf]  ;;  %v7063_v49 = vshrl.u32 %v6793_v18, 16  ;;  %v7066_v16 = vshll.u32 %v6793_v18, 16 }
 0x4f6   : > { %v7693_v53 = vsel %vm11610_vm10, %v7688_v27, %v7692_v20  ;;  %v6297_v27 = vld [vmem:[#allocation3 + $0xd4] sm:$0xf]  ;;  %v7054_v34 = vshrl.u32 %v6792_v9, 16  ;;  %v6607_v59 = vshll.u32 %v6298_v13, 16  ;;  %v6611_v61 = vshrl.u32 %v6298_v13, 16 }
 0x4f7   : > { %7779 = vst [vmem:[#allocation4 + $0x434] sm:$0xf] %v7693_v53 }
 0x4f8   : > { %v9391_v41 = vpop.f32.mrf.mxu2 }
 0x4f9   : > { %v14651_v36 = vadd.f32 %v9391_v41, %v9303_v56  ;;  %v9308_v56 = vadd.f32 %v14460_v46, %v14090_v10  ;;  %v14667_v41 = vpop.f32.mrf.mxu1  ;;  %v6601_v10 = vshll.u32 %v6297_v27, 16  ;;  %v7056_v46 = vrot.slane %v7054_v34, 7 }
 0x4fa   : > { %15302 = vst [vmem:[#allocation113_spill] sm:$0xff] %v14667_v41 }
 0x4fb   : > { %15299 = vst [vmem:[#allocation110_spill] sm:$0xff] %v14651_v36  ;;  %v14665_v44 = vpop.f32.mrf.mxu0  ;;  %v7065_v36 = vrot.slane %v7063_v49, 7  ;;  %v6603_v5 = vrot.slane %v6601_v10, 5 }
 0x4fc   : > { %9835 = vmatmul.bf16.gmra.mxu3 %v10650_v48  ;;  %v14669_v48 = vpop.f32.mrf.mxu3 }
 0x4fd   : > { %15303 = vst [vmem:[#allocation114_spill] sm:$0xff] %v14669_v48  ;;  %v6791_v48 = vld [vmem:[#allocation3 + $0xd0] sm:$0x8] }
 0x4fe   : > { %v11391_v32 = vld [vmem:[#allocation4 + $0x430] sm:$0xf0] }
 0x4ff   : > { %v10910_v26 = vor.u32 %v11391_v32, %v10909_v55  ;;  %v10903_v55 = vld [vmem:[#allocation4 + $0x42c] sm:$0xf0]  ;;  %v7057_v32 = vshll.u32 %v6792_v9, 16  ;;  %v11268_v9 = vld [vmem:[#allocation4 + $0x5c] sm:$0xf] }
 0x500   : > { %v14661_v23 = vpop.f32.mrf.mxu2  ;;  %v10430_v49 = vor.u32 %v11268_v9, %v10427_v45  ;;  %v6795_v45 = vld [vmem:[#allocation3 + $0xe4] sm:$0xf] }
 0x501   : > { %15301 = vst [vmem:[#allocation112_spill] sm:$0xff] %v14661_v23 }
 0x502   : > { %10048 = vmatmul.bf16.gmra.mxu1 %v10910_v26  ;;  %v7059_v26 = vor.u32 %v7057_v32, %v7056_v46  ;;  %v6299_v32 = vld [vmem:[#allocation3 + $0xdc] sm:$0x1] }
 0x503   : > { %9954 = vmatmul.bf16.gmra.mxu0 %v10870_v54  ;;  %v6598_v54 = vshrl.u32 %v6297_v27, 16  ;;  %v6613_v27 = vrot.slane %v6611_v61, 4  ;;  %v14675_v34 = vpop.f32.mrf.mxu0  ;;  %v14684_v61 = vld [vmem:[%s15111_s4] ss:$0 sm:$0xff] }
 0x505   : > { %9711 = vmatmul.bf16.vlgmr.msra.gmra.mxu2 %v10394_v6  ;;  %v11386_v6 = vld [vmem:[#allocation4 + $0x40c] sm:$0xf]  ;;  %v6600_v23 = vrot.slane %v6598_v54, 4  ;;  %v7068_v54 = vor.u32 %v7066_v16, %v7065_v36 }
 0x506   : > { %v10906_v39 = vor.u32 %v11386_v6, %v10903_v55  ;;  %v7061_v6 = vrot.slane %v7056_v46, 4  ;;  %v10721_v46 = vld [vmem:[#allocation4 + $0x2a0] sm:$0xf] }
 0x507   : > { %v6604_v11 = vor.u32 %v6603_v5, %v6600_v23  ;;  %v6796_v23 = vld [vmem:[#allocation3 + $0xe8] sm:$0xf] }
 0x508   : > { %v9396_v20 = vpop.f32.mrf.mxu2  ;;  %v7069_v36 = vsel %vm11623_vm11, %v7061_v6, %v7068_v54  ;;  %v10463_v6 = vld [vmem:[#allocation4 + $0xc4] sm:$0xf0] }
 0x509   : > { %v14671_v53 = vadd.f32 %v9396_v20, %v9308_v56  ;;  %v7049_v20 = vshrl.u32 %v6791_v48, 16  ;;  %v6605_v5 = vrot.slane %v6604_v11, 4  ;;  %7213 = vst [vmem:[#allocation4 + $0x354] sm:$0xf] %v7069_v36 }
 0x50b   : > { %15304 = vst [vmem:[#allocation115_spill] sm:$0xff] %v14671_v53  ;;  %v6609_v53 = vrot.slane %v6607_v59, 5  ;;  %v10366_v13 = vrot.slane %v7049_v20, 11  ;;  %v11345_v59 = vld [vmem:[#allocation4 + $0x2c0] sm:$0xf0] }
 0x50c   : > { %9840 = vmatmul.bf16.gmra.mxu3 %v10686_v60  ;;  %v14677_v60 = vpop.f32.mrf.mxu3  ;;  %v10722_v20 = vor.u32 %v11345_v59, %v10721_v46  ;;  %v11277_v59 = vld [vmem:[#allocation4 + $0xa4] sm:$0xf] }
 0x50d   : > { %15306 = vst [vmem:[#allocation117_spill] sm:$0xff] %v14677_v60  ;;  %v7060_v10 = vsel %vm11623_vm11, %v10366_v13, %v7059_v26  ;;  %v6614_v48 = vor.u32 %v6613_v27, %v6609_v53  ;;  %v6610_v16 = vsel %vm11610_vm10, %v6605_v5, %v6609_v53  ;;  %v6617_v27 = vshll.u32 %v6299_v32, 16 }
 0x50e   : > { %7212 = vst [vmem:[#allocation4 + $0x330] sm:$0xf] %v7060_v10  ;;  %v7076_v13 = vshrl.u32 %v6795_v45, 16  ;;  %v10466_v36 = vor.u32 %v11277_v59, %v10463_v6  ;;  %v9318_v32 = vadd.f32 %v14684_v61, %v14263_v62 }
 0x50f   : > { %v6615_v26 = vrot.slane %v6614_v48, 4  ;;  %6749 = vst [vmem:[#allocation4 + $0x374] sm:$0xf] %v6610_v16  ;;  %v6619_v11 = vrot.slane %v6617_v27, 5 }
 0x510   : > { %v14673_v56 = vpop.f32.mrf.mxu2  ;;  %v7078_v48 = vrot.slane %v7076_v13, 7  ;;  %v10757_v13 = vld [vmem:[#allocation4 + $0x2e8] sm:$0xf] }
 0x511   : > { %15305 = vst [vmem:[#allocation116_spill] sm:$0xff] %v14673_v56  ;;  %v6620_v54 = vsel %vm11610_vm10, %v6615_v26, %v6619_v11  ;;  %v6794_v26 = vld [vmem:[#allocation3 + $0xe0] sm:$0x8] }
 0x512   : > { %6750 = vst [vmem:[#allocation4 + $0x398] sm:$0xf] %v6620_v54  ;;  %v7083_v5 = vrot.slane %v7078_v48, 4 }
 0x513   : > { %9959 = vmatmul.bf16.gmra.mxu0 %v10906_v39  ;;  %v9313_v39 = vadd.f32 %v14684_v61, %v14181_v40  ;;  %v7085_v40 = vshrl.u32 %v6796_v23, 16 }
 0x514   : > { %v14694_v9 = vpop.f32.mrf.mxu3 }
 0x515   : > { %9716 = vmatmul.bf16.gmra.mxu2 %v10430_v49  ;;  %15308 = vst [vmem:[#allocation119_spill] sm:$0xff] %v14694_v9  ;;  %v7087_v49 = vrot.slane %v7085_v40, 7  ;;  %v6799_v40 = vld [vmem:[#allocation3 + $0xf8] sm:$0xf] }
 0x518   : > { %v9401_v18 = vpop.f32.mrf.mxu2 }
 0x519   : > { %v14690_v55 = vadd.f32 %v9401_v18, %v9313_v39  ;;  %v7088_v39 = vshll.u32 %v6796_v23, 16  ;;  %v7079_v18 = vshll.u32 %v6795_v45, 16  ;;  %v7071_v23 = vshrl.u32 %v6794_v26, 16 }
 0x51a   : > { %v7110_v26 = vshll.u32 %v6799_v40, 16 }
 0x51b   : > { %15307 = vst [vmem:[#allocation118_spill] sm:$0xff] %v14690_v55  ;;  %v7090_v53 = vor.u32 %v7088_v39, %v7087_v49  ;;  %v7081_v27 = vor.u32 %v7079_v18, %v7078_v48  ;;  %v6798_v49 = vld [vmem:[#allocation3 + $0xf4] sm:$0xf]  ;;  %v10367_v6 = vrot.slane %v7071_v23, 11  ;;  %v7107_v39 = vshrl.u32 %v6799_v40, 16 }
 0x51c   : > { %9845 = vmatmul.bf16.gmra.mxu3 %v10722_v20  ;;  %v14700_v46 = vpop.f32.mrf.mxu3  ;;  %v11354_v20 = vld [vmem:[#allocation4 + $0x308] sm:$0xf0]  ;;  %v7098_v59 = vshrl.u32 %v6798_v49, 16  ;;  %v6300_v23 = vld [vmem:[#allocation3 + $0xe4] sm:$0xf] }
 0x51d   : > { %15310 = vst [vmem:[#allocation121_spill] sm:$0xff] %v14700_v46  ;;  %v7091_v16 = vsel %vm11623_vm11, %v7083_v5, %v7090_v53  ;;  %v10758_v45 = vor.u32 %v11354_v20, %v10757_v13  ;;  %v7082_v62 = vsel %vm11623_vm11, %v10367_v6, %v7081_v27  ;;  %v10499_v5 = vld [vmem:[#allocation4 + $0x10c] sm:$0xf0]  ;;  %v6301_v13 = vld [vmem:[#allocation3 + $0xe8] sm:$0xf]  ;;  %v9323_v27 = vadd.f32 %v14684_v61, %v14289_v43 }
 0x51e   : > { %7215 = vst [vmem:[#allocation4 + $0x39c] sm:$0xf] %v7091_v16  ;;  %v7100_v18 = vrot.slane %v7098_v59, 7  ;;  %v6801_v6 = vld [vmem:[#allocation3 + $0x104] sm:$0xf] }
 0x51f   : > { %7214 = vst [vmem:[#allocation4 + $0x378] sm:$0xf] %v7082_v62  ;;  %v6797_v62 = vld [vmem:[#allocation3 + $0xf0] sm:$0x8]  ;;  %v6802_v59 = vld [vmem:[#allocation3 + $0x108] sm:$0xf] }
 0x520   : > { %v14698_v10 = vpop.f32.mrf.mxu2  ;;  %v7105_v20 = vrot.slane %v7100_v18, 4  ;;  %v7093_v9 = vshrl.u32 %v6797_v62, 16  ;;  %v7132_v62 = vshll.u32 %v6802_v59, 16  ;;  %v7123_v56 = vshll.u32 %v6801_v6, 16 }
 0x521   : > { %15309 = vst [vmem:[#allocation120_spill] sm:$0xff] %v14698_v10  ;;  %v7129_v10 = vshrl.u32 %v6802_v59, 16  ;;  %v6800_v59 = vld [vmem:[#allocation3 + $0x100] sm:$0x8] }
 0x524   : > { %v14710_v53 = vpop.f32.mrf.mxu3 }
 0x525   : > { %9721 = vmatmul.bf16.gmra.mxu2 %v10466_v36  ;;  %v7109_v36 = vrot.slane %v7107_v39, 7  ;;  %15312 = vst [vmem:[#allocation123_spill] sm:$0xff] %v14710_v53  ;;  %v11363_v39 = vld [vmem:[#allocation4 + $0x350] sm:$0xf0] }
 0x527   : > { %v7112_v16 = vor.u32 %v7110_v26, %v7109_v36  ;;  %v6622_v36 = vshrl.u32 %v6300_v23, 16  ;;  %v10793_v26 = vld [vmem:[#allocation4 + $0x330] sm:$0xf] }
 0x528   : > { %v9406_v11 = vpop.f32.mrf.mxu2  ;;  %v10794_v43 = vor.u32 %v11363_v39, %v10793_v26 }
 0x529   : > { %v14706_v54 = vadd.f32 %v9406_v11, %v9318_v32  ;;  %v11286_v32 = vld [vmem:[#allocation4 + $0xec] sm:$0xf]  ;;  %v7113_v53 = vsel %vm11623_vm11, %v7105_v20, %v7112_v16  ;;  %v6624_v16 = vrot.slane %v6622_v36, 4 }
 0x52a   : > { %v10502_v11 = vor.u32 %v11286_v32, %v10499_v5  ;;  %7217 = vst [vmem:[#allocation4 + $0x3e4] sm:$0xf] %v7113_v53  ;;  %v6625_v5 = vshll.u32 %v6300_v23, 16 }
 0x52b   : > { %15311 = vst [vmem:[#allocation122_spill] sm:$0xff] %v14706_v54  ;;  %v7120_v54 = vshrl.u32 %v6801_v6, 16 }
 0x52c   : > { %9850 = vmatmul.bf16.gmra.mxu3 %v10758_v45  ;;  %v7101_v45 = vshll.u32 %v6798_v49, 16  ;;  %v6631_v49 = vshll.u32 %v6301_v13, 16  ;;  %v14720_v60 = vpop.f32.mrf.mxu3  ;;  %v6627_v53 = vrot.slane %v6625_v5, 5  ;;  %v6302_v5 = vld [vmem:[#allocation3 + $0xec] sm:$0x1] }
 0x52e   : > { %v7103_v46 = vor.u32 %v7101_v45, %v7100_v18  ;;  %v6633_v20 = vrot.slane %v6631_v49, 5  ;;  %v7122_v45 = vrot.slane %v7120_v54, 7  ;;  %v9328_v54 = vadd.f32 %v14684_v61, %v14331_v21 }
 0x530   : > { %v14712_v48 = vpop.f32.mrf.mxu2  ;;  %v7127_v26 = vrot.slane %v7122_v45, 4  ;;  %v7125_v49 = vor.u32 %v7123_v56, %v7122_v45 }
 0x531   : > { %15313 = vst [vmem:[#allocation124_spill] sm:$0xff] %v14712_v48  ;;  %v10368_v48 = vrot.slane %v7093_v9, 11  ;;  %v11295_v9 = vld [vmem:[#allocation4 + $0x134] sm:$0xf] }
 0x533   : > { %v7104_v18 = vsel %vm11623_vm11, %v10368_v48, %v7103_v46 }
 0x534   : > { %7216 = vst [vmem:[#allocation4 + $0x3c0] sm:$0xf] %v7104_v18  ;;  %v14726_v41 = vpop.f32.mrf.mxu3  ;;  %v7115_v18 = vshrl.u32 %v6800_v59, 16  ;;  %v6303_v59 = vld [vmem:[#allocation3 + $0xf4] sm:$0xf] }
 0x535   : > { %9726 = vmatmul.bf16.gmra.mxu2 %v10502_v11  ;;  %v6635_v11 = vshrl.u32 %v6301_v13, 16  ;;  %v10535_v13 = vld [vmem:[#allocation4 + $0x154] sm:$0xf0] }
 0x536   : > { %v10369_v21 = vrot.slane %v7115_v18, 11  ;;  %v6649_v18 = vshll.u32 %v6303_v59, 16 }
 0x537   : > { %v6637_v23 = vrot.slane %v6635_v11, 4 }
 0x538   : > { %v9411_v40 = vpop.f32.mrf.mxu2 }
 0x539   : > { %v14718_v32 = vadd.f32 %v9411_v40, %v9323_v27  ;;  %v7131_v27 = vrot.slane %v7129_v10, 7  ;;  %v6638_v39 = vor.u32 %v6637_v23, %v6633_v20  ;;  %v11372_v10 = vld [vmem:[#allocation4 + $0x398] sm:$0xf0] }
 0x53b   : > { %15314 = vst [vmem:[#allocation125_spill] sm:$0xff] %v14718_v32  ;;  %v6628_v32 = vor.u32 %v6627_v53, %v6624_v16  ;;  %v7134_v55 = vor.u32 %v7132_v62, %v7131_v27  ;;  %v6639_v48 = vrot.slane %v6638_v39, 4  ;;  %v6641_v16 = vshll.u32 %v6302_v5, 16  ;;  %v10829_v53 = vld [vmem:[#allocation4 + $0x378] sm:$0xf] }
 0x53c   : > { %9855 = vmatmul.bf16.gmra.mxu3 %v10794_v43  ;;  %v10538_v43 = vor.u32 %v11295_v9, %v10535_v13  ;;  %v10830_v23 = vor.u32 %v11372_v10, %v10829_v53  ;;  %v14740_v45 = vpop.f32.mrf.mxu3  ;;  %v10571_v62 = vld [vmem:[#allocation4 + $0x19c] sm:$0xf0]  ;;  %v11304_v13 = vld [vmem:[#allocation4 + $0x17c] sm:$0xf]  ;;  %v9333_v9 = vadd.f32 %v14684_v61, %v14372_v24  ;;  %v10607_v5 = vld [vmem:[#allocation4 + $0x1e4] sm:$0xf0] }
 0x53d   : > { %v6629_v46 = vrot.slane %v6628_v32, 4  ;;  %v7135_v36 = vsel %vm11623_vm11, %v7127_v26, %v7134_v55  ;;  %v6643_v27 = vrot.slane %v6641_v16, 5  ;;  %v7126_v55 = vsel %vm11623_vm11, %v10369_v21, %v7125_v49  ;;  %v11381_v26 = vld [vmem:[#allocation4 + $0x3e0] sm:$0xf0]  ;;  %v6304_v49 = vld [vmem:[#allocation3 + $0xf8] sm:$0xf] }
 0x53e   : > { %7219 = vst [vmem:[#allocation4 + $0x42c] sm:$0xf] %v7135_v36  ;;  %v10574_v39 = vor.u32 %v11304_v13, %v10571_v62  ;;  %v11313_v16 = vld [vmem:[#allocation4 + $0x1c4] sm:$0xf]  ;;  %v6655_v53 = vshll.u32 %v6304_v49, 16 }
 0x53f   : > { %v6634_v6 = vsel %vm11610_vm10, %v6629_v46, %v6633_v20  ;;  %v6644_v56 = vsel %vm11610_vm10, %v6639_v48, %v6643_v27  ;;  %7218 = vst [vmem:[#allocation4 + $0x408] sm:$0xf] %v7126_v55  ;;  %v10610_v24 = vor.u32 %v11313_v16, %v10607_v5  ;;  %v6651_v27 = vrot.slane %v6649_v18, 5  ;;  %v10643_v16 = vld [vmem:[#allocation4 + $0x22c] sm:$0xf0] }
 0x540   : > { %v14724_v40 = vpop.f32.mrf.mxu2  ;;  %6751 = vst [vmem:[#allocation4 + $0x3bc] sm:$0xf] %v6634_v6  ;;  %v9338_v55 = vadd.f32 %v14684_v61, %v14412_v57  ;;  %v6657_v13 = vrot.slane %v6655_v53, 5  ;;  %v11322_v53 = vld [vmem:[#allocation4 + $0x20c] sm:$0xf] }
 0x541   : > { %6752 = vst [vmem:[#allocation4 + $0x3e0] sm:$0xf] %v6644_v56 }
 0x545   : > { %9731 = vmatmul.bf16.gmra.mxu2 %v10538_v43  ;;  %v14746_v43 = vpop.f32.mrf.mxu3  ;;  %v11390_v62 = vld [vmem:[#allocation4 + $0x428] sm:$0xf0] }
 0x546   : > { %v10901_v56 = vld [vmem:[#allocation4 + $0x408] sm:$0xf] }
 0x548   : > { %v9416_v11 = vpop.f32.mrf.mxu2 }
 0x549   : > { %v14734_v32 = vadd.f32 %v9416_v11, %v9328_v54  ;;  %v10865_v54 = vld [vmem:[#allocation4 + $0x3c0] sm:$0xf]  ;;  %v6646_v11 = vshrl.u32 %v6303_v59, 16 }
 0x54a   : > { %v10866_v48 = vor.u32 %v11381_v26, %v10865_v54  ;;  %v10902_v54 = vor.u32 %v11390_v62, %v10901_v56 }
 0x54b   : > { %v6648_v21 = vrot.slane %v6646_v11, 4 }
 0x54c   : > { %9860 = vmatmul.bf16.gmra.mxu3 %v10830_v23  ;;  %v6659_v23 = vshrl.u32 %v6304_v49, 16  ;;  %v6305_v49 = vld [vmem:[#allocation3 + $0xfc] sm:$0x1] }
 0x54d   : > { %v14752_v6 = vpop.f32.mrf.mxu3 }
 0x550   : > { %v14742_v20 = vpop.f32.mrf.mxu2 }
 0x555   : > { %9736 = vmatmul.bf16.gmra.mxu2 %v10574_v39  ;;  %v6661_v39 = vrot.slane %v6659_v23, 4  ;;  %v14758_v59 = vpop.f32.mrf.mxu3 }
 0x558   : > { %v9421_v46 = vpop.f32.mrf.mxu2 }
 0x559   : > { %v14748_v10 = vadd.f32 %v9421_v46, %v9333_v9  ;;  %v6652_v46 = vor.u32 %v6651_v27, %v6648_v21  ;;  %v9343_v27 = vadd.f32 %v14684_v61, %v14445_v2 }
 0x55b   : > { %v6653_v5 = vrot.slane %v6652_v46, 4  ;;  %v10679_v46 = vld [vmem:[#allocation4 + $0x274] sm:$0xf0] }
 0x55c   : > { %9865 = vmatmul.bf16.gmra.mxu3 %v10866_v48  ;;  %v6662_v48 = vor.u32 %v6661_v39, %v6657_v13  ;;  %v9345_v39 = vadd.f32 %v14684_v61, %v14453_v1 }
 0x55d   : > { %v6658_v57 = vsel %vm11610_vm10, %v6653_v5, %v6657_v13  ;;  %v9446_v13 = vadd.f32 %v14206_v29, %v14468_v22  ;;  %v11331_v5 = vld [vmem:[#allocation4 + $0x254] sm:$0xf] }
 0x55e   : > { %v6663_v11 = vrot.slane %v6662_v48, 4  ;;  %6753 = vst [vmem:[#allocation4 + $0x404] sm:$0xf] %v6658_v57  ;;  %v14782_v57 = vpop.f32.mrf.mxu3 }
 0x560   : > { %v14750_v36 = vpop.f32.mrf.mxu2 }
 0x565   : > { %9741 = vmatmul.bf16.gmra.mxu2 %v10610_v24  ;;  %v6665_v24 = vshll.u32 %v6305_v49, 16  ;;  %v10682_v49 = vor.u32 %v11331_v5, %v10679_v46 }
 0x567   : > { %v6667_v23 = vrot.slane %v6665_v24, 5 }
 0x568   : > { %v9426_v9 = vpop.f32.mrf.mxu2 }
 0x569   : > { %v14756_v26 = vadd.f32 %v9426_v9, %v9338_v55  ;;  %v10646_v55 = vor.u32 %v11322_v53, %v10643_v16  ;;  %v6668_v21 = vsel %vm11610_vm10, %v6663_v11, %v6667_v23  ;;  %v9535_v11 = vadd.f32 %v13811_v7, %v9446_v13  ;;  %v14794_v23 = vpop.f32.mrf.mxu1 }
 0x56a   : > { %6754 = vst [vmem:[#allocation4 + $0x428] sm:$0xf] %v6668_v21  ;;  %v9451_v7 = vadd.f32 %v14265_v51, %v14496_v25  ;;  %v11340_v51 = vld [vmem:[#allocation4 + $0x29c] sm:$0xf] }
 0x56b   : > { %v9624_v16 = vadd.f32 %v13738_v4, %v9535_v11 }
 0x56c   : > { %9870 = vmatmul.bf16.gmra.mxu3 %v10902_v54  ;;  %v9270_v54 = vadd.f32 %v14684_v61, %v13339_v19 }
 0x56e   : > { %v9359_v2 = vadd.f32 %v14482_v42, %v9270_v54  ;;  %v14788_v42 = vpop.f32.mrf.mxu0 }
 0x570   : > { %v14760_v18 = vpop.f32.mrf.mxu2  ;;  %v9448_v1 = vadd.f32 %v14238_v0, %v9359_v2 }
 0x572   : > { %v9537_v19 = vadd.f32 %v13824_v17, %v9448_v1  ;;  %v15318_v1 = vld [vmem:[#allocation39_spill] sm:$0xff] }
 0x574   : > { %v9626_v4 = vadd.f32 %v13779_v52, %v9537_v19 }
 0x575   : > { %9746 = vmatmul.bf16.gmra.mxu2 %v10646_v55 }
 0x576   : > { %v14813_v54 = vpop.f32.mrf.mxu0 }
 0x578   : > { %v9431_v56 = vpop.f32.mrf.mxu2 }
 0x579   : > { %v14768_v62 = vadd.f32 %v9431_v56, %v9343_v27  ;;  %v9540_v27 = vadd.f32 %v13878_v14, %v9451_v7  ;;  %v14807_v56 = vpop.f32.mrf.mxu3  ;;  %v15320_v7 = vld [vmem:[#allocation7_spill] sm:$0xff] }
 0x580   : > { %v9433_v9 = vpop.f32.mrf.mxu2 }
 0x581   : > { %v14776_v48 = vadd.f32 %v9433_v9, %v9345_v39  ;;  %v15315_v9 = vld [vmem:[#allocation13_spill] sm:$0xff] }
 0x582   : > { %v9629_v46 = vadd.f32 %v15315_v9, %v9540_v27 }
 0x585   : > { %9751 = vmatmul.bf16.gmra.mxu2 %v10682_v49  ;;  %v15316_v49 = vld [vmem:[#allocation16_spill] sm:$0xff] }
 0x588   : > { %v9712_v29 = vpop.f32.mrf.mxu2 }
 0x589   : > { %v9713_v22 = vadd.f32 %v9712_v29, %v9624_v16  ;;  %v14823_v16 = vpop.f32.mrf.mxu3 }
 0x58b   : > { %v9802_v24 = vadd.f32 %v14720_v60, %v9713_v22  ;;  %v10715_v60 = vld [vmem:[#allocation4 + $0x2bc] sm:$0xf0]  ;;  %v15319_v22 = vld [vmem:[#allocation14_spill] sm:$0xff] }
 0x58d   : > { %v9891_v53 = vadd.f32 %v14605_v3, %v9802_v24  ;;  %v9275_v3 = vadd.f32 %v14684_v61, %v13416_v31 }
 0x58f   : > { %v9980_v0 = vadd.f32 %v14591_v33, %v9891_v53  ;;  %v9364_v25 = vadd.f32 %v14511_v58, %v9275_v3  ;;  %v10718_v33 = vor.u32 %v11340_v51, %v10715_v60  ;;  %v10751_v53 = vld [vmem:[#allocation4 + $0x304] sm:$0xf0]  ;;  %v11349_v60 = vld [vmem:[#allocation4 + $0x2e4] sm:$0xf] }
 0x590   : > { %v9714_v17 = vpop.f32.mrf.mxu2 }
 0x591   : > { %v10059_v55 = vmax.f32 %v9980_v0, 0.0  ;;  %v9715_v21 = vadd.f32 %v9714_v17, %v9626_v4  ;;  %v9453_v13 = vadd.f32 %v14273_v37, %v9364_v25  ;;  %v15317_v37 = vld [vmem:[#allocation84_spill] sm:$0xff]  ;;  %v9280_v0 = vadd.f32 %v14684_v61, %v15320_v7  ;;  %v14829_v17 = vpop.f32.mrf.mxu0 }
 0x593   : > { %10091 = vst [vmem:[%s14799_s7] sm:$0xff] %v10059_v55  ;;  %v9804_v52 = vadd.f32 %v14726_v41, %v9715_v21  ;;  %v14815_v41 = vpop.f32.mrf.mxu1  ;;  %v10754_v21 = vor.u32 %v11349_v60, %v10751_v53 }
 0x595   : > { %v9893_v39 = vadd.f32 %v14622_v47, %v9804_v52  ;;  %9756 = vmatmul.bf16.gmra.mxu2 %v10718_v33  ;;  %v9542_v47 = vadd.f32 %v15316_v49, %v9453_v13  ;;  %v15323_v33 = vld [vmem:[#allocation42_spill] sm:$0xff]  ;;  %v15324_v13 = vld [vmem:[#allocation15_spill] sm:$0xff] }
 0x597   : > { %v9982_v31 = vadd.f32 %v14603_v28, %v9893_v39  ;;  %v9456_v28 = vadd.f32 %v15318_v1, %v15317_v37  ;;  %v9631_v24 = vadd.f32 %v15319_v22, %v9542_v47 }
 0x598   : > { %v9717_v58 = vpop.f32.mrf.mxu2 }
 0x599   : > { %v10060_v5 = vmax.f32 %v9982_v31, 0.0  ;;  %v9718_v2 = vadd.f32 %v9717_v58, %v9629_v46  ;;  %v14841_v46 = vpop.f32.mrf.mxu3  ;;  %v14846_v49 = vpop.f32.mrf.mxu0 }
 0x59b   : > { %10092 = vst [vmem:[%s14799_s7 + $0x8] sm:$0xff] %v10060_v5  ;;  %v9807_v14 = vadd.f32 %v14740_v45, %v9718_v2  ;;  %v14835_v25 = vpop.f32.mrf.mxu1  ;;  %v15325_v2 = vld [vmem:[#allocation20_spill] sm:$0xff] }
 0x59d   : > { %v9896_v11 = vadd.f32 %v14643_v15, %v9807_v14  ;;  %v15321_v15 = vld [vmem:[#allocation87_spill] sm:$0xff] }
 0x59e   : > { %v9369_v3 = vadd.f32 %v15321_v15, %v9280_v0  ;;  %v11358_v0 = vld [vmem:[#allocation4 + $0x32c] sm:$0xf] }
 0x59f   : > { %v9985_v29 = vadd.f32 %v14618_v8, %v9896_v11  ;;  %v15322_v8 = vld [vmem:[#allocation18_spill] sm:$0xff] }
 0x5a0   : > { %v9719_v19 = vpop.f32.mrf.mxu2  ;;  %v9545_v51 = vadd.f32 %v15322_v8, %v9456_v28  ;;  %v9458_v27 = vadd.f32 %v15323_v33, %v9369_v3  ;;  %v15327_v11 = vld [vmem:[#allocation46_spill] sm:$0xff]  ;;  %v15328_v28 = vld [vmem:[#allocation17_spill] sm:$0xff]  ;;  %v15333_v33 = vld [vmem:[#allocation19_spill] sm:$0xff] }
 0x5a1   : > { %v10061_v4 = vmax.f32 %v9985_v29, 0.0  ;;  %v9720_v45 = vadd.f32 %v9719_v19, %v9631_v24  ;;  %v10787_v24 = vld [vmem:[#allocation4 + $0x34c] sm:$0xf0]  ;;  %v15329_v19 = vld [vmem:[#allocation8_spill] sm:$0xff] }
 0x5a2   : > { %v9634_v31 = vadd.f32 %v15324_v13, %v9545_v51  ;;  %v9547_v14 = vadd.f32 %v15325_v2, %v9458_v27  ;;  %v10790_v60 = vor.u32 %v11358_v0, %v10787_v24  ;;  %v15332_v51 = vld [vmem:[#allocation113_spill] sm:$0xff]  ;;  %v15340_v0 = vld [vmem:[#allocation26_spill] sm:$0xff] }
 0x5a3   : > { %10093 = vst [vmem:[%s14799_s7 + $0x10] sm:$0xff] %v10061_v4  ;;  %v9809_v55 = vadd.f32 %v14746_v43, %v9720_v45  ;;  %v14849_v47 = vpop.f32.mrf.mxu1  ;;  %v15336_v2 = vld [vmem:[#allocation53_spill] sm:$0xff] }
 0x5a4   : > { %v9636_v29 = vadd.f32 %v15328_v28, %v9547_v14  ;;  %v10823_v28 = vld [vmem:[#allocation4 + $0x394] sm:$0xf0] }
 0x5a5   : > { %v9898_v52 = vadd.f32 %v14653_v38, %v9809_v55  ;;  %9761 = vmatmul.bf16.gmra.mxu2 %v10754_v21  ;;  %v14864_v55 = vpop.f32.mrf.mxu0  ;;  %v15331_v21 = vld [vmem:[#allocation49_spill] sm:$0xff] }
 0x5a7   : > { %v9987_v39 = vadd.f32 %v14631_v35, %v9898_v52  ;;  %v15326_v35 = vld [vmem:[#allocation92_spill] sm:$0xff] }
 0x5a8   : > { %v9722_v9 = vpop.f32.mrf.mxu2  ;;  %v9461_v37 = vadd.f32 %v15327_v11, %v15326_v35  ;;  %v15337_v35 = vld [vmem:[#allocation21_spill] sm:$0xff] }
 0x5a9   : > { %v10062_v58 = vmax.f32 %v9987_v39, 0.0  ;;  %v9723_v5 = vadd.f32 %v9722_v9, %v9634_v31  ;;  %v15334_v9 = vld [vmem:[#allocation24_spill] sm:$0xff] }
 0x5ab   : > { %10094 = vst [vmem:[%s14799_s7 + $0x18] sm:$0xff] %v10062_v58  ;;  %v9812_v43 = vadd.f32 %v14752_v6, %v9723_v5  ;;  %v9285_v6 = vadd.f32 %v14684_v61, %v15329_v19  ;;  %v14869_v27 = vpop.f32.mrf.mxu1 }
 0x5ad   : > { %v9901_v38 = vadd.f32 %v14665_v44, %v9812_v43  ;;  %v9374_v4 = vadd.f32 %v14557_v12, %v9285_v6  ;;  %v14858_v44 = vpop.f32.mrf.mxu3  ;;  %v15335_v43 = vld [vmem:[#allocation97_spill] sm:$0xff]  ;;  %v11367_v6 = vld [vmem:[#allocation4 + $0x374] sm:$0xf] }
 0x5ae   : > { %v9466_v14 = vadd.f32 %v15336_v2, %v15335_v43 }
 0x5af   : > { %v9990_v1 = vadd.f32 %v14655_v63, %v9901_v38  ;;  %v15330_v63 = vld [vmem:[#allocation22_spill] sm:$0xff]  ;;  %v9463_v8 = vadd.f32 %v15331_v21, %v9374_v4 }
 0x5b0   : > { %v9724_v22 = vpop.f32.mrf.mxu2  ;;  %v9550_v15 = vadd.f32 %v15330_v63, %v9461_v37  ;;  %v14881_v37 = vpop.f32.mrf.mxu0  ;;  %v9555_v4 = vadd.f32 %v15340_v0, %v9466_v14  ;;  %v15341_v63 = vld [vmem:[#allocation55_spill] sm:$0xff]  ;;  %v11376_v0 = vld [vmem:[#allocation4 + $0x3bc] sm:$0xf] }
 0x5b1   : > { %v10063_v53 = vmax.f32 %v9990_v1, 0.0  ;;  %v9725_v7 = vadd.f32 %v9724_v22, %v9636_v29  ;;  %v15338_v29 = vld [vmem:[#allocation9_spill] sm:$0xff] }
 0x5b2   : > { %v9639_v12 = vadd.f32 %v15333_v33, %v9550_v15 }
 0x5b3   : > { %10095 = vst [vmem:[%s14799_s7 + $0x20] sm:$0xff] %v10063_v53  ;;  %v9814_v45 = vadd.f32 %v14758_v59, %v9725_v7  ;;  %v14885_v19 = vpop.f32.mrf.mxu1 }
 0x5b5   : > { %v9903_v3 = vadd.f32 %v14675_v34, %v9814_v45  ;;  %9766 = vmatmul.bf16.gmra.mxu2 %v10790_v60  ;;  %v9552_v34 = vadd.f32 %v15334_v9, %v9463_v8  ;;  %v14874_v58 = vpop.f32.mrf.mxu3  ;;  %v6306_v60 = vld [vmem:[#allocation3 + $0x104] sm:$0xf]  ;;  %v15342_v8 = vld [vmem:[#allocation23_spill] sm:$0xff] }
 0x5b7   : > { %v9992_v52 = vadd.f32 %v15332_v51, %v9903_v3  ;;  %v9641_v11 = vadd.f32 %v15337_v35, %v9552_v34  ;;  %v9644_v51 = vadd.f32 %v15342_v8, %v9555_v4  ;;  %v15345_v35 = vld [vmem:[#allocation59_spill] sm:$0xff]  ;;  %v15348_v4 = vld [vmem:[#allocation105_spill] sm:$0xff] }
 0x5b8   : > { %v9727_v39 = vpop.f32.mrf.mxu2 }
 0x5b9   : > { %v10064_v13 = vmax.f32 %v9992_v52, 0.0  ;;  %v9728_v31 = vadd.f32 %v9727_v39, %v9639_v12  ;;  %v6673_v39 = vshll.u32 %v6306_v60, 16 }
 0x5bb   : > { %10096 = vst [vmem:[%s14799_s7 + $0x28] sm:$0xff] %v10064_v13  ;;  %v9817_v59 = vadd.f32 %v14782_v57, %v9728_v31  ;;  %v9290_v57 = vadd.f32 %v14684_v61, %v15338_v29  ;;  %v14897_v13 = vpop.f32.mrf.mxu0  ;;  %v6307_v31 = vld [vmem:[#allocation3 + $0x108] sm:$0xf]  ;;  %v14902_v34 = vpop.f32.mrf.mxu1  ;;  %v6675_v43 = vrot.slane %v6673_v39, 5 }
 0x5bc   : > { %v6679_v2 = vshll.u32 %v6307_v31, 16  ;;  %v6683_v14 = vshrl.u32 %v6307_v31, 16  ;;  %v15351_v31 = vld [vmem:[#allocation27_spill] sm:$0xff] }
 0x5bd   : > { %v9906_v5 = vadd.f32 %v14788_v42, %v9817_v59  ;;  %v15339_v42 = vld [vmem:[#allocation100_spill] sm:$0xff]  ;;  %v14893_v3 = vpop.f32.mrf.mxu3  ;;  %v15343_v59 = vld [vmem:[#allocation29_spill] sm:$0xff] }
 0x5be   : > { %v9379_v53 = vadd.f32 %v15339_v42, %v9290_v57 }
 0x5bf   : > { %v9995_v38 = vadd.f32 %v14794_v23, %v9906_v5  ;;  %v10826_v23 = vor.u32 %v11367_v6, %v10823_v28  ;;  %v15346_v28 = vld [vmem:[#allocation25_spill] sm:$0xff] }
 0x5c0   : > { %v9729_v1 = vpop.f32.mrf.mxu2  ;;  %v9468_v15 = vadd.f32 %v15341_v63, %v9379_v53  ;;  %v15349_v63 = vld [vmem:[#allocation31_spill] sm:$0xff] }
 0x5c1   : > { %v10065_v22 = vmax.f32 %v9995_v38, 0.0  ;;  %v9730_v24 = vadd.f32 %v9729_v1, %v9641_v11  ;;  %v15344_v38 = vld [vmem:[#allocation103_spill] sm:$0xff] }
 0x5c2   : > { %v9557_v9 = vadd.f32 %v15343_v59, %v9468_v15  ;;  %v9471_v11 = vadd.f32 %v15345_v35, %v15344_v38  ;;  %v6804_v59 = vld [vmem:[#allocation3 + $0x114] sm:$0xf] }
 0x5c3   : > { %10097 = vst [vmem:[%s14799_s7 + $0x30] sm:$0xff] %v10065_v22  ;;  %v9819_v7 = vadd.f32 %v14807_v56, %v9730_v24  ;;  %v6670_v56 = vshrl.u32 %v6306_v60, 16  ;;  %v15347_v22 = vld [vmem:[#allocation10_spill] sm:$0xff] }
 0x5c4   : > { %v9646_v29 = vadd.f32 %v15346_v28, %v9557_v9  ;;  %v9295_v24 = vadd.f32 %v14684_v61, %v15347_v22  ;;  %v9560_v15 = vadd.f32 %v15349_v63, %v9471_v11  ;;  %v6805_v9 = vld [vmem:[#allocation3 + $0x118] sm:$0xf]  ;;  %v6308_v22 = vld [vmem:[#allocation3 + $0x10c] sm:$0x1] }
 0x5c5   : > { %v9908_v45 = vadd.f32 %v14813_v54, %v9819_v7  ;;  %9771 = vmatmul.bf16.gmra.mxu2 %v10826_v23  ;;  %v14911_v6 = vpop.f32.mrf.mxu3  ;;  %v6681_v7 = vrot.slane %v6679_v2, 5  ;;  %v6685_v23 = vrot.slane %v6683_v14, 4  ;;  %v7151_v2 = vshrl.u32 %v6805_v9, 16  ;;  %v15354_v63 = vld [vmem:[#allocation106_spill] sm:$0xff] }
 0x5c6   : > { %v7154_v35 = vshll.u32 %v6805_v9, 16 }
 0x5c7   : > { %v9997_v21 = vadd.f32 %v14815_v41, %v9908_v45  ;;  %v6672_v41 = vrot.slane %v6670_v56, 4  ;;  %v9384_v45 = vadd.f32 %v15348_v4, %v9295_v24 }
 0x5c8   : > { %v9732_v52 = vpop.f32.mrf.mxu2 }
 0x5c9   : > { %v10066_v33 = vmax.f32 %v9997_v21, 0.0  ;;  %v9733_v12 = vadd.f32 %v9732_v52, %v9644_v51  ;;  %v6676_v53 = vor.u32 %v6675_v43, %v6672_v41  ;;  %v14917_v21 = vpop.f32.mrf.mxu0  ;;  %v14920_v52 = vpop.f32.mrf.mxu1 }
 0x5cb   : > { %10098 = vst [vmem:[%s14799_s7 + $0x38] sm:$0xff] %v10066_v33  ;;  %v9822_v54 = vadd.f32 %v14823_v16, %v9733_v12  ;;  %v10859_v16 = vld [vmem:[#allocation4 + $0x3dc] sm:$0xf0]  ;;  %v6677_v51 = vrot.slane %v6676_v53, 4  ;;  %v6686_v33 = vor.u32 %v6685_v23, %v6681_v7  ;;  %v6689_v23 = vshll.u32 %v6308_v22, 16 }
 0x5cc   : > { %v10862_v60 = vor.u32 %v11376_v0, %v10859_v16  ;;  %v15350_v12 = vld [vmem:[#allocation61_spill] sm:$0xff]  ;;  %v7253_v0 = vld [vmem:[#allocation3 + $0x118] sm:$0xf]  ;;  %v7331_v22 = vld [vmem:[#allocation3 + $0x114] sm:$0xf] }
 0x5cd   : > { %v9911_v5 = vadd.f32 %v14829_v17, %v9822_v54  ;;  %v9473_v56 = vadd.f32 %v15350_v12, %v9384_v45  ;;  %v9649_v54 = vadd.f32 %v15351_v31, %v9560_v15  ;;  %v6687_v28 = vrot.slane %v6686_v33, 4  ;;  %7285 = vst [vmem:[#allocation4 + $0x478] sm:$0xf] %v7253_v0  ;;  %v15355_v15 = vld [vmem:[#allocation66_spill] sm:$0xff]  ;;  %v15357_v12 = vld [vmem:[#allocation11_spill] sm:$0xff] }
 0x5ce   : > { %v6682_v24 = vsel %vm11610_vm10, %v6677_v51, %v6681_v7  ;;  %v7145_v45 = vshll.u32 %v6804_v59, 16  ;;  %v9476_v7 = vadd.f32 %v15355_v15, %v15354_v63  ;;  %v15356_v51 = vld [vmem:[#allocation30_spill] sm:$0xff]  ;;  %v7698_v0 = vshll.u32 %v7331_v22, 16 }
 0x5cf   : > { %v10000_v1 = vadd.f32 %v14835_v25, %v9911_v5  ;;  %6755 = vst [vmem:[#allocation4 + $0x44c] sm:$0xf] %v6682_v24  ;;  %v10895_v31 = vld [vmem:[#allocation4 + $0x424] sm:$0xf0] }
 0x5d0   : > { %v9734_v57 = vpop.f32.mrf.mxu2 }
 0x5d1   : > { %v10067_v17 = vmax.f32 %v10000_v1, 0.0  ;;  %v9735_v42 = vadd.f32 %v9734_v57, %v9646_v29  ;;  %v7153_v1 = vrot.slane %v7151_v2, 7  ;;  %v15353_v57 = vld [vmem:[#allocation34_spill] sm:$0xff] }
 0x5d2   : > { %v9562_v16 = vadd.f32 %v15353_v57, %v9473_v56  ;;  %v14945_v56 = vpop.f32.mrf.mxu1 }
 0x5d3   : > { %10099 = vst [vmem:[%s14799_s7 + $0x40] sm:$0xff] %v10067_v17  ;;  %v9824_v25 = vadd.f32 %v14841_v46, %v9735_v42  ;;  %v4587_v46 = vld [vmem:[#allocation3 + $0x110] sm:$0x8]  ;;  %v7252_v17 = vld [vmem:[#allocation3 + $0x114] sm:$0xf]  ;;  %v7156_v53 = vor.u32 %v7154_v35, %v7153_v1 }
 0x5d4   : > { %v4588_v43 = vsel %vm11798_vm14, 0, %v4587_v46  ;;  %7284 = vst [vmem:[#allocation4 + $0x454] sm:$0xf] %v7252_v17  ;;  %v9651_v33 = vadd.f32 %v15356_v51, %v9562_v16 }
 0x5d5   : > { %v9913_v8 = vadd.f32 %v14846_v49, %v9824_v25  ;;  %9776 = vmatmul.bf16.gmra.mxu2 %v10862_v60  ;;  %v7142_v49 = vshrl.u32 %v6804_v59, 16  ;;  %4589 = vst [vmem:[#allocation3 + $0x110] sm:$0x8] %v4588_v43  ;;  %v14935_v25 = vpop.f32.mrf.mxu0  ;;  %v6691_v60 = vrot.slane %v6689_v23, 5  ;;  %v7695_v23 = vshrl.u32 %v7331_v22, 16 }
 0x5d7   : > { %v10002_v39 = vadd.f32 %v14849_v47, %v9913_v8  ;;  %v7144_v11 = vrot.slane %v7142_v49, 7  ;;  %v14927_v47 = vpop.f32.mrf.mxu3  ;;  %v6692_v46 = vsel %vm11610_vm10, %v6687_v28, %v6691_v60  ;;  %v11385_v49 = vld [vmem:[#allocation4 + $0x404] sm:$0xf]  ;;  %v15362_v60 = vld [vmem:[#allocation32_spill] sm:$0xff]  ;;  %v7697_v50 = vrot.slane %v7695_v23, 4 }
 0x5d8   : > { %v9737_v5 = vpop.f32.mrf.mxu2  ;;  %6756 = vst [vmem:[#allocation4 + $0x470] sm:$0xf] %v6692_v46 }
 0x5d9   : > { %v10068_v14 = vmax.f32 %v10002_v39, 0.0  ;;  %v9738_v38 = vadd.f32 %v9737_v5, %v9649_v54  ;;  %v7149_v42 = vrot.slane %v7144_v11, 4  ;;  %v7147_v41 = vor.u32 %v7145_v45, %v7144_v11 }
 0x5db   : > { %10100 = vst [vmem:[%s14799_s7 + $0x48] sm:$0xff] %v10068_v14  ;;  %v9827_v29 = vadd.f32 %v14858_v44, %v9738_v38  ;;  %v7157_v44 = vsel %vm11623_vm11, %v7149_v42, %v7156_v53  ;;  %v10898_v14 = vor.u32 %v11385_v49, %v10895_v31  ;;  %v15359_v38 = vld [vmem:[#allocation36_spill] sm:$0xff]  ;;  %v11395_v57 = vld [vmem:[#allocation4 + $0x454] sm:$0xf] }
 0x5dc   : > { %7221 = vst [vmem:[#allocation4 + $0x474] sm:$0xf] %v7157_v44  ;;  %v6803_v54 = vld [vmem:[#allocation3 + $0x110] sm:$0x8]  ;;  %v9565_v35 = vadd.f32 %v15359_v38, %v9476_v7  ;;  %v10939_v42 = vld [vmem:[#allocation4 + $0x474] sm:$0xf0] }
 0x5dd   : > { %v9916_v4 = vadd.f32 %v14864_v55, %v9827_v29  ;;  %v9300_v55 = vadd.f32 %v14684_v61, %v15357_v12  ;;  %v7137_v5 = vshrl.u32 %v6803_v54, 16  ;;  %v4531_v29 = vld [vmem:[#allocation3 + $0x11c] sm:$0x1]  ;;  %v10942_v53 = vor.u32 %v11395_v57, %v10939_v42  ;;  %v14963_v15 = vpop.f32.mrf.mxu0  ;;  %v14965_v12 = vpop.f32.mrf.mxu1  ;;  %v15364_v38 = vld [vmem:[#allocation110_spill] sm:$0xff]  ;;  %v15366_v57 = vld [vmem:[#allocation35_spill] sm:$0xff] }
 0x5de   : > { %v4532_v28 = vsel %vm12180_vm7, 0, %v4531_v29  ;;  %v9654_v63 = vadd.f32 %v15362_v60, %v9565_v35  ;;  %v7700_v7 = vrot.slane %v7698_v0, 5  ;;  %v15368_v0 = vld [vmem:[#allocation112_spill] sm:$0xff] }
 0x5df   : > { %v10005_v8 = vadd.f32 %v14869_v27, %v9916_v4  ;;  %v15358_v27 = vld [vmem:[#allocation108_spill] sm:$0xff]  ;;  %v10370_v1 = vrot.slane %v7137_v5, 11  ;;  %v14955_v24 = vpop.f32.mrf.mxu3  ;;  %4533 = vst [vmem:[#allocation3 + $0x11c] sm:$0x1] %v4532_v28  ;;  %v15361_v4 = vld [vmem:[#allocation69_spill] sm:$0xff]  ;;  %9964 = vmatmul.bf16.gmra.mxu0 %v10942_v53 }
 0x5e0   : > { %v9739_v39 = vpop.f32.mrf.mxu2  ;;  %v9389_v43 = vadd.f32 %v15358_v27, %v9300_v55  ;;  %v7701_v55 = vor.u32 %v7700_v7, %v7697_v50  ;;  %v11394_v28 = vld [vmem:[#allocation4 + $0x44c] sm:$0xf]  ;;  %v10931_v22 = vld [vmem:[#allocation4 + $0x46c] sm:$0xf0] }
 0x5e1   : > { %v10069_v59 = vmax.f32 %v10005_v8, 0.0  ;;  %v9740_v9 = vadd.f32 %v9739_v39, %v9651_v33  ;;  %v7148_v17 = vsel %vm11623_vm11, %v10370_v1, %v7147_v41 }
 0x5e2   : > { %7220 = vst [vmem:[#allocation4 + $0x450] sm:$0xf] %v7148_v17  ;;  %v9478_v45 = vadd.f32 %v15361_v4, %v9389_v43 }
 0x5e3   : > { %10101 = vst [vmem:[%s14799_s7 + $0x50] sm:$0xff] %v10069_v59  ;;  %v9829_v2 = vadd.f32 %v14874_v58, %v9740_v9  ;;  %v7332_v58 = vld [vmem:[#allocation3 + $0x118] sm:$0xf]  ;;  %v11399_v54 = vld [vmem:[#allocation4 + $0x470] sm:$0xf0]  ;;  %v7702_v9 = vrot.slane %v7701_v55, 4 }
 0x5e4   : > { %v7704_v8 = vshll.u32 %v7332_v58, 16  ;;  %v7708_v39 = vshrl.u32 %v7332_v58, 16  ;;  %v15371_v55 = vld [vmem:[#allocation37_spill] sm:$0xff] }
 0x5e5   : > { %v9918_v11 = vadd.f32 %v14881_v37, %v9829_v2  ;;  %9781 = vmatmul.bf16.gmra.mxu2 %v10898_v14  ;;  %v9930_v53 = vpop.f32.mrf.mxu0 }
 0x5e6   : > { %v4641_v59 = vld [vmem:[#allocation3 + $0x11c] sm:$0x1]  ;;  %v7706_v5 = vrot.slane %v7704_v8, 5  ;;  %v7710_v14 = vrot.slane %v7708_v39, 4  ;;  %v15370_v8 = vld [vmem:[#allocation75_spill] sm:$0xff] }
 0x5e7   : > { %v10007_v44 = vadd.f32 %v14885_v19, %v9918_v11  ;;  %v15363_v19 = vld [vmem:[#allocation40_spill] sm:$0xff]  ;;  %v4642_v43 = vsel %vm12180_vm7, 0, %v4641_v59  ;;  %v14977_v1 = vpop.f32.mrf.mxu3 }
 0x5e8   : > { %v9742_v37 = vpop.f32.mrf.mxu2  ;;  %v9567_v46 = vadd.f32 %v15363_v19, %v9478_v45  ;;  %4643 = vst [vmem:[#allocation3 + $0x11c] sm:$0x1] %v4642_v43  ;;  %v7707_v2 = vsel %vm11610_vm10, %v7702_v9, %v7706_v5  ;;  %v15367_v11 = vld [vmem:[#allocation12_spill] sm:$0xff]  ;;  %v7711_v23 = vor.u32 %v7710_v14, %v7706_v5  ;;  %v15372_v9 = vld [vmem:[#allocation47_spill] sm:$0xff] }
 0x5e9   : > { %v10070_v51 = vmax.f32 %v10007_v44, 0.0  ;;  %v9743_v33 = vadd.f32 %v9742_v37, %v9654_v63  ;;  %v10937_v27 = vld [vmem:[#allocation4 + $0x450] sm:$0xf]  ;;  %7780 = vst [vmem:[#allocation4 + $0x458] sm:$0xf] %v7707_v2  ;;  %v9305_v17 = vadd.f32 %v14684_v61, %v15367_v11  ;;  %v15369_v44 = vld [vmem:[#allocation44_spill] sm:$0xff]  ;;  %v10019_v63 = vpop.f32.mrf.mxu1 }
 0x5ea   : > { %v10938_v49 = vor.u32 %v11399_v54, %v10937_v27  ;;  %v7712_v7 = vrot.slane %v7711_v23, 4  ;;  %v15373_v43 = vld [vmem:[#allocation115_spill] sm:$0xff] }
 0x5eb   : > { %10102 = vst [vmem:[%s14799_s7 + $0x58] sm:$0xff] %v10070_v51  ;;  %v9832_v31 = vadd.f32 %v14893_v3, %v9743_v33  ;;  %v15365_v3 = vld [vmem:[#allocation72_spill] sm:$0xff]  ;;  %v9394_v4 = vadd.f32 %v15368_v0, %v9305_v17  ;;  %v15378_v17 = vld [vmem:[#allocation51_spill] sm:$0xff] }
 0x5ec   : > { %v9481_v35 = vadd.f32 %v15365_v3, %v15364_v38  ;;  %9875 = vmatmul.bf16.gmra.mxu3 %v10938_v49  ;;  %v15374_v49 = vld [vmem:[#allocation79_spill] sm:$0xff]  ;;  %v15375_v38 = vld [vmem:[#allocation41_spill] sm:$0xff] }
 0x5ed   : > { %v9921_v41 = vadd.f32 %v14897_v13, %v9832_v31  ;;  %v9656_v13 = vadd.f32 %v15366_v57, %v9567_v46  ;;  %v9483_v51 = vadd.f32 %v15370_v8, %v9394_v4  ;;  %v9486_v2 = vadd.f32 %v15374_v49, %v15373_v43  ;;  %v15379_v4 = vld [vmem:[#allocation82_spill] sm:$0xff] }
 0x5ee   : > { %v9570_v60 = vadd.f32 %v15369_v44, %v9481_v35  ;;  %v15376_v35 = vld [vmem:[#allocation28_spill] sm:$0xff]  ;;  %v15380_v44 = vld [vmem:[#allocation45_spill] sm:$0xff]  ;;  %v15381_v8 = vld [vmem:[#allocation54_spill] sm:$0xff] }
 0x5ef   : > { %v10010_v29 = vadd.f32 %v14902_v34, %v9921_v41  ;;  %v10934_v34 = vor.u32 %v11394_v28, %v10931_v22  ;;  %v7333_v50 = vld [vmem:[#allocation3 + $0x11c] sm:$0x1]  ;;  %v9572_v5 = vadd.f32 %v15372_v9, %v9483_v51  ;;  %v9932_v41 = vpop.f32.mrf.mxu0 }
 0x5f0   : > { %v9744_v16 = vpop.f32.mrf.mxu2  ;;  %v7714_v61 = vshll.u32 %v7333_v50, 16  ;;  %v9659_v39 = vadd.f32 %v15371_v55, %v9570_v60  ;;  %v15382_v55 = vld [vmem:[#allocation118_spill] sm:$0xff] }
 0x5f1   : > { %v10071_v42 = vmax.f32 %v10010_v29, 0.0  ;;  %v9745_v58 = vadd.f32 %v9744_v16, %v9656_v13  ;;  %v10021_v27 = vpop.f32.mrf.mxu1  ;;  %v9661_v3 = vadd.f32 %v15375_v38, %v9572_v5  ;;  %v10945_v13 = vld [vmem:[#allocation4 + $0x458] sm:$0xf] }
 0x5f2   : > { %v7716_v54 = vrot.slane %v7714_v61, 5  ;;  %v15377_v16 = vld [vmem:[#allocation116_spill] sm:$0xff] }
 0x5f3   : > { %10103 = vst [vmem:[%s14799_s7 + $0x60] sm:$0xff] %v10071_v42  ;;  %v9834_v45 = vadd.f32 %v14911_v6, %v9745_v58  ;;  %v9843_v6 = vpop.f32.mrf.mxu3  ;;  %v9575_v42 = vadd.f32 %v15378_v17, %v9486_v2 }
 0x5f4   : > { %v7717_v59 = vsel %vm11610_vm10, %v7712_v7, %v7716_v54 }
 0x5f5   : > { %v9923_v37 = vadd.f32 %v14917_v21, %v9834_v45  ;;  %9786 = vmatmul.bf16.gmra.mxu2 %v10934_v34  ;;  %7781 = vst [vmem:[#allocation4 + $0x47c] sm:$0xf] %v7717_v59  ;;  %v9664_v60 = vadd.f32 %v15380_v44, %v9575_v42  ;;  %v15394_v44 = vld [vmem:[#allocation38_spill] sm:$0xff] }
 0x5f7   : > { %v10012_v33 = vadd.f32 %v14920_v52, %v9923_v37  ;;  %v9935_v0 = vpop.f32.mrf.mxu0 }
 0x5f8   : > { %v9747_v31 = vpop.f32.mrf.mxu2 }
 0x5f9   : > { %v10072_v19 = vmax.f32 %v10012_v33, 0.0  ;;  %v9748_v46 = vadd.f32 %v9747_v31, %v9659_v39  ;;  %v10024_v37 = vpop.f32.mrf.mxu1  ;;  %v15383_v39 = vld [vmem:[#allocation86_spill] sm:$0xff] }
 0x5fa   : > { %v9491_v31 = vadd.f32 %v15383_v39, %v15382_v55 }
 0x5fb   : > { %10104 = vst [vmem:[%s14799_s7 + $0x68] sm:$0xff] %v10072_v19  ;;  %v9837_v21 = vadd.f32 %v14927_v47, %v9748_v46  ;;  %v15004_v47 = vld [vmem:[%s15111_s4] ss:$0 sm:$0xff]  ;;  %v9846_v22 = vpop.f32.mrf.mxu3  ;;  %v15384_v19 = vld [vmem:[#allocation48_spill] sm:$0xff] }
 0x5fc   : > { %v9310_v29 = vadd.f32 %v15004_v47, %v15376_v35 }
 0x5fd   : > { %v9926_v52 = vadd.f32 %v14935_v25, %v9837_v21  ;;  %v15385_v21 = vld [vmem:[#allocation33_spill] sm:$0xff] }
 0x5fe   : > { %v9399_v28 = vadd.f32 %v15377_v16, %v9310_v29  ;;  %v9315_v9 = vadd.f32 %v15004_v47, %v15385_v21  ;;  %v15389_v29 = vld [vmem:[#allocation52_spill] sm:$0xff] }
 0x5ff   : > { %v10015_v14 = vadd.f32 %v14945_v56, %v9926_v52  ;;  %v11400_v56 = vld [vmem:[#allocation4 + $0x478] sm:$0xf0]  ;;  %v9937_v46 = vpop.f32.mrf.mxu0 }
 0x600   : > { %v9749_v30 = vpop.f32.mrf.mxu2  ;;  %v10946_v58 = vor.u32 %v11400_v56, %v10945_v13  ;;  %v9488_v45 = vadd.f32 %v15379_v4, %v9399_v28 }
 0x601   : > { %v10073_v57 = vmax.f32 %v10015_v14, 0.0  ;;  %v9750_v25 = vadd.f32 %v9749_v30, %v9661_v3  ;;  %v10026_v43 = vpop.f32.mrf.mxu1  ;;  %v15388_v3 = vld [vmem:[#allocation90_spill] sm:$0xff] }
 0x602   : > { %10053 = vmatmul.bf16.gmra.mxu1 %v10946_v58  ;;  %v9577_v51 = vadd.f32 %v15381_v8, %v9488_v45  ;;  %v15391_v58 = vld [vmem:[#allocation122_spill] sm:$0xff]  ;;  %v15393_v45 = vld [vmem:[#allocation56_spill] sm:$0xff] }
 0x603   : > { %10105 = vst [vmem:[%s14799_s7 + $0x70] sm:$0xff] %v10073_v57  ;;  %v9839_v11 = vadd.f32 %v14955_v24, %v9750_v25  ;;  %v9848_v33 = vpop.f32.mrf.mxu3 }
 0x605   : > { %v9928_v23 = vadd.f32 %v14963_v15, %v9839_v11  ;;  %v15390_v11 = vld [vmem:[#allocation62_spill] sm:$0xff] }
 0x607   : > { %v10017_v34 = vadd.f32 %v14965_v12, %v9928_v23  ;;  %v9666_v12 = vadd.f32 %v15384_v19, %v9577_v51  ;;  %v9940_v28 = vpop.f32.mrf.mxu0  ;;  %v15392_v23 = vld [vmem:[#allocation94_spill] sm:$0xff]  ;;  %v15396_v51 = vld [vmem:[#allocation65_spill] sm:$0xff]  ;;  %v15398_v19 = vld [vmem:[#allocation60_spill] sm:$0xff] }
 0x608   : > { %v9752_v50 = vpop.f32.mrf.mxu2 }
 0x609   : > { %v10074_v7 = vmax.f32 %v10017_v34, 0.0  ;;  %v9753_v61 = vadd.f32 %v9752_v50, %v9664_v60  ;;  %v10029_v42 = vpop.f32.mrf.mxu1  ;;  %v9320_v60 = vadd.f32 %v15004_v47, %v15394_v44 }
 0x60b   : > { %10106 = vst [vmem:[%s14799_s7 + $0x78] sm:$0xff] %v10074_v7  ;;  %v9842_v24 = vadd.f32 %v14977_v1, %v9753_v61  ;;  %v15386_v1 = vld [vmem:[#allocation120_spill] sm:$0xff]  ;;  %v9851_v30 = vpop.f32.mrf.mxu3 }
 0x60c   : > { %v9404_v49 = vadd.f32 %v15386_v1, %v9315_v9  ;;  %v15399_v1 = vld [vmem:[#allocation68_spill] sm:$0xff] }
 0x60d   : > { %v9931_v15 = vadd.f32 %v9930_v53, %v9842_v24  ;;  %v15387_v53 = vld [vmem:[#allocation58_spill] sm:$0xff]  ;;  %v15395_v24 = vld [vmem:[#allocation124_spill] sm:$0xff] }
 0x60e   : > { %v9580_v14 = vadd.f32 %v15387_v53, %v9491_v31  ;;  %v15400_v53 = vld [vmem:[#allocation125_spill] sm:$0xff] }
 0x60f   : > { %v10020_v54 = vadd.f32 %v10019_v63, %v9931_v15  ;;  %v9493_v63 = vadd.f32 %v15388_v3, %v9404_v49  ;;  %v9942_v15 = vpop.f32.mrf.mxu0  ;;  %v15402_v3 = vld [vmem:[#allocation63_spill] sm:$0xff] }
 0x610   : > { %v9754_v59 = vpop.f32.mrf.mxu2  ;;  %v9669_v57 = vadd.f32 %v15389_v29, %v9580_v14  ;;  %v15401_v14 = vld [vmem:[#allocation102_spill] sm:$0xff]  ;;  %v15403_v29 = vld [vmem:[#allocation43_spill] sm:$0xff] }
 0x611   : > { %v10075_v5 = vmax.f32 %v10020_v54, 0.0  ;;  %v9755_v52 = vadd.f32 %v9754_v59, %v9666_v12  ;;  %v9582_v17 = vadd.f32 %v15390_v11, %v9493_v63  ;;  %v10031_v39 = vpop.f32.mrf.mxu1 }
 0x613   : > { %10107 = vst [vmem:[%s14799_s7 + $0x80] sm:$0xff] %v10075_v5  ;;  %v9844_v2 = vadd.f32 %v9843_v6, %v9755_v52  ;;  %v9671_v34 = vadd.f32 %v15393_v45, %v9582_v17  ;;  %v9853_v50 = vpop.f32.mrf.mxu3 }
 0x615   : > { %v9933_v38 = vadd.f32 %v9932_v41, %v9844_v2  ;;  %v9496_v41 = vadd.f32 %v15392_v23, %v15391_v58  ;;  %v15406_v23 = vld [vmem:[#allocation67_spill] sm:$0xff] }
 0x617   : > { %v10022_v35 = vadd.f32 %v10021_v27, %v9933_v38  ;;  %v9945_v2 = vpop.f32.mrf.mxu0 }
 0x618   : > { %v9757_v13 = vpop.f32.mrf.mxu2 }
 0x619   : > { %v10076_v25 = vmax.f32 %v10022_v35, 0.0  ;;  %v9758_v16 = vadd.f32 %v9757_v13, %v9669_v57  ;;  %v9325_v57 = vadd.f32 %v15004_v47, %v15403_v29  ;;  %v15415_v29 = vld [vmem:[#allocation111_spill] sm:$0xff] }
 0x61b   : > { %10108 = vst [vmem:[%s14799_s7 + $0x88] sm:$0xff] %v10076_v25  ;;  %v9847_v56 = vadd.f32 %v9846_v22, %v9758_v16  ;;  %v9409_v22 = vadd.f32 %v15395_v24, %v9320_v60  ;;  %v9856_v5 = vpop.f32.mrf.mxu3 }
 0x61d   : > { %v9936_v6 = vadd.f32 %v9935_v0, %v9847_v56  ;;  %v9585_v0 = vadd.f32 %v15396_v51, %v9496_v41  ;;  %v15409_v51 = vld [vmem:[#allocation70_spill] sm:$0xff] }
 0x61f   : > { %v10025_v4 = vadd.f32 %v10024_v37, %v9936_v6  ;;  %v15397_v37 = vld [vmem:[#allocation99_spill] sm:$0xff]  ;;  %v9674_v12 = vadd.f32 %v15398_v19, %v9585_v0  ;;  %v15405_v6 = vld [vmem:[#allocation104_spill] sm:$0xff] }
 0x620   : > { %v9759_v27 = vpop.f32.mrf.mxu2  ;;  %v9498_v31 = vadd.f32 %v15397_v37, %v9409_v22 }
 0x621   : > { %v10077_v7 = vmax.f32 %v10025_v4, 0.0  ;;  %v9760_v61 = vadd.f32 %v9759_v27, %v9671_v34  ;;  %v9947_v4 = vpop.f32.mrf.mxu0 }
 0x622   : > { %v9587_v49 = vadd.f32 %v15399_v1, %v9498_v31 }
 0x623   : > { %10109 = vst [vmem:[%s14799_s7 + $0x90] sm:$0xff] %v10077_v7  ;;  %v9849_v8 = vadd.f32 %v9848_v33, %v9760_v61  ;;  %v9858_v11 = vpop.f32.mrf.mxu3  ;;  %v15408_v61 = vld [vmem:[#allocation107_spill] sm:$0xff] }
 0x624   : > { %v9676_v63 = vadd.f32 %v15402_v3, %v9587_v49  ;;  %v9506_v24 = vadd.f32 %v15408_v61, %v14734_v32  ;;  %v15413_v49 = vld [vmem:[#allocation73_spill] sm:$0xff]  ;;  %v15414_v3 = vld [vmem:[#allocation80_spill] sm:$0xff] }
 0x625   : > { %v9938_v55 = vadd.f32 %v9937_v46, %v9849_v8  ;;  %v9501_v46 = vadd.f32 %v15401_v14, %v15400_v53 }
 0x627   : > { %v10027_v54 = vadd.f32 %v10026_v43, %v9938_v55  ;;  %v10034_v43 = vpop.f32.mrf.mxu1  ;;  %v15410_v55 = vld [vmem:[#allocation50_spill] sm:$0xff] }
 0x628   : > { %v9762_v59 = vpop.f32.mrf.mxu2 }
 0x629   : > { %v10078_v21 = vmax.f32 %v10027_v54, 0.0  ;;  %v9763_v9 = vadd.f32 %v9762_v59, %v9674_v12  ;;  %v9950_v54 = vpop.f32.mrf.mxu0  ;;  %v15411_v59 = vld [vmem:[#allocation77_spill] sm:$0xff] }
 0x62b   : > { %10110 = vst [vmem:[%s14799_s7 + $0x98] sm:$0xff] %v10078_v21  ;;  %v9852_v52 = vadd.f32 %v9851_v30, %v9763_v9  ;;  %v9414_v30 = vadd.f32 %v14724_v40, %v9325_v57  ;;  %v15407_v40 = vld [vmem:[#allocation74_spill] sm:$0xff]  ;;  %v9861_v22 = vpop.f32.mrf.mxu3  ;;  %v9595_v21 = vadd.f32 %v15411_v59, %v9506_v24  ;;  %v9511_v57 = vadd.f32 %v15415_v29, %v14748_v10 }
 0x62c   : > { %v15419_v10 = vld [vmem:[#allocation114_spill] sm:$0xff] }
 0x62d   : > { %v9941_v33 = vadd.f32 %v9940_v28, %v9852_v52  ;;  %v15404_v28 = vld [vmem:[#allocation71_spill] sm:$0xff] }
 0x62e   : > { %v9590_v56 = vadd.f32 %v15404_v28, %v9501_v46  ;;  %v15417_v28 = vld [vmem:[#allocation57_spill] sm:$0xff] }
 0x62f   : > { %v10030_v38 = vadd.f32 %v10029_v42, %v9941_v33  ;;  %v9503_v42 = vadd.f32 %v15405_v6, %v9414_v30  ;;  %v10036_v44 = vpop.f32.mrf.mxu1  ;;  %v9684_v33 = vadd.f32 %v15413_v49, %v9595_v21 }
 0x630   : > { %v9764_v35 = vpop.f32.mrf.mxu2  ;;  %v9679_v41 = vadd.f32 %v15406_v23, %v9590_v56  ;;  %v9335_v56 = vadd.f32 %v15004_v47, %v15417_v28  ;;  %v15418_v23 = vld [vmem:[#allocation83_spill] sm:$0xff] }
 0x631   : > { %v10079_v13 = vmax.f32 %v10030_v38, 0.0  ;;  %v9765_v25 = vadd.f32 %v9764_v35, %v9676_v63  ;;  %v9592_v7 = vadd.f32 %v15407_v40, %v9503_v42  ;;  %v9952_v63 = vpop.f32.mrf.mxu0 }
 0x632   : > { %v9424_v6 = vadd.f32 %v14750_v36, %v9335_v56  ;;  %v15421_v36 = vld [vmem:[#allocation88_spill] sm:$0xff] }
 0x633   : > { %10111 = vst [vmem:[%s14799_s7 + $0xa0] sm:$0xff] %v10079_v13  ;;  %v9854_v16 = vadd.f32 %v9853_v50, %v9765_v25  ;;  %v9681_v0 = vadd.f32 %v15409_v51, %v9592_v7  ;;  %v9863_v53 = vpop.f32.mrf.mxu3  ;;  %v15416_v25 = vld [vmem:[#allocation76_spill] sm:$0xff] }
 0x635   : > { %v9943_v17 = vadd.f32 %v9942_v15, %v9854_v16 }
 0x637   : > { %v10032_v58 = vadd.f32 %v10031_v39, %v9943_v17  ;;  %v9330_v39 = vadd.f32 %v15004_v47, %v15410_v55  ;;  %v10039_v9 = vpop.f32.mrf.mxu1 }
 0x638   : > { %v9767_v45 = vpop.f32.mrf.mxu2 }
 0x639   : > { %v10080_v34 = vmax.f32 %v10032_v58, 0.0  ;;  %v9768_v27 = vadd.f32 %v9767_v45, %v9679_v41  ;;  %v9419_v19 = vadd.f32 %v14742_v20, %v9330_v39  ;;  %v9600_v41 = vadd.f32 %v15418_v23, %v9511_v57  ;;  %v9955_v45 = vpop.f32.mrf.mxu0  ;;  %v15423_v39 = vld [vmem:[#allocation81_spill] sm:$0xff] }
 0x63a   : > { %v15429_v57 = vld [vmem:[#allocation121_spill] sm:$0xff] }
 0x63b   : > { %10112 = vst [vmem:[%s14799_s7 + $0xa8] sm:$0xff] %v10080_v34  ;;  %v9857_v60 = vadd.f32 %v9856_v5, %v9768_v27  ;;  %v15412_v5 = vld [vmem:[#allocation109_spill] sm:$0xff]  ;;  %v9866_v42 = vpop.f32.mrf.mxu3  ;;  %v9513_v34 = vadd.f32 %v15419_v10, %v9424_v6 }
 0x63c   : > { %v9508_v52 = vadd.f32 %v15412_v5, %v9419_v19  ;;  %v15424_v19 = vld [vmem:[#allocation64_spill] sm:$0xff] }
 0x63d   : > { %v9946_v50 = vadd.f32 %v9945_v2, %v9857_v60 }
 0x63e   : > { %v9597_v20 = vadd.f32 %v15414_v3, %v9508_v52  ;;  %v15425_v52 = vld [vmem:[#allocation91_spill] sm:$0xff] }
 0x63f   : > { %v10035_v8 = vadd.f32 %v10034_v43, %v9946_v50  ;;  %v10041_v35 = vpop.f32.mrf.mxu1 }
 0x640   : > { %v9769_v15 = vpop.f32.mrf.mxu2  ;;  %v9686_v30 = vadd.f32 %v15416_v25, %v9597_v20 }
 0x641   : > { %v10081_v37 = vmax.f32 %v10035_v8, 0.0  ;;  %v9770_v31 = vadd.f32 %v9769_v15, %v9681_v0  ;;  %v15422_v0 = vld [vmem:[#allocation117_spill] sm:$0xff] }
 0x642   : > { %v9516_v15 = vadd.f32 %v15422_v0, %v14756_v26  ;;  %v15426_v26 = vld [vmem:[#allocation119_spill] sm:$0xff] }
 0x643   : > { %10113 = vst [vmem:[%s14799_s7 + $0xb0] sm:$0xff] %v10081_v37  ;;  %v9859_v12 = vadd.f32 %v9858_v11, %v9770_v31  ;;  %v9868_v8 = vpop.f32.mrf.mxu3  ;;  %v9957_v31 = vpop.f32.mrf.mxu0 }
 0x645   : > { %v9948_v32 = vadd.f32 %v9947_v4, %v9859_v12  ;;  %v9340_v12 = vadd.f32 %v15004_v47, %v15424_v19 }
 0x647   : > { %v10037_v1 = vadd.f32 %v10036_v44, %v9948_v32  ;;  %v15420_v44 = vld [vmem:[#allocation78_spill] sm:$0xff]  ;;  %v10044_v40 = vpop.f32.mrf.mxu1  ;;  %v9429_v32 = vadd.f32 %v14760_v18, %v9340_v12 }
 0x648   : > { %v9772_v2 = vpop.f32.mrf.mxu2  ;;  %v9689_v60 = vadd.f32 %v15420_v44, %v9600_v41 }
 0x649   : > { %v10082_v14 = vmax.f32 %v10037_v1, 0.0  ;;  %v9773_v46 = vadd.f32 %v9772_v2, %v9684_v33  ;;  %v9605_v1 = vadd.f32 %v15425_v52, %v9516_v15  ;;  %v9518_v33 = vadd.f32 %v15426_v26, %v9429_v32 }
 0x64b   : > { %10114 = vst [vmem:[%s14799_s7 + $0xb8] sm:$0xff] %v10082_v14  ;;  %v9862_v38 = vadd.f32 %v9861_v22, %v9773_v46  ;;  %v9602_v22 = vadd.f32 %v15421_v36, %v9513_v34  ;;  %v9871_v2 = vpop.f32.mrf.mxu3  ;;  %v15427_v14 = vld [vmem:[#allocation85_spill] sm:$0xff]  ;;  %v9960_v20 = vpop.f32.mrf.mxu0 }
 0x64c   : > { %v9694_v46 = vadd.f32 %v15427_v14, %v9605_v1 }
 0x64d   : > { %v9951_v43 = vadd.f32 %v9950_v54, %v9862_v38  ;;  %v9691_v37 = vadd.f32 %v15423_v39, %v9602_v22  ;;  %v15435_v22 = vld [vmem:[#allocation96_spill] sm:$0xff] }
 0x64f   : > { %v10040_v13 = vadd.f32 %v10039_v9, %v9951_v43  ;;  %v10046_v9 = vpop.f32.mrf.mxu1  ;;  %v15428_v43 = vld [vmem:[#allocation95_spill] sm:$0xff] }
 0x650   : > { %v9774_v16 = vpop.f32.mrf.mxu2  ;;  %v9607_v18 = vadd.f32 %v15428_v43, %v9518_v33 }
 0x651   : > { %v10083_v11 = vmax.f32 %v10040_v13, 0.0  ;;  %v9775_v17 = vadd.f32 %v9774_v16, %v9686_v30  ;;  %v9521_v13 = vadd.f32 %v15429_v57, %v14768_v62  ;;  %v15430_v30 = vld [vmem:[#allocation89_spill] sm:$0xff] }
 0x652   : > { %v9696_v16 = vadd.f32 %v15430_v30, %v9607_v18  ;;  %v15433_v62 = vld [vmem:[#allocation93_spill] sm:$0xff] }
 0x653   : > { %10115 = vst [vmem:[%s14799_s7 + $0xc0] sm:$0xff] %v10083_v11  ;;  %v9864_v58 = vadd.f32 %v9863_v53, %v9775_v17  ;;  %v9873_v56 = vpop.f32.mrf.mxu3  ;;  %v9962_v23 = vpop.f32.mrf.mxu0 }
 0x655   : > { %v9953_v4 = vadd.f32 %v9952_v63, %v9864_v58 }
 0x657   : > { %v10042_v27 = vadd.f32 %v10041_v35, %v9953_v4  ;;  %v10049_v35 = vpop.f32.mrf.mxu1 }
 0x658   : > { %v9777_v7 = vpop.f32.mrf.mxu2 }
 0x659   : > { %v10084_v50 = vmax.f32 %v10042_v27, 0.0  ;;  %v9778_v61 = vadd.f32 %v9777_v7, %v9689_v60 }
 0x65b   : > { %10116 = vst [vmem:[%s14799_s7 + $0xc8] sm:$0xff] %v10084_v50  ;;  %v9867_v24 = vadd.f32 %v9866_v42, %v9778_v61  ;;  %v15431_v42 = vld [vmem:[#allocation98_spill] sm:$0xff]  ;;  %v15434_v50 = vld [vmem:[#allocation101_spill] sm:$0xff] }
 0x65c   : > { %v9610_v58 = vadd.f32 %v15431_v42, %v9521_v13  ;;  %v9965_v36 = vpop.f32.mrf.mxu0 }
 0x65d   : > { %v9956_v51 = vadd.f32 %v9955_v45, %v9867_v24  ;;  %v15432_v45 = vld [vmem:[#allocation123_spill] sm:$0xff] }
 0x65e   : > { %v9523_v10 = vadd.f32 %v15432_v45, %v14776_v48  ;;  %v9699_v27 = vadd.f32 %v15433_v62, %v9610_v58 }
 0x65f   : > { %v10045_v55 = vadd.f32 %v10044_v40, %v9956_v51  ;;  %v10051_v4 = vpop.f32.mrf.mxu1 }
 0x660   : > { %v9779_v54 = vpop.f32.mrf.mxu2  ;;  %v9612_v61 = vadd.f32 %v15434_v50, %v9523_v10 }
 0x661   : > { %v10085_v59 = vmax.f32 %v10045_v55, 0.0  ;;  %v9780_v21 = vadd.f32 %v9779_v54, %v9691_v37 }
 0x663   : > { %10117 = vst [vmem:[%s14799_s7 + $0xd0] sm:$0xff] %v10085_v59  ;;  %v9869_v5 = vadd.f32 %v9868_v8, %v9780_v21  ;;  %v9701_v8 = vadd.f32 %v15435_v22, %v9612_v61 }
 0x664   : > { %v9967_v54 = vpop.f32.mrf.mxu0 }
 0x665   : > { %v9958_v49 = vadd.f32 %v9957_v31, %v9869_v5 }
 0x667   : > { %v10047_v53 = vadd.f32 %v10046_v9, %v9958_v49 }
 0x668   : > { %v9782_v38 = vpop.f32.mrf.mxu2 }
 0x669   : > { %v10086_v47 = vmax.f32 %v10047_v53, 0.0  ;;  %v9783_v3 = vadd.f32 %v9782_v38, %v9694_v46 }
 0x66b   : > { %10118 = vst [vmem:[%s14799_s7 + $0xd8] sm:$0xff] %v10086_v47  ;;  %v9872_v63 = vadd.f32 %v9871_v2, %v9783_v3 }
 0x66d   : > { %v9961_v29 = vadd.f32 %v9960_v20, %v9872_v63 }
 0x66f   : > { %v10050_v25 = vadd.f32 %v10049_v35, %v9961_v29  ;;  %v9876_v40 = vpop.f32.mrf.mxu3 }
 0x670   : > { %v9784_v28 = vpop.f32.mrf.mxu2 }
 0x671   : > { %v10087_v11 = vmax.f32 %v10050_v25, 0.0  ;;  %v9785_v17 = vadd.f32 %v9784_v28, %v9696_v16 }
 0x673   : > { %10119 = vst [vmem:[%s14799_s7 + $0xe0] sm:$0xff] %v10087_v11  ;;  %v9874_v6 = vadd.f32 %v9873_v56, %v9785_v17 }
 0x675   : > { %v9963_v41 = vadd.f32 %v9962_v23, %v9874_v6 }
 0x677   : > { %v10052_v34 = vadd.f32 %v10051_v4, %v9963_v41  ;;  %v9878_v55 = vpop.f32.mrf.mxu3 }
 0x678   : > { %v9787_v44 = vpop.f32.mrf.mxu2 }
 0x679   : > { %v10088_v60 = vmax.f32 %v10052_v34, 0.0  ;;  %v9788_v7 = vadd.f32 %v9787_v44, %v9699_v27 }
 0x67b   : > { %10120 = vst [vmem:[%s14799_s7 + $0xe8] sm:$0xff] %v10088_v60  ;;  %v9877_v24 = vadd.f32 %v9876_v40, %v9788_v7 }
 0x67d   : > { %v9966_v51 = vadd.f32 %v9965_v36, %v9877_v24 }
 0x67f   : > { %v10054_v48 = vpop.f32.mrf.mxu1 }
 0x680   : > { %v9789_v0 = vpop.f32.mrf.mxu2  ;;  %v10055_v39 = vadd.f32 %v10054_v48, %v9966_v51 }
 0x681   : > { %v9790_v15 = vadd.f32 %v9789_v0, %v9701_v8 }
 0x682   : > { %v10089_v31 = vmax.f32 %v10055_v39, 0.0 }
 0x683   : > { %v9879_v37 = vadd.f32 %v9878_v55, %v9790_v15 }
 0x684   : > { %10121 = vst [vmem:[%s14799_s7 + $0xf0] sm:$0xff] %v10089_v31 }
 0x685   : > { %v9968_v19 = vadd.f32 %v9967_v54, %v9879_v37 }
 0x687   : > { %v10056_v12 = vpop.f32.mrf.mxu1 }
 0x688   : > { %v10057_v59 = vadd.f32 %v10056_v12, %v9968_v19 }
 0x68a   : > { %v10090_v21 = vmax.f32 %v10057_v59, 0.0 }
 0x68c   : > { %10122 = vst [vmem:[%s14799_s7 + $0xf8] sm:$0xff] %v10090_v21 }
 0x68d PF: > { %s15_s18 = sadd.s32 1, %s11517_s18  }
 0x68e   : > { %p12_p4 = scmp.ge.s32.totalorder %s15_s18, 4  }
 0x690   :  { %14 = sbr.rel (!%p12_p4) target bundleno = 1 (0x1), region = 76 }

</bundles_post_ra>
